<compile_context>
chip_gen: v7x
topology: tpu7x:2x2x1
jax: 0.10.0
libtpu: 0.0.40
codegen_flags: <defaults>
</compile_context>

<pallas_src>
import jax
import jax.numpy as jnp
from jax import lax
from jax.experimental import pallas as pl
from jax.experimental.pallas import tpu as pltpu


def _topolstm_kernel(topo_ref, seq_ref, xproj_ref, U_ref, out_ref,
                     h_state, c_state, hsum_acc, csum_acc, hmean_acc, len_acc):
    # topo_ref : (1, 1, N, Tc, Tc)  topo[chunk*Tc+lt, n, slab*Tc+ls]  (slab = min(k, chunk))
    # seq_ref  : (1, Tc, N, 1)      per-chunk sequence-mask columns
    # xproj_ref: (1, N, Tc, 4H)     precomputed emb @ W + b for this chunk
    # U_ref    : (H, 4H)
    # out_ref  : (N, H)             masked-mean hidden state (written at the last step)
    # h_state, c_state : (N, K, Tc, H) full recurrent history (batch-leading)
    # hsum_acc, csum_acc : (N, Tc, H) cross-chunk predecessor sums for the current chunk
    chunk = pl.program_id(0)          # chunk of timesteps being produced
    slab = pl.program_id(1)           # earlier chunk of state being consumed
    n_chunks = pl.num_programs(0)
    n_slabs = pl.num_programs(1)
    N, H = out_ref.shape
    Tc = hsum_acc.shape[1]

    @pl.when(jnp.logical_and(chunk == 0, slab == 0))
    def _global_init():
        hmean_acc[...] = jnp.zeros_like(hmean_acc)
        len_acc[...] = jnp.zeros_like(len_acc)
        # h_state / c_state are never read before being written (only slabs of
        # already-finished chunks are consumed), so no zero-init needed.

    @pl.when(slab == 0)
    def _chunk_init():
        hsum_acc[...] = jnp.zeros_like(hsum_acc)
        csum_acc[...] = jnp.zeros_like(csum_acc)

    @pl.when(slab < chunk)
    def _cross_chunk():
        # hc_sum_prev[n, lt, :] += sum_ls topo[t, n, slab*Tc+ls] * state[n, slab, ls, :]
        topo_blk = topo_ref[0, 0]                                      # (N, Tc, Tc)
        h_blk = h_state[:, pl.ds(slab, 1), :, :].reshape(N, Tc, H)     # (N, Tc, H)
        c_blk = c_state[:, pl.ds(slab, 1), :, :].reshape(N, Tc, H)
        dn = (((2,), (1,)), ((0,), (0,)))                              # 'nts,nsh->nth'
        hsum_acc[...] += lax.dot_general(topo_blk, h_blk, dn,
                                         preferred_element_type=jnp.float32)
        csum_acc[...] += lax.dot_general(topo_blk, c_blk, dn,
                                         preferred_element_type=jnp.float32)

    @pl.when(slab == chunk)
    def _recurrence():
        topo_cur = topo_ref[0, 0]          # (N, Tc, Tc) intra-chunk slab
        x_chunk = xproj_ref[0]             # (N, Tc, 4H)
        U_val = U_ref[...]                 # (H, 4H), loaded once per chunk

        # Hoisted gate contribution: cross-chunk h_sum premultiplied by U with
        # M = N*Tc rows (much better MXU utilization than per-step N rows).
        gates_pre = (jnp.dot(hsum_acc[...].reshape(N * Tc, H), U_val,
                             preferred_element_type=jnp.float32)
                     .reshape(N, Tc, 4 * H) + x_chunk)                 # (N, Tc, 4H)
        c_prev = csum_acc[...]                                         # (N, Tc, H)

        h_loc, c_loc = [], []
        for lt in range(Tc):               # serial recurrence; unrolled (Tc small)
            seq_t = seq_ref[0, lt]                                     # (N, 1)
            if lt == 0:
                gate_t = gates_pre[:, 0, :]
                c_sum = c_prev[:, 0, :]
            else:
                # Intra-chunk causal correction (strictly serial part only).
                h_in = jnp.zeros((N, H), jnp.float32)
                c_in = jnp.zeros((N, H), jnp.float32)
                for ls in range(lt):
                    w = topo_cur[:, lt, ls:ls + 1]                     # (N, 1) lane splat
                    h_in = h_in + w * h_loc[ls]
                    c_in = c_in + w * c_loc[ls]
                gate_t = gates_pre[:, lt, :] + jnp.dot(
                    h_in, U_val, preferred_element_type=jnp.float32)
                c_sum = c_prev[:, lt, :] + c_in

            i_g = jax.nn.sigmoid(gate_t[:, 0 * H:1 * H])
            f_g = jax.nn.sigmoid(gate_t[:, 1 * H:2 * H])
            o_g = jax.nn.sigmoid(gate_t[:, 2 * H:3 * H])
            c_tilde = jnp.tanh(gate_t[:, 3 * H:4 * H])

            seq_b = jnp.broadcast_to(seq_t, (N, H))                    # one broadcast, reused
            c_new = seq_b * (f_g * c_sum + i_g * c_tilde)
            h_new = seq_b * (o_g * jnp.tanh(c_new))

            h_loc.append(h_new)
            c_loc.append(c_new)
            h_state[:, pl.ds(chunk, 1), pl.ds(lt, 1), :] = h_new[:, None, None, :]
            c_state[:, pl.ds(chunk, 1), pl.ds(lt, 1), :] = c_new[:, None, None, :]

            hmean_acc[...] += h_new        # h_new already masked (mask is 0/1)
            len_acc[...] += seq_t

    @pl.when(jnp.logical_and(chunk == n_chunks - 1, slab == n_slabs - 1))
    def _finalize():
        # Guarded division (PyTorch reference is unguarded 0/0 -> NaN for
        # all-zero masks; identical for any sample with length >= 1).
        out_ref[...] = hmean_acc[...] / jnp.maximum(len_acc[...], 1.0)


def topolstm_forward(sequence_matrix, sequence_masks, topo_masks,
                     node_embedding, W, U, b, W_out, b_out, *, chunk_size=8):
    """sequence_matrix: (T, N) int32; sequence_masks: (T, N) f32;
       topo_masks: (T, N, T) f32.  Returns decode logits (N, V)."""
    T, N = sequence_matrix.shape
    H = node_embedding.shape[1]

    if T % chunk_size != 0:
        chunk_size = T                   # fall back to a single chunk
    Tc = chunk_size
    K = T // Tc

    # ---- Glue in plain JAX (hoisted out of the serial recurrence) ----
    emb_seq = jnp.take(node_embedding, sequence_matrix, axis=0)            # (T, N, H)
    x_proj = (emb_seq.reshape(T * N, H) @ W + b).reshape(T, N, 4 * H)
    x_proj_r = x_proj.reshape(K, Tc, N, 4 * H).transpose(0, 2, 1, 3)       # (K, N, Tc, 4H)
    seq_r = sequence_masks.astype(jnp.float32).reshape(K, Tc, N)[..., None]  # (K, Tc, N, 1)
    # topo_r[c, k, n, lt, ls] = topo_masks[c*Tc+lt, n, k*Tc+ls]
    topo_r = topo_masks.reshape(K, Tc, N, K, Tc).transpose(0, 3, 2, 1, 4)  # (K, K, N, Tc, Tc)

    # VMEM limit with headroom (never the full physical capacity — v7x has 64 MiB).
    try:
        vmem_cap = pltpu.get_tpu_info().vmem_capacity_bytes
        vmem_limit = min(int(vmem_cap * 0.85), 96 * 1024 * 1024)
    except Exception:
        vmem_limit = 48 * 1024 * 1024

    grid_spec = pltpu.PrefetchScalarGridSpec(
        num_scalar_prefetch=0,
        grid=(K, K),                     # (chunk, slab); slab > chunk steps are no-ops
        in_specs=[
            # min(slab, chunk): causal streaming — non-causal slabs are never DMA'd
            # (the block index repeats, so the pipeline skips the copy).
            pl.BlockSpec((1, 1, N, Tc, Tc),
                         lambda c, k: (c, jnp.minimum(k, c), 0, 0, 0)),
            pl.BlockSpec((1, Tc, N, 1), lambda c, k: (c, 0, 0, 0)),
            pl.BlockSpec((1, N, Tc, 4 * H), lambda c, k: (c, 0, 0, 0)),
            pl.BlockSpec((H, 4 * H), lambda c, k: (0, 0)),
        ],
        out_specs=pl.BlockSpec((N, H), lambda c, k: (0, 0)),
        scratch_shapes=[
            pltpu.VMEM((N, K, Tc, H), jnp.float32),   # h history (batch-leading)
            pltpu.VMEM((N, K, Tc, H), jnp.float32),   # c history
            pltpu.VMEM((N, Tc, H), jnp.float32),      # cross-chunk h_sum accumulator
            pltpu.VMEM((N, Tc, H), jnp.float32),      # cross-chunk c_sum accumulator
            pltpu.VMEM((N, H), jnp.float32),          # masked-mean numerator
            pltpu.VMEM((N, 1), jnp.float32),          # masked-mean denominator
        ],
    )

    h_mean = pl.pallas_call(
        _topolstm_kernel,
        out_shape=jax.ShapeDtypeStruct((N, H), jnp.float32),
        grid_spec=grid_spec,
        compiler_params=pltpu.CompilerParams(
            dimension_semantics=("arbitrary", "arbitrary"),
            vmem_limit_bytes=vmem_limit),
    )(topo_r, seq_r, x_proj_r, U)

    # Decode kept outside the kernel (W_out never occupies VMEM during the loop).
    return h_mean @ W_out + b_out[None, :]


def reference_forward(sequence_matrix, sequence_masks, topo_masks,
                      node_embedding, W, U, b, W_out, b_out):
    """Pure-JAX port of the PyTorch forward for verification."""
    T, N = sequence_matrix.shape
    H = node_embedding.shape[1]
    emb_seq = jnp.take(node_embedding, sequence_matrix, axis=0)   # (T, N, H)
    h_state = jnp.zeros((T, N, H), jnp.float32)
    c_state = jnp.zeros((T, N, H), jnp.float32)
    for t in range(T):
        topo = topo_masks[t]                                       # (N, T)
        h_sum = jnp.sum(topo[:, :, None] * jnp.transpose(h_state, (1, 0, 2)),
                        axis=1)
        c_sum = jnp.sum(topo[:, :, None] * jnp.transpose(c_state, (1, 0, 2)),
                        axis=1)
        gates = h_sum @ U + emb_seq[t] @ W + b
        i = jax.nn.sigmoid(gates[:, 0:H])
        f = jax.nn.sigmoid(gates[:, H:2 * H])
        o = jax.nn.sigmoid(gates[:, 2 * H:3 * H])
        ct = jnp.tanh(gates[:, 3 * H:4 * H])
        c = f * c_sum + i * ct
        c = sequence_masks[t][:, None] * c
        h = o * jnp.tanh(c)
        h = sequence_masks[t][:, None] * h
        h_state = h_state.at[t].set(h)
        c_state = c_state.at[t].set(c)
    h_sum_f = jnp.sum(sequence_masks[:, :, None] * h_state, axis=0)
    lengths = sequence_masks.sum(axis=0)
    h_mean = h_sum_f / lengths[:, None]
    return h_mean @ W_out + b_out[None, :]


if __name__ == "__main__":
    key = jax.random.PRNGKey(0)
    T, N, H, V = 16, 8, 32, 16     # timesteps, samples, hidden, vocab
    keys = jax.random.split(key, 8)

    sequence_matrix = jax.random.randint(keys[0], (T, N), 0, V, dtype=jnp.int32)
    lengths = jax.random.randint(keys[1], (N,), 1, T + 1)
    sequence_masks = (jnp.arange(T)[:, None] < lengths[None, :]).astype(jnp.float32)
    topo_raw = (jax.random.uniform(keys[2], (T, N, T)) < 0.5).astype(jnp.float32)
    causal = (jnp.arange(T)[None, None, :] < jnp.arange(T)[:, None, None]).astype(jnp.float32)
    topo_masks = topo_raw * causal                                 # (T, N, T)

    node_embedding = jax.random.normal(keys[3], (V, H), jnp.float32) * 0.1

    def ortho(k):
        q, _ = jnp.linalg.qr(jax.random.normal(k, (H, H), jnp.float32))
        return q

    W = jnp.concatenate([ortho(k) for k in jax.random.split(keys[4], 4)], axis=1)
    U = jnp.concatenate([ortho(k) for k in jax.random.split(keys[5], 4)], axis=1)
    b = jnp.zeros((4 * H,), jnp.float32)
    W_out = jax.random.normal(keys[6], (H, V), jnp.float32) * 0.1
    b_out = jax.random.normal(keys[7], (V,), jnp.float32) * 0.01

    out = topolstm_forward(sequence_matrix, sequence_masks, topo_masks,
                           node_embedding, W, U, b, W_out, b_out)
    out = jax.block_until_ready(out)

    ref = reference_forward(sequence_matrix, sequence_masks, topo_masks,
                            node_embedding, W, U, b, W_out, b_out)

    assert out.shape == (N, V), out.shape
    max_err = float(jnp.max(jnp.abs(out - ref)))
    assert max_err < 5e-4, f"mismatch vs reference, max err {max_err}"
    print("KERNEL_OK")
</pallas_src>

<mosaic_0001>
module attributes {stable_mosaic.version = 11 : i64} {
  func.func @_topolstm_kernel(%arg0: i32, %arg1: i32, %arg2: memref<1x1x8x8x8xf32, #tpu.memory_space<vmem>>, %arg3: memref<1x8x8x1xf32, #tpu.memory_space<vmem>>, %arg4: memref<1x8x8x128xf32, #tpu.memory_space<vmem>>, %arg5: memref<32x128xf32, #tpu.memory_space<vmem>>, %arg6: memref<8x32xf32, #tpu.memory_space<vmem>>, %arg7: memref<8x2x8x32xf32, #tpu.memory_space<vmem>>, %arg8: memref<8x2x8x32xf32, #tpu.memory_space<vmem>>, %arg9: memref<8x8x32xf32, #tpu.memory_space<vmem>>, %arg10: memref<8x8x32xf32, #tpu.memory_space<vmem>>, %arg11: memref<8x32xf32, #tpu.memory_space<vmem>>, %arg12: memref<8x1xf32, #tpu.memory_space<vmem>>) attributes {dimension_semantics = [#tpu.dimension_semantics<arbitrary>, #tpu.dimension_semantics<arbitrary>], iteration_bounds = array<i64: 2, 2>, scalar_prefetch = 0 : i64, scratch_operands = 6 : i64, tpu.core_type = #tpu.core_type<tc>, window_params = [{transform_indices = @transform_0, window_bounds = array<i64: 1, 1, 8, 8, 8>}, {transform_indices = @transform_1, window_bounds = array<i64: 1, 8, 8, 1>}, {transform_indices = @transform_2, window_bounds = array<i64: 1, 8, 8, 128>}, {pipeline_mode = #tpu.pipeline_mode<synchronous>, transform_indices = @transform_3, window_bounds = array<i64: 32, 128>}, {pipeline_mode = #tpu.pipeline_mode<synchronous>, transform_indices = @transform_4, window_bounds = array<i64: 8, 32>}]} {
    %c0_i32 = arith.constant 0 : i32
    %0 = arith.cmpi eq, %arg0, %c0_i32 : i32
    %c0_i32_0 = arith.constant 0 : i32
    %1 = arith.cmpi eq, %arg1, %c0_i32_0 : i32
    %2 = arith.andi %0, %1 : i1
    %3 = arith.extui %2 : i1 to i32
    %c0_i32_1 = arith.constant 0 : i32
    %4 = arith.cmpi ne, %3, %c0_i32_1 : i32
    scf.if %4 {
      %cst = arith.constant 0.000000e+00 : f32
      %19 = vector.broadcast %cst : f32 to vector<8x32xf32>
      %c0 = arith.constant 0 : index
      %c0_8 = arith.constant 0 : index
      %20 = vector.load %arg11[%c0, %c0_8] : memref<8x32xf32, #tpu.memory_space<vmem>>, vector<8x32xf32>
      tpu.vector_store %arg11[%c0, %c0_8], %19 {strides = array<i32>} : memref<8x32xf32, #tpu.memory_space<vmem>>, vector<8x32xf32>,
      %cst_9 = arith.constant 0.000000e+00 : f32
      %21 = vector.broadcast %cst_9 : f32 to vector<8x1xf32>
      %c0_10 = arith.constant 0 : index
      %c0_11 = arith.constant 0 : index
      %22 = vector.load %arg12[%c0_10, %c0_11] : memref<8x1xf32, #tpu.memory_space<vmem>>, vector<8x1xf32>
      tpu.vector_store %arg12[%c0_10, %c0_11], %21 {strides = array<i32>} : memref<8x1xf32, #tpu.memory_space<vmem>>, vector<8x1xf32>,
    } else {
    }
    %c0_i32_2 = arith.constant 0 : i32
    %5 = arith.cmpi eq, %arg1, %c0_i32_2 : i32
    %6 = arith.extui %5 : i1 to i32
    %c0_i32_3 = arith.constant 0 : i32
    %7 = arith.cmpi ne, %6, %c0_i32_3 : i32
    scf.if %7 {
      %cst = arith.constant 0.000000e+00 : f32
      %19 = vector.broadcast %cst : f32 to vector<8x8x32xf32>
      %c0 = arith.constant 0 : index
      %c0_8 = arith.constant 0 : index
      %c0_9 = arith.constant 0 : index
      %20 = vector.load %arg9[%c0, %c0_8, %c0_9] : memref<8x8x32xf32, #tpu.memory_space<vmem>>, vector<8x8x32xf32>
      tpu.vector_store %arg9[%c0, %c0_8, %c0_9], %19 {strides = array<i32>} : memref<8x8x32xf32, #tpu.memory_space<vmem>>, vector<8x8x32xf32>,
      %cst_10 = arith.constant 0.000000e+00 : f32
      %21 = vector.broadcast %cst_10 : f32 to vector<8x8x32xf32>
      %c0_11 = arith.constant 0 : index
      %c0_12 = arith.constant 0 : index
      %c0_13 = arith.constant 0 : index
      %22 = vector.load %arg10[%c0_11, %c0_12, %c0_13] : memref<8x8x32xf32, #tpu.memory_space<vmem>>, vector<8x8x32xf32>
      tpu.vector_store %arg10[%c0_11, %c0_12, %c0_13], %21 {strides = array<i32>} : memref<8x8x32xf32, #tpu.memory_space<vmem>>, vector<8x8x32xf32>,
    } else {
    }
    %8 = arith.cmpi slt, %arg1, %arg0 : i32
    %9 = arith.extui %8 : i1 to i32
    %c0_i32_4 = arith.constant 0 : i32
    %10 = arith.cmpi ne, %9, %c0_i32_4 : i32
    scf.if %10 {
      %c0 = arith.constant 0 : index
      %c0_8 = arith.constant 0 : index
      %c0_9 = arith.constant 0 : index
      %c0_10 = arith.constant 0 : index
      %c0_11 = arith.constant 0 : index
      %19 = vector.load %arg2[%c0, %c0_8, %c0_9, %c0_10, %c0_11] : memref<1x1x8x8x8xf32, #tpu.memory_space<vmem>>, vector<1x1x8x8x8xf32>
      %20 = vector.shape_cast %19 : vector<1x1x8x8x8xf32> to vector<8x8x8xf32>
      %c0_12 = arith.constant 0 : index
      %21 = arith.index_cast %arg1 : i32 to index
      %c0_13 = arith.constant 0 : index
      %c0_14 = arith.constant 0 : index
      %22 = vector.load %arg7[%c0_12, %21, %c0_13, %c0_14] : memref<8x2x8x32xf32, #tpu.memory_space<vmem>>, vector<8x1x8x32xf32>
      %23 = vector.shape_cast %22 : vector<8x1x8x32xf32> to vector<8x8x32xf32>
      %c0_15 = arith.constant 0 : index
      %24 = arith.index_cast %arg1 : i32 to index
      %c0_16 = arith.constant 0 : index
      %c0_17 = arith.constant 0 : index
      %25 = vector.load %arg8[%c0_15, %24, %c0_16, %c0_17] : memref<8x2x8x32xf32, #tpu.memory_space<vmem>>, vector<8x1x8x32xf32>
      %26 = vector.shape_cast %25 : vector<8x1x8x32xf32> to vector<8x8x32xf32>
      %c0_18 = arith.constant 0 : index
      %c0_19 = arith.constant 0 : index
      %c0_20 = arith.constant 0 : index
      %27 = vector.load %arg9[%c0_18, %c0_19, %c0_20] : memref<8x8x32xf32, #tpu.memory_space<vmem>>, vector<8x8x32xf32>
      %cst = arith.constant dense<0.000000e+00> : vector<8x8x32xf32>
      %28 = tpu.matmul %20, %23, %cst {dimension_numbers = #tpu.dot_dimension_numbers<[2], [1], [1], [2], [0, 0, 0, 1, 1, 2], [0], [0]>} : vector<8x8x8xf32>, vector<8x8x32xf32>, vector<8x8x32xf32> -> vector<8x8x32xf32>
      %29 = arith.addf %27, %28 : vector<8x8x32xf32>
      %c0_21 = arith.constant 0 : index
      %c0_22 = arith.constant 0 : index
      %c0_23 = arith.constant 0 : index
      %30 = vector.load %arg9[%c0_21, %c0_22, %c0_23] : memref<8x8x32xf32, #tpu.memory_space<vmem>>, vector<8x8x32xf32>
      tpu.vector_store %arg9[%c0_21, %c0_22, %c0_23], %29 {strides = array<i32>} : memref<8x8x32xf32, #tpu.memory_space<vmem>>, vector<8x8x32xf32>,
      %c0_24 = arith.constant 0 : index
      %c0_25 = arith.constant 0 : index
      %c0_26 = arith.constant 0 : index
      %31 = vector.load %arg10[%c0_24, %c0_25, %c0_26] : memref<8x8x32xf32, #tpu.memory_space<vmem>>, vector<8x8x32xf32>
      %cst_27 = arith.constant dense<0.000000e+00> : vector<8x8x32xf32>
      %32 = tpu.matmul %20, %26, %cst_27 {dimension_numbers = #tpu.dot_dimension_numbers<[2], [1], [1], [2], [0, 0, 0, 1, 1, 2], [0], [0]>} : vector<8x8x8xf32>, vector<8x8x32xf32>, vector<8x8x32xf32> -> vector<8x8x32xf32>
      %33 = arith.addf %31, %32 : vector<8x8x32xf32>
      %c0_28 = arith.constant 0 : index
      %c0_29 = arith.constant 0 : index
      %c0_30 = arith.constant 0 : index
      %34 = vector.load %arg10[%c0_28, %c0_29, %c0_30] : memref<8x8x32xf32, #tpu.memory_space<vmem>>, vector<8x8x32xf32>
      tpu.vector_store %arg10[%c0_28, %c0_29, %c0_30], %33 {strides = array<i32>} : memref<8x8x32xf32, #tpu.memory_space<vmem>>, vector<8x8x32xf32>,
    } else {
    }
    %11 = arith.cmpi eq, %arg1, %arg0 : i32
    %12 = arith.extui %11 : i1 to i32
    %c0_i32_5 = arith.constant 0 : i32
    %13 = arith.cmpi ne, %12, %c0_i32_5 : i32
    scf.if %13 {
      %c0 = arith.constant 0 : index
      %c0_8 = arith.constant 0 : index
      %c0_9 = arith.constant 0 : index
      %c0_10 = arith.constant 0 : index
      %c0_11 = arith.constant 0 : index
      %19 = vector.load %arg2[%c0, %c0_8, %c0_9, %c0_10, %c0_11] : memref<1x1x8x8x8xf32, #tpu.memory_space<vmem>>, vector<1x1x8x8x8xf32>
      %20 = vector.shape_cast %19 : vector<1x1x8x8x8xf32> to vector<8x8x8xf32>
      %c0_12 = arith.constant 0 : index
      %c0_13 = arith.constant 0 : index
      %c0_14 = arith.constant 0 : index
      %c0_15 = arith.constant 0 : index
      %21 = vector.load %arg4[%c0_12, %c0_13, %c0_14, %c0_15] : memref<1x8x8x128xf32, #tpu.memory_space<vmem>>, vector<1x8x8x128xf32>
      %22 = vector.shape_cast %21 : vector<1x8x8x128xf32> to vector<8x8x128xf32>
      %c0_16 = arith.constant 0 : index
      %c0_17 = arith.constant 0 : index
      %23 = vector.load %arg5[%c0_16, %c0_17] : memref<32x128xf32, #tpu.memory_space<vmem>>, vector<32x128xf32>
      %c0_18 = arith.constant 0 : index
      %c0_19 = arith.constant 0 : index
      %c0_20 = arith.constant 0 : index
      %24 = vector.load %arg9[%c0_18, %c0_19, %c0_20] : memref<8x8x32xf32, #tpu.memory_space<vmem>>, vector<8x8x32xf32>
      %25 = vector.shape_cast %24 : vector<8x8x32xf32> to vector<64x32xf32>
      %cst = arith.constant dense<0.000000e+00> : vector<64x128xf32>
      %26 = tpu.matmul %25, %23, %cst {dimension_numbers = #tpu.dot_dimension_numbers<[1], [0], [0], [1], [0, 0, 1, 1], [], []>} : vector<64x32xf32>, vector<32x128xf32>, vector<64x128xf32> -> vector<64x128xf32>
      %27 = vector.shape_cast %26 : vector<64x128xf32> to vector<8x8x128xf32>
      %28 = arith.addf %27, %22 : vector<8x8x128xf32>
      %c0_21 = arith.constant 0 : index
      %c0_22 = arith.constant 0 : index
      %c0_23 = arith.constant 0 : index
      %29 = vector.load %arg10[%c0_21, %c0_22, %c0_23] : memref<8x8x32xf32, #tpu.memory_space<vmem>>, vector<8x8x32xf32>
      %c0_24 = arith.constant 0 : index
      %c0_25 = arith.constant 0 : index
      %c0_26 = arith.constant 0 : index
      %c0_27 = arith.constant 0 : index
      %30 = vector.load %arg3[%c0_24, %c0_25, %c0_26, %c0_27] : memref<1x8x8x1xf32, #tpu.memory_space<vmem>>, vector<1x1x8x1xf32>
      %31 = vector.shape_cast %30 : vector<1x1x8x1xf32> to vector<8x1xf32>
      %32 = vector.extract_strided_slice %28 {offsets = [0, 0, 0], sizes = [8, 1, 128], strides = [1, 1, 1]} : vector<8x8x128xf32> to vector<8x1x128xf32>
      %33 = vector.shape_cast %32 : vector<8x1x128xf32> to vector<8x128xf32>
      %34 = vector.extract_strided_slice %29 {offsets = [0, 0, 0], sizes = [8, 1, 32], strides = [1, 1, 1]} : vector<8x8x32xf32> to vector<8x1x32xf32>
      %35 = vector.shape_cast %34 : vector<8x1x32xf32> to vector<8x32xf32>
      %36 = vector.extract_strided_slice %33 {offsets = [0, 0], sizes = [8, 32], strides = [1, 1]} : vector<8x128xf32> to vector<8x32xf32>
      %37 = arith.negf %36 : vector<8x32xf32>
      %38 = math.exp %37 : vector<8x32xf32>
      %cst_28 = arith.constant 1.000000e+00 : f32
      %39 = vector.broadcast %cst_28 : f32 to vector<8x32xf32>
      %40 = arith.addf %39, %38 : vector<8x32xf32>
      %41 = arith.divf %39, %40 : vector<8x32xf32>
      %42 = vector.extract_strided_slice %33 {offsets = [0, 32], sizes = [8, 32], strides = [1, 1]} : vector<8x128xf32> to vector<8x32xf32>
      %43 = arith.negf %42 : vector<8x32xf32>
      %44 = math.exp %43 : vector<8x32xf32>
      %cst_29 = arith.constant 1.000000e+00 : f32
      %45 = vector.broadcast %cst_29 : f32 to vector<8x32xf32>
      %46 = arith.addf %45, %44 : vector<8x32xf32>
      %47 = arith.divf %45, %46 : vector<8x32xf32>
      %48 = vector.extract_strided_slice %33 {offsets = [0, 64], sizes = [8, 32], strides = [1, 1]} : vector<8x128xf32> to vector<8x32xf32>
      %49 = arith.negf %48 : vector<8x32xf32>
      %50 = math.exp %49 : vector<8x32xf32>
      %cst_30 = arith.constant 1.000000e+00 : f32
      %51 = vector.broadcast %cst_30 : f32 to vector<8x32xf32>
      %52 = arith.addf %51, %50 : vector<8x32xf32>
      %53 = arith.divf %51, %52 : vector<8x32xf32>
      %54 = vector.extract_strided_slice %33 {offsets = [0, 96], sizes = [8, 32], strides = [1, 1]} : vector<8x128xf32> to vector<8x32xf32>
      %55 = math.tanh %54 : vector<8x32xf32>
      %56 = vector.shape_cast %31 : vector<8x1xf32> to vector<8x1xf32>
      %57 = vector.broadcast %56 : vector<8x1xf32> to vector<8x32xf32>
      %58 = arith.mulf %47, %35 : vector<8x32xf32>
      %59 = arith.mulf %41, %55 : vector<8x32xf32>
      %60 = arith.addf %58, %59 : vector<8x32xf32>
      %61 = arith.mulf %57, %60 : vector<8x32xf32>
      %62 = math.tanh %61 : vector<8x32xf32>
      %63 = arith.mulf %53, %62 : vector<8x32xf32>
      %64 = arith.mulf %57, %63 : vector<8x32xf32>
      %65 = vector.shape_cast %64 : vector<8x32xf32> to vector<8x1x1x32xf32>
      %c0_31 = arith.constant 0 : index
      %66 = arith.index_cast %arg0 : i32 to index
      %c0_32 = arith.constant 0 : index
      %c0_33 = arith.constant 0 : index
      %67 = vector.load %arg7[%c0_31, %66, %c0_32, %c0_33] : memref<8x2x8x32xf32, #tpu.memory_space<vmem>>, vector<8x1x1x32xf32>
      tpu.vector_store %arg7[%c0_31, %66, %c0_32, %c0_33], %65 {strides = array<i32>} : memref<8x2x8x32xf32, #tpu.memory_space<vmem>>, vector<8x1x1x32xf32>,
      %68 = vector.shape_cast %61 : vector<8x32xf32> to vector<8x1x1x32xf32>
      %c0_34 = arith.constant 0 : index
      %69 = arith.index_cast %arg0 : i32 to index
      %c0_35 = arith.constant 0 : index
      %c0_36 = arith.constant 0 : index
      %70 = vector.load %arg8[%c0_34, %69, %c0_35, %c0_36] : memref<8x2x8x32xf32, #tpu.memory_space<vmem>>, vector<8x1x1x32xf32>
      tpu.vector_store %arg8[%c0_34, %69, %c0_35, %c0_36], %68 {strides = array<i32>} : memref<8x2x8x32xf32, #tpu.memory_space<vmem>>, vector<8x1x1x32xf32>,
      %c0_37 = arith.constant 0 : index
      %c0_38 = arith.constant 0 : index
      %71 = vector.load %arg11[%c0_37, %c0_38] : memref<8x32xf32, #tpu.memory_space<vmem>>, vector<8x32xf32>
      %72 = arith.addf %71, %64 : vector<8x32xf32>
      %c0_39 = arith.constant 0 : index
      %c0_40 = arith.constant 0 : index
      %73 = vector.load %arg11[%c0_39, %c0_40] : memref<8x32xf32, #tpu.memory_space<vmem>>, vector<8x32xf32>
      tpu.vector_store %arg11[%c0_39, %c0_40], %72 {strides = array<i32>} : memref<8x32xf32, #tpu.memory_space<vmem>>, vector<8x32xf32>,
      %c0_41 = arith.constant 0 : index
      %c0_42 = arith.constant 0 : index
      %74 = vector.load %arg12[%c0_41, %c0_42] : memref<8x1xf32, #tpu.memory_space<vmem>>, vector<8x1xf32>
      %75 = arith.addf %74, %31 : vector<8x1xf32>
      %c0_43 = arith.constant 0 : index
      %c0_44 = arith.constant 0 : index
      %76 = vector.load %arg12[%c0_43, %c0_44] : memref<8x1xf32, #tpu.memory_space<vmem>>, vector<8x1xf32>
      tpu.vector_store %arg12[%c0_43, %c0_44], %75 {strides = array<i32>} : memref<8x1xf32, #tpu.memory_space<vmem>>, vector<8x1xf32>,
      %c0_45 = arith.constant 0 : index
      %c1 = arith.constant 1 : index
      %c0_46 = arith.constant 0 : index
      %c0_47 = arith.constant 0 : index
      %77 = vector.load %arg3[%c0_45, %c1, %c0_46, %c0_47] : memref<1x8x8x1xf32, #tpu.memory_space<vmem>>, vector<1x1x8x1xf32>
      %78 = vector.shape_cast %77 : vector<1x1x8x1xf32> to vector<8x1xf32>
      %cst_48 = arith.constant 0.000000e+00 : f32
      %79 = vector.broadcast %cst_48 : f32 to vector<8x32xf32>
      %cst_49 = arith.constant 0.000000e+00 : f32
      %80 = vector.broadcast %cst_49 : f32 to vector<8x32xf32>
      %81 = vector.extract_strided_slice %20 {offsets = [0, 1, 0], sizes = [8, 1, 1], strides = [1, 1, 1]} : vector<8x8x8xf32> to vector<8x1x1xf32>
      %82 = vector.shape_cast %81 : vector<8x1x1xf32> to vector<8x1xf32>
      %83 = vector.broadcast %82 : vector<8x1xf32> to vector<8x32xf32>
      %84 = arith.mulf %83, %64 : vector<8x32xf32>
      %85 = arith.addf %79, %84 : vector<8x32xf32>
      %86 = vector.broadcast %82 : vector<8x1xf32> to vector<8x32xf32>
      %87 = arith.mulf %86, %61 : vector<8x32xf32>
      %88 = arith.addf %80, %87 : vector<8x32xf32>
      %89 = vector.extract_strided_slice %28 {offsets = [0, 1, 0], sizes = [8, 1, 128], strides = [1, 1, 1]} : vector<8x8x128xf32> to vector<8x1x128xf32>
      %90 = vector.shape_cast %89 : vector<8x1x128xf32> to vector<8x128xf32>
      %cst_50 = arith.constant dense<0.000000e+00> : vector<8x128xf32>
      %91 = tpu.matmul %85, %23, %cst_50 {dimension_numbers = #tpu.dot_dimension_numbers<[1], [0], [0], [1], [0, 0, 1, 1], [], []>} : vector<8x32xf32>, vector<32x128xf32>, vector<8x128xf32> -> vector<8x128xf32>
      %92 = arith.addf %90, %91 : vector<8x128xf32>
      %93 = vector.extract_strided_slice %29 {offsets = [0, 1, 0], sizes = [8, 1, 32], strides = [1, 1, 1]} : vector<8x8x32xf32> to vector<8x1x32xf32>
      %94 = vector.shape_cast %93 : vector<8x1x32xf32> to vector<8x32xf32>
      %95 = arith.addf %94, %88 : vector<8x32xf32>
      %96 = vector.extract_strided_slice %92 {offsets = [0, 0], sizes = [8, 32], strides = [1, 1]} : vector<8x128xf32> to vector<8x32xf32>
      %97 = arith.negf %96 : vector<8x32xf32>
      %98 = math.exp %97 : vector<8x32xf32>
      %cst_51 = arith.constant 1.000000e+00 : f32
      %99 = vector.broadcast %cst_51 : f32 to vector<8x32xf32>
      %100 = arith.addf %99, %98 : vector<8x32xf32>
      %101 = arith.divf %99, %100 : vector<8x32xf32>
      %102 = vector.extract_strided_slice %92 {offsets = [0, 32], sizes = [8, 32], strides = [1, 1]} : vector<8x128xf32> to vector<8x32xf32>
      %103 = arith.negf %102 : vector<8x32xf32>
      %104 = math.exp %103 : vector<8x32xf32>
      %cst_52 = arith.constant 1.000000e+00 : f32
      %105 = vector.broadcast %cst_52 : f32 to vector<8x32xf32>
      %106 = arith.addf %105, %104 : vector<8x32xf32>
      %107 = arith.divf %105, %106 : vector<8x32xf32>
      %108 = vector.extract_strided_slice %92 {offsets = [0, 64], sizes = [8, 32], strides = [1, 1]} : vector<8x128xf32> to vector<8x32xf32>
      %109 = arith.negf %108 : vector<8x32xf32>
      %110 = math.exp %109 : vector<8x32xf32>
      %cst_53 = arith.constant 1.000000e+00 : f32
      %111 = vector.broadcast %cst_53 : f32 to vector<8x32xf32>
      %112 = arith.addf %111, %110 : vector<8x32xf32>
      %113 = arith.divf %111, %112 : vector<8x32xf32>
      %114 = vector.extract_strided_slice %92 {offsets = [0, 96], sizes = [8, 32], strides = [1, 1]} : vector<8x128xf32> to vector<8x32xf32>
      %115 = math.tanh %114 : vector<8x32xf32>
      %116 = vector.shape_cast %78 : vector<8x1xf32> to vector<8x1xf32>
      %117 = vector.broadcast %116 : vector<8x1xf32> to vector<8x32xf32>
      %118 = arith.mulf %107, %95 : vector<8x32xf32>
      %119 = arith.mulf %101, %115 : vector<8x32xf32>
      %120 = arith.addf %118, %119 : vector<8x32xf32>
      %121 = arith.mulf %117, %120 : vector<8x32xf32>
      %122 = math.tanh %121 : vector<8x32xf32>
      %123 = arith.mulf %113, %122 : vector<8x32xf32>
      %124 = arith.mulf %117, %123 : vector<8x32xf32>
      %125 = vector.shape_cast %124 : vector<8x32xf32> to vector<8x1x1x32xf32>
      %c0_54 = arith.constant 0 : index
      %126 = arith.index_cast %arg0 : i32 to index
      %c1_55 = arith.constant 1 : index
      %c0_56 = arith.constant 0 : index
      %127 = vector.load %arg7[%c0_54, %126, %c1_55, %c0_56] : memref<8x2x8x32xf32, #tpu.memory_space<vmem>>, vector<8x1x1x32xf32>
      tpu.vector_store %arg7[%c0_54, %126, %c1_55, %c0_56], %125 {strides = array<i32>} : memref<8x2x8x32xf32, #tpu.memory_space<vmem>>, vector<8x1x1x32xf32>,
      %128 = vector.shape_cast %121 : vector<8x32xf32> to vector<8x1x1x32xf32>
      %c0_57 = arith.constant 0 : index
      %129 = arith.index_cast %arg0 : i32 to index
      %c1_58 = arith.constant 1 : index
      %c0_59 = arith.constant 0 : index
      %130 = vector.load %arg8[%c0_57, %129, %c1_58, %c0_59] : memref<8x2x8x32xf32, #tpu.memory_space<vmem>>, vector<8x1x1x32xf32>
      tpu.vector_store %arg8[%c0_57, %129, %c1_58, %c0_59], %128 {strides = array<i32>} : memref<8x2x8x32xf32, #tpu.memory_space<vmem>>, vector<8x1x1x32xf32>,
      %c0_60 = arith.constant 0 : index
      %c0_61 = arith.constant 0 : index
      %131 = vector.load %arg11[%c0_60, %c0_61] : memref<8x32xf32, #tpu.memory_space<vmem>>, vector<8x32xf32>
      %132 = arith.addf %131, %124 : vector<8x32xf32>
      %c0_62 = arith.constant 0 : index
      %c0_63 = arith.constant 0 : index
      %133 = vector.load %arg11[%c0_62, %c0_63] : memref<8x32xf32, #tpu.memory_space<vmem>>, vector<8x32xf32>
      tpu.vector_store %arg11[%c0_62, %c0_63], %132 {strides = array<i32>} : memref<8x32xf32, #tpu.memory_space<vmem>>, vector<8x32xf32>,
      %c0_64 = arith.constant 0 : index
      %c0_65 = arith.constant 0 : index
      %134 = vector.load %arg12[%c0_64, %c0_65] : memref<8x1xf32, #tpu.memory_space<vmem>>, vector<8x1xf32>
      %135 = arith.addf %134, %78 : vector<8x1xf32>
      %c0_66 = arith.constant 0 : index
      %c0_67 = arith.constant 0 : index
      %136 = vector.load %arg12[%c0_66, %c0_67] : memref<8x1xf32, #tpu.memory_space<vmem>>, vector<8x1xf32>
      tpu.vector_store %arg12[%c0_66, %c0_67], %135 {strides = array<i32>} : memref<8x1xf32, #tpu.memory_space<vmem>>, vector<8x1xf32>,
      %c0_68 = arith.constant 0 : index
      %c2 = arith.constant 2 : index
      %c0_69 = arith.constant 0 : index
      %c0_70 = arith.constant 0 : index
      %137 = vector.load %arg3[%c0_68, %c2, %c0_69, %c0_70] : memref<1x8x8x1xf32, #tpu.memory_space<vmem>>, vector<1x1x8x1xf32>
      %138 = vector.shape_cast %137 : vector<1x1x8x1xf32> to vector<8x1xf32>
      %cst_71 = arith.constant 0.000000e+00 : f32
      %139 = vector.broadcast %cst_71 : f32 to vector<8x32xf32>
      %cst_72 = arith.constant 0.000000e+00 : f32
      %140 = vector.broadcast %cst_72 : f32 to vector<8x32xf32>
      %141 = vector.extract_strided_slice %20 {offsets = [0, 2, 0], sizes = [8, 1, 1], strides = [1, 1, 1]} : vector<8x8x8xf32> to vector<8x1x1xf32>
      %142 = vector.shape_cast %141 : vector<8x1x1xf32> to vector<8x1xf32>
      %143 = vector.broadcast %142 : vector<8x1xf32> to vector<8x32xf32>
      %144 = arith.mulf %143, %64 : vector<8x32xf32>
      %145 = arith.addf %139, %144 : vector<8x32xf32>
      %146 = vector.broadcast %142 : vector<8x1xf32> to vector<8x32xf32>
      %147 = arith.mulf %146, %61 : vector<8x32xf32>
      %148 = arith.addf %140, %147 : vector<8x32xf32>
      %149 = vector.extract_strided_slice %20 {offsets = [0, 2, 1], sizes = [8, 1, 1], strides = [1, 1, 1]} : vector<8x8x8xf32> to vector<8x1x1xf32>
      %150 = vector.shape_cast %149 : vector<8x1x1xf32> to vector<8x1xf32>
      %151 = vector.broadcast %150 : vector<8x1xf32> to vector<8x32xf32>
      %152 = arith.mulf %151, %124 : vector<8x32xf32>
      %153 = arith.addf %145, %152 : vector<8x32xf32>
      %154 = vector.broadcast %150 : vector<8x1xf32> to vector<8x32xf32>
      %155 = arith.mulf %154, %121 : vector<8x32xf32>
      %156 = arith.addf %148, %155 : vector<8x32xf32>
      %157 = vector.extract_strided_slice %28 {offsets = [0, 2, 0], sizes = [8, 1, 128], strides = [1, 1, 1]} : vector<8x8x128xf32> to vector<8x1x128xf32>
      %158 = vector.shape_cast %157 : vector<8x1x128xf32> to vector<8x128xf32>
      %cst_73 = arith.constant dense<0.000000e+00> : vector<8x128xf32>
      %159 = tpu.matmul %153, %23, %cst_73 {dimension_numbers = #tpu.dot_dimension_numbers<[1], [0], [0], [1], [0, 0, 1, 1], [], []>} : vector<8x32xf32>, vector<32x128xf32>, vector<8x128xf32> -> vector<8x128xf32>
      %160 = arith.addf %158, %159 : vector<8x128xf32>
      %161 = vector.extract_strided_slice %29 {offsets = [0, 2, 0], sizes = [8, 1, 32], strides = [1, 1, 1]} : vector<8x8x32xf32> to vector<8x1x32xf32>
      %162 = vector.shape_cast %161 : vector<8x1x32xf32> to vector<8x32xf32>
      %163 = arith.addf %162, %156 : vector<8x32xf32>
      %164 = vector.extract_strided_slice %160 {offsets = [0, 0], sizes = [8, 32], strides = [1, 1]} : vector<8x128xf32> to vector<8x32xf32>
      %165 = arith.negf %164 : vector<8x32xf32>
      %166 = math.exp %165 : vector<8x32xf32>
      %cst_74 = arith.constant 1.000000e+00 : f32
      %167 = vector.broadcast %cst_74 : f32 to vector<8x32xf32>
      %168 = arith.addf %167, %166 : vector<8x32xf32>
      %169 = arith.divf %167, %168 : vector<8x32xf32>
      %170 = vector.extract_strided_slice %160 {offsets = [0, 32], sizes = [8, 32], strides = [1, 1]} : vector<8x128xf32> to vector<8x32xf32>
      %171 = arith.negf %170 : vector<8x32xf32>
      %172 = math.exp %171 : vector<8x32xf32>
      %cst_75 = arith.constant 1.000000e+00 : f32
      %173 = vector.broadcast %cst_75 : f32 to vector<8x32xf32>
      %174 = arith.addf %173, %172 : vector<8x32xf32>
      %175 = arith.divf %173, %174 : vector<8x32xf32>
      %176 = vector.extract_strided_slice %160 {offsets = [0, 64], sizes = [8, 32], strides = [1, 1]} : vector<8x128xf32> to vector<8x32xf32>
      %177 = arith.negf %176 : vector<8x32xf32>
      %178 = math.exp %177 : vector<8x32xf32>
      %cst_76 = arith.constant 1.000000e+00 : f32
      %179 = vector.broadcast %cst_76 : f32 to vector<8x32xf32>
      %180 = arith.addf %179, %178 : vector<8x32xf32>
      %181 = arith.divf %179, %180 : vector<8x32xf32>
      %182 = vector.extract_strided_slice %160 {offsets = [0, 96], sizes = [8, 32], strides = [1, 1]} : vector<8x128xf32> to vector<8x32xf32>
      %183 = math.tanh %182 : vector<8x32xf32>
      %184 = vector.shape_cast %138 : vector<8x1xf32> to vector<8x1xf32>
      %185 = vector.broadcast %184 : vector<8x1xf32> to vector<8x32xf32>
      %186 = arith.mulf %175, %163 : vector<8x32xf32>
      %187 = arith.mulf %169, %183 : vector<8x32xf32>
      %188 = arith.addf %186, %187 : vector<8x32xf32>
      %189 = arith.mulf %185, %188 : vector<8x32xf32>
      %190 = math.tanh %189 : vector<8x32xf32>
      %191 = arith.mulf %181, %190 : vector<8x32xf32>
      %192 = arith.mulf %185, %191 : vector<8x32xf32>
      %193 = vector.shape_cast %192 : vector<8x32xf32> to vector<8x1x1x32xf32>
      %c0_77 = arith.constant 0 : index
      %194 = arith.index_cast %arg0 : i32 to index
      %c2_78 = arith.constant 2 : index
      %c0_79 = arith.constant 0 : index
      %195 = vector.load %arg7[%c0_77, %194, %c2_78, %c0_79] : memref<8x2x8x32xf32, #tpu.memory_space<vmem>>, vector<8x1x1x32xf32>
      tpu.vector_store %arg7[%c0_77, %194, %c2_78, %c0_79], %193 {strides = array<i32>} : memref<8x2x8x32xf32, #tpu.memory_space<vmem>>, vector<8x1x1x32xf32>,
      %196 = vector.shape_cast %189 : vector<8x32xf32> to vector<8x1x1x32xf32>
      %c0_80 = arith.constant 0 : index
      %197 = arith.index_cast %arg0 : i32 to index
      %c2_81 = arith.constant 2 : index
      %c0_82 = arith.constant 0 : index
      %198 = vector.load %arg8[%c0_80, %197, %c2_81, %c0_82] : memref<8x2x8x32xf32, #tpu.memory_space<vmem>>, vector<8x1x1x32xf32>
      tpu.vector_store %arg8[%c0_80, %197, %c2_81, %c0_82], %196 {strides = array<i32>} : memref<8x2x8x32xf32, #tpu.memory_space<vmem>>, vector<8x1x1x32xf32>,
      %c0_83 = arith.constant 0 : index
      %c0_84 = arith.constant 0 : index
      %199 = vector.load %arg11[%c0_83, %c0_84] : memref<8x32xf32, #tpu.memory_space<vmem>>, vector<8x32xf32>
      %200 = arith.addf %199, %192 : vector<8x32xf32>
      %c0_85 = arith.constant 0 : index
      %c0_86 = arith.constant 0 : index
      %201 = vector.load %arg11[%c0_85, %c0_86] : memref<8x32xf32, #tpu.memory_space<vmem>>, vector<8x32xf32>
      tpu.vector_store %arg11[%c0_85, %c0_86], %200 {strides = array<i32>} : memref<8x32xf32, #tpu.memory_space<vmem>>, vector<8x32xf32>,
      %c0_87 = arith.constant 0 : index
      %c0_88 = arith.constant 0 : index
      %202 = vector.load %arg12[%c0_87, %c0_88] : memref<8x1xf32, #tpu.memory_space<vmem>>, vector<8x1xf32>
      %203 = arith.addf %202, %138 : vector<8x1xf32>
      %c0_89 = arith.constant 0 : index
      %c0_90 = arith.constant 0 : index
      %204 = vector.load %arg12[%c0_89, %c0_90] : memref<8x1xf32, #tpu.memory_space<vmem>>, vector<8x1xf32>
      tpu.vector_store %arg12[%c0_89, %c0_90], %203 {strides = array<i32>} : memref<8x1xf32, #tpu.memory_space<vmem>>, vector<8x1xf32>,
      %c0_91 = arith.constant 0 : index
      %c3 = arith.constant 3 : index
      %c0_92 = arith.constant 0 : index
      %c0_93 = arith.constant 0 : index
      %205 = vector.load %arg3[%c0_91, %c3, %c0_92, %c0_93] : memref<1x8x8x1xf32, #tpu.memory_space<vmem>>, vector<1x1x8x1xf32>
      %206 = vector.shape_cast %205 : vector<1x1x8x1xf32> to vector<8x1xf32>
      %cst_94 = arith.constant 0.000000e+00 : f32
      %207 = vector.broadcast %cst_94 : f32 to vector<8x32xf32>
      %cst_95 = arith.constant 0.000000e+00 : f32
      %208 = vector.broadcast %cst_95 : f32 to vector<8x32xf32>
      %209 = vector.extract_strided_slice %20 {offsets = [0, 3, 0], sizes = [8, 1, 1], strides = [1, 1, 1]} : vector<8x8x8xf32> to vector<8x1x1xf32>
      %210 = vector.shape_cast %209 : vector<8x1x1xf32> to vector<8x1xf32>
      %211 = vector.broadcast %210 : vector<8x1xf32> to vector<8x32xf32>
      %212 = arith.mulf %211, %64 : vector<8x32xf32>
      %213 = arith.addf %207, %212 : vector<8x32xf32>
      %214 = vector.broadcast %210 : vector<8x1xf32> to vector<8x32xf32>
      %215 = arith.mulf %214, %61 : vector<8x32xf32>
      %216 = arith.addf %208, %215 : vector<8x32xf32>
      %217 = vector.extract_strided_slice %20 {offsets = [0, 3, 1], sizes = [8, 1, 1], strides = [1, 1, 1]} : vector<8x8x8xf32> to vector<8x1x1xf32>
      %218 = vector.shape_cast %217 : vector<8x1x1xf32> to vector<8x1xf32>
      %219 = vector.broadcast %218 : vector<8x1xf32> to vector<8x32xf32>
      %220 = arith.mulf %219, %124 : vector<8x32xf32>
      %221 = arith.addf %213, %220 : vector<8x32xf32>
      %222 = vector.broadcast %218 : vector<8x1xf32> to vector<8x32xf32>
      %223 = arith.mulf %222, %121 : vector<8x32xf32>
      %224 = arith.addf %216, %223 : vector<8x32xf32>
      %225 = vector.extract_strided_slice %20 {offsets = [0, 3, 2], sizes = [8, 1, 1], strides = [1, 1, 1]} : vector<8x8x8xf32> to vector<8x1x1xf32>
      %226 = vector.shape_cast %225 : vector<8x1x1xf32> to vector<8x1xf32>
      %227 = vector.broadcast %226 : vector<8x1xf32> to vector<8x32xf32>
      %228 = arith.mulf %227, %192 : vector<8x32xf32>
      %229 = arith.addf %221, %228 : vector<8x32xf32>
      %230 = vector.broadcast %226 : vector<8x1xf32> to vector<8x32xf32>
      %231 = arith.mulf %230, %189 : vector<8x32xf32>
      %232 = arith.addf %224, %231 : vector<8x32xf32>
      %233 = vector.extract_strided_slice %28 {offsets = [0, 3, 0], sizes = [8, 1, 128], strides = [1, 1, 1]} : vector<8x8x128xf32> to vector<8x1x128xf32>
      %234 = vector.shape_cast %233 : vector<8x1x128xf32> to vector<8x128xf32>
      %cst_96 = arith.constant dense<0.000000e+00> : vector<8x128xf32>
      %235 = tpu.matmul %229, %23, %cst_96 {dimension_numbers = #tpu.dot_dimension_numbers<[1], [0], [0], [1], [0, 0, 1, 1], [], []>} : vector<8x32xf32>, vector<32x128xf32>, vector<8x128xf32> -> vector<8x128xf32>
      %236 = arith.addf %234, %235 : vector<8x128xf32>
      %237 = vector.extract_strided_slice %29 {offsets = [0, 3, 0], sizes = [8, 1, 32], strides = [1, 1, 1]} : vector<8x8x32xf32> to vector<8x1x32xf32>
      %238 = vector.shape_cast %237 : vector<8x1x32xf32> to vector<8x32xf32>
      %239 = arith.addf %238, %232 : vector<8x32xf32>
      %240 = vector.extract_strided_slice %236 {offsets = [0, 0], sizes = [8, 32], strides = [1, 1]} : vector<8x128xf32> to vector<8x32xf32>
      %241 = arith.negf %240 : vector<8x32xf32>
      %242 = math.exp %241 : vector<8x32xf32>
      %cst_97 = arith.constant 1.000000e+00 : f32
      %243 = vector.broadcast %cst_97 : f32 to vector<8x32xf32>
      %244 = arith.addf %243, %242 : vector<8x32xf32>
      %245 = arith.divf %243, %244 : vector<8x32xf32>
      %246 = vector.extract_strided_slice %236 {offsets = [0, 32], sizes = [8, 32], strides = [1, 1]} : vector<8x128xf32> to vector<8x32xf32>
      %247 = arith.negf %246 : vector<8x32xf32>
      %248 = math.exp %247 : vector<8x32xf32>
      %cst_98 = arith.constant 1.000000e+00 : f32
      %249 = vector.broadcast %cst_98 : f32 to vector<8x32xf32>
      %250 = arith.addf %249, %248 : vector<8x32xf32>
      %251 = arith.divf %249, %250 : vector<8x32xf32>
      %252 = vector.extract_strided_slice %236 {offsets = [0, 64], sizes = [8, 32], strides = [1, 1]} : vector<8x128xf32> to vector<8x32xf32>
      %253 = arith.negf %252 : vector<8x32xf32>
      %254 = math.exp %253 : vector<8x32xf32>
      %cst_99 = arith.constant 1.000000e+00 : f32
      %255 = vector.broadcast %cst_99 : f32 to vector<8x32xf32>
      %256 = arith.addf %255, %254 : vector<8x32xf32>
      %257 = arith.divf %255, %256 : vector<8x32xf32>
      %258 = vector.extract_strided_slice %236 {offsets = [0, 96], sizes = [8, 32], strides = [1, 1]} : vector<8x128xf32> to vector<8x32xf32>
      %259 = math.tanh %258 : vector<8x32xf32>
      %260 = vector.shape_cast %206 : vector<8x1xf32> to vector<8x1xf32>
      %261 = vector.broadcast %260 : vector<8x1xf32> to vector<8x32xf32>
      %262 = arith.mulf %251, %239 : vector<8x32xf32>
      %263 = arith.mulf %245, %259 : vector<8x32xf32>
      %264 = arith.addf %262, %263 : vector<8x32xf32>
      %265 = arith.mulf %261, %264 : vector<8x32xf32>
      %266 = math.tanh %265 : vector<8x32xf32>
      %267 = arith.mulf %257, %266 : vector<8x32xf32>
      %268 = arith.mulf %261, %267 : vector<8x32xf32>
      %269 = vector.shape_cast %268 : vector<8x32xf32> to vector<8x1x1x32xf32>
      %c0_100 = arith.constant 0 : index
      %270 = arith.index_cast %arg0 : i32 to index
      %c3_101 = arith.constant 3 : index
      %c0_102 = arith.constant 0 : index
      %271 = vector.load %arg7[%c0_100, %270, %c3_101, %c0_102] : memref<8x2x8x32xf32, #tpu.memory_space<vmem>>, vector<8x1x1x32xf32>
      tpu.vector_store %arg7[%c0_100, %270, %c3_101, %c0_102], %269 {strides = array<i32>} : memref<8x2x8x32xf32, #tpu.memory_space<vmem>>, vector<8x1x1x32xf32>,
      %272 = vector.shape_cast %265 : vector<8x32xf32> to vector<8x1x1x32xf32>
      %c0_103 = arith.constant 0 : index
      %273 = arith.index_cast %arg0 : i32 to index
      %c3_104 = arith.constant 3 : index
      %c0_105 = arith.constant 0 : index
      %274 = vector.load %arg8[%c0_103, %273, %c3_104, %c0_105] : memref<8x2x8x32xf32, #tpu.memory_space<vmem>>, vector<8x1x1x32xf32>
      tpu.vector_store %arg8[%c0_103, %273, %c3_104, %c0_105], %272 {strides = array<i32>} : memref<8x2x8x32xf32, #tpu.memory_space<vmem>>, vector<8x1x1x32xf32>,
      %c0_106 = arith.constant 0 : index
      %c0_107 = arith.constant 0 : index
      %275 = vector.load %arg11[%c0_106, %c0_107] : memref<8x32xf32, #tpu.memory_space<vmem>>, vector<8x32xf32>
      %276 = arith.addf %275, %268 : vector<8x32xf32>
      %c0_108 = arith.constant 0 : index
      %c0_109 = arith.constant 0 : index
      %277 = vector.load %arg11[%c0_108, %c0_109] : memref<8x32xf32, #tpu.memory_space<vmem>>, vector<8x32xf32>
      tpu.vector_store %arg11[%c0_108, %c0_109], %276 {strides = array<i32>} : memref<8x32xf32, #tpu.memory_space<vmem>>, vector<8x32xf32>,
      %c0_110 = arith.constant 0 : index
      %c0_111 = arith.constant 0 : index
      %278 = vector.load %arg12[%c0_110, %c0_111] : memref<8x1xf32, #tpu.memory_space<vmem>>, vector<8x1xf32>
      %279 = arith.addf %278, %206 : vector<8x1xf32>
      %c0_112 = arith.constant 0 : index
      %c0_113 = arith.constant 0 : index
      %280 = vector.load %arg12[%c0_112, %c0_113] : memref<8x1xf32, #tpu.memory_space<vmem>>, vector<8x1xf32>
      tpu.vector_store %arg12[%c0_112, %c0_113], %279 {strides = array<i32>} : memref<8x1xf32, #tpu.memory_space<vmem>>, vector<8x1xf32>,
      %c0_114 = arith.constant 0 : index
      %c4 = arith.constant 4 : index
      %c0_115 = arith.constant 0 : index
      %c0_116 = arith.constant 0 : index
      %281 = vector.load %arg3[%c0_114, %c4, %c0_115, %c0_116] : memref<1x8x8x1xf32, #tpu.memory_space<vmem>>, vector<1x1x8x1xf32>
      %282 = vector.shape_cast %281 : vector<1x1x8x1xf32> to vector<8x1xf32>
      %cst_117 = arith.constant 0.000000e+00 : f32
      %283 = vector.broadcast %cst_117 : f32 to vector<8x32xf32>
      %cst_118 = arith.constant 0.000000e+00 : f32
      %284 = vector.broadcast %cst_118 : f32 to vector<8x32xf32>
      %285 = vector.extract_strided_slice %20 {offsets = [0, 4, 0], sizes = [8, 1, 1], strides = [1, 1, 1]} : vector<8x8x8xf32> to vector<8x1x1xf32>
      %286 = vector.shape_cast %285 : vector<8x1x1xf32> to vector<8x1xf32>
      %287 = vector.broadcast %286 : vector<8x1xf32> to vector<8x32xf32>
      %288 = arith.mulf %287, %64 : vector<8x32xf32>
      %289 = arith.addf %283, %288 : vector<8x32xf32>
      %290 = vector.broadcast %286 : vector<8x1xf32> to vector<8x32xf32>
      %291 = arith.mulf %290, %61 : vector<8x32xf32>
      %292 = arith.addf %284, %291 : vector<8x32xf32>
      %293 = vector.extract_strided_slice %20 {offsets = [0, 4, 1], sizes = [8, 1, 1], strides = [1, 1, 1]} : vector<8x8x8xf32> to vector<8x1x1xf32>
      %294 = vector.shape_cast %293 : vector<8x1x1xf32> to vector<8x1xf32>
      %295 = vector.broadcast %294 : vector<8x1xf32> to vector<8x32xf32>
      %296 = arith.mulf %295, %124 : vector<8x32xf32>
      %297 = arith.addf %289, %296 : vector<8x32xf32>
      %298 = vector.broadcast %294 : vector<8x1xf32> to vector<8x32xf32>
      %299 = arith.mulf %298, %121 : vector<8x32xf32>
      %300 = arith.addf %292, %299 : vector<8x32xf32>
      %301 = vector.extract_strided_slice %20 {offsets = [0, 4, 2], sizes = [8, 1, 1], strides = [1, 1, 1]} : vector<8x8x8xf32> to vector<8x1x1xf32>
      %302 = vector.shape_cast %301 : vector<8x1x1xf32> to vector<8x1xf32>
      %303 = vector.broadcast %302 : vector<8x1xf32> to vector<8x32xf32>
      %304 = arith.mulf %303, %192 : vector<8x32xf32>
      %305 = arith.addf %297, %304 : vector<8x32xf32>
      %306 = vector.broadcast %302 : vector<8x1xf32> to vector<8x32xf32>
      %307 = arith.mulf %306, %189 : vector<8x32xf32>
      %308 = arith.addf %300, %307 : vector<8x32xf32>
      %309 = vector.extract_strided_slice %20 {offsets = [0, 4, 3], sizes = [8, 1, 1], strides = [1, 1, 1]} : vector<8x8x8xf32> to vector<8x1x1xf32>
      %310 = vector.shape_cast %309 : vector<8x1x1xf32> to vector<8x1xf32>
      %311 = vector.broadcast %310 : vector<8x1xf32> to vector<8x32xf32>
      %312 = arith.mulf %311, %268 : vector<8x32xf32>
      %313 = arith.addf %305, %312 : vector<8x32xf32>
      %314 = vector.broadcast %310 : vector<8x1xf32> to vector<8x32xf32>
      %315 = arith.mulf %314, %265 : vector<8x32xf32>
      %316 = arith.addf %308, %315 : vector<8x32xf32>
      %317 = vector.extract_strided_slice %28 {offsets = [0, 4, 0], sizes = [8, 1, 128], strides = [1, 1, 1]} : vector<8x8x128xf32> to vector<8x1x128xf32>
      %318 = vector.shape_cast %317 : vector<8x1x128xf32> to vector<8x128xf32>
      %cst_119 = arith.constant dense<0.000000e+00> : vector<8x128xf32>
      %319 = tpu.matmul %313, %23, %cst_119 {dimension_numbers = #tpu.dot_dimension_numbers<[1], [0], [0], [1], [0, 0, 1, 1], [], []>} : vector<8x32xf32>, vector<32x128xf32>, vector<8x128xf32> -> vector<8x128xf32>
      %320 = arith.addf %318, %319 : vector<8x128xf32>
      %321 = vector.extract_strided_slice %29 {offsets = [0, 4, 0], sizes = [8, 1, 32], strides = [1, 1, 1]} : vector<8x8x32xf32> to vector<8x1x32xf32>
      %322 = vector.shape_cast %321 : vector<8x1x32xf32> to vector<8x32xf32>
      %323 = arith.addf %322, %316 : vector<8x32xf32>
      %324 = vector.extract_strided_slice %320 {offsets = [0, 0], sizes = [8, 32], strides = [1, 1]} : vector<8x128xf32> to vector<8x32xf32>
      %325 = arith.negf %324 : vector<8x32xf32>
      %326 = math.exp %325 : vector<8x32xf32>
      %cst_120 = arith.constant 1.000000e+00 : f32
      %327 = vector.broadcast %cst_120 : f32 to vector<8x32xf32>
      %328 = arith.addf %327, %326 : vector<8x32xf32>
      %329 = arith.divf %327, %328 : vector<8x32xf32>
      %330 = vector.extract_strided_slice %320 {offsets = [0, 32], sizes = [8, 32], strides = [1, 1]} : vector<8x128xf32> to vector<8x32xf32>
      %331 = arith.negf %330 : vector<8x32xf32>
      %332 = math.exp %331 : vector<8x32xf32>
      %cst_121 = arith.constant 1.000000e+00 : f32
      %333 = vector.broadcast %cst_121 : f32 to vector<8x32xf32>
      %334 = arith.addf %333, %332 : vector<8x32xf32>
      %335 = arith.divf %333, %334 : vector<8x32xf32>
      %336 = vector.extract_strided_slice %320 {offsets = [0, 64], sizes = [8, 32], strides = [1, 1]} : vector<8x128xf32> to vector<8x32xf32>
      %337 = arith.negf %336 : vector<8x32xf32>
      %338 = math.exp %337 : vector<8x32xf32>
      %cst_122 = arith.constant 1.000000e+00 : f32
      %339 = vector.broadcast %cst_122 : f32 to vector<8x32xf32>
      %340 = arith.addf %339, %338 : vector<8x32xf32>
      %341 = arith.divf %339, %340 : vector<8x32xf32>
      %342 = vector.extract_strided_slice %320 {offsets = [0, 96], sizes = [8, 32], strides = [1, 1]} : vector<8x128xf32> to vector<8x32xf32>
      %343 = math.tanh %342 : vector<8x32xf32>
      %344 = vector.shape_cast %282 : vector<8x1xf32> to vector<8x1xf32>
      %345 = vector.broadcast %344 : vector<8x1xf32> to vector<8x32xf32>
      %346 = arith.mulf %335, %323 : vector<8x32xf32>
      %347 = arith.mulf %329, %343 : vector<8x32xf32>
      %348 = arith.addf %346, %347 : vector<8x32xf32>
      %349 = arith.mulf %345, %348 : vector<8x32xf32>
      %350 = math.tanh %349 : vector<8x32xf32>
      %351 = arith.mulf %341, %350 : vector<8x32xf32>
      %352 = arith.mulf %345, %351 : vector<8x32xf32>
      %353 = vector.shape_cast %352 : vector<8x32xf32> to vector<8x1x1x32xf32>
      %c0_123 = arith.constant 0 : index
      %354 = arith.index_cast %arg0 : i32 to index
      %c4_124 = arith.constant 4 : index
      %c0_125 = arith.constant 0 : index
      %355 = vector.load %arg7[%c0_123, %354, %c4_124, %c0_125] : memref<8x2x8x32xf32, #tpu.memory_space<vmem>>, vector<8x1x1x32xf32>
      tpu.vector_store %arg7[%c0_123, %354, %c4_124, %c0_125], %353 {strides = array<i32>} : memref<8x2x8x32xf32, #tpu.memory_space<vmem>>, vector<8x1x1x32xf32>,
      %356 = vector.shape_cast %349 : vector<8x32xf32> to vector<8x1x1x32xf32>
      %c0_126 = arith.constant 0 : index
      %357 = arith.index_cast %arg0 : i32 to index
      %c4_127 = arith.constant 4 : index
      %c0_128 = arith.constant 0 : index
      %358 = vector.load %arg8[%c0_126, %357, %c4_127, %c0_128] : memref<8x2x8x32xf32, #tpu.memory_space<vmem>>, vector<8x1x1x32xf32>
      tpu.vector_store %arg8[%c0_126, %357, %c4_127, %c0_128], %356 {strides = array<i32>} : memref<8x2x8x32xf32, #tpu.memory_space<vmem>>, vector<8x1x1x32xf32>,
      %c0_129 = arith.constant 0 : index
      %c0_130 = arith.constant 0 : index
      %359 = vector.load %arg11[%c0_129, %c0_130] : memref<8x32xf32, #tpu.memory_space<vmem>>, vector<8x32xf32>
      %360 = arith.addf %359, %352 : vector<8x32xf32>
      %c0_131 = arith.constant 0 : index
      %c0_132 = arith.constant 0 : index
      %361 = vector.load %arg11[%c0_131, %c0_132] : memref<8x32xf32, #tpu.memory_space<vmem>>, vector<8x32xf32>
      tpu.vector_store %arg11[%c0_131, %c0_132], %360 {strides = array<i32>} : memref<8x32xf32, #tpu.memory_space<vmem>>, vector<8x32xf32>,
      %c0_133 = arith.constant 0 : index
      %c0_134 = arith.constant 0 : index
      %362 = vector.load %arg12[%c0_133, %c0_134] : memref<8x1xf32, #tpu.memory_space<vmem>>, vector<8x1xf32>
      %363 = arith.addf %362, %282 : vector<8x1xf32>
      %c0_135 = arith.constant 0 : index
      %c0_136 = arith.constant 0 : index
      %364 = vector.load %arg12[%c0_135, %c0_136] : memref<8x1xf32, #tpu.memory_space<vmem>>, vector<8x1xf32>
      tpu.vector_store %arg12[%c0_135, %c0_136], %363 {strides = array<i32>} : memref<8x1xf32, #tpu.memory_space<vmem>>, vector<8x1xf32>,
      %c0_137 = arith.constant 0 : index
      %c5 = arith.constant 5 : index
      %c0_138 = arith.constant 0 : index
      %c0_139 = arith.constant 0 : index
      %365 = vector.load %arg3[%c0_137, %c5, %c0_138, %c0_139] : memref<1x8x8x1xf32, #tpu.memory_space<vmem>>, vector<1x1x8x1xf32>
      %366 = vector.shape_cast %365 : vector<1x1x8x1xf32> to vector<8x1xf32>
      %cst_140 = arith.constant 0.000000e+00 : f32
      %367 = vector.broadcast %cst_140 : f32 to vector<8x32xf32>
      %cst_141 = arith.constant 0.000000e+00 : f32
      %368 = vector.broadcast %cst_141 : f32 to vector<8x32xf32>
      %369 = vector.extract_strided_slice %20 {offsets = [0, 5, 0], sizes = [8, 1, 1], strides = [1, 1, 1]} : vector<8x8x8xf32> to vector<8x1x1xf32>
      %370 = vector.shape_cast %369 : vector<8x1x1xf32> to vector<8x1xf32>
      %371 = vector.broadcast %370 : vector<8x1xf32> to vector<8x32xf32>
      %372 = arith.mulf %371, %64 : vector<8x32xf32>
      %373 = arith.addf %367, %372 : vector<8x32xf32>
      %374 = vector.broadcast %370 : vector<8x1xf32> to vector<8x32xf32>
      %375 = arith.mulf %374, %61 : vector<8x32xf32>
      %376 = arith.addf %368, %375 : vector<8x32xf32>
      %377 = vector.extract_strided_slice %20 {offsets = [0, 5, 1], sizes = [8, 1, 1], strides = [1, 1, 1]} : vector<8x8x8xf32> to vector<8x1x1xf32>
      %378 = vector.shape_cast %377 : vector<8x1x1xf32> to vector<8x1xf32>
      %379 = vector.broadcast %378 : vector<8x1xf32> to vector<8x32xf32>
      %380 = arith.mulf %379, %124 : vector<8x32xf32>
      %381 = arith.addf %373, %380 : vector<8x32xf32>
      %382 = vector.broadcast %378 : vector<8x1xf32> to vector<8x32xf32>
      %383 = arith.mulf %382, %121 : vector<8x32xf32>
      %384 = arith.addf %376, %383 : vector<8x32xf32>
      %385 = vector.extract_strided_slice %20 {offsets = [0, 5, 2], sizes = [8, 1, 1], strides = [1, 1, 1]} : vector<8x8x8xf32> to vector<8x1x1xf32>
      %386 = vector.shape_cast %385 : vector<8x1x1xf32> to vector<8x1xf32>
      %387 = vector.broadcast %386 : vector<8x1xf32> to vector<8x32xf32>
      %388 = arith.mulf %387, %192 : vector<8x32xf32>
      %389 = arith.addf %381, %388 : vector<8x32xf32>
      %390 = vector.broadcast %386 : vector<8x1xf32> to vector<8x32xf32>
      %391 = arith.mulf %390, %189 : vector<8x32xf32>
      %392 = arith.addf %384, %391 : vector<8x32xf32>
      %393 = vector.extract_strided_slice %20 {offsets = [0, 5, 3], sizes = [8, 1, 1], strides = [1, 1, 1]} : vector<8x8x8xf32> to vector<8x1x1xf32>
      %394 = vector.shape_cast %393 : vector<8x1x1xf32> to vector<8x1xf32>
      %395 = vector.broadcast %394 : vector<8x1xf32> to vector<8x32xf32>
      %396 = arith.mulf %395, %268 : vector<8x32xf32>
      %397 = arith.addf %389, %396 : vector<8x32xf32>
      %398 = vector.broadcast %394 : vector<8x1xf32> to vector<8x32xf32>
      %399 = arith.mulf %398, %265 : vector<8x32xf32>
      %400 = arith.addf %392, %399 : vector<8x32xf32>
      %401 = vector.extract_strided_slice %20 {offsets = [0, 5, 4], sizes = [8, 1, 1], strides = [1, 1, 1]} : vector<8x8x8xf32> to vector<8x1x1xf32>
      %402 = vector.shape_cast %401 : vector<8x1x1xf32> to vector<8x1xf32>
      %403 = vector.broadcast %402 : vector<8x1xf32> to vector<8x32xf32>
      %404 = arith.mulf %403, %352 : vector<8x32xf32>
      %405 = arith.addf %397, %404 : vector<8x32xf32>
      %406 = vector.broadcast %402 : vector<8x1xf32> to vector<8x32xf32>
      %407 = arith.mulf %406, %349 : vector<8x32xf32>
      %408 = arith.addf %400, %407 : vector<8x32xf32>
      %409 = vector.extract_strided_slice %28 {offsets = [0, 5, 0], sizes = [8, 1, 128], strides = [1, 1, 1]} : vector<8x8x128xf32> to vector<8x1x128xf32>
      %410 = vector.shape_cast %409 : vector<8x1x128xf32> to vector<8x128xf32>
      %cst_142 = arith.constant dense<0.000000e+00> : vector<8x128xf32>
      %411 = tpu.matmul %405, %23, %cst_142 {dimension_numbers = #tpu.dot_dimension_numbers<[1], [0], [0], [1], [0, 0, 1, 1], [], []>} : vector<8x32xf32>, vector<32x128xf32>, vector<8x128xf32> -> vector<8x128xf32>
      %412 = arith.addf %410, %411 : vector<8x128xf32>
      %413 = vector.extract_strided_slice %29 {offsets = [0, 5, 0], sizes = [8, 1, 32], strides = [1, 1, 1]} : vector<8x8x32xf32> to vector<8x1x32xf32>
      %414 = vector.shape_cast %413 : vector<8x1x32xf32> to vector<8x32xf32>
      %415 = arith.addf %414, %408 : vector<8x32xf32>
      %416 = vector.extract_strided_slice %412 {offsets = [0, 0], sizes = [8, 32], strides = [1, 1]} : vector<8x128xf32> to vector<8x32xf32>
      %417 = arith.negf %416 : vector<8x32xf32>
      %418 = math.exp %417 : vector<8x32xf32>
      %cst_143 = arith.constant 1.000000e+00 : f32
      %419 = vector.broadcast %cst_143 : f32 to vector<8x32xf32>
      %420 = arith.addf %419, %418 : vector<8x32xf32>
      %421 = arith.divf %419, %420 : vector<8x32xf32>
      %422 = vector.extract_strided_slice %412 {offsets = [0, 32], sizes = [8, 32], strides = [1, 1]} : vector<8x128xf32> to vector<8x32xf32>
      %423 = arith.negf %422 : vector<8x32xf32>
      %424 = math.exp %423 : vector<8x32xf32>
      %cst_144 = arith.constant 1.000000e+00 : f32
      %425 = vector.broadcast %cst_144 : f32 to vector<8x32xf32>
      %426 = arith.addf %425, %424 : vector<8x32xf32>
      %427 = arith.divf %425, %426 : vector<8x32xf32>
      %428 = vector.extract_strided_slice %412 {offsets = [0, 64], sizes = [8, 32], strides = [1, 1]} : vector<8x128xf32> to vector<8x32xf32>
      %429 = arith.negf %428 : vector<8x32xf32>
      %430 = math.exp %429 : vector<8x32xf32>
      %cst_145 = arith.constant 1.000000e+00 : f32
      %431 = vector.broadcast %cst_145 : f32 to vector<8x32xf32>
      %432 = arith.addf %431, %430 : vector<8x32xf32>
      %433 = arith.divf %431, %432 : vector<8x32xf32>
      %434 = vector.extract_strided_slice %412 {offsets = [0, 96], sizes = [8, 32], strides = [1, 1]} : vector<8x128xf32> to vector<8x32xf32>
      %435 = math.tanh %434 : vector<8x32xf32>
      %436 = vector.shape_cast %366 : vector<8x1xf32> to vector<8x1xf32>
      %437 = vector.broadcast %436 : vector<8x1xf32> to vector<8x32xf32>
      %438 = arith.mulf %427, %415 : vector<8x32xf32>
      %439 = arith.mulf %421, %435 : vector<8x32xf32>
      %440 = arith.addf %438, %439 : vector<8x32xf32>
      %441 = arith.mulf %437, %440 : vector<8x32xf32>
      %442 = math.tanh %441 : vector<8x32xf32>
      %443 = arith.mulf %433, %442 : vector<8x32xf32>
      %444 = arith.mulf %437, %443 : vector<8x32xf32>
      %445 = vector.shape_cast %444 : vector<8x32xf32> to vector<8x1x1x32xf32>
      %c0_146 = arith.constant 0 : index
      %446 = arith.index_cast %arg0 : i32 to index
      %c5_147 = arith.constant 5 : index
      %c0_148 = arith.constant 0 : index
      %447 = vector.load %arg7[%c0_146, %446, %c5_147, %c0_148] : memref<8x2x8x32xf32, #tpu.memory_space<vmem>>, vector<8x1x1x32xf32>
      tpu.vector_store %arg7[%c0_146, %446, %c5_147, %c0_148], %445 {strides = array<i32>} : memref<8x2x8x32xf32, #tpu.memory_space<vmem>>, vector<8x1x1x32xf32>,
      %448 = vector.shape_cast %441 : vector<8x32xf32> to vector<8x1x1x32xf32>
      %c0_149 = arith.constant 0 : index
      %449 = arith.index_cast %arg0 : i32 to index
      %c5_150 = arith.constant 5 : index
      %c0_151 = arith.constant 0 : index
      %450 = vector.load %arg8[%c0_149, %449, %c5_150, %c0_151] : memref<8x2x8x32xf32, #tpu.memory_space<vmem>>, vector<8x1x1x32xf32>
      tpu.vector_store %arg8[%c0_149, %449, %c5_150, %c0_151], %448 {strides = array<i32>} : memref<8x2x8x32xf32, #tpu.memory_space<vmem>>, vector<8x1x1x32xf32>,
      %c0_152 = arith.constant 0 : index
      %c0_153 = arith.constant 0 : index
      %451 = vector.load %arg11[%c0_152, %c0_153] : memref<8x32xf32, #tpu.memory_space<vmem>>, vector<8x32xf32>
      %452 = arith.addf %451, %444 : vector<8x32xf32>
      %c0_154 = arith.constant 0 : index
      %c0_155 = arith.constant 0 : index
      %453 = vector.load %arg11[%c0_154, %c0_155] : memref<8x32xf32, #tpu.memory_space<vmem>>, vector<8x32xf32>
      tpu.vector_store %arg11[%c0_154, %c0_155], %452 {strides = array<i32>} : memref<8x32xf32, #tpu.memory_space<vmem>>, vector<8x32xf32>,
      %c0_156 = arith.constant 0 : index
      %c0_157 = arith.constant 0 : index
      %454 = vector.load %arg12[%c0_156, %c0_157] : memref<8x1xf32, #tpu.memory_space<vmem>>, vector<8x1xf32>
      %455 = arith.addf %454, %366 : vector<8x1xf32>
      %c0_158 = arith.constant 0 : index
      %c0_159 = arith.constant 0 : index
      %456 = vector.load %arg12[%c0_158, %c0_159] : memref<8x1xf32, #tpu.memory_space<vmem>>, vector<8x1xf32>
      tpu.vector_store %arg12[%c0_158, %c0_159], %455 {strides = array<i32>} : memref<8x1xf32, #tpu.memory_space<vmem>>, vector<8x1xf32>,
      %c0_160 = arith.constant 0 : index
      %c6 = arith.constant 6 : index
      %c0_161 = arith.constant 0 : index
      %c0_162 = arith.constant 0 : index
      %457 = vector.load %arg3[%c0_160, %c6, %c0_161, %c0_162] : memref<1x8x8x1xf32, #tpu.memory_space<vmem>>, vector<1x1x8x1xf32>
      %458 = vector.shape_cast %457 : vector<1x1x8x1xf32> to vector<8x1xf32>
      %cst_163 = arith.constant 0.000000e+00 : f32
      %459 = vector.broadcast %cst_163 : f32 to vector<8x32xf32>
      %cst_164 = arith.constant 0.000000e+00 : f32
      %460 = vector.broadcast %cst_164 : f32 to vector<8x32xf32>
      %461 = vector.extract_strided_slice %20 {offsets = [0, 6, 0], sizes = [8, 1, 1], strides = [1, 1, 1]} : vector<8x8x8xf32> to vector<8x1x1xf32>
      %462 = vector.shape_cast %461 : vector<8x1x1xf32> to vector<8x1xf32>
      %463 = vector.broadcast %462 : vector<8x1xf32> to vector<8x32xf32>
      %464 = arith.mulf %463, %64 : vector<8x32xf32>
      %465 = arith.addf %459, %464 : vector<8x32xf32>
      %466 = vector.broadcast %462 : vector<8x1xf32> to vector<8x32xf32>
      %467 = arith.mulf %466, %61 : vector<8x32xf32>
      %468 = arith.addf %460, %467 : vector<8x32xf32>
      %469 = vector.extract_strided_slice %20 {offsets = [0, 6, 1], sizes = [8, 1, 1], strides = [1, 1, 1]} : vector<8x8x8xf32> to vector<8x1x1xf32>
      %470 = vector.shape_cast %469 : vector<8x1x1xf32> to vector<8x1xf32>
      %471 = vector.broadcast %470 : vector<8x1xf32> to vector<8x32xf32>
      %472 = arith.mulf %471, %124 : vector<8x32xf32>
      %473 = arith.addf %465, %472 : vector<8x32xf32>
      %474 = vector.broadcast %470 : vector<8x1xf32> to vector<8x32xf32>
      %475 = arith.mulf %474, %121 : vector<8x32xf32>
      %476 = arith.addf %468, %475 : vector<8x32xf32>
      %477 = vector.extract_strided_slice %20 {offsets = [0, 6, 2], sizes = [8, 1, 1], strides = [1, 1, 1]} : vector<8x8x8xf32> to vector<8x1x1xf32>
      %478 = vector.shape_cast %477 : vector<8x1x1xf32> to vector<8x1xf32>
      %479 = vector.broadcast %478 : vector<8x1xf32> to vector<8x32xf32>
      %480 = arith.mulf %479, %192 : vector<8x32xf32>
      %481 = arith.addf %473, %480 : vector<8x32xf32>
      %482 = vector.broadcast %478 : vector<8x1xf32> to vector<8x32xf32>
      %483 = arith.mulf %482, %189 : vector<8x32xf32>
      %484 = arith.addf %476, %483 : vector<8x32xf32>
      %485 = vector.extract_strided_slice %20 {offsets = [0, 6, 3], sizes = [8, 1, 1], strides = [1, 1, 1]} : vector<8x8x8xf32> to vector<8x1x1xf32>
      %486 = vector.shape_cast %485 : vector<8x1x1xf32> to vector<8x1xf32>
      %487 = vector.broadcast %486 : vector<8x1xf32> to vector<8x32xf32>
      %488 = arith.mulf %487, %268 : vector<8x32xf32>
      %489 = arith.addf %481, %488 : vector<8x32xf32>
      %490 = vector.broadcast %486 : vector<8x1xf32> to vector<8x32xf32>
      %491 = arith.mulf %490, %265 : vector<8x32xf32>
      %492 = arith.addf %484, %491 : vector<8x32xf32>
      %493 = vector.extract_strided_slice %20 {offsets = [0, 6, 4], sizes = [8, 1, 1], strides = [1, 1, 1]} : vector<8x8x8xf32> to vector<8x1x1xf32>
      %494 = vector.shape_cast %493 : vector<8x1x1xf32> to vector<8x1xf32>
      %495 = vector.broadcast %494 : vector<8x1xf32> to vector<8x32xf32>
      %496 = arith.mulf %495, %352 : vector<8x32xf32>
      %497 = arith.addf %489, %496 : vector<8x32xf32>
      %498 = vector.broadcast %494 : vector<8x1xf32> to vector<8x32xf32>
      %499 = arith.mulf %498, %349 : vector<8x32xf32>
      %500 = arith.addf %492, %499 : vector<8x32xf32>
      %501 = vector.extract_strided_slice %20 {offsets = [0, 6, 5], sizes = [8, 1, 1], strides = [1, 1, 1]} : vector<8x8x8xf32> to vector<8x1x1xf32>
      %502 = vector.shape_cast %501 : vector<8x1x1xf32> to vector<8x1xf32>
      %503 = vector.broadcast %502 : vector<8x1xf32> to vector<8x32xf32>
      %504 = arith.mulf %503, %444 : vector<8x32xf32>
      %505 = arith.addf %497, %504 : vector<8x32xf32>
      %506 = vector.broadcast %502 : vector<8x1xf32> to vector<8x32xf32>
      %507 = arith.mulf %506, %441 : vector<8x32xf32>
      %508 = arith.addf %500, %507 : vector<8x32xf32>
      %509 = vector.extract_strided_slice %28 {offsets = [0, 6, 0], sizes = [8, 1, 128], strides = [1, 1, 1]} : vector<8x8x128xf32> to vector<8x1x128xf32>
      %510 = vector.shape_cast %509 : vector<8x1x128xf32> to vector<8x128xf32>
      %cst_165 = arith.constant dense<0.000000e+00> : vector<8x128xf32>
      %511 = tpu.matmul %505, %23, %cst_165 {dimension_numbers = #tpu.dot_dimension_numbers<[1], [0], [0], [1], [0, 0, 1, 1], [], []>} : vector<8x32xf32>, vector<32x128xf32>, vector<8x128xf32> -> vector<8x128xf32>
      %512 = arith.addf %510, %511 : vector<8x128xf32>
      %513 = vector.extract_strided_slice %29 {offsets = [0, 6, 0], sizes = [8, 1, 32], strides = [1, 1, 1]} : vector<8x8x32xf32> to vector<8x1x32xf32>
      %514 = vector.shape_cast %513 : vector<8x1x32xf32> to vector<8x32xf32>
      %515 = arith.addf %514, %508 : vector<8x32xf32>
      %516 = vector.extract_strided_slice %512 {offsets = [0, 0], sizes = [8, 32], strides = [1, 1]} : vector<8x128xf32> to vector<8x32xf32>
      %517 = arith.negf %516 : vector<8x32xf32>
      %518 = math.exp %517 : vector<8x32xf32>
      %cst_166 = arith.constant 1.000000e+00 : f32
      %519 = vector.broadcast %cst_166 : f32 to vector<8x32xf32>
      %520 = arith.addf %519, %518 : vector<8x32xf32>
      %521 = arith.divf %519, %520 : vector<8x32xf32>
      %522 = vector.extract_strided_slice %512 {offsets = [0, 32], sizes = [8, 32], strides = [1, 1]} : vector<8x128xf32> to vector<8x32xf32>
      %523 = arith.negf %522 : vector<8x32xf32>
      %524 = math.exp %523 : vector<8x32xf32>
      %cst_167 = arith.constant 1.000000e+00 : f32
      %525 = vector.broadcast %cst_167 : f32 to vector<8x32xf32>
      %526 = arith.addf %525, %524 : vector<8x32xf32>
      %527 = arith.divf %525, %526 : vector<8x32xf32>
      %528 = vector.extract_strided_slice %512 {offsets = [0, 64], sizes = [8, 32], strides = [1, 1]} : vector<8x128xf32> to vector<8x32xf32>
      %529 = arith.negf %528 : vector<8x32xf32>
      %530 = math.exp %529 : vector<8x32xf32>
      %cst_168 = arith.constant 1.000000e+00 : f32
      %531 = vector.broadcast %cst_168 : f32 to vector<8x32xf32>
      %532 = arith.addf %531, %530 : vector<8x32xf32>
      %533 = arith.divf %531, %532 : vector<8x32xf32>
      %534 = vector.extract_strided_slice %512 {offsets = [0, 96], sizes = [8, 32], strides = [1, 1]} : vector<8x128xf32> to vector<8x32xf32>
      %535 = math.tanh %534 : vector<8x32xf32>
      %536 = vector.shape_cast %458 : vector<8x1xf32> to vector<8x1xf32>
      %537 = vector.broadcast %536 : vector<8x1xf32> to vector<8x32xf32>
      %538 = arith.mulf %527, %515 : vector<8x32xf32>
      %539 = arith.mulf %521, %535 : vector<8x32xf32>
      %540 = arith.addf %538, %539 : vector<8x32xf32>
      %541 = arith.mulf %537, %540 : vector<8x32xf32>
      %542 = math.tanh %541 : vector<8x32xf32>
      %543 = arith.mulf %533, %542 : vector<8x32xf32>
      %544 = arith.mulf %537, %543 : vector<8x32xf32>
      %545 = vector.shape_cast %544 : vector<8x32xf32> to vector<8x1x1x32xf32>
      %c0_169 = arith.constant 0 : index
      %546 = arith.index_cast %arg0 : i32 to index
      %c6_170 = arith.constant 6 : index
      %c0_171 = arith.constant 0 : index
      %547 = vector.load %arg7[%c0_169, %546, %c6_170, %c0_171] : memref<8x2x8x32xf32, #tpu.memory_space<vmem>>, vector<8x1x1x32xf32>
      tpu.vector_store %arg7[%c0_169, %546, %c6_170, %c0_171], %545 {strides = array<i32>} : memref<8x2x8x32xf32, #tpu.memory_space<vmem>>, vector<8x1x1x32xf32>,
      %548 = vector.shape_cast %541 : vector<8x32xf32> to vector<8x1x1x32xf32>
      %c0_172 = arith.constant 0 : index
      %549 = arith.index_cast %arg0 : i32 to index
      %c6_173 = arith.constant 6 : index
      %c0_174 = arith.constant 0 : index
      %550 = vector.load %arg8[%c0_172, %549, %c6_173, %c0_174] : memref<8x2x8x32xf32, #tpu.memory_space<vmem>>, vector<8x1x1x32xf32>
      tpu.vector_store %arg8[%c0_172, %549, %c6_173, %c0_174], %548 {strides = array<i32>} : memref<8x2x8x32xf32, #tpu.memory_space<vmem>>, vector<8x1x1x32xf32>,
      %c0_175 = arith.constant 0 : index
      %c0_176 = arith.constant 0 : index
      %551 = vector.load %arg11[%c0_175, %c0_176] : memref<8x32xf32, #tpu.memory_space<vmem>>, vector<8x32xf32>
      %552 = arith.addf %551, %544 : vector<8x32xf32>
      %c0_177 = arith.constant 0 : index
      %c0_178 = arith.constant 0 : index
      %553 = vector.load %arg11[%c0_177, %c0_178] : memref<8x32xf32, #tpu.memory_space<vmem>>, vector<8x32xf32>
      tpu.vector_store %arg11[%c0_177, %c0_178], %552 {strides = array<i32>} : memref<8x32xf32, #tpu.memory_space<vmem>>, vector<8x32xf32>,
      %c0_179 = arith.constant 0 : index
      %c0_180 = arith.constant 0 : index
      %554 = vector.load %arg12[%c0_179, %c0_180] : memref<8x1xf32, #tpu.memory_space<vmem>>, vector<8x1xf32>
      %555 = arith.addf %554, %458 : vector<8x1xf32>
      %c0_181 = arith.constant 0 : index
      %c0_182 = arith.constant 0 : index
      %556 = vector.load %arg12[%c0_181, %c0_182] : memref<8x1xf32, #tpu.memory_space<vmem>>, vector<8x1xf32>
      tpu.vector_store %arg12[%c0_181, %c0_182], %555 {strides = array<i32>} : memref<8x1xf32, #tpu.memory_space<vmem>>, vector<8x1xf32>,
      %c0_183 = arith.constant 0 : index
      %c7 = arith.constant 7 : index
      %c0_184 = arith.constant 0 : index
      %c0_185 = arith.constant 0 : index
      %557 = vector.load %arg3[%c0_183, %c7, %c0_184, %c0_185] : memref<1x8x8x1xf32, #tpu.memory_space<vmem>>, vector<1x1x8x1xf32>
      %558 = vector.shape_cast %557 : vector<1x1x8x1xf32> to vector<8x1xf32>
      %cst_186 = arith.constant 0.000000e+00 : f32
      %559 = vector.broadcast %cst_186 : f32 to vector<8x32xf32>
      %cst_187 = arith.constant 0.000000e+00 : f32
      %560 = vector.broadcast %cst_187 : f32 to vector<8x32xf32>
      %561 = vector.extract_strided_slice %20 {offsets = [0, 7, 0], sizes = [8, 1, 1], strides = [1, 1, 1]} : vector<8x8x8xf32> to vector<8x1x1xf32>
      %562 = vector.shape_cast %561 : vector<8x1x1xf32> to vector<8x1xf32>
      %563 = vector.broadcast %562 : vector<8x1xf32> to vector<8x32xf32>
      %564 = arith.mulf %563, %64 : vector<8x32xf32>
      %565 = arith.addf %559, %564 : vector<8x32xf32>
      %566 = vector.broadcast %562 : vector<8x1xf32> to vector<8x32xf32>
      %567 = arith.mulf %566, %61 : vector<8x32xf32>
      %568 = arith.addf %560, %567 : vector<8x32xf32>
      %569 = vector.extract_strided_slice %20 {offsets = [0, 7, 1], sizes = [8, 1, 1], strides = [1, 1, 1]} : vector<8x8x8xf32> to vector<8x1x1xf32>
      %570 = vector.shape_cast %569 : vector<8x1x1xf32> to vector<8x1xf32>
      %571 = vector.broadcast %570 : vector<8x1xf32> to vector<8x32xf32>
      %572 = arith.mulf %571, %124 : vector<8x32xf32>
      %573 = arith.addf %565, %572 : vector<8x32xf32>
      %574 = vector.broadcast %570 : vector<8x1xf32> to vector<8x32xf32>
      %575 = arith.mulf %574, %121 : vector<8x32xf32>
      %576 = arith.addf %568, %575 : vector<8x32xf32>
      %577 = vector.extract_strided_slice %20 {offsets = [0, 7, 2], sizes = [8, 1, 1], strides = [1, 1, 1]} : vector<8x8x8xf32> to vector<8x1x1xf32>
      %578 = vector.shape_cast %577 : vector<8x1x1xf32> to vector<8x1xf32>
      %579 = vector.broadcast %578 : vector<8x1xf32> to vector<8x32xf32>
      %580 = arith.mulf %579, %192 : vector<8x32xf32>
      %581 = arith.addf %573, %580 : vector<8x32xf32>
      %582 = vector.broadcast %578 : vector<8x1xf32> to vector<8x32xf32>
      %583 = arith.mulf %582, %189 : vector<8x32xf32>
      %584 = arith.addf %576, %583 : vector<8x32xf32>
      %585 = vector.extract_strided_slice %20 {offsets = [0, 7, 3], sizes = [8, 1, 1], strides = [1, 1, 1]} : vector<8x8x8xf32> to vector<8x1x1xf32>
      %586 = vector.shape_cast %585 : vector<8x1x1xf32> to vector<8x1xf32>
      %587 = vector.broadcast %586 : vector<8x1xf32> to vector<8x32xf32>
      %588 = arith.mulf %587, %268 : vector<8x32xf32>
      %589 = arith.addf %581, %588 : vector<8x32xf32>
      %590 = vector.broadcast %586 : vector<8x1xf32> to vector<8x32xf32>
      %591 = arith.mulf %590, %265 : vector<8x32xf32>
      %592 = arith.addf %584, %591 : vector<8x32xf32>
      %593 = vector.extract_strided_slice %20 {offsets = [0, 7, 4], sizes = [8, 1, 1], strides = [1, 1, 1]} : vector<8x8x8xf32> to vector<8x1x1xf32>
      %594 = vector.shape_cast %593 : vector<8x1x1xf32> to vector<8x1xf32>
      %595 = vector.broadcast %594 : vector<8x1xf32> to vector<8x32xf32>
      %596 = arith.mulf %595, %352 : vector<8x32xf32>
      %597 = arith.addf %589, %596 : vector<8x32xf32>
      %598 = vector.broadcast %594 : vector<8x1xf32> to vector<8x32xf32>
      %599 = arith.mulf %598, %349 : vector<8x32xf32>
      %600 = arith.addf %592, %599 : vector<8x32xf32>
      %601 = vector.extract_strided_slice %20 {offsets = [0, 7, 5], sizes = [8, 1, 1], strides = [1, 1, 1]} : vector<8x8x8xf32> to vector<8x1x1xf32>
      %602 = vector.shape_cast %601 : vector<8x1x1xf32> to vector<8x1xf32>
      %603 = vector.broadcast %602 : vector<8x1xf32> to vector<8x32xf32>
      %604 = arith.mulf %603, %444 : vector<8x32xf32>
      %605 = arith.addf %597, %604 : vector<8x32xf32>
      %606 = vector.broadcast %602 : vector<8x1xf32> to vector<8x32xf32>
      %607 = arith.mulf %606, %441 : vector<8x32xf32>
      %608 = arith.addf %600, %607 : vector<8x32xf32>
      %609 = vector.extract_strided_slice %20 {offsets = [0, 7, 6], sizes = [8, 1, 1], strides = [1, 1, 1]} : vector<8x8x8xf32> to vector<8x1x1xf32>
      %610 = vector.shape_cast %609 : vector<8x1x1xf32> to vector<8x1xf32>
      %611 = vector.broadcast %610 : vector<8x1xf32> to vector<8x32xf32>
      %612 = arith.mulf %611, %544 : vector<8x32xf32>
      %613 = arith.addf %605, %612 : vector<8x32xf32>
      %614 = vector.broadcast %610 : vector<8x1xf32> to vector<8x32xf32>
      %615 = arith.mulf %614, %541 : vector<8x32xf32>
      %616 = arith.addf %608, %615 : vector<8x32xf32>
      %617 = vector.extract_strided_slice %28 {offsets = [0, 7, 0], sizes = [8, 1, 128], strides = [1, 1, 1]} : vector<8x8x128xf32> to vector<8x1x128xf32>
      %618 = vector.shape_cast %617 : vector<8x1x128xf32> to vector<8x128xf32>
      %cst_188 = arith.constant dense<0.000000e+00> : vector<8x128xf32>
      %619 = tpu.matmul %613, %23, %cst_188 {dimension_numbers = #tpu.dot_dimension_numbers<[1], [0], [0], [1], [0, 0, 1, 1], [], []>} : vector<8x32xf32>, vector<32x128xf32>, vector<8x128xf32> -> vector<8x128xf32>
      %620 = arith.addf %618, %619 : vector<8x128xf32>
      %621 = vector.extract_strided_slice %29 {offsets = [0, 7, 0], sizes = [8, 1, 32], strides = [1, 1, 1]} : vector<8x8x32xf32> to vector<8x1x32xf32>
      %622 = vector.shape_cast %621 : vector<8x1x32xf32> to vector<8x32xf32>
      %623 = arith.addf %622, %616 : vector<8x32xf32>
      %624 = vector.extract_strided_slice %620 {offsets = [0, 0], sizes = [8, 32], strides = [1, 1]} : vector<8x128xf32> to vector<8x32xf32>
      %625 = arith.negf %624 : vector<8x32xf32>
      %626 = math.exp %625 : vector<8x32xf32>
      %cst_189 = arith.constant 1.000000e+00 : f32
      %627 = vector.broadcast %cst_189 : f32 to vector<8x32xf32>
      %628 = arith.addf %627, %626 : vector<8x32xf32>
      %629 = arith.divf %627, %628 : vector<8x32xf32>
      %630 = vector.extract_strided_slice %620 {offsets = [0, 32], sizes = [8, 32], strides = [1, 1]} : vector<8x128xf32> to vector<8x32xf32>
      %631 = arith.negf %630 : vector<8x32xf32>
      %632 = math.exp %631 : vector<8x32xf32>
      %cst_190 = arith.constant 1.000000e+00 : f32
      %633 = vector.broadcast %cst_190 : f32 to vector<8x32xf32>
      %634 = arith.addf %633, %632 : vector<8x32xf32>
      %635 = arith.divf %633, %634 : vector<8x32xf32>
      %636 = vector.extract_strided_slice %620 {offsets = [0, 64], sizes = [8, 32], strides = [1, 1]} : vector<8x128xf32> to vector<8x32xf32>
      %637 = arith.negf %636 : vector<8x32xf32>
      %638 = math.exp %637 : vector<8x32xf32>
      %cst_191 = arith.constant 1.000000e+00 : f32
      %639 = vector.broadcast %cst_191 : f32 to vector<8x32xf32>
      %640 = arith.addf %639, %638 : vector<8x32xf32>
      %641 = arith.divf %639, %640 : vector<8x32xf32>
      %642 = vector.extract_strided_slice %620 {offsets = [0, 96], sizes = [8, 32], strides = [1, 1]} : vector<8x128xf32> to vector<8x32xf32>
      %643 = math.tanh %642 : vector<8x32xf32>
      %644 = vector.shape_cast %558 : vector<8x1xf32> to vector<8x1xf32>
      %645 = vector.broadcast %644 : vector<8x1xf32> to vector<8x32xf32>
      %646 = arith.mulf %635, %623 : vector<8x32xf32>
      %647 = arith.mulf %629, %643 : vector<8x32xf32>
      %648 = arith.addf %646, %647 : vector<8x32xf32>
      %649 = arith.mulf %645, %648 : vector<8x32xf32>
      %650 = math.tanh %649 : vector<8x32xf32>
      %651 = arith.mulf %641, %650 : vector<8x32xf32>
      %652 = arith.mulf %645, %651 : vector<8x32xf32>
      %653 = vector.shape_cast %652 : vector<8x32xf32> to vector<8x1x1x32xf32>
      %c0_192 = arith.constant 0 : index
      %654 = arith.index_cast %arg0 : i32 to index
      %c7_193 = arith.constant 7 : index
      %c0_194 = arith.constant 0 : index
      %655 = vector.load %arg7[%c0_192, %654, %c7_193, %c0_194] : memref<8x2x8x32xf32, #tpu.memory_space<vmem>>, vector<8x1x1x32xf32>
      tpu.vector_store %arg7[%c0_192, %654, %c7_193, %c0_194], %653 {strides = array<i32>} : memref<8x2x8x32xf32, #tpu.memory_space<vmem>>, vector<8x1x1x32xf32>,
      %656 = vector.shape_cast %649 : vector<8x32xf32> to vector<8x1x1x32xf32>
      %c0_195 = arith.constant 0 : index
      %657 = arith.index_cast %arg0 : i32 to index
      %c7_196 = arith.constant 7 : index
      %c0_197 = arith.constant 0 : index
      %658 = vector.load %arg8[%c0_195, %657, %c7_196, %c0_197] : memref<8x2x8x32xf32, #tpu.memory_space<vmem>>, vector<8x1x1x32xf32>
      tpu.vector_store %arg8[%c0_195, %657, %c7_196, %c0_197], %656 {strides = array<i32>} : memref<8x2x8x32xf32, #tpu.memory_space<vmem>>, vector<8x1x1x32xf32>,
      %c0_198 = arith.constant 0 : index
      %c0_199 = arith.constant 0 : index
      %659 = vector.load %arg11[%c0_198, %c0_199] : memref<8x32xf32, #tpu.memory_space<vmem>>, vector<8x32xf32>
      %660 = arith.addf %659, %652 : vector<8x32xf32>
      %c0_200 = arith.constant 0 : index
      %c0_201 = arith.constant 0 : index
      %661 = vector.load %arg11[%c0_200, %c0_201] : memref<8x32xf32, #tpu.memory_space<vmem>>, vector<8x32xf32>
      tpu.vector_store %arg11[%c0_200, %c0_201], %660 {strides = array<i32>} : memref<8x32xf32, #tpu.memory_space<vmem>>, vector<8x32xf32>,
      %c0_202 = arith.constant 0 : index
      %c0_203 = arith.constant 0 : index
      %662 = vector.load %arg12[%c0_202, %c0_203] : memref<8x1xf32, #tpu.memory_space<vmem>>, vector<8x1xf32>
      %663 = arith.addf %662, %558 : vector<8x1xf32>
      %c0_204 = arith.constant 0 : index
      %c0_205 = arith.constant 0 : index
      %664 = vector.load %arg12[%c0_204, %c0_205] : memref<8x1xf32, #tpu.memory_space<vmem>>, vector<8x1xf32>
      tpu.vector_store %arg12[%c0_204, %c0_205], %663 {strides = array<i32>} : memref<8x1xf32, #tpu.memory_space<vmem>>, vector<8x1xf32>,
    } else {
    }
    %c1_i32 = arith.constant 1 : i32
    %14 = arith.cmpi eq, %arg0, %c1_i32 : i32
    %c1_i32_6 = arith.constant 1 : i32
    %15 = arith.cmpi eq, %arg1, %c1_i32_6 : i32
    %16 = arith.andi %14, %15 : i1
    %17 = arith.extui %16 : i1 to i32
    %c0_i32_7 = arith.constant 0 : i32
    %18 = arith.cmpi ne, %17, %c0_i32_7 : i32
    scf.if %18 {
      %c0 = arith.constant 0 : index
      %c0_8 = arith.constant 0 : index
      %19 = vector.load %arg11[%c0, %c0_8] : memref<8x32xf32, #tpu.memory_space<vmem>>, vector<8x32xf32>
      %c0_9 = arith.constant 0 : index
      %c0_10 = arith.constant 0 : index
      %20 = vector.load %arg12[%c0_9, %c0_10] : memref<8x1xf32, #tpu.memory_space<vmem>>, vector<8x1xf32>
      %cst = arith.constant 1.000000e+00 : f32
      %21 = vector.broadcast %cst : f32 to vector<8x1xf32>
      %22 = arith.maximumf %20, %21 : vector<8x1xf32>
      %23 = vector.broadcast %22 : vector<8x1xf32> to vector<8x32xf32>
      %24 = arith.divf %19, %23 : vector<8x32xf32>
      %c0_11 = arith.constant 0 : index
      %c0_12 = arith.constant 0 : index
      %25 = vector.load %arg6[%c0_11, %c0_12] : memref<8x32xf32, #tpu.memory_space<vmem>>, vector<8x32xf32>
      tpu.vector_store %arg6[%c0_11, %c0_12], %24 {strides = array<i32>} : memref<8x32xf32, #tpu.memory_space<vmem>>, vector<8x32xf32>,
    } else {
    }
    return
  }
  func.func @transform_0(%arg0: i32, %arg1: i32) -> (i32, i32, i32, i32, i32) {
    %0 = arith.minsi %arg1, %arg0 : i32
    %c0_i32 = arith.constant 0 : i32
    %c0_i32_0 = arith.constant 0 : i32
    %c0_i32_1 = arith.constant 0 : i32
    %c0_i32_2 = arith.constant 0 : i32
    return %arg0, %0, %c0_i32, %c0_i32_0, %c0_i32_1 : i32, i32, i32, i32, i32
  }
  func.func @transform_1(%arg0: i32, %arg1: i32) -> (i32, i32, i32, i32) {
    %c0_i32 = arith.constant 0 : i32
    %c0_i32_0 = arith.constant 0 : i32
    %c0_i32_1 = arith.constant 0 : i32
    %c0_i32_2 = arith.constant 0 : i32
    return %arg0, %c0_i32, %c0_i32_0, %c0_i32_1 : i32, i32, i32, i32
  }
  func.func @transform_2(%arg0: i32, %arg1: i32) -> (i32, i32, i32, i32) {
    %c0_i32 = arith.constant 0 : i32
    %c0_i32_0 = arith.constant 0 : i32
    %c0_i32_1 = arith.constant 0 : i32
    %c0_i32_2 = arith.constant 0 : i32
    return %arg0, %c0_i32, %c0_i32_0, %c0_i32_1 : i32, i32, i32, i32
  }
  func.func @transform_3(%arg0: i32, %arg1: i32) -> (i32, i32) {
    %c0_i32 = arith.constant 0 : i32
    %c0_i32_0 = arith.constant 0 : i32
    %c0_i32_1 = arith.constant 0 : i32
    return %c0_i32, %c0_i32_0 : i32, i32
  }
  func.func @transform_4(%arg0: i32, %arg1: i32) -> (i32, i32) {
    %c0_i32 = arith.constant 0 : i32
    %c0_i32_0 = arith.constant 0 : i32
    %c0_i32_1 = arith.constant 0 : i32
    return %c0_i32, %c0_i32_0 : i32, i32
  }
}

</mosaic_0001>

<bundles_post_ra>
// kernel: tpu_custom_call.1
= control target key start
LH: loop header
LB: loop body
LE: loop exit
PB: predicated region body
PF: predicated region fallthrough
CT: control target
= control target key end

     0   :  { %s12704_s0 = inlined_call_operand.hbm [shape: f32[2,2,8,8,8], index: 0, kind: input, shape index: {}]   ;;  %s12705_s1 = inlined_call_operand.vmem [shape: f32[2,8,8,1], index: 1, kind: input, shape index: {}]   ;;  %s12706_s2 = inlined_call_operand.vmem [shape: f32[2,8,8,128], index: 2, kind: input, shape index: {}]   ;;  %s12707_s3 = inlined_call_operand.hbm [shape: f32[32,128], index: 3, kind: input, shape index: {}]   ;;  %s12708_s4 = inlined_call_operand.hbm [shape: f32[8,32], index: 4, kind: output, shape index: {}]  }
   0x1   :  { %12904 = sst [smem:[#allocation110_spill]] %s12705_s1 }
   0x2   :  { %12905 = sst [smem:[#allocation111_spill]] %s12706_s2 }
   0x3   :  { %12906 = sst [smem:[#allocation112_spill]] %s12707_s3 }
   0x4   :  { %12907 = sst [smem:[#allocation113_spill]] %s12708_s4 }
   0x5   :  { %9 = vsyncpa [#allocation9], 0 }
   0x6   :  { %11 = vsyncpa [#allocation9 + $0x1], 0 }
   0x7   :  { %12 = vsyncpa [#allocation12], 0 }
   0x8   :  { %13 = vsyncpa [#allocation10], 0  ;;  %s8616_s15 = smov 0   ;;  %s8618_s16 = smov 0  }
   0x9   :  { %s8620_s17 = smov 0   ;;  %s8622_s18 = smov 0  }
   0xa   :  { %s8624_s19 = smov 0   ;;  %s8626_s20 = smov 0  }
   0xb   :  { %s8628_s21 = smov 0   ;;  %s8630_s22 = smov 0  }
   0xc LB: > { %12908 = sst [smem:[#allocation17_spill]] %s8557_s20  ;;  %s12713_s23 = sadd.s32 4294967295, %s8565_s22   ;;  %s8565_s22 = sphi %s8630_s22, %s19_s22   ;;  %s8561_s21 = sphi %s8628_s21, %s13487_s21   ;;  %s8557_s20 = sphi %s8626_s20, %s13486_s20   ;;  %s8553_s19 = sphi %s8624_s19, %s13485_s19   ;;  %s8549_s18 = sphi %s8622_s18, %s13481_s18   ;;  %s8545_s17 = sphi %s8620_s17, %s13484_s17   ;;  %s8541_s16 = sphi %s8618_s16, %s13483_s16   ;;  %s8537_s15 = sphi %s8616_s15, %s13482_s15  }
   0xd   : > { %p57_p0 = scmp.ne.s32.totalorder %s8541_s16, %s8537_s15  ;;  %p8658_p1 = scmp.eq.s32.totalorder %s12713_s23, 0 }
   0xe   : > { %p7392_p2 = scmp.ge.s32.totalorder %s8565_s22, 1  ;;  %p162_p3 = scmp.lt.s32.totalorder %s8565_s22, 5 }
   0xf   : > { %s12909_s24 = scalar_select %p8658_p1, 1, 0 }
  0x10   : > { %p8666_p4 = por %p8658_p1, %p57_p0  ;;  %p8670_p5 = pnand %p7392_p2, %p162_p3 }
  0x11   : > { %s8567_s27 = smov [#allocation11]   ;;  %s12913_s3 = sld [smem:[#allocation112_spill]] }
  0x12   : > { %s12910_s25 = scalar_select %p8666_p4, 1, 0 }
  0x13   : > { %s12911_s26 = scalar_select %p8670_p5, 1, 0 }
  0x14   : > { %s174_s28 = sshll.u32 %s8567_s27, 4  ;;  %p7835_p6 = pneg %p8670_p5  ;;  %s175_s28 = int_to_ptr.vmem [resolvable:$true] %s174_s28 }
  0x16   : > { %p8678_p7 = pnand %p7835_p6, %p8658_p1 }
  0x17   : > { %s8407_s6 = scalar_lea.hbm %s12913_s3, 512 }
  0x18   : > { %p8408_p8 = scmp.ne.s32.totalorder %s12913_s3, %s8407_s6  ;;  %p8409_p9 = pneg %p8678_p7 }
  0x19   : > { %p8414_p12 = scmp.lt.u32.totalorder %s8407_s6, %s12913_s3 }
  0x1a   : > { %p8410_p10 = pnand %p8409_p9, %p8408_p8 }
  0x1c   : > { %p8411_p11 = pneg %p8410_p10 }
  0x1e   : > { %p8416_p13 = pnand %p8414_p12, %p8411_p11 }
  0x20   : > { %8419 = shalt.err (!%p8416_p13)
}
  0x21   : > { %s8420_s11 = scalar_lea.vmem %s175_s28, 512  ;;  %p8428_p6 = scmp.lt.s32.totalorder %s175_s28, %s175_s28 }
  0x22   : > { %p8421_p0 = scmp.ne.s32.totalorder %s175_s28, %s8420_s11  ;;  %p8429_p1 = scmp.lt.s32.totalorder %s8420_s11, %s8420_s11 }
  0x24   : > { %p8423_p2 = pnand %p8421_p0, %p8409_p9  ;;  %p8430_p4 = por %p8429_p1, %p8428_p6 }
  0x26   : > { %p8424_p3 = pneg %p8423_p2 }
  0x28   : > { %p8431_p5 = pnand %p8430_p4, %p8424_p3 }
  0x2a   : > { %8434 = shalt.err (!%p8431_p5)
}
  0x2b   : > { %s12714_s12 = smov 128   ;;  %s12715_s13 = smov 8  }
  0x2c   : > { %7838 = dma.hbm_to_vmem [thread:$0]  (!%p8678_p7), %s12913_s3, 512, %s175_s28, [#allocation12], %s12714_s12, %s12714_s12, %s12715_s13  }
  0x2d   : > { %s28_s27 = sadd.s32 1, %s8557_s20  ;;  %s31_s30 = sadd.s32 1, %s8561_s21 }
  0x2e   : > { %p29_p1 = scmp.ge.s32.totalorder %s28_s27, 2  ;;  %p35_p4 = scmp.lt.s32.totalorder %s8557_s20, %s8561_s21 }
  0x2f   : > { %s44_s5 = sadd.s32 1, %s8545_s17  ;;  %p51_p8 = scmp.ne.s32.totalorder %s8545_s17, %s8541_s16 }
  0x30   : > { %s13489_s27 = smov (%p29_p1, %s28_s27), 0  ;;  %s13491_s30 = smov (!%p29_p1, %s31_s30), %s8561_s21 }
  0x31   : > { %s36_s29 = scalar_select %p35_p4, %s8557_s20, %s8561_s21 }
  0x32   : > { %p33_p5 = scmp.ge.s32.totalorder %s13491_s30, 2  ;;  %p52_p9 = scmp.eq.s32.totalorder %s8565_s22, 0 }
  0x33   : > { %p7844_p10 = scmp.lt.s32.totalorder %s8565_s22, 4  ;;  %s188_s6 = sand.u32 1, %s8545_s17  }
  0x34   : > { %s13493_s30 = smov (%p33_p5, %s13491_s30), 0  ;;  %p8717_p7 = por %p52_p9, %p51_p8 }
  0x35   : > { %p37_p11 = scmp.lt.s32.totalorder %s13489_s27, %s13493_s30  ;;  %s39_s7 = ssub.s32 %s8561_s21, %s13493_s30 }
  0x36   : > { %s7395_s8 = sshll.u32 %s188_s6, 6  ;;  %s7396_s10 = sshll.u32 %s36_s29, 3 }
  0x37   : > { %s38_s9 = scalar_select %p37_p11, %s13489_s27, %s13493_s30 }
  0x38   : > { %s7397_s14 = sshll.u32 %s8561_s21, 4  ;;  %s192_s4 = scalar_lea.vmem [#allocation8], %s7395_s8 }
  0x39   : > { %s40_s11 = ssub.s32 %s36_s29, %s38_s9  ;;  %s200_s23 = sadd.s32 %s7397_s14, %s7396_s10 }
  0x3a   : > { %s41_s15 = sor.u32 %s40_s11, %s39_s7  ;;  %s7398_s12 = sshll.u32 %s200_s23, 7 }
  0x3b   : > { %p42_p12 = scmp.eq.s32.totalorder %s41_s15, 0  ;;  %s8732_s20 = scalar_lea.hbm %s12704_s0, %s7398_s12 }
  0x3c   : > { %s203_s2 = sshll.u32 %s192_s4, 4  ;;  %p8743_p13 = pnand %p7844_p10, %p8717_p7  ;;  %s8737_s2 = int_to_ptr.vmem [resolvable:$true] %s203_s2 }
  0x3d   : > { %s8735_s1 = scalar_select %p42_p12, %s8545_s17, %s44_s5  }
  0x3e   : > { %s8747_s3 = scalar_lea.sflag [#allocation9], %s188_s6  ;;  %s8435_s23 = scalar_lea.hbm %s8732_s20, 1024 }
  0x3f   : > { %p8436_p0 = scmp.ne.s32.totalorder %s8732_s20, %s8435_s23  ;;  %p8437_p2 = pneg %p8743_p13 }
  0x40   : > { %s8440_s13 = scalar_lea.hbm %s12704_s0, 4096  ;;  %p8441_p1 = scmp.lt.u32.totalorder %s8732_s20, %s12704_s0 }
  0x41   : > { %p8438_p3 = pnand %p8437_p2, %p8436_p0  ;;  %p8442_p4 = scmp.lt.u32.totalorder %s8440_s13, %s8435_s23 }
  0x42   : > { %p8444_p8 = scmp.lt.u32.totalorder %s8435_s23, %s8732_s20 }
  0x43   : > { %p8439_p6 = pneg %p8438_p3  ;;  %p8443_p5 = por %p8442_p4, %p8441_p1 }
  0x45   : > { %p8445_p9 = por %p8444_p8, %p8443_p5 }
  0x47   : > { %p8446_p10 = pnand %p8445_p9, %p8439_p6 }
  0x49   : > { %8449 = shalt.err (!%p8446_p10)
}
  0x4a   : > { %s8450_s6 = scalar_lea.vmem %s8737_s2, 1024  ;;  %s8570_s7 = smov [#allocation8]  }
  0x4b   : > { %p8451_p7 = scmp.ne.s32.totalorder %s8737_s2, %s8450_s6  ;;  %s8455_s8 = sshll.u32 %s8570_s7, 4  ;;  %s8456_s8 = int_to_ptr.vmem [resolvable:$false] %s8455_s8 }
  0x4c   : > { %s8457_s9 = scalar_lea.vmem %s8456_s8, 2048  ;;  %p8458_p0 = scmp.lt.s32.totalorder %s8737_s2, %s8456_s8 }
  0x4d   : > { %p8453_p11 = pnand %p8451_p7, %p8437_p2  ;;  %p8459_p3 = scmp.lt.s32.totalorder %s8457_s9, %s8450_s6 }
  0x4f   : > { %p8454_p12 = pneg %p8453_p11  ;;  %p8460_p1 = por %p8459_p3, %p8458_p0 }
  0x51   : > { %p8461_p4 = pnand %p8460_p1, %p8454_p12 }
  0x53   : > { %8464 = shalt.err (!%p8461_p4)
}
  0x54   : > { %s12916_s10 = smov 8   ;;  %s12917_s11 = smov 128  }
  0x55   : > { %7842 = dma.hbm_to_vmem [thread:$0]  (!%p8743_p13), %s8732_s20, 1024, %s8737_s2, %s8747_s3, %s12917_s11, %s12917_s11, %s12916_s10  }
  0x56   : > { %p12918_p2 = scmp.ne.s32.totalorder %s12911_s26, 0 }
  0x57   : > { %s233_s14 = sand.u32 (!%p12918_p2), 1, %s8541_s16   ;;  %p12919_p6 = scmp.ne.s32.totalorder (!%p12918_p2), %s12910_s25, 0 }
  0x58   : > { %231 = sbr.rel (%p12918_p2) target bundleno = 7613 (0x1dbd), region = 36  ;;  %s7400_s15 = sshll.u32 (!%p12918_p2), %s233_s14, 6 }
  0x59   : > { %s234_s23 = scalar_lea.sflag (!%p12918_p2), [#allocation9], %s233_s14  ;;  %s8781_s4 = scalar_lea.vmem (!%p12918_p2), [#allocation8], %s7400_s15 }
  0x5f   : > { %8524 = dma.done.wait (%p12919_p6), %s234_s23, 1024  }
  0x60   : > { %8526 = vsyncadd (%p12919_p6), %s234_s23, 4294966272  ;;  %p12920_p5 = scmp.ne.s32.totalorder %s12909_s24, 0 }
  0x62   : > { %8528 = dma.done.wait (%p12920_p5), [#allocation12], 512  }
  0x63   : > { %8530 = vsyncadd (%p12920_p5), [#allocation12], 4294966784  ;;  %p273_p13 = scmp.lt.s32.totalorder %s8553_s19, 1  ;;  %p283_p8 = scmp.eq.s32.totalorder %s8553_s19, 0 }
  0x64   : > { %p284_p9 = scmp.eq.s32.totalorder %s8549_s18, 0  ;;  %s12921_s25 = sld [smem:[#allocation110_spill]] }
  0x65   : > { %s274_s2 = scalar_select %p273_p13, %s8553_s19, 1 }
  0x66   : > { %p285_p10 = pnand %p284_p9, %p283_p8  ;;  %s12922_s5 = sld [smem:[#allocation111_spill]] }
  0x67   : > { %s7517_s20 = sshll.u32 %s274_s2, 6  ;;  %vm289_vm0 = vcmask (!%p285_p10), 261120   ;;  %vm291_vm1 = vcmask (!%p285_p10), 7168   ;;  %v8571_v0 = vmov (!%p285_p10), 0.0  }
  0x68   : > { %288 = sbr.rel (%p285_p10) target bundleno = 111 (0x6f), region = 48  ;;  %290 = vst.msk [vmem:[#allocation6] sm:$0xff] (!%p285_p10), %vm289_vm0, %v8571_v0 }
  0x69   : > { %292 = vst.msk [vmem:[#allocation7] sm:$0xff] (!%p285_p10), %vm291_vm1, %v8571_v0 }
  0x6a   : > { %s8798_s3 = scalar_lea.vmem %s12921_s25, %s7517_s20 }
  0x6c   : > { %s8803_s24 = scalar_lea.vmem %s12922_s5, %s7517_s20 }
  0x6f PF: > { %p7406_p7 = scmp.ne.s32.totalorder %s8549_s18, 0 }
  0x70   : > { %vm296_vm2 = vcmask (!%p7406_p7), 261120   ;;  %v8572_v1 = vmov (!%p7406_p7), 0.0  }
  0x71   : > { %295 = sbr.rel (%p7406_p7) target bundleno = 121 (0x79), region = 52  ;;  %297 = vst.msk [vmem:[#allocation4] sm:$0xff] (!%p7406_p7), %vm296_vm2, %v8572_v1  ;;  %298 = vst.msk [vmem:[#allocation4 + $0x8] sm:$0xff] (!%p7406_p7), %vm296_vm2, %v8572_v1 }
  0x72   : > { %299 = vst.msk [vmem:[#allocation4 + $0x10] sm:$0xff] (!%p7406_p7), %vm296_vm2, %v8572_v1  ;;  %300 = vst.msk [vmem:[#allocation4 + $0x18] sm:$0xff] (!%p7406_p7), %vm296_vm2, %v8572_v1 }
  0x73   : > { %301 = vst.msk [vmem:[#allocation4 + $0x20] sm:$0xff] (!%p7406_p7), %vm296_vm2, %v8572_v1  ;;  %302 = vst.msk [vmem:[#allocation4 + $0x28] sm:$0xff] (!%p7406_p7), %vm296_vm2, %v8572_v1 }
  0x74   : > { %303 = vst.msk [vmem:[#allocation4 + $0x30] sm:$0xff] (!%p7406_p7), %vm296_vm2, %v8572_v1  ;;  %304 = vst.msk [vmem:[#allocation4 + $0x38] sm:$0xff] (!%p7406_p7), %vm296_vm2, %v8572_v1 }
  0x75   : > { %305 = vst.msk [vmem:[#allocation5] sm:$0xff] (!%p7406_p7), %vm296_vm2, %v8572_v1  ;;  %306 = vst.msk [vmem:[#allocation5 + $0x8] sm:$0xff] (!%p7406_p7), %vm296_vm2, %v8572_v1 }
  0x76   : > { %307 = vst.msk [vmem:[#allocation5 + $0x10] sm:$0xff] (!%p7406_p7), %vm296_vm2, %v8572_v1  ;;  %308 = vst.msk [vmem:[#allocation5 + $0x18] sm:$0xff] (!%p7406_p7), %vm296_vm2, %v8572_v1 }
  0x77   : > { %309 = vst.msk [vmem:[#allocation5 + $0x20] sm:$0xff] (!%p7406_p7), %vm296_vm2, %v8572_v1  ;;  %310 = vst.msk [vmem:[#allocation5 + $0x28] sm:$0xff] (!%p7406_p7), %vm296_vm2, %v8572_v1 }
  0x78   : > { %311 = vst.msk [vmem:[#allocation5 + $0x30] sm:$0xff] %vm296_vm2, %v8572_v1  ;;  %312 = vst.msk [vmem:[#allocation5 + $0x38] sm:$0xff] %vm296_vm2, %v8572_v1 }
  0x79 PF: > { %p7407_p11 = scmp.ge.s32.totalorder %s8549_s18, %s8553_s19 }
  0x7a   : > { %s7408_s28 = sshll.u32 (!%p7407_p11), %s8549_s18, 3  ;;  %v8573_v2 = vmov (!%p7407_p11), 0.0   ;;  %v317_v3 = vld [vmem:[%s8781_s4] sm:$0xff] (!%p7407_p11)  ;;  %vm352_vm3 = vcmask (!%p7407_p11), 64512   ;;  %v318_v4 = vld [vmem:[%s8781_s4 + $0x8] sm:$0xff] (!%p7407_p11)  ;;  %vm8574_vm4 = vmmov (!%p7407_p11), 0  }
  0x7b   : > { %316 = sbr.rel (%p7407_p11) target bundleno = 369 (0x171), region = 56  ;;  %7598 = vmatprep.subr.mxu0 (!%p7407_p11), %v8573_v2  ;;  %7603 = vmatprep.subr.mxu1 (!%p7407_p11), %v8573_v2  ;;  %s8831_s6 = scalar_lea.vmem (!%p7407_p11), [#allocation2], %s7408_s28  ;;  %v319_v9 = vld [vmem:[%s8781_s4 + $0x10] sm:$0xff] (!%p7407_p11)  ;;  %v320_v10 = vld [vmem:[%s8781_s4 + $0x18] sm:$0xff] (!%p7407_p11)  ;;  %v321_v13 = vld [vmem:[%s8781_s4 + $0x20] sm:$0xff] (!%p7407_p11)  ;;  %vm945_vm5 = vcmask (!%p7407_p11), 261120  }
  0x7c   : > { %v327_v5 = vld [vmem:[%s8831_s6] sm:$0xff] (!%p7407_p11)  ;;  %7600 = vmatprep.mubr.msk.f32.mxu0 (!%p7407_p11), %vm8574_vm4, %v8573_v2  ;;  %v328_v6 = vld [vmem:[%s8831_s6 + $0x10] sm:$0xff] (!%p7407_p11)  ;;  %7605 = vmatprep.mubr.msk.f32.mxu1 (!%p7407_p11), %vm8574_vm4, %v8573_v2  ;;  %v322_v14 = vld [vmem:[%s8781_s4 + $0x28] sm:$0xff] (!%p7407_p11)  ;;  %s8877_s7 = scalar_lea.vmem (!%p7407_p11), [#allocation3], %s7408_s28 }
  0x7d   : > { %7599 = vmatpush3.msra.mxu0 (!%p7407_p11), %v327_v5  ;;  %7604 = vmatpush3.msra.mxu1 (!%p7407_p11), %v328_v6  ;;  %v329_v7 = vld [vmem:[%s8831_s6 + $0x20] sm:$0xff] (!%p7407_p11)  ;;  %v330_v8 = vld [vmem:[%s8831_s6 + $0x30] sm:$0xff] (!%p7407_p11)  ;;  %v324_v18 = vld [vmem:[%s8781_s4 + $0x38] sm:$0xff] (!%p7407_p11) }
  0x7e   : > { %7601 = vmatmul.mubr.msk.f32.vlgmr.msra.gmra.mrb[0].mxu0 (!%p7407_p11), %vm352_vm3, %v317_v3  ;;  %7606 = vmatmul.mubr.msk.f32.vlgmr.msra.gmra.mrb[0].mxu1 (!%p7407_p11), %vm352_vm3, %v318_v4  ;;  %v331_v11 = vld [vmem:[%s8831_s6 + $0x40] sm:$0xff] (!%p7407_p11)  ;;  %v332_v12 = vld [vmem:[%s8831_s6 + $0x50] sm:$0xff] (!%p7407_p11)  ;;  %v345_v28 = vld [vmem:[#allocation4 + $0x8] sm:$0xff] (!%p7407_p11) }
  0x7f   : > { %7608 = vmatprep.subr.mxu0 (!%p7407_p11), %v8573_v2  ;;  %7613 = vmatprep.subr.mxu1 (!%p7407_p11), %v8573_v2  ;;  %v333_v15 = vld [vmem:[%s8831_s6 + $0x60] sm:$0xff] (!%p7407_p11)  ;;  %v334_v16 = vld [vmem:[%s8831_s6 + $0x70] sm:$0xff] (!%p7407_p11)  ;;  %v347_v36 = vld [vmem:[#allocation4 + $0x18] sm:$0xff] (!%p7407_p11) }
  0x80   : > { %7609 = vmatpush3.msra.mxu0 (!%p7407_p11), %v329_v7  ;;  %7614 = vmatpush3.msra.mxu1 (!%p7407_p11), %v330_v8  ;;  %v323_v17 = vld [vmem:[%s8781_s4 + $0x30] sm:$0xff] (!%p7407_p11)  ;;  %v337_v20 = vld [vmem:[%s8877_s7 + $0x10] sm:$0xff] (!%p7407_p11)  ;;  %v349_v44 = vld [vmem:[#allocation4 + $0x28] sm:$0xff] (!%p7407_p11) }
  0x81   : > { %7610 = vmatprep.mubr.msk.f32.mxu0 (!%p7407_p11), %vm8574_vm4, %v8573_v2  ;;  %7615 = vmatprep.mubr.msk.f32.mxu1 (!%p7407_p11), %vm8574_vm4, %v8573_v2  ;;  %v336_v19 = vld [vmem:[%s8877_s7] sm:$0xff] (!%p7407_p11)  ;;  %v339_v22 = vld [vmem:[%s8877_s7 + $0x30] sm:$0xff] (!%p7407_p11)  ;;  %v351_v52 = vld [vmem:[#allocation4 + $0x38] sm:$0xff] (!%p7407_p11) }
  0x82   : > { %7611 = vmatmul.mubr.msk.f32.vlgmr.msra.gmra.mrb[2].mxu0 %vm352_vm3, %v319_v9  ;;  %7616 = vmatmul.mubr.msk.f32.vlgmr.msra.gmra.mrb[2].mxu1 %vm352_vm3, %v320_v10  ;;  %v338_v21 = vld [vmem:[%s8877_s7 + $0x20] sm:$0xff]  ;;  %v341_v24 = vld [vmem:[%s8877_s7 + $0x50] sm:$0xff]  ;;  %v955_v60 = vld [vmem:[#allocation5 + $0x8] sm:$0xff] }
  0x83   : > { %7618 = vmatprep.subr.mxu0 %v8573_v2  ;;  %7623 = vmatprep.subr.mxu1 %v8573_v2  ;;  %v340_v23 = vld [vmem:[%s8877_s7 + $0x40] sm:$0xff]  ;;  %v343_v26 = vld [vmem:[%s8877_s7 + $0x70] sm:$0xff] }
  0x84   : > { %7619 = vmatpush3.msra.mxu0 %v331_v11  ;;  %7624 = vmatpush3.msra.mxu1 %v332_v12  ;;  %v342_v25 = vld [vmem:[%s8877_s7 + $0x60] sm:$0xff]  ;;  %v346_v35 = vld [vmem:[#allocation4 + $0x10] sm:$0xff]  ;;  %v959_v12 = vld [vmem:[#allocation5 + $0x28] sm:$0xff] }
  0x85   : > { %7620 = vmatprep.mubr.msk.f32.mxu0 %vm8574_vm4, %v8573_v2  ;;  %7625 = vmatprep.mubr.msk.f32.mxu1 %vm8574_vm4, %v8573_v2  ;;  %v344_v27 = vld [vmem:[#allocation4] sm:$0xff]  ;;  %v350_v51 = vld [vmem:[#allocation4 + $0x30] sm:$0xff] }
  0x86   : > { %7621 = vmatmul.mubr.msk.f32.vlgmr.msra.gmra.mrb[4].mxu0 %vm352_vm3, %v321_v13  ;;  %7626 = vmatmul.mubr.msk.f32.vlgmr.msra.gmra.mrb[4].mxu1 %vm352_vm3, %v322_v14  ;;  %v348_v43 = vld [vmem:[#allocation4 + $0x20] sm:$0xff] }
  0x87   : > { %7628 = vmatprep.subr.mxu0 %v8573_v2  ;;  %7633 = vmatprep.subr.mxu1 %v8573_v2  ;;  %v954_v59 = vld [vmem:[#allocation5] sm:$0xff] }
  0x88   : > { %7629 = vmatpush3.msra.mxu0 %v333_v15  ;;  %7634 = vmatpush3.msra.mxu1 %v334_v16  ;;  %v958_v11 = vld [vmem:[#allocation5 + $0x20] sm:$0xff] }
  0x89   : > { %7630 = vmatprep.mubr.msk.f32.mxu0 %vm8574_vm4, %v8573_v2  ;;  %7635 = vmatprep.mubr.msk.f32.mxu1 %vm8574_vm4, %v8573_v2 }
  0x8a   : > { %7631 = vmatmul.mubr.msk.f32.vlgmr.msra.gmra.mrb[6].mxu0 %vm352_vm3, %v323_v17  ;;  %7636 = vmatmul.mubr.msk.f32.vlgmr.msra.gmra.mrb[6].mxu1 %vm352_vm3, %v324_v18 }
  0x8b   : > { %7638 = vmatprep.subr.mxu0 %v8573_v2  ;;  %7643 = vmatprep.subr.mxu1 %v8573_v2 }
  0x8c   : > { %7639 = vmatpush3.msra.mxu0 %v336_v19  ;;  %7644 = vmatpush3.msra.mxu1 %v337_v20  ;;  %v960_v19 = vld [vmem:[#allocation5 + $0x30] sm:$0xff]  ;;  %v961_v20 = vld [vmem:[#allocation5 + $0x38] sm:$0xff] }
  0x8d   : > { %7640 = vmatprep.mubr.msk.f32.mxu0 %vm8574_vm4, %v8573_v2  ;;  %7645 = vmatprep.mubr.msk.f32.mxu1 %vm8574_vm4, %v8573_v2 }
  0x8e   : > { %7641 = vmatmul.mubr.msk.f32.vlgmr.msra.gmra.mrb[8].mxu0 %vm352_vm3, %v317_v3  ;;  %7646 = vmatmul.mubr.msk.f32.vlgmr.msra.gmra.mrb[8].mxu1 %vm352_vm3, %v318_v4  ;;  %v956_v3 = vld [vmem:[#allocation5 + $0x10] sm:$0xff]  ;;  %v957_v4 = vld [vmem:[#allocation5 + $0x18] sm:$0xff] }
  0x8f   : > { %7648 = vmatprep.subr.mxu0 %v8573_v2  ;;  %7653 = vmatprep.subr.mxu1 %v8573_v2 }
  0x90   : > { %7649 = vmatpush3.msra.mxu0 %v338_v21  ;;  %7654 = vmatpush3.msra.mxu1 %v339_v22 }
  0x91   : > { %7650 = vmatprep.mubr.msk.f32.mxu0 %vm8574_vm4, %v8573_v2  ;;  %7655 = vmatprep.mubr.msk.f32.mxu1 %vm8574_vm4, %v8573_v2 }
  0x92   : > { %7651 = vmatmul.mubr.msk.f32.vlgmr.msra.gmra.mrb[10].mxu0 %vm352_vm3, %v319_v9  ;;  %7656 = vmatmul.mubr.msk.f32.vlgmr.msra.gmra.mrb[10].mxu1 %vm352_vm3, %v320_v10 }
  0x93   : > { %7658 = vmatprep.subr.mxu0 %v8573_v2  ;;  %7663 = vmatprep.subr.mxu1 %v8573_v2 }
  0x94   : > { %7659 = vmatpush3.msra.mxu0 %v340_v23  ;;  %7664 = vmatpush3.msra.mxu1 %v341_v24 }
  0x95   : > { %7660 = vmatprep.mubr.msk.f32.mxu0 %vm8574_vm4, %v8573_v2  ;;  %7665 = vmatprep.mubr.msk.f32.mxu1 %vm8574_vm4, %v8573_v2 }
  0x96   : > { %7661 = vmatmul.mubr.msk.f32.vlgmr.msra.gmra.mrb[12].mxu0 %vm352_vm3, %v321_v13  ;;  %7666 = vmatmul.mubr.msk.f32.vlgmr.msra.gmra.mrb[12].mxu1 %vm352_vm3, %v322_v14 }
  0x97   : > { %7668 = vmatprep.subr.mxu0 %v8573_v2  ;;  %7673 = vmatprep.subr.mxu1 %v8573_v2 }
  0x98   : > { %7669 = vmatpush3.msra.mxu0 %v342_v25  ;;  %7674 = vmatpush3.msra.mxu1 %v343_v26 }
  0x99   : > { %7670 = vmatprep.mubr.msk.f32.mxu0 %vm8574_vm4, %v8573_v2  ;;  %7675 = vmatprep.mubr.msk.f32.mxu1 %vm8574_vm4, %v8573_v2 }
  0x9a   : > { %7671 = vmatmul.mubr.msk.f32.vlgmr.msra.gmra.mrb[14].mxu0 %vm352_vm3, %v323_v17  ;;  %7676 = vmatmul.mubr.msk.f32.vlgmr.msra.gmra.mrb[14].mxu1 %vm352_vm3, %v324_v18 }
 0x151   : > { %v422_v29 = vpop.f32.mrb[0].mxu0  ;;  %v495_v30 = vpop.f32.mrb[0].mxu1 }
 0x152   : > { %v937_v31 = vadd.f32 %v422_v29, %v344_v27  ;;  %v938_v32 = vadd.f32 %v495_v30, %v345_v28  ;;  %v7602_v33 = vpop.f32.mrb[1].mxu0  ;;  %v7607_v34 = vpop.f32.mrb[1].mxu1 }
 0x154   : > { %946 = vst.msk [vmem:[#allocation4] sm:$0xff] %vm945_vm5, %v937_v31  ;;  %947 = vst.msk [vmem:[#allocation4 + $0x8] sm:$0xff] %vm945_vm5, %v938_v32 }
 0x155   : > { %v568_v37 = vpop.f32.mrb[2].mxu0  ;;  %v641_v38 = vpop.f32.mrb[2].mxu1 }
 0x156   : > { %v939_v39 = vadd.f32 %v568_v37, %v346_v35  ;;  %v940_v40 = vadd.f32 %v641_v38, %v347_v36  ;;  %v7612_v41 = vpop.f32.mrb[3].mxu0  ;;  %v7617_v42 = vpop.f32.mrb[3].mxu1 }
 0x158   : > { %948 = vst.msk [vmem:[#allocation4 + $0x10] sm:$0xff] %vm945_vm5, %v939_v39  ;;  %949 = vst.msk [vmem:[#allocation4 + $0x18] sm:$0xff] %vm945_vm5, %v940_v40 }
 0x159   : > { %v714_v45 = vpop.f32.mrb[4].mxu0  ;;  %v787_v46 = vpop.f32.mrb[4].mxu1 }
 0x15a   : > { %v941_v47 = vadd.f32 %v714_v45, %v348_v43  ;;  %v942_v48 = vadd.f32 %v787_v46, %v349_v44  ;;  %v7622_v49 = vpop.f32.mrb[5].mxu0  ;;  %v7627_v50 = vpop.f32.mrb[5].mxu1 }
 0x15c   : > { %950 = vst.msk [vmem:[#allocation4 + $0x20] sm:$0xff] %vm945_vm5, %v941_v47  ;;  %951 = vst.msk [vmem:[#allocation4 + $0x28] sm:$0xff] %vm945_vm5, %v942_v48 }
 0x15d   : > { %v860_v53 = vpop.f32.mrb[6].mxu0  ;;  %v933_v54 = vpop.f32.mrb[6].mxu1 }
 0x15e   : > { %v943_v55 = vadd.f32 %v860_v53, %v350_v51  ;;  %v944_v56 = vadd.f32 %v933_v54, %v351_v52  ;;  %v7632_v57 = vpop.f32.mrb[7].mxu0  ;;  %v7637_v58 = vpop.f32.mrb[7].mxu1 }
 0x160   : > { %952 = vst.msk [vmem:[#allocation4 + $0x30] sm:$0xff] %vm945_vm5, %v943_v55  ;;  %953 = vst.msk [vmem:[#allocation4 + $0x38] sm:$0xff] %vm945_vm5, %v944_v56 }
 0x161   : > { %v1028_v61 = vpop.f32.mrb[8].mxu0  ;;  %v1098_v62 = vpop.f32.mrb[8].mxu1 }
 0x162   : > { %v1522_v63 = vadd.f32 %v1028_v61, %v954_v59  ;;  %v1523_v0 = vadd.f32 %v1098_v62, %v955_v60  ;;  %v7642_v1 = vpop.f32.mrb[9].mxu0  ;;  %v7647_v2 = vpop.f32.mrb[9].mxu1 }
 0x164   : > { %1530 = vst.msk [vmem:[#allocation5] sm:$0xff] %vm945_vm5, %v1522_v63  ;;  %1531 = vst.msk [vmem:[#allocation5 + $0x8] sm:$0xff] %vm945_vm5, %v1523_v0 }
 0x165   : > { %v1168_v5 = vpop.f32.mrb[10].mxu0  ;;  %v1238_v6 = vpop.f32.mrb[10].mxu1 }
 0x166   : > { %v1524_v7 = vadd.f32 %v1168_v5, %v956_v3  ;;  %v1525_v8 = vadd.f32 %v1238_v6, %v957_v4  ;;  %v7652_v9 = vpop.f32.mrb[11].mxu0  ;;  %v7657_v10 = vpop.f32.mrb[11].mxu1 }
 0x168   : > { %1532 = vst.msk [vmem:[#allocation5 + $0x10] sm:$0xff] %vm945_vm5, %v1524_v7  ;;  %1533 = vst.msk [vmem:[#allocation5 + $0x18] sm:$0xff] %vm945_vm5, %v1525_v8 }
 0x169   : > { %v1308_v13 = vpop.f32.mrb[12].mxu0  ;;  %v1378_v14 = vpop.f32.mrb[12].mxu1 }
 0x16a   : > { %v1526_v15 = vadd.f32 %v1308_v13, %v958_v11  ;;  %v1527_v16 = vadd.f32 %v1378_v14, %v959_v12  ;;  %v7662_v17 = vpop.f32.mrb[13].mxu0  ;;  %v7667_v18 = vpop.f32.mrb[13].mxu1 }
 0x16c   : > { %1534 = vst.msk [vmem:[#allocation5 + $0x20] sm:$0xff] %vm945_vm5, %v1526_v15  ;;  %1535 = vst.msk [vmem:[#allocation5 + $0x28] sm:$0xff] %vm945_vm5, %v1527_v16 }
 0x16d   : > { %v1448_v21 = vpop.f32.mrb[14].mxu0  ;;  %v1518_v22 = vpop.f32.mrb[14].mxu1 }
 0x16e   : > { %v1528_v23 = vadd.f32 %v1448_v21, %v960_v19  ;;  %v1529_v24 = vadd.f32 %v1518_v22, %v961_v20  ;;  %v7672_v25 = vpop.f32.mrb[15].mxu0  ;;  %v7677_v26 = vpop.f32.mrb[15].mxu1 }
 0x170   : > { %1536 = vst.msk [vmem:[#allocation5 + $0x30] sm:$0xff] %vm945_vm5, %v1528_v23  ;;  %1537 = vst.msk [vmem:[#allocation5 + $0x38] sm:$0xff] %vm945_vm5, %v1529_v24 }
 0x171 PF: > { %p7425_p12 = scmp.ne.s32.totalorder %s8549_s18, %s8553_s19 }
 0x173   : > { %1541 = sbr.rel (%p7425_p12) target bundleno = 7434 (0x1d0a), region = 60 }
 0x17a   : > { %v1558_v27 = vld [vmem:[#allocation11] sm:$0xff]  ;;  %v1559_v28 = vld [vmem:[#allocation11 + $0x8] sm:$0xff]  ;;  %v1560_v29 = vld [vmem:[#allocation11 + $0x10] sm:$0xff]  ;;  %vm1570_vm6 = vcmask 261120   ;;  %s8575_s8 = smov 32   ;;  %vm2139_vm7 = vcmask 7168  }
 0x17b   : > { %v8939_v30 = vpack.c.bf16 %v1559_v28, %v1558_v27  ;;  %v1561_v31 = vld [vmem:[#allocation11 + $0x18] sm:$0xff]  ;;  %v1562_v32 = vld [vmem:[#allocation4] sm:$0xff]  ;;  %v1564_v35 = vld [vmem:[#allocation4 + $0x10] sm:$0xff]  ;;  %vm1907_vm8 = vcmask 1041409   ;;  %vm1910_vm9 = vcmask 1042434   ;;  %vm1913_vm10 = vcmask 1043459  }
 0x17c   : > { %v8941_v33 = vpack.c.bf16 %v1561_v31, %v1560_v29  ;;  %7686 = vmatprep.mubr.msk.f32.mxu0 %vm1570_vm6, %v1562_v32  ;;  %v1563_v34 = vld [vmem:[#allocation4 + $0x8] sm:$0xff]  ;;  %v1565_v36 = vld [vmem:[#allocation4 + $0x18] sm:$0xff]  ;;  %v1566_v37 = vld [vmem:[#allocation4 + $0x20] sm:$0xff]  ;;  %vm1916_vm11 = vcmask 1044484   ;;  %vm1919_vm12 = vcmask 1045509   ;;  %vm1922_vm13 = vcmask 1046534  }
 0x17d   : > { %12923 = vst [vmem:[#allocation18_spill] sm:$0xff] %v8939_v30  ;;  %7776 = vmatprep.subr.bf16.mxu0 %v8939_v30  ;;  %v1567_v38 = vld [vmem:[#allocation4 + $0x28] sm:$0xff]  ;;  %v1568_v39 = vld [vmem:[#allocation4 + $0x30] sm:$0xff]  ;;  %v1569_v40 = vld [vmem:[#allocation4 + $0x38] sm:$0xff]  ;;  %vm1925_vm14 = vcmask 1047559   ;;  %s8577_s9 = smov 96  }
 0x17e   : > { %12924 = vst [vmem:[#allocation19_spill] sm:$0xff] %v8941_v33  ;;  %7778 = vmatpush3.bf16.msra.mxu0 %v8939_v30  ;;  %v1551_v41 = vld [vmem:[%s8803_s24 + $0x8] sm:$0xff]  ;;  %v1550_v42 = vld [vmem:[%s8803_s24] sm:$0xff]  ;;  %v1553_v47 = vld [vmem:[%s8803_s24 + $0x18] sm:$0xff]  ;;  %s7442_s10 = sshll.u32 %s8553_s19, 3  ;;  %vm2058_vm15 = vcmask 253952  }
 0x17f   : > { %7780 = vmatprep.subr.bf16.mxu0 %v8941_v33  ;;  %v1552_v48 = vld [vmem:[%s8803_s24 + $0x10] sm:$0xff]  ;;  %v1555_v53 = vld [vmem:[%s8803_s24 + $0x28] sm:$0xff]  ;;  %v1554_v54 = vld [vmem:[%s8803_s24 + $0x20] sm:$0xff]  ;;  %s9106_s11 = scalar_lea.vmem [#allocation3], %s7442_s10  ;;  %s8579_s14 = smov 64   ;;  %vm8581_vm0 = vmmov 0  }
 0x180   : > { %v1557_v59 = vld [vmem:[%s8803_s24 + $0x38] sm:$0xff]  ;;  %v1556_v60 = vld [vmem:[%s8803_s24 + $0x30] sm:$0xff]  ;;  %v8995_v9 = vld [vmem:[#allocation5 + $0x8] sm:$0xff]  ;;  %s9238_s15 = scalar_lea.vmem [#allocation2], %s7442_s10 }
 0x181   : > { %v8997_v10 = vld [vmem:[#allocation5 + $0x10] sm:$0xff]  ;;  %v9003_v11 = vld [vmem:[#allocation5] sm:$0xff]  ;;  %v9005_v12 = vld [vmem:[#allocation5 + $0x18] sm:$0xff] }
 0x182   : > { %7782 = vmatpush3.bf16.msra.mxu0 %v8941_v33  ;;  %v9011_v13 = vld [vmem:[#allocation5 + $0x30] sm:$0xff]  ;;  %v9013_v14 = vld [vmem:[#allocation5 + $0x20] sm:$0xff]  ;;  %v9019_v15 = vld [vmem:[#allocation5 + $0x38] sm:$0xff] }
 0x183   : > { %v9021_v16 = vld [vmem:[#allocation5 + $0x28] sm:$0xff] }
 0x185   : > { %7687 = vmatmul.mubr.msk.f32.vlgmr.msra.gmra.mrb[0].mxu0 %vm1570_vm6, %v1563_v34 }
 0x186   : > { %7689 = vmatprep.mubr.msk.f32.mxu0 %vm1570_vm6, %v1564_v35 }
 0x189   : > { %7690 = vmatmul.mubr.msk.f32.gmra.mrb[2].mxu0 %vm1570_vm6, %v1565_v36 }
 0x18a   : > { %7692 = vmatprep.mubr.msk.f32.mxu0 %vm1570_vm6, %v1566_v37 }
 0x18d   : > { %7693 = vmatmul.mubr.msk.f32.gmra.mrb[4].mxu0 %vm1570_vm6, %v1567_v38 }
 0x18e   : > { %7695 = vmatprep.mubr.msk.f32.mxu0 %vm1570_vm6, %v1568_v39 }
 0x191   : > { %7696 = vmatmul.mubr.msk.f32.gmra.mrb[6].mxu0 %vm1570_vm6, %v1569_v40  ;;  %v12722_v40 = vmov 0  }
 0x192   : > { %7935 = vset.pattern.permute.xlu0 %v12722_v40  ;;  %7936 = vset.pattern.permute.xlu1 %v12722_v40 }
 0x258   : > { %v7688_v43 = vpop.f32.mrb[0].mxu0 }
 0x259   : > { %v8957_v44 = vadd.f32 %v7688_v43, %v1551_v41  ;;  %v1661_v45 = vpop.f32.mrb[1].mxu0 }
 0x25a   : > { %v8959_v46 = vadd.f32 %v1661_v45, %v1550_v42 }
 0x25b   : > { %12925 = vst [vmem:[#allocation20_spill] sm:$0xff] %v8957_v44  ;;  %7956 = vtanh.f32 %v8957_v44  ;;  %v7435_v17 = vmul.f32 -1.442695, %v8957_v44 }
 0x25c   : > { %12926 = vst [vmem:[#allocation21_spill] sm:$0xff] %v8959_v46  ;;  %v7691_v49 = vpop.f32.mrb[2].mxu0  ;;  %7958 = vtanh.f32 %v8959_v46  ;;  %v7434_v18 = vmul.f32 -1.442695, %v8959_v46 }
 0x25d   : > { %v8965_v50 = vadd.f32 %v7691_v49, %v1553_v47  ;;  %v1671_v51 = vpop.f32.mrb[3].mxu0  ;;  %v1716_v49 = vld [vmem:[%s8798_s3] sm:$0xff] }
 0x25e   : > { %v8967_v52 = vadd.f32 %v1671_v51, %v1552_v48  ;;  %v2137_v51 = vld [vmem:[#allocation7] sm:$0xff] }
 0x25f   : > { %12927 = vst [vmem:[#allocation22_spill] sm:$0xff] %v8965_v50  ;;  %7960 = vtanh.f32 %v8965_v50  ;;  %v7437_v19 = vmul.f32 -1.442695, %v8965_v50 }
 0x260   : > { %12928 = vst [vmem:[#allocation23_spill] sm:$0xff] %v8967_v52  ;;  %v7694_v55 = vpop.f32.mrb[4].mxu0  ;;  %7962 = vtanh.f32 %v8967_v52  ;;  %v7436_v20 = vmul.f32 -1.442695, %v8967_v52 }
 0x261   : > { %v8973_v56 = vadd.f32 %v7694_v55, %v1555_v53  ;;  %v1681_v57 = vpop.f32.mrb[5].mxu0 }
 0x262   : > { %v8975_v58 = vadd.f32 %v1681_v57, %v1554_v54  ;;  %v2138_v54 = vadd.f32 %v2137_v51, %v1716_v49 }
 0x263   : > { %12929 = vst [vmem:[#allocation24_spill] sm:$0xff] %v8973_v56  ;;  %7964 = vtanh.f32 %v8973_v56  ;;  %v7439_v21 = vmul.f32 -1.442695, %v8973_v56 }
 0x264   : > { %12930 = vst [vmem:[#allocation25_spill] sm:$0xff] %v8975_v58  ;;  %v7697_v61 = vpop.f32.mrb[6].mxu0  ;;  %7966 = vtanh.f32 %v8975_v58  ;;  %v7438_v22 = vmul.f32 -1.442695, %v8975_v58  ;;  %2140 = vst.msk [vmem:[#allocation7] sm:$0xff] %vm2139_vm7, %v2138_v54 }
 0x265   : > { %v7957_v62 = vpop.eup %7956  ;;  %v8981_v63 = vadd.f32 %v7697_v61, %v1557_v59  ;;  %v1691_v0 = vpop.f32.mrb[7].mxu0 }
 0x266   : > { %v7959_v1 = vpop.eup %7958  ;;  %v8983_v2 = vadd.f32 %v1691_v0, %v1556_v60  ;;  %1828 = vrot.lane.b32.xlu0 %v7957_v62, %s8575_s8 }
 0x267   : > { %12931 = vst [vmem:[#allocation26_spill] sm:$0xff] %v8981_v63  ;;  %1826 = vrot.lane.b32.xlu1 %v7959_v1, %s8575_s8  ;;  %7968 = vtanh.f32 %v8981_v63  ;;  %v7441_v25 = vmul.f32 -1.442695, %v8981_v63 }
 0x268   : > { %12932 = vst [vmem:[#allocation27_spill] sm:$0xff] %v8983_v2  ;;  %7970 = vtanh.f32 %v8983_v2  ;;  %v7440_v23 = vmul.f32 -1.442695, %v8983_v2 }
 0x269   : > { %v7961_v3 = vpop.eup %7960  ;;  %7972 = vpow2.f32 %v7435_v17 }
 0x26a   : > { %v7963_v4 = vpop.eup %7962  ;;  %7974 = vpow2.f32 %v7434_v18 }
 0x26b   : > { %1830 = vrot.lane.b32.xlu0 %v7963_v4, %s8575_s8  ;;  %1832 = vrot.lane.b32.xlu1 %v7961_v3, %s8575_s8  ;;  %7976 = vpow2.f32 %v7437_v19 }
 0x26c   : > { %7978 = vpow2.f32 %v7436_v20 }
 0x26d   : > { %v7965_v5 = vpop.eup %7964  ;;  %7980 = vpow2.f32 %v7439_v21 }
 0x26e   : > { %v7967_v6 = vpop.eup %7966  ;;  %7982 = vpow2.f32 %v7438_v22 }
 0x26f   : > { %1834 = vrot.lane.b32.xlu0 %v7967_v6, %s8575_s8  ;;  %1836 = vrot.lane.b32.xlu1 %v7965_v5, %s8575_s8  ;;  %7984 = vpow2.f32 %v7440_v23 }
 0x270   : > { %7986 = vpow2.f32 %v7441_v25 }
 0x271   : > { %v7969_v7 = vpop.eup %7968 }
 0x272   : > { %v7971_v8 = vpop.eup %7970 }
 0x273   : > { %1838 = vrot.lane.b32.xlu0 %v7971_v8, %s8575_s8  ;;  %1840 = vrot.lane.b32.xlu1 %v7969_v7, %s8575_s8  ;;  %v7973_v24 = vpop.eup %7972 }
 0x274   : > { %v1742_v26 = vadd.f32 1.0, %v7973_v24  ;;  %v7975_v27 = vpop.eup %7974 }
 0x275   : > { %v7977_v28 = vpop.eup %7976  ;;  %v1741_v29 = vadd.f32 1.0, %v7975_v27 }
 0x276   : > { %7988 = vrcp.f32 %v1742_v26  ;;  %v7979_v31 = vpop.eup %7978  ;;  %v1744_v32 = vadd.f32 1.0, %v7977_v28 }
 0x277   : > { %1788 = vrot.lane.b32.xlu0 %v8995_v9, %s8575_s8  ;;  %1790 = vrot.lane.b32.xlu1 %v8997_v10, %s8575_s8  ;;  %v7981_v34 = vpop.eup %7980  ;;  %7990 = vrcp.f32 %v1741_v29  ;;  %v1743_v35 = vadd.f32 1.0, %v7979_v31 }
 0x278   : > { %v7983_v36 = vpop.eup %7982  ;;  %7992 = vrcp.f32 %v1744_v32  ;;  %v1746_v37 = vadd.f32 1.0, %v7981_v34 }
 0x279   : > { %v7985_v38 = vpop.eup %7984  ;;  %7994 = vrcp.f32 %v1743_v35  ;;  %v1745_v39 = vadd.f32 1.0, %v7983_v36 }
 0x27a   : > { %v7987_v41 = vpop.eup %7986  ;;  %7996 = vrcp.f32 %v1746_v37  ;;  %v1747_v42 = vadd.f32 1.0, %v7985_v38 }
 0x27b   : > { %1786 = vrot.lane.b32.xlu0 %v9003_v11, %s8575_s8  ;;  %1792 = vrot.lane.b32.xlu1 %v9005_v12, %s8575_s8  ;;  %7998 = vrcp.f32 %v1745_v39  ;;  %v1748_v53 = vadd.f32 1.0, %v7987_v41 }
 0x27c   : > { %8000 = vrcp.f32 %v1747_v42 }
 0x27d   : > { %8002 = vrcp.f32 %v1748_v53 }
 0x27f   : > { %1798 = vrot.lane.b32.xlu0 %v9011_v13, %s8575_s8  ;;  %1794 = vrot.lane.b32.xlu1 %v9013_v14, %s8575_s8 }
 0x280   : > { %v9037_v43 = vpop.eup %7988 }
 0x281   : > { %v9042_v55 = vpop.eup %7990 }
 0x282   : > { %v9044_v57 = vpop.eup %7992 }
 0x283   : > { %1800 = vrot.lane.b32.xlu0 %v9019_v15, %s8575_s8  ;;  %1796 = vrot.lane.b32.xlu1 %v9021_v16, %s8575_s8  ;;  %v9050_v0 = vpop.eup %7994 }
 0x284   : > { %v9053_v1 = vpop.eup %7996 }
 0x285   : > { %v9058_v7 = vpop.eup %7998 }
 0x286   : > { %v9061_v8 = vpop.eup %8000 }
 0x287   : > { %v9067_v21 = vpop.eup %8002 }
 0x2d8   : > { %v1829_v45 = vpop.permute.xlu0 %1828 }
 0x2d9   : > { %v1851_v47 = vmul.f32 %v9037_v43, %v1829_v45  ;;  %v1827_v48 = vpop.permute.xlu1 %1826 }
 0x2da   : > { %v1850_v59 = vmul.f32 %v9042_v55, %v1827_v48 }
 0x2db   : > { %1868 = vrot.lane.b32.xlu0 %v1851_v47, %s8575_s8 }
 0x2dd   : > { %v1831_v60 = vpop.permute.xlu0 %1830  ;;  %v1833_v61 = vpop.permute.xlu1 %1832 }
 0x2de   : > { %v1853_v62 = vmul.f32 %v9044_v57, %v1833_v61  ;;  %v1852_v3 = vmul.f32 %v9050_v0, %v1831_v60 }
 0x2df   : > { %1866 = vrot.lane.b32.xlu0 %v1850_v59, %s8575_s8 }
 0x2e0   : > { %1872 = vrot.lane.b32.xlu1 %v1853_v62, %s8575_s8 }
 0x2e1   : > { %v1835_v4 = vpop.permute.xlu0 %1834  ;;  %v1837_v5 = vpop.permute.xlu1 %1836 }
 0x2e2   : > { %v1855_v6 = vmul.f32 %v9053_v1, %v1837_v5  ;;  %v1854_v18 = vmul.f32 %v9058_v7, %v1835_v4 }
 0x2e3   : > { %1870 = vrot.lane.b32.xlu0 %v1852_v3, %s8575_s8 }
 0x2e4   : > { %1876 = vrot.lane.b32.xlu1 %v1855_v6, %s8575_s8 }
 0x2e5   : > { %v1839_v17 = vpop.permute.xlu0 %1838  ;;  %v1841_v20 = vpop.permute.xlu1 %1840 }
 0x2e6   : > { %v1856_v19 = vmul.f32 %v9061_v8, %v1839_v17  ;;  %v1857_v22 = vmul.f32 %v9067_v21, %v1841_v20 }
 0x2e8   : > { %1874 = vrot.lane.b32.xlu1 %v1854_v18, %s8575_s8  ;;  %1878 = vrot.lane.b32.xlu0 %v1856_v19, %s8575_s8 }
 0x2e9   : > { %v1789_v23 = vpop.permute.xlu0 %1788  ;;  %v1791_v24 = vpop.permute.xlu1 %1790 }
 0x2ea   : > { %v1811_v35 = vmul.f32 %v9037_v43, %v1789_v23  ;;  %v1812_v37 = vmul.f32 %v9050_v0, %v1791_v24 }
 0x2ec   : > { %1880 = vrot.lane.b32.xlu1 %v1857_v22, %s8575_s8  ;;  %1775 = vperm.xlu0 %7935, %v1716_v49  }
 0x2ed   : > { %v1787_v25 = vpop.permute.xlu0 %1786  ;;  %v1793_v26 = vpop.permute.xlu1 %1792 }
 0x2ee   : > { %v1810_v38 = vmul.f32 %v9042_v55, %v1787_v25  ;;  %v1813_v42 = vmul.f32 %v9044_v57, %v1793_v26 }
 0x2f1   : > { %v1799_v27 = vpop.permute.xlu0 %1798  ;;  %v1795_v28 = vpop.permute.xlu1 %1794 }
 0x2f2   : > { %v1816_v59 = vmul.f32 %v9061_v8, %v1799_v27  ;;  %v1814_v60 = vmul.f32 %v9058_v7, %v1795_v28 }
 0x2f5   : > { %v1801_v29 = vpop.permute.xlu0 %1800  ;;  %v1797_v32 = vpop.permute.xlu1 %1796 }
 0x2f6   : > { %v1815_v49 = vmul.f32 %v9053_v1, %v1797_v32  ;;  %v1817_v19 = vmul.f32 %v9067_v21, %v1801_v29 }
 0x34d   : > { %v1869_v31 = vpop.permute.xlu0 %1868 }
 0x34e   : > { %v1891_v39 = vadd.f32 %v1869_v31, %v1811_v35 }
 0x350   : > { %v1906_v51 = vrot.slane %v1891_v39, 7 }
 0x351   : > { %v1867_v34 = vpop.permute.xlu0 %1866 }
 0x352   : > { %v1873_v36 = vpop.permute.xlu1 %1872  ;;  %v1890_v45 = vadd.f32 %v1867_v34, %v1810_v38  ;;  %v8578_v34 = vmov 1966171168  }
 0x353   : > { %v1893_v53 = vadd.f32 %v1873_v36, %v1813_v42  ;;  %v2001_v35 = vunpack.c.l.s4 %v8578_v34  ;;  %v2003_v36 = vlaneseq }
 0x354   : > { %v1908_v61 = vsel %vm1907_vm8, %v1906_v51, %v1890_v45 }
 0x355   : > { %v1871_v41 = vpop.permute.xlu0 %1870  ;;  %v1912_v18 = vrot.slane %v1893_v53, 5  ;;  %v2004_v38 = vshrl.u32 %v2003_v36, 7 }
 0x356   : > { %v1892_v47 = vadd.f32 %v1871_v41, %v1812_v37  ;;  %v1877_v48 = vpop.permute.xlu1 %1876  ;;  %v2002_v37 = vunpack.c.0.s8 %v2001_v35 }
 0x357   : > { %v1895_v62 = vadd.f32 %v1877_v48, %v1815_v49 }
 0x358   : > { %v1909_v54 = vrot.slane %v1892_v47, 6  ;;  %v9089_v41 = vsub.s32 %v2002_v37, %v2004_v38 }
 0x359   : > { %v1918_v22 = vrot.slane %v1895_v62, 3 }
 0x35a   : > { %v1875_v3 = vpop.permute.xlu1 %1874  ;;  %v1879_v4 = vpop.permute.xlu0 %1878  ;;  %v1911_v5 = vsel %vm1910_vm9, %v1909_v54, %v1908_v61  ;;  %12933 = vst [vmem:[#allocation28_spill] sm:$0xff] %v9089_v41 }
 0x35b   : > { %v1894_v6 = vadd.f32 %v1875_v3, %v1814_v60  ;;  %v1896_v17 = vadd.f32 %v1879_v4, %v1816_v59  ;;  %v1914_v23 = vsel %vm1913_vm10, %v1912_v18, %v1911_v5 }
 0x35d   : > { %v1915_v20 = vrot.slane %v1894_v6, 4  ;;  %v1921_v26 = vrot.slane %v1896_v17, 2 }
 0x35e   : > { %v1881_v24 = vpop.permute.xlu1 %1880 }
 0x35f   : > { %v1917_v25 = vsel %vm1916_vm11, %v1915_v20, %v1914_v23  ;;  %v1897_v27 = vadd.f32 %v1881_v24, %v1817_v19 }
 0x360   : > { %v1920_v28 = vsel %vm1919_vm12, %v1918_v22, %v1917_v25  ;;  %v9133_v25 = vld [vmem:[%s8781_s4] sm:$0xff] }
 0x361   : > { %v1924_v31 = vrot.slane %v1897_v27, 1  ;;  %v1923_v32 = vsel %vm1922_vm13, %v1921_v26, %v1920_v28  ;;  %v9137_v26 = vld [vmem:[%s8781_s4 + $0x10] sm:$0xff]  ;;  %v9141_v27 = vld [vmem:[%s8781_s4 + $0x8] sm:$0xff]  ;;  %v9145_v28 = vld [vmem:[%s8781_s4 + $0x18] sm:$0xff] }
 0x363   : > { %v1926_v29 = vsel %vm1925_vm14, %v1924_v31, %v1923_v32  ;;  %v9149_v31 = vld [vmem:[%s8781_s4 + $0x28] sm:$0xff]  ;;  %v9153_v32 = vld [vmem:[%s8781_s4 + $0x20] sm:$0xff] }
 0x364   : > { %1927 = vrot.lane.b32.xlu1 %v1926_v29, %s8577_s9  ;;  %v9158_v29 = vld [vmem:[%s8781_s4 + $0x30] sm:$0xff] }
 0x36b   : > { %v9087_v39 = vpop.permute.xlu0 %1775 }
 0x3d6   : > { %v1928_v42 = vpop.permute.xlu1 %1927 }
 0x3d7   : > { %v9093_v45 = vmul.f32 %v1928_v42, %v9087_v39 }
 0x3d9   : > { %12934 = vst [vmem:[#allocation29_spill] sm:$0xff] %v9093_v45  ;;  %8004 = vtanh.f32 %v9093_v45  ;;  %v2068_v47 = vcombine.high %v9093_v45, %v9093_v45  ;;  %v2075_v48 = vrot.slane %v9093_v45, %v9089_v41 }
 0x3db   : > { %v2082_v49 = vrot.slane %v2068_v47, %v9089_v41  ;;  %v2083_v51 = vcombine.high %v2075_v48, %v2075_v48  ;;  %v2091_v53 = vrot.slane %v2075_v48, %v9089_v41 }
 0x3dd   : > { %v2084_v54 = vcombine.high %v2082_v49, %v2082_v49  ;;  %v2098_v59 = vrot.slane %v2082_v49, %v9089_v41  ;;  %v2105_v60 = vrot.slane %v2083_v51, %v9089_v41  ;;  %v2113_v61 = vcombine.high %v2091_v53, %v2091_v53  ;;  %2126 = vst.msk [vmem:[%s9106_s11] sm:$0x1] %vm2058_vm15, %v2091_v53 }
 0x3df   : > { %v2112_v62 = vrot.slane %v2084_v54, %v9089_v41  ;;  %v2114_v3 = vcombine.high %v2098_v59, %v2098_v59  ;;  %v2115_v4 = vcombine.high %v2105_v60, %v2105_v60  ;;  %2127 = vst.msk [vmem:[%s9106_s11 + $0x10] sm:$0x1] %vm2058_vm15, %v2105_v60  ;;  %2128 = vst.msk [vmem:[%s9106_s11 + $0x20] sm:$0x1] %vm2058_vm15, %v2113_v61 }
 0x3e0   : > { %2130 = vst.msk [vmem:[%s9106_s11 + $0x40] sm:$0x1] %vm2058_vm15, %v2098_v59 }
 0x3e1   : > { %v2116_v5 = vcombine.high %v2112_v62, %v2112_v62  ;;  %2129 = vst.msk [vmem:[%s9106_s11 + $0x30] sm:$0x1] %vm2058_vm15, %v2115_v4  ;;  %2131 = vst.msk [vmem:[%s9106_s11 + $0x50] sm:$0x1] %vm2058_vm15, %v2112_v62 }
 0x3e2   : > { %2132 = vst.msk [vmem:[%s9106_s11 + $0x60] sm:$0x1] %vm2058_vm15, %v2114_v3 }
 0x3e3   : > { %v8005_v6 = vpop.eup %8004  ;;  %2133 = vst.msk [vmem:[%s9106_s11 + $0x70] sm:$0x1] %vm2058_vm15, %v2116_v5 }
 0x3e4   : > { %1940 = vrot.lane.b32.xlu1 %v8005_v6, %s8579_s14  ;;  %v1934_v17 = vrot.slane %v8005_v6, 2  ;;  %v1933_v18 = vrot.slane %v8005_v6, 1  ;;  %v1935_v19 = vrot.slane %v8005_v6, 3  ;;  %v1936_v20 = vrot.slane %v8005_v6, 4 }
 0x3e5   : > { %v1937_v22 = vrot.slane %v8005_v6, 5  ;;  %v1938_v23 = vrot.slane %v8005_v6, 6  ;;  %v1939_v24 = vrot.slane %v8005_v6, 7 }
 0x3e6   : > { %1944 = vrot.lane.b32.xlu0 %v1934_v17, %s8579_s14 }
 0x3e8   : > { %1942 = vrot.lane.b32.xlu1 %v1933_v18, %s8579_s14 }
 0x3ea   : > { %1946 = vrot.lane.b32.xlu0 %v1935_v19, %s8579_s14 }
 0x3ec   : > { %1948 = vrot.lane.b32.xlu1 %v1936_v20, %s8579_s14 }
 0x3ee   : > { %1950 = vrot.lane.b32.xlu0 %v1937_v22, %s8579_s14 }
 0x3f0   : > { %1952 = vrot.lane.b32.xlu1 %v1938_v23, %s8579_s14  ;;  %v9179_v23 = vld [vmem:[%s8781_s4 + $0x38] sm:$0xff] }
 0x3f2   : > { %1954 = vrot.lane.b32.xlu0 %v1939_v24, %s8579_s14 }
 0x3f4   : > { %2145 = vperm.xlu1 %7936, %v9133_v25  }
 0x3f6   : > { %2155 = vperm.xlu0 %7935, %v9137_v26  }
 0x3f8   : > { %2150 = vperm.xlu1 %7936, %v9141_v27  }
 0x3fa   : > { %2160 = vperm.xlu0 %7935, %v9145_v28  }
 0x3fc   : > { %2170 = vperm.xlu1 %7936, %v9149_v31  }
 0x3fe   : > { %2165 = vperm.xlu0 %7935, %v9153_v32  }
 0x402   : > { %2175 = vperm.xlu0 %7935, %v9158_v29  }
 0x456   : > { %v1941_v34 = vpop.permute.xlu1 %1940 }
 0x457   : > { %v1964_v47 = vmul.f32 %v9042_v55, %v1941_v34 }
 0x458   : > { %v1945_v35 = vpop.permute.xlu0 %1944 }
 0x459   : > { %v1966_v36 = vmul.f32 %v9050_v0, %v1945_v35 }
 0x45a   : > { %v1943_v37 = vpop.permute.xlu1 %1942 }
 0x45b   : > { %v1965_v38 = vmul.f32 %v9037_v43, %v1943_v37  ;;  %v1982_v51 = vrot.slane %v1966_v36, 6 }
 0x45c   : > { %v1947_v42 = vpop.permute.xlu0 %1946 }
 0x45d   : > { %v1980_v48 = vrot.slane %v1965_v38, 7  ;;  %v1967_v49 = vmul.f32 %v9044_v57, %v1947_v42 }
 0x45e   : > { %v1949_v53 = vpop.permute.xlu1 %1948 }
 0x45f   : > { %v1981_v54 = vsel %vm1907_vm8, %v1980_v48, %v1964_v47  ;;  %v1984_v59 = vrot.slane %v1967_v49, 5  ;;  %v1968_v60 = vmul.f32 %v9058_v7, %v1949_v53 }
 0x460   : > { %v1983_v61 = vsel %vm1910_vm9, %v1982_v51, %v1981_v54  ;;  %v1951_v62 = vpop.permute.xlu0 %1950 }
 0x461   : > { %v1985_v0 = vsel %vm1913_vm10, %v1984_v59, %v1983_v61  ;;  %v1986_v3 = vrot.slane %v1968_v60, 4  ;;  %v1969_v43 = vmul.f32 %v9053_v1, %v1951_v62  ;;  %v12718_v1 = vmov 0.0|0.0  }
 0x462   : > { %v1953_v55 = vpop.permute.xlu1 %1952  ;;  %7783 = vmatprep.subr.bf16.mxu1 %v12718_v1  ;;  %7795 = vmatprep.subr.bf16.mxu0 %v12718_v1 }
 0x463   : > { %v1987_v4 = vsel %vm1916_vm11, %v1986_v3, %v1985_v0  ;;  %v1988_v57 = vrot.slane %v1969_v43, 3  ;;  %v1970_v5 = vmul.f32 %v9061_v8, %v1953_v55  ;;  %7785 = vmatpush3.bf16.msra.mxu1 %v8939_v30  ;;  %7797 = vmatpush3.bf16.msra.mxu0 %v8939_v30  ;;  %v12720_v8 = vmov 0.0  }
 0x464   : > { %v1955_v6 = vpop.permute.xlu0 %1954  ;;  %7786 = vmatprep.subr.bf16.mxu1 %v12718_v1  ;;  %7798 = vmatprep.subr.bf16.mxu0 %v12718_v1 }
 0x465   : > { %v1990_v17 = vrot.slane %v1970_v5, 2  ;;  %v1971_v18 = vmul.f32 %v9067_v21, %v1955_v6  ;;  %v1989_v7 = vsel %vm1919_vm12, %v1988_v57, %v1987_v4  ;;  %7706 = vmatprep.mubr.msk.f32.mxu1 %vm8581_vm0, %v12720_v8  ;;  %7728 = vmatprep.mubr.msk.f32.mxu0 %vm8581_vm0, %v12720_v8 }
 0x467   : > { %v1992_v19 = vrot.slane %v1971_v18, 1  ;;  %v1991_v20 = vsel %vm1922_vm13, %v1990_v17, %v1989_v7  ;;  %7788 = vmatpush3.bf16.msra.mxu1 %v8941_v33  ;;  %7800 = vmatpush3.bf16.msra.mxu0 %v8941_v33 }
 0x468   : > { %7789 = vmatprep.subr.bf16.mxu1 %v12718_v1  ;;  %7807 = vmatprep.subr.bf16.mxu0 %v12718_v1 }
 0x469   : > { %v1993_v22 = vsel %vm1925_vm14, %v1992_v19, %v1991_v20 }
 0x46a   : > { %1994 = vrot.lane.b32.xlu1 %v1993_v22, %s8579_s14 }
 0x46e   : > { %2180 = vperm.xlu1 %7936, %v9179_v23  }
 0x473   : > { %v9195_v21 = vpop.permute.xlu1 %2145 }
 0x474   : > { %12935 = vst [vmem:[#allocation30_spill] sm:$0xff] %v9195_v21 }
 0x475   : > { %v9199_v34 = vpop.permute.xlu0 %2155 }
 0x476   : > { %12937 = vst [vmem:[#allocation32_spill] sm:$0xff] %v9199_v34 }
 0x477   : > { %v9197_v24 = vpop.permute.xlu1 %2150 }
 0x478   : > { %12936 = vst [vmem:[#allocation31_spill] sm:$0xff] %v9197_v24 }
 0x479   : > { %v9203_v37 = vpop.permute.xlu0 %2160 }
 0x47b   : > { %v9201_v35 = vpop.permute.xlu1 %2170 }
 0x47c   : > { %12938 = vst [vmem:[#allocation33_spill] sm:$0xff] %v9201_v35 }
 0x47d   : > { %v9232_v0 = vpop.permute.xlu0 %2165 }
 0x4dc   : > { %v1995_v36 = vpop.permute.xlu1 %1994 }
 0x4dd   : > { %v9206_v38 = vmul.f32 %v1995_v36, %v9087_v39 }
 0x4df   : > { %12939 = vst [vmem:[#allocation34_spill] sm:$0xff] %v9206_v38  ;;  %v1999_v42 = vcombine.high %v9206_v38, %v9206_v38  ;;  %v2006_v47 = vrot.slane %v9206_v38, %v9089_v41  ;;  %v9213_v48 = vrot.slane %v9206_v38, 7  ;;  %v9216_v49 = vrot.slane %v9206_v38, 1 }
 0x4e0   : > { %v9219_v51 = vrot.slane %v9206_v38, 2  ;;  %v9222_v53 = vrot.slane %v9206_v38, 3  ;;  %v9243_v57 = vrot.slane %v9206_v38, 4  ;;  %v2199_v5 = vmul.f32 %v9197_v24, %v9206_v38 }
 0x4e1   : > { %12940 = vst [vmem:[#allocation35_spill] sm:$0xff] %v9216_v49  ;;  %v2013_v39 = vrot.slane %v1999_v42, %v9089_v41  ;;  %v2014_v54 = vcombine.high %v2006_v47, %v2006_v47  ;;  %v2022_v59 = vrot.slane %v2006_v47, %v9089_v41  ;;  %v2198_v60 = vmul.f32 %v9213_v48, %v9195_v21 }
 0x4e2   : > { %v2200_v61 = vmul.f32 %v9216_v49, %v9199_v34  ;;  %v2201_v62 = vmul.f32 %v9219_v51, %v9203_v37  ;;  %v2202_v6 = vmul.f32 %v9222_v53, %v9232_v0  ;;  %v9264_v47 = vrot.slane %v9206_v38, 5 }
 0x4e3   : > { %v2015_v3 = vcombine.high %v2013_v39, %v2013_v39  ;;  %v2029_v43 = vrot.slane %v2013_v39, %v9089_v41  ;;  %v2036_v55 = vrot.slane %v2014_v54, %v9089_v41  ;;  %v2044_v4 = vcombine.high %v2022_v59, %v2022_v59  ;;  %2059 = vst.msk [vmem:[%s9238_s15] sm:$0x1] %vm2058_vm15, %v2022_v59 }
 0x4e4   : > { %v2253_v17 = vrot.slane %v2198_v60, 1  ;;  %v2255_v20 = vrot.slane %v2200_v61, 7  ;;  %v2257_v36 = vrot.slane %v2201_v62, 6  ;;  %v2203_v54 = vmul.f32 %v9243_v57, %v9201_v35  ;;  %v9272_v61 = vpop.permute.xlu0 %2175 }
 0x4e5   : > { %v2043_v18 = vrot.slane %v2015_v3, %v9089_v41  ;;  %v2045_v7 = vcombine.high %v2029_v43, %v2029_v43  ;;  %v2046_v19 = vcombine.high %v2036_v55, %v2036_v55  ;;  %2060 = vst.msk [vmem:[%s9238_s15 + $0x10] sm:$0x1] %vm2058_vm15, %v2036_v55  ;;  %2061 = vst.msk [vmem:[%s9238_s15 + $0x20] sm:$0x1] %vm2058_vm15, %v2044_v4  ;;  %v2259_v60 = vrot.slane %v2202_v6, 5 }
 0x4e6   : > { %2063 = vst.msk [vmem:[%s9238_s15 + $0x40] sm:$0x1] %vm2058_vm15, %v2029_v43  ;;  %v2254_v22 = vsel %vm1907_vm8, %v2199_v5, %v2253_v17  ;;  %12941 = vst [vmem:[#allocation36_spill] sm:$0xff] %v9272_v61  ;;  %v2204_v62 = vmul.f32 %v9264_v47, %v9272_v61  ;;  %v9278_v43 = vrot.slane %v9206_v38, 6  ;;  %v2261_v55 = vrot.slane %v2203_v54, 4 }
 0x4e7   : > { %v2047_v42 = vcombine.high %v2043_v18, %v2043_v18  ;;  %2062 = vst.msk [vmem:[%s9238_s15 + $0x30] sm:$0x1] %vm2058_vm15, %v2046_v19  ;;  %2064 = vst.msk [vmem:[%s9238_s15 + $0x50] sm:$0x1] %vm2058_vm15, %v2043_v18  ;;  %v2256_v39 = vsel %vm1910_vm9, %v2255_v20, %v2254_v22  ;;  %v2134_v20 = vld [vmem:[#allocation6] sm:$0xff] }
 0x4e8   : > { %2065 = vst.msk [vmem:[%s9238_s15 + $0x60] sm:$0x1] %vm2058_vm15, %v2045_v7  ;;  %v2258_v59 = vsel %vm1913_vm10, %v2257_v36, %v2256_v39  ;;  %v2263_v18 = vrot.slane %v2204_v62, 3  ;;  %v2135_v22 = vadd.f32 %v2134_v20, %v9206_v38 }
 0x4e9   : > { %2066 = vst.msk [vmem:[%s9238_s15 + $0x70] sm:$0x1] %vm2058_vm15, %v2047_v42  ;;  %v2260_v3 = vsel %vm1916_vm11, %v2259_v60, %v2258_v59 }
 0x4ea   : > { %v2262_v17 = vsel %vm1919_vm12, %v2261_v55, %v2260_v3  ;;  %2136 = vst.msk [vmem:[#allocation6] sm:$0xff] %vm1570_vm6, %v2135_v22 }
 0x4eb   : > { %v2264_v7 = vsel %vm1922_vm13, %v2263_v18, %v2262_v17 }
 0x4ed   : > { %v9280_v4 = vpop.permute.xlu1 %2180 }
 0x4ee   : > { %12942 = vst [vmem:[#allocation37_spill] sm:$0xff] %v9280_v4  ;;  %v2205_v5 = vmul.f32 %v9278_v43, %v9280_v4 }
 0x4f0   : > { %v2265_v6 = vrot.slane %v2205_v5, 2 }
 0x4f2   : > { %v2266_v19 = vsel %vm1925_vm14, %v2265_v6, %v2264_v7 }
 0x4f3   : > { %7707 = vmatmul.mubr.msk.f32.vlgmr.msra.gmra.mrb[0].mxu1 %vm1570_vm6, %v2266_v19 }
 0x4f4   : > { %7791 = vmatpush3.bf16.msra.mxu1 %v8939_v30  ;;  %7717 = vmatprep.mubr.msk.f32.mxu1 %vm8581_vm0, %v12720_v8 }
 0x4f5   : > { %7792 = vmatprep.subr.bf16.mxu1 %v12718_v1 }
 0x4f8   : > { %7794 = vmatpush3.bf16.msra.mxu1 %v8941_v33 }
 0x4f9   : > { %7801 = vmatprep.subr.bf16.mxu1 %v12718_v1 }
 0x5c6   : > { %v2335_v36 = vpop.f32.mrb[0].mxu1 }
 0x5c7   : > { %v7708_v42 = vpop.f32.mrb[1].mxu1  ;;  %v2341_v39 = vrot.slane %v2335_v36, 1  ;;  %v2340_v54 = vrot.slane %v2335_v36, 7  ;;  %v9297_v59 = vadd.f32 %v2335_v36, %v8957_v44  ;;  %v2342_v60 = vrot.slane %v2335_v36, 2 }
 0x5c8   : > { %v2343_v3 = vrot.slane %v2335_v36, 3  ;;  %v2344_v5 = vrot.slane %v2335_v36, 4  ;;  %v2345_v18 = vrot.slane %v2335_v36, 5  ;;  %v2346_v7 = vrot.slane %v2335_v36, 6 }
 0x5c9   : > { %v9300_v62 = vadd.f32 %v2341_v39, %v8967_v52  ;;  %v9303_v55 = vadd.f32 %v2340_v54, %v8959_v46  ;;  %8006 = vtanh.f32 %v9297_v59  ;;  %v9307_v17 = vadd.f32 %v2342_v60, %v8965_v50  ;;  %v9332_v60 = vld [vmem:[%s8798_s3 + $0x8] sm:$0xff] }
 0x5ca   : > { %v9311_v6 = vadd.f32 %v2343_v3, %v8975_v58  ;;  %v9315_v19 = vadd.f32 %v2344_v5, %v8973_v56  ;;  %v9319_v20 = vadd.f32 %v2345_v18, %v8983_v2  ;;  %v9323_v22 = vadd.f32 %v2346_v7, %v8981_v63  ;;  %v2780_v3 = vld [vmem:[#allocation7] sm:$0xff] }
 0x5cb   : > { %8008 = vtanh.f32 %v9300_v62  ;;  %v2781_v5 = vadd.f32 %v9332_v60, %v2780_v3 }
 0x5cc   : > { %8010 = vtanh.f32 %v9303_v55 }
 0x5cd   : > { %8012 = vtanh.f32 %v9307_v17  ;;  %2782 = vst.msk [vmem:[#allocation7] sm:$0xff] %vm2139_vm7, %v2781_v5  ;;  %v9352_v5 = vrot.slane %v9093_v45, 2 }
 0x5ce   : > { %8014 = vtanh.f32 %v9311_v6 }
 0x5cf   : > { %8016 = vtanh.f32 %v9315_v19  ;;  %12945 = vst [vmem:[#allocation40_spill] sm:$0xff] %v9352_v5  ;;  %v2232_v40 = vmul.f32 %v9352_v5, %v9203_v37 }
 0x5d0   : > { %8018 = vtanh.f32 %v9319_v20 }
 0x5d1   : > { %8020 = vtanh.f32 %v9323_v22 }
 0x5d3   : > { %v8007_v42 = vpop.eup %8006 }
 0x5d4   : > { %2482 = vrot.lane.b32.xlu0 %v8007_v42, %s8575_s8  ;;  %v9339_v42 = vrot.slane %v9093_v45, 7 }
 0x5d5   : > { %v8009_v39 = vpop.eup %8008 }
 0x5d6   : > { %2484 = vrot.lane.b32.xlu1 %v8009_v39, %s8575_s8  ;;  %v8011_v36 = vpop.eup %8010  ;;  %12943 = vst [vmem:[#allocation38_spill] sm:$0xff] %v9339_v42  ;;  %v9343_v39 = vrot.slane %v9093_v45, 1 }
 0x5d7   : > { %v8013_v54 = vpop.eup %8012 }
 0x5d8   : > { %2480 = vrot.lane.b32.xlu0 %v8011_v36, %s8575_s8  ;;  %v8015_v18 = vpop.eup %8014  ;;  %12944 = vst [vmem:[#allocation39_spill] sm:$0xff] %v9343_v39  ;;  %v2229_v36 = vmul.f32 %v9339_v42, %v9195_v21  ;;  %v2231_v3 = vmul.f32 %v9343_v39, %v9199_v34  ;;  %v9362_v39 = vrot.slane %v9093_v45, 5 }
 0x5d9   : > { %v8017_v7 = vpop.eup %8016 }
 0x5da   : > { %2486 = vrot.lane.b32.xlu1 %v8013_v54, %s8575_s8  ;;  %v8019_v54 = vpop.eup %8018  ;;  %v2365_v8 = vadd.f32 %v2231_v3, %v8997_v10  ;;  %12946 = vst [vmem:[#allocation41_spill] sm:$0xff] %v9362_v39  ;;  %v2366_v10 = vadd.f32 %v2232_v40, %v9005_v12  ;;  %v9376_v3 = vrot.slane %v9093_v45, 6 }
 0x5db   : > { %v8021_v1 = vpop.eup %8020 }
 0x5dc   : > { %2488 = vrot.lane.b32.xlu0 %v8015_v18, %s8575_s8  ;;  %v2363_v18 = vadd.f32 %v2229_v36, %v9003_v11  ;;  %v2235_v36 = vmul.f32 %v9362_v39, %v9272_v61  ;;  %12948 = vst [vmem:[#allocation43_spill] sm:$0xff] %v9376_v3 }
 0x5de   : > { %2490 = vrot.lane.b32.xlu1 %v8017_v7, %s8575_s8  ;;  %v2230_v7 = vmul.f32 %v9197_v24, %v9093_v45 }
 0x5e0   : > { %2492 = vrot.lane.b32.xlu0 %v8019_v54, %s8575_s8  ;;  %v2364_v11 = vadd.f32 %v2230_v7, %v8995_v9  ;;  %v2369_v9 = vadd.f32 %v2235_v36, %v9011_v13  ;;  %v7446_v13 = vmul.f32 -1.442695, %v9297_v59  ;;  %v7445_v36 = vmul.f32 -1.442695, %v9303_v55 }
 0x5e1   : > { %v7452_v59 = vmul.f32 -1.442695, %v9323_v22 }
 0x5e2   : > { %2494 = vrot.lane.b32.xlu1 %v8021_v1, %s8575_s8  ;;  %v9366_v1 = vrot.slane %v9093_v45, 3  ;;  %8022 = vpow2.f32 %v7446_v13 }
 0x5e3   : > { %8024 = vpow2.f32 %v7445_v36 }
 0x5e4   : > { %2440 = vrot.lane.b32.xlu0 %v2363_v18, %s8575_s8  ;;  %12947 = vst [vmem:[#allocation42_spill] sm:$0xff] %v9366_v1  ;;  %v2233_v54 = vmul.f32 %v9366_v1, %v9232_v0  ;;  %v2236_v18 = vmul.f32 %v9376_v3, %v9280_v4 }
 0x5e6   : > { %2444 = vrot.lane.b32.xlu1 %v2365_v8, %s8575_s8  ;;  %v9380_v8 = vrot.slane %v9093_v45, 4  ;;  %v2367_v12 = vadd.f32 %v2233_v54, %v9013_v14  ;;  %v2370_v7 = vadd.f32 %v2236_v18, %v9019_v15  ;;  %v7448_v14 = vmul.f32 -1.442695, %v9307_v17 }
 0x5e7   : > { %v7449_v54 = vmul.f32 -1.442695, %v9311_v6  ;;  %v7451_v15 = vmul.f32 -1.442695, %v9319_v20 }
 0x5e8   : > { %2442 = vrot.lane.b32.xlu0 %v2364_v11, %s8575_s8  ;;  %12949 = vst [vmem:[#allocation44_spill] sm:$0xff] %v9380_v8  ;;  %v2234_v40 = vmul.f32 %v9380_v8, %v9201_v35  ;;  %8026 = vpow2.f32 %v7448_v14 }
 0x5ea   : > { %2446 = vrot.lane.b32.xlu1 %v2366_v10, %s8575_s8  ;;  %v2368_v11 = vadd.f32 %v2234_v40, %v9021_v16  ;;  %v7447_v10 = vmul.f32 -1.442695, %v9300_v62  ;;  %v7450_v16 = vmul.f32 -1.442695, %v9315_v19 }
 0x5ec   : > { %2452 = vrot.lane.b32.xlu0 %v2369_v9, %s8575_s8  ;;  %8028 = vpow2.f32 %v7447_v10  ;;  %v8023_v9 = vpop.eup %8022 }
 0x5ed   : > { %8030 = vpow2.f32 %v7449_v54  ;;  %v2396_v55 = vadd.f32 1.0, %v8023_v9  ;;  %v8025_v18 = vpop.eup %8024 }
 0x5ee   : > { %2448 = vrot.lane.b32.xlu1 %v2367_v12, %s8575_s8  ;;  %8032 = vpow2.f32 %v7451_v15  ;;  %v2395_v62 = vadd.f32 1.0, %v8025_v18 }
 0x5ef   : > { %8034 = vpow2.f32 %v7450_v16 }
 0x5f0   : > { %2454 = vrot.lane.b32.xlu0 %v2370_v7, %s8575_s8  ;;  %8036 = vpow2.f32 %v7452_v59 }
 0x5f1   : > { %8038 = vrcp.f32 %v2396_v55 }
 0x5f2   : > { %2450 = vrot.lane.b32.xlu1 %v2368_v11, %s8575_s8  ;;  %v8027_v17 = vpop.eup %8026  ;;  %8040 = vrcp.f32 %v2395_v62 }
 0x5f3   : > { %v2398_v40 = vadd.f32 1.0, %v8027_v17 }
 0x5f5   : > { %8042 = vrcp.f32 %v2398_v40 }
 0x5f6   : > { %v8029_v12 = vpop.eup %8028 }
 0x5f7   : > { %v8031_v6 = vpop.eup %8030  ;;  %v2397_v7 = vadd.f32 1.0, %v8029_v12 }
 0x5f8   : > { %v8033_v20 = vpop.eup %8032  ;;  %v2399_v11 = vadd.f32 1.0, %v8031_v6 }
 0x5f9   : > { %v8035_v19 = vpop.eup %8034  ;;  %8044 = vrcp.f32 %v2397_v7  ;;  %v2401_v13 = vadd.f32 1.0, %v8033_v20 }
 0x5fa   : > { %v8037_v36 = vpop.eup %8036  ;;  %8046 = vrcp.f32 %v2399_v11  ;;  %v2400_v22 = vadd.f32 1.0, %v8035_v19 }
 0x5fb   : > { %v9402_v14 = vpop.eup %8038  ;;  %8048 = vrcp.f32 %v2401_v13  ;;  %v2402_v16 = vadd.f32 1.0, %v8037_v36 }
 0x5fc   : > { %8050 = vrcp.f32 %v2400_v22  ;;  %v9406_v9 = vpop.eup %8040 }
 0x5fd   : > { %8052 = vrcp.f32 %v2402_v16 }
 0x5ff   : > { %v9408_v55 = vpop.eup %8042 }
 0x603   : > { %v9413_v12 = vpop.eup %8044 }
 0x604   : > { %v9416_v6 = vpop.eup %8046 }
 0x605   : > { %v9421_v19 = vpop.eup %8048 }
 0x606   : > { %v9424_v36 = vpop.eup %8050 }
 0x646   : > { %v2483_v10 = vpop.permute.xlu0 %2482 }
 0x647   : > { %v2505_v54 = vmul.f32 %v9402_v14, %v2483_v10 }
 0x648   : > { %v2485_v15 = vpop.permute.xlu1 %2484 }
 0x649   : > { %2522 = vrot.lane.b32.xlu0 %v2505_v54, %s8575_s8  ;;  %v2506_v7 = vmul.f32 %v9413_v12, %v2485_v15  ;;  %v9430_v15 = vpop.eup %8052 }
 0x64a   : > { %v2481_v59 = vpop.permute.xlu0 %2480 }
 0x64b   : > { %v2504_v18 = vmul.f32 %v9406_v9, %v2481_v59 }
 0x64c   : > { %v2487_v17 = vpop.permute.xlu1 %2486 }
 0x64d   : > { %v2507_v62 = vmul.f32 %v9408_v55, %v2487_v17  ;;  %2520 = vrot.lane.b32.xlu0 %v2504_v18, %s8575_s8 }
 0x64e   : > { %v2489_v40 = vpop.permute.xlu0 %2488 }
 0x64f   : > { %2526 = vrot.lane.b32.xlu1 %v2507_v62, %s8575_s8  ;;  %v2508_v11 = vmul.f32 %v9416_v6, %v2489_v40 }
 0x650   : > { %v2491_v20 = vpop.permute.xlu1 %2490 }
 0x651   : > { %2524 = vrot.lane.b32.xlu0 %v2506_v7, %s8575_s8  ;;  %v2509_v10 = vmul.f32 %v9424_v36, %v2491_v20 }
 0x652   : > { %v2493_v13 = vpop.permute.xlu0 %2492 }
 0x653   : > { %2528 = vrot.lane.b32.xlu1 %v2508_v11, %s8575_s8  ;;  %v2510_v22 = vmul.f32 %v9421_v19, %v2493_v13 }
 0x654   : > { %v2495_v54 = vpop.permute.xlu1 %2494 }
 0x655   : > { %2532 = vrot.lane.b32.xlu0 %v2510_v22, %s8575_s8  ;;  %v2511_v16 = vmul.f32 %v9430_v15, %v2495_v54 }
 0x656   : > { %v2441_v59 = vpop.permute.xlu0 %2440 }
 0x657   : > { %2530 = vrot.lane.b32.xlu1 %v2509_v10, %s8575_s8  ;;  %v2464_v22 = vmul.f32 %v9406_v9, %v2441_v59 }
 0x658   : > { %v2445_v18 = vpop.permute.xlu1 %2444 }
 0x659   : > { %2429 = vperm.xlu0 %7935, %v9332_v60   ;;  %v2466_v60 = vmul.f32 %v9413_v12, %v2445_v18 }
 0x65a   : > { %v2443_v17 = vpop.permute.xlu0 %2442 }
 0x65b   : > { %2534 = vrot.lane.b32.xlu1 %v2511_v16, %s8575_s8  ;;  %v2465_v16 = vmul.f32 %v9402_v14, %v2443_v17 }
 0x65c   : > { %v2447_v62 = vpop.permute.xlu1 %2446 }
 0x65d   : > { %v2467_v54 = vmul.f32 %v9408_v55, %v2447_v62 }
 0x65e   : > { %v2453_v40 = vpop.permute.xlu0 %2452 }
 0x65f   : > { %v2470_v18 = vmul.f32 %v9421_v19, %v2453_v40 }
 0x660   : > { %v2449_v7 = vpop.permute.xlu1 %2448 }
 0x661   : > { %v2468_v1 = vmul.f32 %v9416_v6, %v2449_v7 }
 0x662   : > { %v2455_v20 = vpop.permute.xlu0 %2454 }
 0x664   : > { %v2451_v13 = vpop.permute.xlu1 %2450 }
 0x665   : > { %v2469_v59 = vmul.f32 %v9424_v36, %v2451_v13 }
 0x6bb   : > { %v2523_v11 = vpop.permute.xlu0 %2522 }
 0x6bc   : > { %v2545_v2 = vadd.f32 %v2523_v11, %v2465_v16  ;;  %v2471_v11 = vmul.f32 %v9430_v15, %v2455_v20 }
 0x6bf   : > { %v2521_v10 = vpop.permute.xlu0 %2520 }
 0x6c0   : > { %v2544_v8 = vadd.f32 %v2521_v10, %v2464_v22 }
 0x6c1   : > { %v2527_v39 = vpop.permute.xlu1 %2526 }
 0x6c2   : > { %v2560_v5 = vrot.slane %v2544_v8, 1  ;;  %v2547_v45 = vadd.f32 %v2527_v39, %v2467_v54 }
 0x6c3   : > { %v2525_v42 = vpop.permute.xlu0 %2524 }
 0x6c4   : > { %v2546_v3 = vadd.f32 %v2525_v42, %v2466_v60  ;;  %v2561_v22 = vsel %vm1907_vm8, %v2545_v2, %v2560_v5  ;;  %v2564_v10 = vrot.slane %v2547_v45, 6 }
 0x6c5   : > { %v2529_v63 = vpop.permute.xlu1 %2528 }
 0x6c6   : > { %v2548_v56 = vadd.f32 %v2529_v63, %v2468_v1  ;;  %v2562_v58 = vrot.slane %v2546_v3, 7 }
 0x6c7   : > { %v2533_v62 = vpop.permute.xlu0 %2532 }
 0x6c8   : > { %v2563_v17 = vsel %vm1910_vm9, %v2562_v58, %v2561_v22  ;;  %v2566_v44 = vrot.slane %v2548_v56, 5  ;;  %v2550_v42 = vadd.f32 %v2533_v62, %v2470_v18  ;;  %v8583_v58 = vmov 1  }
 0x6c9   : > { %v2531_v7 = vpop.permute.xlu1 %2530  ;;  %v2565_v39 = vsel %vm1913_vm10, %v2564_v10, %v2563_v17  ;;  %7937 = vset.pattern.permute.xlu0 %v8583_v58  ;;  %7938 = vset.pattern.permute.xlu1 %v8583_v58 }
 0x6ca   : > { %v2549_v8 = vadd.f32 %v2531_v7, %v2469_v59  ;;  %v2567_v1 = vsel %vm1916_vm11, %v2566_v44, %v2565_v39  ;;  %v2570_v45 = vrot.slane %v2550_v42, 3 }
 0x6cc   : > { %v2568_v63 = vrot.slane %v2549_v8, 4 }
 0x6cd   : > { %v2535_v3 = vpop.permute.xlu1 %2534 }
 0x6ce   : > { %v2551_v13 = vadd.f32 %v2535_v3, %v2471_v11  ;;  %v2569_v2 = vsel %vm1919_vm12, %v2568_v63, %v2567_v1 }
 0x6cf   : > { %v2571_v40 = vsel %vm1922_vm13, %v2570_v45, %v2569_v2 }
 0x6d0   : > { %v2572_v5 = vrot.slane %v2551_v13, 2 }
 0x6d2   : > { %v2573_v56 = vsel %vm1925_vm14, %v2572_v5, %v2571_v40 }
 0x6d3   : > { %2574 = vrot.lane.b32.xlu1 %v2573_v56, %s8577_s9 }
 0x6d8   : > { %v9451_v20 = vpop.permute.xlu0 %2429 }
 0x745   : > { %v2575_v54 = vpop.permute.xlu1 %2574 }
 0x746   : > { %v9454_v44 = vmul.f32 %v2575_v54, %v9451_v20 }
 0x748   : > { %12950 = vst [vmem:[#allocation45_spill] sm:$0xff] %v9454_v44  ;;  %8054 = vtanh.f32 %v9454_v44  ;;  %v2712_v60 = vcombine.high %v9454_v44, %v9454_v44  ;;  %v2719_v16 = vrot.slane %v9454_v44, %v9089_v41 }
 0x74a   : > { %v2726_v59 = vrot.slane %v2712_v60, %v9089_v41  ;;  %v2727_v22 = vcombine.high %v2719_v16, %v2719_v16  ;;  %v2735_v10 = vrot.slane %v2719_v16, %v9089_v41 }
 0x74c   : > { %v2728_v62 = vcombine.high %v2726_v59, %v2726_v59  ;;  %v2742_v18 = vrot.slane %v2726_v59, %v9089_v41  ;;  %v2749_v17 = vrot.slane %v2727_v22, %v9089_v41  ;;  %v2757_v7 = vcombine.high %v2735_v10, %v2735_v10  ;;  %2769 = vst.msk [vmem:[%s9106_s11 + $0x1] sm:$0x1] %vm2058_vm15, %v2735_v10 }
 0x74e   : > { %v2756_v39 = vrot.slane %v2728_v62, %v9089_v41  ;;  %v2758_v8 = vcombine.high %v2742_v18, %v2742_v18  ;;  %v2759_v42 = vcombine.high %v2749_v17, %v2749_v17  ;;  %2770 = vst.msk [vmem:[%s9106_s11 + $0x11] sm:$0x1] %vm2058_vm15, %v2749_v17  ;;  %2771 = vst.msk [vmem:[%s9106_s11 + $0x21] sm:$0x1] %vm2058_vm15, %v2757_v7 }
 0x74f   : > { %2773 = vst.msk [vmem:[%s9106_s11 + $0x41] sm:$0x1] %vm2058_vm15, %v2742_v18 }
 0x750   : > { %v2760_v11 = vcombine.high %v2756_v39, %v2756_v39  ;;  %2772 = vst.msk [vmem:[%s9106_s11 + $0x31] sm:$0x1] %vm2058_vm15, %v2759_v42  ;;  %2774 = vst.msk [vmem:[%s9106_s11 + $0x51] sm:$0x1] %vm2058_vm15, %v2756_v39 }
 0x751   : > { %2775 = vst.msk [vmem:[%s9106_s11 + $0x61] sm:$0x1] %vm2058_vm15, %v2758_v8 }
 0x752   : > { %v8055_v63 = vpop.eup %8054  ;;  %2776 = vst.msk [vmem:[%s9106_s11 + $0x71] sm:$0x1] %vm2058_vm15, %v2760_v11 }
 0x753   : > { %2589 = vrot.lane.b32.xlu0 %v8055_v63, %s8579_s14  ;;  %v2581_v1 = vrot.slane %v8055_v63, 1  ;;  %v2580_v3 = vrot.slane %v8055_v63, 7  ;;  %v2582_v13 = vrot.slane %v8055_v63, 2  ;;  %v2583_v2 = vrot.slane %v8055_v63, 3 }
 0x754   : > { %v2584_v45 = vrot.slane %v8055_v63, 4  ;;  %v2585_v5 = vrot.slane %v8055_v63, 5  ;;  %v2586_v40 = vrot.slane %v8055_v63, 6 }
 0x755   : > { %2591 = vrot.lane.b32.xlu1 %v2581_v1, %s8579_s14 }
 0x757   : > { %2587 = vrot.lane.b32.xlu0 %v2580_v3, %s8579_s14 }
 0x759   : > { %2593 = vrot.lane.b32.xlu1 %v2582_v13, %s8579_s14 }
 0x75b   : > { %2595 = vrot.lane.b32.xlu0 %v2583_v2, %s8579_s14  ;;  %v9527_v2 = vmul.f32 %v9213_v48, %v9197_v24 }
 0x75d   : > { %2597 = vrot.lane.b32.xlu1 %v2584_v45, %s8579_s14  ;;  %v9531_v45 = vmul.f32 %v9199_v34, %v9206_v38 }
 0x75f   : > { %2599 = vrot.lane.b32.xlu0 %v2585_v5, %s8579_s14  ;;  %v9539_v5 = vmul.f32 %v9219_v51, %v9232_v0 }
 0x761   : > { %2601 = vrot.lane.b32.xlu1 %v2586_v40, %s8579_s14  ;;  %v9543_v40 = vmul.f32 %v9222_v53, %v9201_v35 }
 0x763   : > { %2818 = vperm.xlu0 %7937, %v9133_v25  }
 0x765   : > { %2822 = vperm.xlu1 %7938, %v9141_v27  }
 0x767   : > { %2834 = vperm.xlu0 %7937, %v9153_v32  }
 0x769   : > { %2830 = vperm.xlu1 %7938, %v9145_v28  }
 0x76d   : > { %2826 = vperm.xlu1 %7938, %v9137_v26  }
 0x771   : > { %2838 = vperm.xlu1 %7938, %v9149_v31  }
 0x775   : > { %2846 = vperm.xlu1 %7938, %v9179_v23  }
 0x7c5   : > { %v2590_v56 = vpop.permute.xlu0 %2589 }
 0x7c6   : > { %v2612_v27 = vmul.f32 %v9402_v14, %v2590_v56  ;;  %v9547_v56 = vmul.f32 %v9243_v57, %v9272_v61 }
 0x7c7   : > { %v2592_v58 = vpop.permute.xlu1 %2591 }
 0x7c8   : > { %v2613_v54 = vmul.f32 %v9413_v12, %v2592_v58  ;;  %v9551_v58 = vmul.f32 %v9264_v47, %v9195_v21 }
 0x7c9   : > { %v2588_v60 = vpop.permute.xlu0 %2587 }
 0x7ca   : > { %v2611_v16 = vmul.f32 %v9406_v9, %v2588_v60  ;;  %v2629_v28 = vrot.slane %v2613_v54, 7  ;;  %v9557_v60 = vmul.f32 %v9278_v43, %v9197_v24 }
 0x7cb   : > { %v2594_v25 = vpop.permute.xlu1 %2593 }
 0x7cc   : > { %v2627_v59 = vrot.slane %v2611_v16, 1  ;;  %v2614_v32 = vmul.f32 %v9408_v55, %v2594_v25  ;;  %v9561_v16 = vmul.f32 %v9213_v48, %v9199_v34  ;;  %v9565_v25 = vmul.f32 %v9203_v37, %v9206_v38 }
 0x7cd   : > { %v2596_v22 = vpop.permute.xlu0 %2595 }
 0x7ce   : > { %v2628_v26 = vsel %vm1907_vm8, %v2612_v27, %v2627_v59  ;;  %v2631_v31 = vrot.slane %v2614_v32, 6  ;;  %v2615_v23 = vmul.f32 %v9416_v6, %v2596_v22  ;;  %v9569_v27 = vmul.f32 %v9216_v49, %v9232_v0 }
 0x7cf   : > { %v2630_v10 = vsel %vm1910_vm9, %v2629_v28, %v2628_v26  ;;  %v2598_v62 = vpop.permute.xlu1 %2597  ;;  %v9573_v59 = vmul.f32 %v9219_v51, %v9201_v35  ;;  %v9577_v32 = vmul.f32 %v9222_v53, %v9272_v61  ;;  %v9581_v28 = vmul.f32 %v9243_v57, %v9195_v21 }
 0x7d0   : > { %v2632_v12 = vsel %vm1913_vm10, %v2631_v31, %v2630_v10  ;;  %v2633_v18 = vrot.slane %v2615_v23, 5  ;;  %v2616_v9 = vmul.f32 %v9424_v36, %v2598_v62  ;;  %v12951_v36 = vmov 0  }
 0x7d1   : > { %v2600_v17 = vpop.permute.xlu0 %2599  ;;  %v9585_v22 = vmul.f32 %v9264_v47, %v9197_v24  ;;  %v9591_v31 = vmul.f32 %v9278_v43, %v9199_v34  ;;  %v9595_v23 = vmul.f32 %v9213_v48, %v9203_v37  ;;  %v9599_v10 = vmul.f32 %v9232_v0, %v9206_v38 }
 0x7d2   : > { %v2634_v14 = vsel %vm1916_vm11, %v2633_v18, %v2632_v12  ;;  %v2635_v7 = vrot.slane %v2616_v9, 4  ;;  %v2617_v55 = vmul.f32 %v9421_v19, %v2600_v17  ;;  %v9603_v62 = vmul.f32 %v9216_v49, %v9201_v35 }
 0x7d3   : > { %v2602_v39 = vpop.permute.xlu1 %2601  ;;  %v9607_v12 = vmul.f32 %v9264_v47, %v9280_v4  ;;  %v9611_v18 = vmul.f32 %v9243_v57, %v9280_v4  ;;  %v9615_v9 = vmul.f32 %v9219_v51, %v9272_v61  ;;  %v9619_v17 = vmul.f32 %v9222_v53, %v9280_v4 }
 0x7d4   : > { %v2637_v8 = vrot.slane %v2617_v55, 3  ;;  %v2618_v42 = vmul.f32 %v9430_v15, %v2602_v39  ;;  %v2636_v6 = vsel %vm1919_vm12, %v2635_v7, %v2634_v14  ;;  %v9523_v15 = vmul.f32 %v9278_v43, %v9195_v21 }
 0x7d5   : > { %v9623_v7 = vmul.f32 %v9222_v53, %v9195_v21  ;;  %v9627_v55 = vmul.f32 %v9243_v57, %v9197_v24  ;;  %v9631_v39 = vmul.f32 %v9264_v47, %v9199_v34 }
 0x7d6   : > { %v2639_v11 = vrot.slane %v2618_v42, 2  ;;  %v2638_v63 = vsel %vm1922_vm13, %v2637_v8, %v2636_v6  ;;  %v9635_v8 = vmul.f32 %v9278_v43, %v9203_v37  ;;  %v9642_v6 = vmul.f32 %v9213_v48, %v9232_v0 }
 0x7d7   : > { %12955 = vst [vmem:[#allocation49_spill] sm:$0xff] %v9623_v7  ;;  %12956 = vst [vmem:[#allocation50_spill] sm:$0xff] %v9627_v55 }
 0x7d8   : > { %v2640_v1 = vsel %vm1925_vm14, %v2639_v11, %v2638_v63  ;;  %12957 = vst [vmem:[#allocation51_spill] sm:$0xff] %v9631_v39  ;;  %12958 = vst [vmem:[#allocation52_spill] sm:$0xff] %v9635_v8  ;;  %v9646_v11 = vmul.f32 %v9201_v35, %v9206_v38  ;;  %v9650_v63 = vmul.f32 %v9216_v49, %v9272_v61 }
 0x7d9   : > { %2641 = vrot.lane.b32.xlu0 %v2640_v1, %s8579_s14  ;;  %12959 = vst [vmem:[#allocation53_spill] sm:$0xff] %v9642_v6  ;;  %v9654_v1 = vmul.f32 %v9219_v51, %v9280_v4 }
 0x7da   : > { %12960 = vst [vmem:[#allocation54_spill] sm:$0xff] %v9646_v11  ;;  %12961 = vst [vmem:[#allocation55_spill] sm:$0xff] %v9650_v63  ;;  %v9697_v63 = vmul.f32 %v9213_v48, %v9272_v61 }
 0x7db   : > { %12962 = vst [vmem:[#allocation56_spill] sm:$0xff] %v9654_v1 }
 0x7dc   : > { %12968 = vst [vmem:[#allocation62_spill] sm:$0xff] %v9697_v63 }
 0x7dd   : > { %2842 = vperm.xlu0 %7937, %v9158_v29   ;;  %v9535_v29 = vmul.f32 %v9216_v49, %v9203_v37 }
 0x7e1   : > { %7939 = vset.pattern.permute.xlu0 %v12951_v36  ;;  %v9666_v36 = vmul.f32 %v9213_v48, %v9201_v35 }
 0x7e2   : > { %v9517_v19 = vpop.permute.xlu0 %2818 }
 0x7e3   : > { %12953 = vst [vmem:[#allocation47_spill] sm:$0xff] %v9517_v19  ;;  %12965 = vst [vmem:[#allocation59_spill] sm:$0xff] %v9666_v36 }
 0x7e4   : > { %v9515_v3 = vpop.permute.xlu1 %2822 }
 0x7e5   : > { %12952 = vst [vmem:[#allocation46_spill] sm:$0xff] %v9515_v3 }
 0x7e6   : > { %v9553_v54 = vpop.permute.xlu0 %2834 }
 0x7e8   : > { %v9519_v13 = vpop.permute.xlu1 %2830 }
 0x7ec   : > { %v9587_v26 = vpop.permute.xlu1 %2826 }
 0x7ed   : > { %12954 = vst [vmem:[#allocation48_spill] sm:$0xff] %v9587_v26 }
 0x84b   : > { %v2642_v14 = vpop.permute.xlu0 %2641 }
 0x84c   : > { %v9638_v42 = vmul.f32 %v2642_v14, %v9451_v20  ;;  %v9658_v20 = vmul.f32 %v9219_v51, %v9195_v21  ;;  %v9662_v14 = vmul.f32 %v9219_v51, %v9197_v24 }
 0x84e   : > { %12963 = vst [vmem:[#allocation57_spill] sm:$0xff] %v9658_v20  ;;  %12964 = vst [vmem:[#allocation58_spill] sm:$0xff] %v9662_v14  ;;  %v2646_v44 = vcombine.high %v9638_v42, %v9638_v42  ;;  %v2653_v50 = vrot.slane %v9638_v42, %v9089_v41  ;;  %v9673_v52 = vrot.slane %v9638_v42, 6  ;;  %v9676_v46 = vrot.slane %v9638_v42, 7  ;;  %v9678_v20 = vpop.permute.xlu1 %2838 }
 0x84f   : > { %12966 = vst [vmem:[#allocation60_spill] sm:$0xff] %v9678_v20  ;;  %v9681_v51 = vrot.slane %v9638_v42, 1  ;;  %v9684_v35 = vrot.slane %v9638_v42, 2  ;;  %v9687_v36 = vrot.slane %v9638_v42, 3  ;;  %v9691_v14 = vmul.f32 %v9272_v61, %v9206_v38 }
 0x850   : > { %v2660_v33 = vrot.slane %v2646_v44, %v9089_v41  ;;  %v2661_v21 = vcombine.high %v2653_v50, %v2653_v50  ;;  %v2669_v1 = vrot.slane %v2653_v50, %v9089_v41  ;;  %v9700_v11 = vrot.slane %v9638_v42, 5 }
 0x851   : > { %12967 = vst [vmem:[#allocation61_spill] sm:$0xff] %v9691_v14  ;;  %v2864_v6 = vmul.f32 %v9673_v52, %v9517_v19  ;;  %v2865_v38 = vmul.f32 %v9676_v46, %v9515_v3  ;;  %v2867_v44 = vmul.f32 %v9681_v51, %v9519_v13  ;;  %v2866_v63 = vmul.f32 %v9587_v26, %v9638_v42 }
 0x852   : > { %v2662_v50 = vcombine.high %v2660_v33, %v2660_v33  ;;  %v2676_v14 = vrot.slane %v2660_v33, %v9089_v41  ;;  %v2683_v48 = vrot.slane %v2661_v21, %v9089_v41  ;;  %v2691_v61 = vcombine.high %v2669_v1, %v2669_v1  ;;  %2703 = vst.msk [vmem:[%s9238_s15 + $0x1] sm:$0x1] %vm2058_vm15, %v2669_v1  ;;  %v9727_v30 = vpop.permute.xlu1 %2846 }
 0x853   : > { %v2868_v8 = vmul.f32 %v9684_v35, %v9553_v54  ;;  %v2869_v39 = vmul.f32 %v9687_v36, %v9678_v20  ;;  %v2872_v55 = vadd.f32 %v2864_v6, %v9523_v15  ;;  %v2873_v1 = vadd.f32 %v2865_v38, %v9527_v2  ;;  %12969 = vst [vmem:[#allocation63_spill] sm:$0xff] %v9727_v30 }
 0x854   : > { %v2690_v33 = vrot.slane %v2662_v50, %v9089_v41  ;;  %v2692_v21 = vcombine.high %v2676_v14, %v2676_v14  ;;  %v2693_v7 = vcombine.high %v2683_v48, %v2683_v48  ;;  %2704 = vst.msk [vmem:[%s9238_s15 + $0x11] sm:$0x1] %vm2058_vm15, %v2683_v48  ;;  %2705 = vst.msk [vmem:[%s9238_s15 + $0x21] sm:$0x1] %vm2058_vm15, %v2691_v61  ;;  %v9730_v49 = vrot.slane %v9638_v42, 4 }
 0x855   : > { %2707 = vst.msk [vmem:[%s9238_s15 + $0x41] sm:$0x1] %vm2058_vm15, %v2676_v14  ;;  %v2875_v15 = vadd.f32 %v2867_v44, %v9535_v29  ;;  %v2876_v6 = vadd.f32 %v2868_v8, %v9539_v5  ;;  %v2877_v50 = vadd.f32 %v2869_v39, %v9543_v40  ;;  %v2871_v38 = vmul.f32 %v9700_v11, %v9727_v30 }
 0x856   : > { %v2694_v41 = vcombine.high %v2690_v33, %v2690_v33  ;;  %2706 = vst.msk [vmem:[%s9238_s15 + $0x31] sm:$0x1] %vm2058_vm15, %v2693_v7  ;;  %2708 = vst.msk [vmem:[%s9238_s15 + $0x51] sm:$0x1] %vm2058_vm15, %v2690_v33  ;;  %v2919_v61 = vrot.slane %v2872_v55, 2  ;;  %v2920_v2 = vrot.slane %v2873_v1, 1  ;;  %v2874_v14 = vadd.f32 %v2866_v63, %v9531_v45 }
 0x857   : > { %2709 = vst.msk [vmem:[%s9238_s15 + $0x61] sm:$0x1] %vm2058_vm15, %v2692_v21  ;;  %v2923_v48 = vrot.slane %v2875_v15, 7  ;;  %v2925_v29 = vrot.slane %v2876_v6, 6  ;;  %v3483_v5 = vmul.f32 %v9700_v11, %v9517_v19  ;;  %v2927_v7 = vrot.slane %v2877_v50, 5 }
 0x858   : > { %2710 = vst.msk [vmem:[%s9238_s15 + $0x71] sm:$0x1] %vm2058_vm15, %v2694_v41  ;;  %v2921_v40 = vsel %vm1907_vm8, %v2920_v2, %v2919_v61  ;;  %v3484_v39 = vmul.f32 %v9673_v52, %v9515_v3  ;;  %v3485_v8 = vmul.f32 %v9676_v46, %v9587_v26  ;;  %v3486_v45 = vmul.f32 %v9519_v13, %v9638_v42 }
 0x859   : > { %v2922_v55 = vsel %vm1910_vm9, %v2874_v14, %v2921_v40  ;;  %v3487_v63 = vmul.f32 %v9681_v51, %v9553_v54  ;;  %v3488_v41 = vmul.f32 %v9684_v35, %v9678_v20  ;;  %v3490_v33 = vmul.f32 %v9730_v49, %v9727_v30 }
 0x85a   : > { %v2924_v44 = vsel %vm1913_vm10, %v2923_v48, %v2922_v55  ;;  %v9764_v21 = vadd.f32 %v3483_v5, %v9551_v58  ;;  %v9767_v1 = vadd.f32 %v3484_v39, %v9557_v60  ;;  %v9771_v6 = vadd.f32 %v3485_v8, %v9561_v16 }
 0x85b   : > { %v2926_v15 = vsel %vm1916_vm11, %v2925_v29, %v2924_v44  ;;  %v9774_v50 = vadd.f32 %v3486_v45, %v9565_v25  ;;  %v9777_v61 = vadd.f32 %v3487_v63, %v9569_v27  ;;  %v9783_v58 = vadd.f32 %v3488_v41, %v9573_v59 }
 0x85c   : > { %v9779_v2 = vpop.permute.xlu0 %2842  ;;  %v2928_v14 = vsel %vm1919_vm12, %v2927_v7, %v2926_v15  ;;  %v9786_v60 = vadd.f32 %v3490_v33, %v9611_v18  ;;  %v4181_v16 = vmul.f32 %v9730_v49, %v9517_v19  ;;  %v2879_v48 = vadd.f32 %v2871_v38, %v9607_v12 }
 0x85d   : > { %12970 = vst [vmem:[#allocation64_spill] sm:$0xff] %v9779_v2  ;;  %v2870_v25 = vmul.f32 %v9730_v49, %v9779_v2  ;;  %v3489_v27 = vmul.f32 %v9687_v36, %v9779_v2  ;;  %v9797_v29 = vmul.f32 %v9222_v53, %v9197_v24  ;;  %v4182_v59 = vmul.f32 %v9700_v11, %v9515_v3 }
 0x85e   : > { %12971 = vst [vmem:[#allocation65_spill] sm:$0xff] %v9786_v60  ;;  %v4183_v18 = vmul.f32 %v9673_v52, %v9587_v26  ;;  %v4184_v5 = vmul.f32 %v9676_v46, %v9519_v13  ;;  %v4185_v40 = vmul.f32 %v9553_v54, %v9638_v42  ;;  %v9813_v7 = vmul.f32 %v9243_v57, %v9199_v34 }
 0x85f   : > { %v2878_v12 = vadd.f32 %v2870_v25, %v9547_v56  ;;  %v9809_v38 = vadd.f32 %v3489_v27, %v9577_v32  ;;  %v9817_v39 = vmul.f32 %v9264_v47, %v9203_v37  ;;  %v4186_v8 = vmul.f32 %v9681_v51, %v9678_v20 }
 0x860   : > { %v4187_v55 = vmul.f32 %v9684_v35, %v9779_v2  ;;  %v4188_v56 = vmul.f32 %v9687_v36, %v9727_v30  ;;  %v9826_v32 = vadd.f32 %v4181_v16, %v9581_v28  ;;  %v2931_v63 = vrot.slane %v2879_v48, 3 }
 0x861   : > { %12972 = vst [vmem:[#allocation66_spill] sm:$0xff] %v9809_v38  ;;  %v2929_v45 = vrot.slane %v2878_v12, 4  ;;  %v9829_v41 = vadd.f32 %v4182_v59, %v9585_v22  ;;  %v9832_v44 = vadd.f32 %v4183_v18, %v9591_v31  ;;  %v9835_v33 = vadd.f32 %v4184_v5, %v9595_v23  ;;  %v12976_v59 = vld [vmem:[#allocation35_spill] sm:$0xff]  ;;  %v12977_v5 = vld [vmem:[#allocation18_spill] sm:$0xff] }
 0x862   : > { %v9838_v15 = vadd.f32 %v4185_v40, %v9599_v10  ;;  %v9841_v25 = vadd.f32 %v4186_v8, %v9603_v62  ;;  %v9844_v28 = vadd.f32 %v4187_v55, %v9615_v9  ;;  %v9848_v22 = vadd.f32 %v4188_v56, %v9619_v17  ;;  %v12979_v8 = vld [vmem:[#allocation49_spill] sm:$0xff]  ;;  %v12980_v56 = vld [vmem:[#allocation50_spill] sm:$0xff] }
 0x863   : > { %v2930_v16 = vsel %vm1922_vm13, %v2929_v45, %v2928_v14  ;;  %v4911_v31 = vmul.f32 %v9687_v36, %v9517_v19  ;;  %v5645_v23 = vmul.f32 %v9278_v43, %v9232_v0  ;;  %v4912_v62 = vmul.f32 %v9730_v49, %v9515_v3 }
 0x864   : > { %12973 = vst [vmem:[#allocation67_spill] sm:$0xff] %v9841_v25  ;;  %12974 = vst [vmem:[#allocation68_spill] sm:$0xff] %v9844_v28  ;;  %v2932_v10 = vsel %vm1925_vm14, %v2931_v63, %v2930_v16  ;;  %v4913_v9 = vmul.f32 %v9700_v11, %v9587_v26  ;;  %v4914_v14 = vmul.f32 %v9673_v52, %v9519_v13  ;;  %v12978_v40 = vmov 0.0   ;;  %v12982_v16 = vld [vmem:[#allocation51_spill] sm:$0xff]  ;;  %v12983_v28 = vld [vmem:[#allocation52_spill] sm:$0xff] }
 0x865   : > { %12975 = vst [vmem:[#allocation69_spill] sm:$0xff] %v9848_v22  ;;  %7718 = vmatmul.mubr.msk.f32.vlgmr.msra.gmra.mrb[2].mxu1 %vm1570_vm6, %v2932_v10  ;;  %v4915_v17 = vmul.f32 %v9676_v46, %v9553_v54  ;;  %v4916_v48 = vmul.f32 %v9678_v20, %v9638_v42  ;;  %v4917_v27 = vmul.f32 %v9681_v51, %v9779_v2  ;;  %v12981_v63 = vmov 0.0|0.0   ;;  %v12986_v25 = vld [vmem:[#allocation55_spill] sm:$0xff] }
 0x866   : > { %v5648_v18 = vmul.f32 %v12976_v59, %v9280_v4  ;;  %7803 = vmatpush3.bf16.msra.mxu1 %v12977_v5  ;;  %7739 = vmatprep.mubr.msk.f32.mxu1 %vm8581_vm0, %v12978_v40  ;;  %v4918_v12 = vmul.f32 %v9684_v35, %v9727_v30  ;;  %v9876_v55 = vadd.f32 %v4911_v31, %v12979_v8  ;;  %v12984_v5 = vld [vmem:[#allocation53_spill] sm:$0xff]  ;;  %v12985_v40 = vld [vmem:[#allocation54_spill] sm:$0xff]  ;;  %v12988_v8 = vld [vmem:[#allocation56_spill] sm:$0xff] }
 0x867   : > { %v9879_v45 = vadd.f32 %v4912_v62, %v12980_v56  ;;  %7804 = vmatprep.subr.bf16.mxu1 %v12981_v63  ;;  %v9883_v10 = vadd.f32 %v4913_v9, %v12982_v16  ;;  %v9886_v38 = vadd.f32 %v4914_v14, %v12983_v28  ;;  %v9889_v60 = vadd.f32 %v4915_v17, %v12984_v5  ;;  %v12990_v17 = vld [vmem:[#allocation30_spill] sm:$0xff]  ;;  %v12992_v5 = vld [vmem:[#allocation57_spill] sm:$0xff] }
 0x868   : > { %v9892_v22 = vadd.f32 %v4916_v48, %v12985_v40  ;;  %v9895_v31 = vadd.f32 %v4917_v27, %v12986_v25  ;;  %v9898_v62 = vadd.f32 %v4918_v12, %v12988_v8  ;;  %v5673_v56 = vmul.f32 %v9684_v35, %v9517_v19  ;;  %v12991_v27 = vld [vmem:[#allocation19_spill] sm:$0xff]  ;;  %v12994_v12 = vld [vmem:[#allocation58_spill] sm:$0xff] }
 0x869   : > { %v6468_v9 = vmul.f32 %v9684_v35, %v9515_v3  ;;  %v5678_v28 = vmul.f32 %v9676_v46, %v9678_v20  ;;  %v5679_v14 = vmul.f32 %v9779_v2, %v9638_v42  ;;  %v6435_v48 = vmul.f32 %v12976_v59, %v12990_v17  ;;  %v12996_v59 = vld [vmem:[#allocation59_spill] sm:$0xff] }
 0x86a   : > { %12987 = vst [vmem:[#allocation35_spill] sm:$0xff] %v9895_v31  ;;  %12989 = vst [vmem:[#allocation49_spill] sm:$0xff] %v9898_v62  ;;  %v6437_v25 = vmul.f32 %v9222_v53, %v9199_v34  ;;  %7806 = vmatpush3.bf16.msra.mxu1 %v12991_v27  ;;  %v9914_v40 = vadd.f32 %v5673_v56, %v12992_v5  ;;  %v6473_v35 = vmul.f32 %v9676_v46, %v9779_v2  ;;  %v12998_v53 = vld [vmem:[#allocation61_spill] sm:$0xff]  ;;  %v13000_v5 = vld [vmem:[#allocation62_spill] sm:$0xff] }
 0x86b   : > { %v9917_v16 = vadd.f32 %v6468_v9, %v12994_v12  ;;  %v5674_v8 = vmul.f32 %v9687_v36, %v9515_v3  ;;  %7813 = vmatprep.subr.bf16.mxu1 %v12981_v63  ;;  %v9925_v62 = vadd.f32 %v5678_v28, %v12996_v59  ;;  %v9928_v31 = vadd.f32 %v5679_v14, %v12998_v53 }
 0x86c   : > { %12993 = vst [vmem:[#allocation50_spill] sm:$0xff] %v9914_v40  ;;  %v6438_v56 = vmul.f32 %v9243_v57, %v9203_v37  ;;  %v6439_v9 = vmul.f32 %v9264_v47, %v9232_v0  ;;  %v9935_v12 = vadd.f32 %v6473_v35, %v13000_v5  ;;  %v5675_v46 = vmul.f32 %v9730_v49, %v9587_v26  ;;  %v13003_v35 = vld [vmem:[#allocation33_spill] sm:$0xff] }
 0x86d   : > { %12995 = vst [vmem:[#allocation51_spill] sm:$0xff] %v9917_v16  ;;  %12997 = vst [vmem:[#allocation52_spill] sm:$0xff] %v9925_v62  ;;  %v5676_v27 = vmul.f32 %v9700_v11, %v9519_v13  ;;  %v5677_v28 = vmul.f32 %v9673_v52, %v9553_v54  ;;  %v5680_v14 = vmul.f32 %v9681_v51, %v9727_v30 }
 0x86e   : > { %12999 = vst [vmem:[#allocation53_spill] sm:$0xff] %v9928_v31  ;;  %13001 = vst [vmem:[#allocation54_spill] sm:$0xff] %v9935_v12  ;;  %v9946_v57 = vadd.f32 %v5674_v8, %v9797_v29  ;;  %v6467_v47 = vmul.f32 %v9681_v51, %v9517_v19  ;;  %v6440_v59 = vmul.f32 %v9278_v43, %v13003_v35  ;;  %v13009_v8 = vld [vmem:[#allocation34_spill] sm:$0xff] }
 0x86f   : > { %v9953_v53 = vadd.f32 %v5675_v46, %v9813_v7  ;;  %v9956_v5 = vadd.f32 %v5676_v27, %v9817_v39  ;;  %v9958_v12 = vadd.f32 %v5677_v28, %v5645_v23  ;;  %v6469_v63 = vmul.f32 %v9687_v36, %v9587_v26 }
 0x870   : > { %13002 = vst [vmem:[#allocation55_spill] sm:$0xff] %v9946_v57  ;;  %v9962_v31 = vadd.f32 %v5680_v14, %v5648_v18  ;;  %v9964_v29 = vadd.f32 %v6467_v47, %v6435_v48  ;;  %v6470_v51 = vmul.f32 %v9730_v49, %v9519_v13  ;;  %v6442_v43 = vmul.f32 %v9280_v4, %v13009_v8  ;;  %v2777_v18 = vld [vmem:[#allocation6] sm:$0xff] }
 0x871   : > { %13004 = vst [vmem:[#allocation56_spill] sm:$0xff] %v9953_v53  ;;  %13005 = vst [vmem:[#allocation57_spill] sm:$0xff] %v9956_v5  ;;  %v6471_v7 = vmul.f32 %v9700_v11, %v9553_v54  ;;  %v6472_v39 = vmul.f32 %v9673_v52, %v9678_v20  ;;  %v9974_v23 = vadd.f32 %v6469_v63, %v6437_v25  ;;  %v13015_v25 = vld [vmem:[#allocation21_spill] sm:$0xff] }
 0x872   : > { %13006 = vst [vmem:[#allocation58_spill] sm:$0xff] %v9958_v12  ;;  %13007 = vst [vmem:[#allocation59_spill] sm:$0xff] %v9962_v31  ;;  %v6474_v36 = vmul.f32 %v9727_v30, %v9638_v42  ;;  %v9978_v48 = vadd.f32 %v6470_v51, %v6438_v56  ;;  %v2778_v27 = vadd.f32 %v2777_v18, %v9638_v42  ;;  %v13016_v51 = vld [vmem:[#allocation23_spill] sm:$0xff] }
 0x873   : > { %13008 = vst [vmem:[#allocation61_spill] sm:$0xff] %v9964_v29  ;;  %13010 = vst [vmem:[#allocation62_spill] sm:$0xff] %v9974_v23  ;;  %v9981_v49 = vadd.f32 %v6471_v7, %v6439_v9  ;;  %v9983_v46 = vadd.f32 %v6472_v39, %v6440_v59  ;;  %v13017_v59 = vld [vmem:[#allocation22_spill] sm:$0xff]  ;;  %v13018_v39 = vld [vmem:[#allocation20_spill] sm:$0xff] }
 0x874   : > { %13011 = vst [vmem:[#allocation34_spill] sm:$0xff] %v9978_v48  ;;  %v9985_v28 = vadd.f32 %v6474_v36, %v6442_v43  ;;  %2779 = vst.msk [vmem:[#allocation6] sm:$0xff] %vm1570_vm6, %v2778_v27  ;;  %v13019_v27 = vld [vmem:[#allocation25_spill] sm:$0xff] }
 0x875   : > { %13012 = vst [vmem:[#allocation70_spill] sm:$0xff] %v9981_v49  ;;  %13013 = vst [vmem:[#allocation71_spill] sm:$0xff] %v9983_v46  ;;  %v13027_v49 = vld [vmem:[#allocation38_spill] sm:$0xff] }
 0x876   : > { %13014 = vst [vmem:[#allocation72_spill] sm:$0xff] %v9985_v28 }
 0x938   : > { %v3001_v11 = vpop.f32.mrb[2].mxu1 }
 0x939   : > { %v3006_v52 = vrot.slane %v3001_v11, 6  ;;  %v7719_v63 = vpop.f32.mrb[3].mxu1  ;;  %v3008_v56 = vrot.slane %v3001_v11, 1  ;;  %v3007_v47 = vrot.slane %v3001_v11, 7  ;;  %v9993_v42 = vadd.f32 %v3001_v11, %v13016_v51  ;;  %v13020_v51 = vld [vmem:[#allocation24_spill] sm:$0xff] }
 0x93a   : > { %v3009_v9 = vrot.slane %v3001_v11, 2  ;;  %v3010_v7 = vrot.slane %v3001_v11, 3  ;;  %v3011_v18 = vrot.slane %v3001_v11, 4  ;;  %v3012_v63 = vrot.slane %v3001_v11, 5  ;;  %v13023_v11 = vld [vmem:[#allocation45_spill] sm:$0xff] }
 0x93b   : > { %v9989_v14 = vadd.f32 %v3006_v52, %v13015_v25  ;;  %v9996_v8 = vadd.f32 %v3008_v56, %v13017_v59  ;;  %v9999_v36 = vadd.f32 %v3007_v47, %v13018_v39  ;;  %v13021_v56 = vld [vmem:[#allocation27_spill] sm:$0xff]  ;;  %v13022_v47 = vld [vmem:[#allocation26_spill] sm:$0xff]  ;;  %v10049_v23 = vrot.slane %v13023_v11, 2 }
 0x93c   : > { %v10003_v52 = vadd.f32 %v3009_v9, %v13019_v27  ;;  %v10008_v25 = vadd.f32 %v3010_v7, %v13020_v51  ;;  %v10012_v59 = vadd.f32 %v3011_v18, %v13021_v56  ;;  %v10016_v39 = vadd.f32 %v3012_v63, %v13022_v47 }
 0x93d   : > { %8056 = vtanh.f32 %v9989_v14  ;;  %v10024_v7 = vrot.slane %v13023_v11, 6  ;;  %v10030_v47 = vrot.slane %v13023_v11, 7  ;;  %13029 = vst [vmem:[#allocation74_spill] sm:$0xff] %v10049_v23  ;;  %v10062_v31 = vrot.slane %v13023_v11, 3 }
 0x93e   : > { %8058 = vtanh.f32 %v9993_v42  ;;  %v10068_v12 = vrot.slane %v13023_v11, 5  ;;  %v10084_v53 = vrot.slane %v13023_v11, 4 }
 0x93f   : > { %8060 = vtanh.f32 %v9996_v8  ;;  %v2895_v63 = vmul.f32 %v10024_v7, %v9517_v19  ;;  %13024 = vst [vmem:[#allocation73_spill] sm:$0xff] %v10030_v47  ;;  %v2896_v27 = vmul.f32 %v10030_v47, %v9515_v3  ;;  %13032 = vst [vmem:[#allocation76_spill] sm:$0xff] %v10062_v31 }
 0x940   : > { %8062 = vtanh.f32 %v9999_v36  ;;  %13037 = vst [vmem:[#allocation79_spill] sm:$0xff] %v10084_v53 }
 0x941   : > { %8064 = vtanh.f32 %v10003_v52 }
 0x942   : > { %8066 = vtanh.f32 %v10008_v25 }
 0x943   : > { %8068 = vtanh.f32 %v10012_v59 }
 0x944   : > { %8070 = vtanh.f32 %v10016_v39 }
 0x947   : > { %v8057_v43 = vpop.eup %8056 }
 0x948   : > { %3146 = vrot.lane.b32.xlu0 %v8057_v43, %s8575_s8  ;;  %v8059_v9 = vpop.eup %8058 }
 0x949   : > { %v8061_v43 = vpop.eup %8060  ;;  %3150 = vrot.lane.b32.xlu1 %v8059_v9, %s8575_s8  ;;  %v13025_v9 = vld [vmem:[#allocation43_spill] sm:$0xff] }
 0x94a   : > { %v8063_v18 = vpop.eup %8062  ;;  %v2801_v51 = vmul.f32 %v13025_v9, %v12990_v17  ;;  %v13028_v17 = vld [vmem:[#allocation39_spill] sm:$0xff] }
 0x94b   : > { %v8065_v56 = vpop.eup %8064  ;;  %v2804_v48 = vmul.f32 %v13028_v17, %v9203_v37 }
 0x94c   : > { %3152 = vrot.lane.b32.xlu0 %v8061_v43, %s8575_s8  ;;  %v10036_v43 = vrot.slane %v13023_v11, 1  ;;  %v8067_v28 = vpop.eup %8066  ;;  %v2903_v46 = vadd.f32 %v2895_v63, %v2801_v51  ;;  %v2897_v51 = vmul.f32 %v9587_v26, %v13023_v11 }
 0x94d   : > { %3148 = vrot.lane.b32.xlu1 %v8063_v18, %s8575_s8  ;;  %v8069_v18 = vpop.eup %8068 }
 0x94e   : > { %13026 = vst [vmem:[#allocation43_spill] sm:$0xff] %v10036_v43  ;;  %v2898_v19 = vmul.f32 %v10036_v43, %v9519_v13  ;;  %v8071_v63 = vpop.eup %8070  ;;  %v10053_v43 = vld [vmem:[#allocation5] sm:$0xff] }
 0x94f   : > { %13030 = vst [vmem:[#allocation75_spill] sm:$0xff] %v10053_v43 }
 0x950   : > { %3154 = vrot.lane.b32.xlu0 %v8065_v56, %s8575_s8  ;;  %v2802_v56 = vmul.f32 %v13027_v49, %v9197_v24  ;;  %v2906_v29 = vadd.f32 %v2898_v19, %v2804_v48  ;;  %v2899_v49 = vmul.f32 %v10049_v23, %v9553_v54  ;;  %v10070_v19 = vld [vmem:[#allocation5 + $0x8] sm:$0xff] }
 0x951   : > { %3156 = vrot.lane.b32.xlu1 %v8067_v28, %s8575_s8  ;;  %v3029_v28 = vadd.f32 %v10053_v43, %v2903_v46  ;;  %13034 = vst [vmem:[#allocation77_spill] sm:$0xff] %v10070_v19  ;;  %v10075_v43 = vld [vmem:[#allocation5 + $0x18] sm:$0xff] }
 0x952   : > { %v2904_v47 = vadd.f32 %v2896_v27, %v2802_v56  ;;  %v13033_v27 = vld [vmem:[#allocation40_spill] sm:$0xff]  ;;  %13035 = vst [vmem:[#allocation78_spill] sm:$0xff] %v10075_v43 }
 0x953   : > { %v2805_v56 = vmul.f32 %v13033_v27, %v9232_v0  ;;  %v13036_v27 = vld [vmem:[#allocation42_spill] sm:$0xff] }
 0x954   : > { %3158 = vrot.lane.b32.xlu0 %v8069_v18, %s8575_s8  ;;  %v13031_v18 = vld [vmem:[#allocation29_spill] sm:$0xff]  ;;  %v3030_v48 = vadd.f32 %v10070_v19, %v2904_v47  ;;  %v2806_v5 = vmul.f32 %v13036_v27, %v13003_v35  ;;  %v13041_v27 = vld [vmem:[#allocation36_spill] sm:$0xff] }
 0x955   : > { %3160 = vrot.lane.b32.xlu1 %v8071_v63, %s8575_s8  ;;  %v2803_v17 = vmul.f32 %v9199_v34, %v13031_v18  ;;  %v2900_v63 = vmul.f32 %v10062_v31, %v9678_v20  ;;  %v3032_v18 = vadd.f32 %v10075_v43, %v2906_v29  ;;  %v2907_v23 = vadd.f32 %v2899_v49, %v2805_v56 }
 0x956   : > { %v2901_v56 = vmul.f32 %v10084_v53, %v9779_v2 }
 0x957   : > { %v2905_v46 = vadd.f32 %v2897_v51, %v2803_v17  ;;  %v13038_v17 = vld [vmem:[#allocation41_spill] sm:$0xff]  ;;  %v2908_v49 = vadd.f32 %v2900_v63, %v2806_v5  ;;  %v10104_v63 = vld [vmem:[#allocation5 + $0x38] sm:$0xff] }
 0x958   : > { %3106 = vrot.lane.b32.xlu0 %v3029_v28, %s8575_s8  ;;  %v2902_v28 = vmul.f32 %v10068_v12, %v9727_v30  ;;  %v2808_v47 = vmul.f32 %v13038_v17, %v9280_v4  ;;  %v10089_v51 = vld [vmem:[#allocation5 + $0x10] sm:$0xff]  ;;  %v10101_v4 = vld [vmem:[#allocation5 + $0x28] sm:$0xff]  ;;  %13044 = vst [vmem:[#allocation82_spill] sm:$0xff] %v10104_v63 }
 0x959   : > { %3108 = vrot.lane.b32.xlu1 %v3030_v48, %s8575_s8  ;;  %13039 = vst [vmem:[#allocation41_spill] sm:$0xff] %v10089_v51  ;;  %v3031_v29 = vadd.f32 %v10089_v51, %v2905_v46  ;;  %v10094_v48 = vld [vmem:[#allocation5 + $0x20] sm:$0xff]  ;;  %13043 = vst [vmem:[#allocation81_spill] sm:$0xff] %v10101_v4  ;;  %v3034_v46 = vadd.f32 %v10101_v4, %v2908_v49 }
 0x95a   : > { %13040 = vst [vmem:[#allocation80_spill] sm:$0xff] %v10094_v48  ;;  %v3033_v43 = vadd.f32 %v10094_v48, %v2907_v23  ;;  %v2910_v30 = vadd.f32 %v2902_v28, %v2808_v47  ;;  %v10109_v23 = vld [vmem:[#allocation5 + $0x30] sm:$0xff]  ;;  %v7457_v47 = vmul.f32 -1.442695, %v9993_v42 }
 0x95b   : > { %13045 = vst [vmem:[#allocation83_spill] sm:$0xff] %v10109_v23 }
 0x95c   : > { %3112 = vrot.lane.b32.xlu0 %v3032_v18, %s8575_s8  ;;  %v13042_v18 = vld [vmem:[#allocation44_spill] sm:$0xff]  ;;  %v3036_v51 = vadd.f32 %v10104_v63, %v2910_v30  ;;  %v7459_v30 = vmul.f32 -1.442695, %v10003_v52 }
 0x95d   : > { %3110 = vrot.lane.b32.xlu1 %v3031_v29, %s8575_s8  ;;  %v2807_v31 = vmul.f32 %v13042_v18, %v13041_v27  ;;  %v7456_v29 = vmul.f32 -1.442695, %v9999_v36 }
 0x95f   : > { %v2909_v5 = vadd.f32 %v2901_v56, %v2807_v31  ;;  %v7460_v56 = vmul.f32 -1.442695, %v10008_v25 }
 0x960   : > { %3114 = vrot.lane.b32.xlu0 %v3033_v43, %s8575_s8  ;;  %v7455_v43 = vmul.f32 -1.442695, %v9989_v14  ;;  %v7462_v14 = vmul.f32 -1.442695, %v10016_v39 }
 0x961   : > { %3116 = vrot.lane.b32.xlu1 %v3034_v46, %s8575_s8  ;;  %v3035_v28 = vadd.f32 %v10109_v23, %v2909_v5  ;;  %v7461_v46 = vmul.f32 -1.442695, %v10012_v59 }
 0x962   : > { %8072 = vpow2.f32 %v7455_v43 }
 0x963   : > { %8074 = vpow2.f32 %v7457_v47 }
 0x964   : > { %3120 = vrot.lane.b32.xlu0 %v3036_v51, %s8575_s8  ;;  %8076 = vpow2.f32 %v7456_v29  ;;  %v7458_v51 = vmul.f32 -1.442695, %v9996_v8 }
 0x965   : > { %3118 = vrot.lane.b32.xlu1 %v3035_v28, %s8575_s8  ;;  %8078 = vpow2.f32 %v7459_v30 }
 0x96c   : > { %v8073_v31 = vpop.eup %8072 }
 0x96d   : > { %v3061_v49 = vadd.f32 1.0, %v8073_v31  ;;  %v8075_v42 = vpop.eup %8074 }
 0x96e   : > { %v3063_v36 = vadd.f32 1.0, %v8075_v42  ;;  %v8077_v5 = vpop.eup %8076 }
 0x96f   : > { %8080 = vrcp.f32 %v3061_v49  ;;  %v8079_v52 = vpop.eup %8078  ;;  %v3062_v43 = vadd.f32 1.0, %v8077_v5  ;;  %v7453_v5 = vld [vmem:[%s8798_s3 + $0x10] sm:$0xff] }
 0x970   : > { %8082 = vpow2.f32 %v7458_v51  ;;  %v3065_v59 = vadd.f32 1.0, %v8079_v52  ;;  %v3446_v52 = vld [vmem:[#allocation7] sm:$0xff] }
 0x971   : > { %8084 = vpow2.f32 %v7460_v56 }
 0x972   : > { %8086 = vpow2.f32 %v7461_v46 }
 0x973   : > { %8088 = vpow2.f32 %v7462_v14 }
 0x974   : > { %8090 = vrcp.f32 %v3063_v36 }
 0x975   : > { %8092 = vrcp.f32 %v3062_v43 }
 0x976   : > { %8094 = vrcp.f32 %v3065_v59 }
 0x979   : > { %v10121_v28 = vpop.eup %8080 }
 0x97a   : > { %v8083_v47 = vpop.eup %8082 }
 0x97b   : > { %v8085_v31 = vpop.eup %8084  ;;  %v3064_v39 = vadd.f32 1.0, %v8083_v47  ;;  %v3447_v47 = vadd.f32 %v7453_v5, %v3446_v52 }
 0x97c   : > { %v8087_v29 = vpop.eup %8086  ;;  %v3066_v30 = vadd.f32 1.0, %v8085_v31 }
 0x97d   : > { %v8089_v49 = vpop.eup %8088  ;;  %v3067_v51 = vadd.f32 1.0, %v8087_v29  ;;  %8096 = vrcp.f32 %v3064_v39  ;;  %3448 = vst.msk [vmem:[#allocation7] sm:$0xff] %vm2139_vm7, %v3447_v47 }
 0x97e   : > { %8098 = vrcp.f32 %v3066_v30  ;;  %v3068_v56 = vadd.f32 1.0, %v8089_v49  ;;  %v10125_v46 = vpop.eup %8090 }
 0x97f   : > { %8100 = vrcp.f32 %v3067_v51 }
 0x980   : > { %8102 = vrcp.f32 %v3068_v56 }
 0x9ba   : > { %v3147_v8 = vpop.permute.xlu0 %3146 }
 0x9bb   : > { %v3170_v25 = vmul.f32 %v10121_v28, %v3147_v8  ;;  %v3151_v14 = vpop.permute.xlu1 %3150  ;;  %v10130_v8 = vpop.eup %8092 }
 0x9bc   : > { %v3172_v42 = vmul.f32 %v10125_v46, %v3151_v14 }
 0x9bd   : > { %3186 = vrot.lane.b32.xlu1 %v3170_v25, %s8575_s8  ;;  %v10132_v25 = vpop.eup %8094 }
 0x9be   : > { %v3153_v36 = vpop.permute.xlu0 %3152  ;;  %3190 = vrot.lane.b32.xlu0 %v3172_v42, %s8575_s8  ;;  %v10138_v39 = vpop.eup %8096 }
 0x9bf   : > { %v3149_v43 = vpop.permute.xlu1 %3148  ;;  %v10141_v49 = vpop.eup %8098  ;;  %v3173_v51 = vmul.f32 %v10138_v39, %v3153_v36 }
 0x9c0   : > { %v3171_v59 = vmul.f32 %v10130_v8, %v3149_v43  ;;  %v10144_v14 = vpop.eup %8100 }
 0x9c1   : > { %v10150_v47 = vpop.eup %8102 }
 0x9c2   : > { %v3155_v31 = vpop.permute.xlu0 %3154  ;;  %3188 = vrot.lane.b32.xlu0 %v3171_v59, %s8575_s8 }
 0x9c3   : > { %v3174_v29 = vmul.f32 %v10132_v25, %v3155_v31  ;;  %v3157_v30 = vpop.permute.xlu1 %3156 }
 0x9c4   : > { %v3175_v42 = vmul.f32 %v10141_v49, %v3157_v30 }
 0x9c5   : > { %3194 = vrot.lane.b32.xlu1 %v3174_v29, %s8575_s8 }
 0x9c6   : > { %v3159_v56 = vpop.permute.xlu0 %3158  ;;  %3192 = vrot.lane.b32.xlu0 %v3173_v51, %s8575_s8 }
 0x9c7   : > { %v3176_v52 = vmul.f32 %v10144_v14, %v3159_v56  ;;  %v3161_v43 = vpop.permute.xlu1 %3160 }
 0x9c8   : > { %v3177_v59 = vmul.f32 %v10150_v47, %v3161_v43 }
 0x9c9   : > { %3196 = vrot.lane.b32.xlu1 %v3175_v42, %s8575_s8 }
 0x9ca   : > { %3198 = vrot.lane.b32.xlu0 %v3176_v52, %s8575_s8  ;;  %v3107_v31 = vpop.permute.xlu0 %3106 }
 0x9cb   : > { %v3109_v36 = vpop.permute.xlu1 %3108  ;;  %v3130_v42 = vmul.f32 %v10121_v28, %v3107_v31 }
 0x9cc   : > { %v3131_v53 = vmul.f32 %v10130_v8, %v3109_v36 }
 0x9cd   : > { %3200 = vrot.lane.b32.xlu1 %v3177_v59, %s8575_s8 }
 0x9ce   : > { %3095 = vperm.xlu0 %7939, %v7453_v5   ;;  %v3113_v30 = vpop.permute.xlu0 %3112 }
 0x9cf   : > { %v3111_v29 = vpop.permute.xlu1 %3110  ;;  %v3133_v2 = vmul.f32 %v10138_v39, %v3113_v30 }
 0x9d0   : > { %v3132_v57 = vmul.f32 %v10125_v46, %v3111_v29 }
 0x9d2   : > { %v3115_v51 = vpop.permute.xlu0 %3114 }
 0x9d3   : > { %v3117_v63 = vpop.permute.xlu1 %3116  ;;  %v3134_v52 = vmul.f32 %v10132_v25, %v3115_v51 }
 0x9d4   : > { %v3135_v62 = vmul.f32 %v10141_v49, %v3117_v63 }
 0x9d6   : > { %v3121_v56 = vpop.permute.xlu0 %3120 }
 0x9d7   : > { %v3119_v23 = vpop.permute.xlu1 %3118 }
 0xa2f   : > { %v3187_v18 = vpop.permute.xlu1 %3186 }
 0xa30   : > { %v3191_v4 = vpop.permute.xlu0 %3190  ;;  %v3210_v43 = vadd.f32 %v3187_v18, %v3130_v42 }
 0xa31   : > { %v3212_v18 = vadd.f32 %v3191_v4, %v3132_v57 }
 0xa32   : > { %v3226_v19 = vrot.slane %v3210_v43, 2 }
 0xa34   : > { %v3189_v48 = vpop.permute.xlu0 %3188 }
 0xa35   : > { %v3211_v59 = vadd.f32 %v3189_v48, %v3131_v53  ;;  %v3136_v53 = vmul.f32 %v10144_v14, %v3119_v23 }
 0xa37   : > { %v3195_v5 = vpop.permute.xlu1 %3194  ;;  %v3227_v11 = vrot.slane %v3211_v59, 1 }
 0xa38   : > { %v3214_v27 = vadd.f32 %v3195_v5, %v3134_v52  ;;  %v3193_v16 = vpop.permute.xlu0 %3192  ;;  %v3137_v52 = vmul.f32 %v10150_v47, %v3121_v56 }
 0xa39   : > { %v3228_v31 = vsel %vm1907_vm8, %v3227_v11, %v3226_v19  ;;  %v3213_v40 = vadd.f32 %v3193_v16, %v3133_v2 }
 0xa3a   : > { %v3232_v42 = vrot.slane %v3214_v27, 6  ;;  %v3229_v30 = vsel %vm1910_vm9, %v3212_v18, %v3228_v31  ;;  %v8584_v27 = vmov 2  }
 0xa3b   : > { %v3197_v36 = vpop.permute.xlu1 %3196  ;;  %v3230_v48 = vrot.slane %v3213_v40, 7  ;;  %7941 = vset.pattern.permute.xlu0 %v8584_v27  ;;  %7940 = vset.pattern.permute.xlu1 %v8584_v27 }
 0xa3c   : > { %v3215_v51 = vadd.f32 %v3197_v36, %v3135_v62  ;;  %v3199_v43 = vpop.permute.xlu0 %3198  ;;  %v13047_v36 = vld [vmem:[#allocation28_spill] sm:$0xff] }
 0xa3d   : > { %v3231_v29 = vsel %vm1913_vm10, %v3230_v48, %v3229_v30  ;;  %v3216_v63 = vadd.f32 %v3199_v43, %v3136_v53 }
 0xa3e   : > { %v3234_v59 = vrot.slane %v3215_v51, 5  ;;  %v3233_v11 = vsel %vm1916_vm11, %v3232_v42, %v3231_v29 }
 0xa3f   : > { %v3201_v5 = vpop.permute.xlu1 %3200  ;;  %v3236_v16 = vrot.slane %v3216_v63, 4 }
 0xa40   : > { %v3217_v2 = vadd.f32 %v3201_v5, %v3137_v52  ;;  %v3235_v4 = vsel %vm1919_vm12, %v3234_v59, %v3233_v11 }
 0xa41   : > { %v3237_v57 = vsel %vm1922_vm13, %v3236_v16, %v3235_v4 }
 0xa42   : > { %v3238_v62 = vrot.slane %v3217_v2, 3 }
 0xa44   : > { %v3239_v40 = vsel %vm1925_vm14, %v3238_v62, %v3237_v57 }
 0xa45   : > { %3240 = vrot.lane.b32.xlu1 %v3239_v40, %s8577_s9 }
 0xa4d   : > { %v10171_v19 = vpop.permute.xlu0 %3095 }
 0xab7   : > { %v3241_v23 = vpop.permute.xlu1 %3240 }
 0xab8   : > { %v10174_v56 = vmul.f32 %v3241_v23, %v10171_v19  ;;  %v10211_v23 = vld [vmem:[%s8781_s4 + $0x8] sm:$0xff] }
 0xab9   : > { %13048 = vst [vmem:[#allocation85_spill] sm:$0xff] %v10211_v23 }
 0xaba   : > { %13046 = vst [vmem:[#allocation84_spill] sm:$0xff] %v10174_v56  ;;  %8104 = vtanh.f32 %v10174_v56  ;;  %v3378_v31 = vcombine.high %v10174_v56, %v10174_v56  ;;  %v3385_v18 = vrot.slane %v10174_v56, %v13047_v36 }
 0xabc   : > { %v3392_v42 = vrot.slane %v3378_v31, %v13047_v36  ;;  %v3393_v51 = vcombine.high %v3385_v18, %v3385_v18  ;;  %v3401_v53 = vrot.slane %v3385_v18, %v13047_v36  ;;  %v10215_v31 = vld [vmem:[%s8781_s4] sm:$0xff] }
 0xabd   : > { %13049 = vst [vmem:[#allocation86_spill] sm:$0xff] %v10215_v31  ;;  %v10219_v18 = vld [vmem:[%s8781_s4 + $0x20] sm:$0xff] }
 0xabe   : > { %v3394_v48 = vcombine.high %v3392_v42, %v3392_v42  ;;  %v3408_v52 = vrot.slane %v3392_v42, %v13047_v36  ;;  %v3415_v30 = vrot.slane %v3393_v51, %v13047_v36  ;;  %v3423_v43 = vcombine.high %v3401_v53, %v3401_v53  ;;  %3435 = vst.msk [vmem:[%s9106_s11 + $0x2] sm:$0x1] %vm2058_vm15, %v3401_v53  ;;  %v10223_v42 = vld [vmem:[%s8781_s4 + $0x10] sm:$0xff]  ;;  %v10227_v51 = vld [vmem:[%s8781_s4 + $0x28] sm:$0xff]  ;;  %v10231_v53 = vld [vmem:[%s8781_s4 + $0x18] sm:$0xff] }
 0xabf   : > { %13050 = vst [vmem:[#allocation87_spill] sm:$0xff] %v10219_v18  ;;  %13051 = vst [vmem:[#allocation88_spill] sm:$0xff] %v10223_v42 }
 0xac0   : > { %v3422_v59 = vrot.slane %v3394_v48, %v13047_v36  ;;  %v3424_v29 = vcombine.high %v3408_v52, %v3408_v52  ;;  %v3425_v63 = vcombine.high %v3415_v30, %v3415_v30  ;;  %3436 = vst.msk [vmem:[%s9106_s11 + $0x12] sm:$0x1] %vm2058_vm15, %v3415_v30  ;;  %3437 = vst.msk [vmem:[%s9106_s11 + $0x22] sm:$0x1] %vm2058_vm15, %v3423_v43  ;;  %v8370_v48 = vld [vmem:[%s8781_s4 + $0x38] sm:$0xff] }
 0xac1   : > { %3439 = vst.msk [vmem:[%s9106_s11 + $0x42] sm:$0x1] %vm2058_vm15, %v3408_v52  ;;  %13052 = vst [vmem:[#allocation89_spill] sm:$0xff] %v10227_v51 }
 0xac2   : > { %v3426_v5 = vcombine.high %v3422_v59, %v3422_v59  ;;  %3438 = vst.msk [vmem:[%s9106_s11 + $0x32] sm:$0x1] %vm2058_vm15, %v3425_v63  ;;  %3440 = vst.msk [vmem:[%s9106_s11 + $0x52] sm:$0x1] %vm2058_vm15, %v3422_v59 }
 0xac3   : > { %3441 = vst.msk [vmem:[%s9106_s11 + $0x62] sm:$0x1] %vm2058_vm15, %v3424_v29  ;;  %13053 = vst [vmem:[#allocation90_spill] sm:$0xff] %v10231_v53 }
 0xac4   : > { %v8105_v11 = vpop.eup %8104  ;;  %3442 = vst.msk [vmem:[%s9106_s11 + $0x72] sm:$0x1] %vm2058_vm15, %v3426_v5 }
 0xac5   : > { %3257 = vrot.lane.b32.xlu0 %v8105_v11, %s8579_s14  ;;  %v3246_v2 = vrot.slane %v8105_v11, 6  ;;  %v3247_v16 = vrot.slane %v8105_v11, 7  ;;  %v3248_v4 = vrot.slane %v8105_v11, 1  ;;  %v3250_v62 = vrot.slane %v8105_v11, 3 }
 0xac6   : > { %v3249_v57 = vrot.slane %v8105_v11, 2  ;;  %v3252_v40 = vrot.slane %v8105_v11, 5  ;;  %v3251_v27 = vrot.slane %v8105_v11, 4 }
 0xac7   : > { %3253 = vrot.lane.b32.xlu1 %v3246_v2, %s8579_s14 }
 0xac9   : > { %3255 = vrot.lane.b32.xlu0 %v3247_v16, %s8579_s14 }
 0xacb   : > { %3259 = vrot.lane.b32.xlu1 %v3248_v4, %s8579_s14 }
 0xacd   : > { %3263 = vrot.lane.b32.xlu0 %v3250_v62, %s8579_s14 }
 0xacf   : > { %3261 = vrot.lane.b32.xlu1 %v3249_v57, %s8579_s14 }
 0xad1   : > { %3267 = vrot.lane.b32.xlu0 %v3252_v40, %s8579_s14 }
 0xad3   : > { %3265 = vrot.lane.b32.xlu1 %v3251_v27, %s8579_s14 }
 0xad5   : > { %3520 = vperm.xlu0 %7941, %v10211_v23  }
 0xad7   : > { %3516 = vperm.xlu1 %7940, %v10215_v31  }
 0xad9   : > { %3532 = vperm.xlu0 %7941, %v10219_v18  }
 0xadb   : > { %3524 = vperm.xlu1 %7940, %v10223_v42  }
 0xadd   : > { %3536 = vperm.xlu0 %7941, %v10227_v51  }
 0xadf   : > { %3528 = vperm.xlu1 %7940, %v10231_v53  }
 0xae1   : > { %3544 = vperm.xlu0 %7941, %v8370_v48  }
 0xb37   : > { %v3258_v52 = vpop.permute.xlu0 %3257 }
 0xb38   : > { %v3279_v4 = vmul.f32 %v10125_v46, %v3258_v52 }
 0xb39   : > { %v3254_v30 = vpop.permute.xlu1 %3253 }
 0xb3a   : > { %v3277_v43 = vmul.f32 %v10121_v28, %v3254_v30 }
 0xb3b   : > { %v3256_v59 = vpop.permute.xlu0 %3255 }
 0xb3c   : > { %v3278_v29 = vmul.f32 %v10130_v8, %v3256_v59  ;;  %v3293_v5 = vrot.slane %v3277_v43, 2 }
 0xb3d   : > { %v3260_v63 = vpop.permute.xlu1 %3259 }
 0xb3e   : > { %v3294_v11 = vrot.slane %v3278_v29, 1  ;;  %v3280_v2 = vmul.f32 %v10138_v39, %v3260_v63 }
 0xb3f   : > { %v3264_v16 = vpop.permute.xlu0 %3263 }
 0xb40   : > { %v3295_v62 = vsel %vm1907_vm8, %v3294_v11, %v3293_v5  ;;  %v3297_v57 = vrot.slane %v3280_v2, 7  ;;  %v3282_v28 = vmul.f32 %v10141_v49, %v3264_v16  ;;  %v10252_v2 = vld [vmem:[%s8781_s4 + $0x30] sm:$0xff]  ;;  %v4166_v16 = vmul.f32 %v13038_v17, %v9197_v24 }
 0xb41   : > { %v3262_v40 = vpop.permute.xlu1 %3261  ;;  %v3296_v27 = vsel %vm1910_vm9, %v3279_v4, %v3295_v62  ;;  %13054 = vst [vmem:[#allocation91_spill] sm:$0xff] %v10252_v2  ;;  %v13056_v62 = vmov 0  }
 0xb42   : > { %v3281_v48 = vmul.f32 %v10132_v25, %v3262_v40  ;;  %v3298_v43 = vsel %vm1913_vm10, %v3297_v57, %v3296_v27  ;;  %v3301_v29 = vrot.slane %v3282_v28, 5  ;;  %v4199_v28 = vmul.f32 %v10024_v7, %v9587_v26 }
 0xb43   : > { %v3268_v8 = vpop.permute.xlu0 %3267 }
 0xb44   : > { %v3299_v30 = vrot.slane %v3281_v48, 6  ;;  %v3284_v39 = vmul.f32 %v10150_v47, %v3268_v8  ;;  %v4198_v47 = vmul.f32 %v10068_v12, %v9515_v3  ;;  %v4929_v8 = vmul.f32 %v10068_v12, %v9587_v26 }
 0xb45   : > { %v3266_v59 = vpop.permute.xlu1 %3265 }
 0xb46   : > { %v3300_v46 = vsel %vm1916_vm11, %v3299_v30, %v3298_v43  ;;  %v3283_v52 = vmul.f32 %v10144_v14, %v3266_v59  ;;  %v3305_v5 = vrot.slane %v3284_v39, 3  ;;  %v10258_v14 = vrot.slane %v10174_v56, 5 }
 0xb47   : > { %v3302_v11 = vsel %vm1919_vm12, %v3301_v29, %v3300_v46  ;;  %v4206_v57 = vadd.f32 %v4198_v47, %v4166_v16  ;;  %v10276_v30 = vrot.slane %v10174_v56, 6  ;;  %v4167_v43 = vmul.f32 %v13025_v9, %v9199_v34 }
 0xb48   : > { %v3303_v63 = vrot.slane %v3283_v52, 4  ;;  %v4897_v59 = vmul.f32 %v13038_v17, %v9199_v34  ;;  %v4930_v29 = vmul.f32 %v10024_v7, %v9519_v13  ;;  %v4898_v47 = vmul.f32 %v13025_v9, %v9203_v37 }
 0xb49   : > { %v4207_v46 = vadd.f32 %v4199_v28, %v4167_v43  ;;  %v5660_v43 = vmul.f32 %v13038_v17, %v9203_v37 }
 0xb4a   : > { %v3304_v25 = vsel %vm1922_vm13, %v3303_v63, %v3302_v11  ;;  %v4937_v63 = vadd.f32 %v4929_v8, %v4897_v59  ;;  %v4938_v28 = vadd.f32 %v4930_v29, %v4898_v47  ;;  %v5661_v59 = vmul.f32 %v13025_v9, %v9232_v0 }
 0xb4b   : > { %v3306_v49 = vsel %vm1925_vm14, %v3305_v5, %v3304_v25  ;;  %v6488_v47 = vmul.f32 %v10024_v7, %v9678_v20 }
 0xb4c   : > { %3307 = vrot.lane.b32.xlu1 %v3306_v49, %s8579_s14 }
 0xb50   : > { %3540 = vperm.xlu1 %7940, %v10252_v2  }
 0xb54   : > { %v10262_v4 = vpop.permute.xlu0 %3520  ;;  %7942 = vset.pattern.permute.xlu1 %v13056_v62 }
 0xb55   : > { %13055 = vst [vmem:[#allocation92_spill] sm:$0xff] %v10262_v4  ;;  %v4230_v40 = vmul.f32 %v10258_v14, %v10262_v4 }
 0xb56   : > { %v10267_v27 = vpop.permute.xlu1 %3516 }
 0xb57   : > { %13057 = vst [vmem:[#allocation93_spill] sm:$0xff] %v10267_v27  ;;  %v10269_v48 = vadd.f32 %v4230_v40, %v4206_v57  ;;  %v5692_v57 = vmul.f32 %v10068_v12, %v9519_v13  ;;  %v5693_v40 = vmul.f32 %v10024_v7, %v9553_v54 }
 0xb58   : > { %v10292_v25 = vpop.permute.xlu0 %3532 }
 0xb59   : > { %13058 = vst [vmem:[#allocation94_spill] sm:$0xff] %v10269_v48  ;;  %v5701_v48 = vadd.f32 %v5693_v40, %v5661_v59  ;;  %v5725_v29 = vmul.f32 %v10276_v30, %v10292_v25  ;;  %v6519_v40 = vmul.f32 %v10258_v14, %v10292_v25 }
 0xb5a   : > { %v10280_v39 = vpop.permute.xlu1 %3524 }
 0xb5b   : > { %13059 = vst [vmem:[#allocation95_spill] sm:$0xff] %v10280_v39  ;;  %v4231_v52 = vmul.f32 %v10276_v30, %v10280_v39  ;;  %v4961_v5 = vmul.f32 %v10258_v14, %v10280_v39 }
 0xb5d   : > { %v10290_v11 = vadd.f32 %v4231_v52, %v4207_v46  ;;  %v10298_v16 = vadd.f32 %v4961_v5, %v4937_v63  ;;  %v5700_v52 = vadd.f32 %v5692_v57, %v5660_v43  ;;  %v6487_v63 = vmul.f32 %v10068_v12, %v9553_v54 }
 0xb5e   : > { %v10294_v49 = vpop.permute.xlu1 %3528  ;;  %v10326_v57 = vadd.f32 %v5725_v29, %v5701_v48  ;;  %v6456_v43 = vmul.f32 %v13025_v9, %v13003_v35 }
 0xb5f   : > { %13060 = vst [vmem:[#allocation96_spill] sm:$0xff] %v10290_v11  ;;  %13061 = vst [vmem:[#allocation97_spill] sm:$0xff] %v10298_v16  ;;  %v4962_v8 = vmul.f32 %v10276_v30, %v10294_v49  ;;  %v5724_v5 = vmul.f32 %v10258_v14, %v10294_v49  ;;  %v10320_v11 = vpop.permute.xlu0 %3536 }
 0xb60   : > { %13063 = vst [vmem:[#allocation99_spill] sm:$0xff] %v10320_v11  ;;  %13065 = vst [vmem:[#allocation101_spill] sm:$0xff] %v10326_v57  ;;  %v6496_v59 = vadd.f32 %v6488_v47, %v6456_v43  ;;  %v6520_v16 = vmul.f32 %v10276_v30, %v10320_v11 }
 0xb61   : > { %v10310_v46 = vadd.f32 %v4962_v8, %v4938_v28  ;;  %v6455_v28 = vmul.f32 %v13038_v17, %v9232_v0  ;;  %v10324_v8 = vadd.f32 %v5724_v5, %v5700_v52 }
 0xb62   : > { %v10336_v2 = vadd.f32 %v6520_v16, %v6496_v59 }
 0xb63   : > { %13062 = vst [vmem:[#allocation98_spill] sm:$0xff] %v10310_v46  ;;  %13064 = vst [vmem:[#allocation100_spill] sm:$0xff] %v10324_v8  ;;  %v6495_v46 = vadd.f32 %v6487_v63, %v6455_v28  ;;  %v10390_v31 = vpop.permute.xlu0 %3544 }
 0xb64   : > { %13067 = vst [vmem:[#allocation103_spill] sm:$0xff] %v10336_v2  ;;  %13068 = vst [vmem:[#allocation104_spill] sm:$0xff] %v10390_v31 }
 0xb65   : > { %v10334_v62 = vadd.f32 %v6519_v40, %v6495_v46 }
 0xb67   : > { %13066 = vst [vmem:[#allocation102_spill] sm:$0xff] %v10334_v62 }
 0xbbe   : > { %v3308_v51 = vpop.permute.xlu1 %3307 }
 0xbbf   : > { %v10339_v52 = vmul.f32 %v3308_v51, %v10171_v19 }
 0xbc1   : > { %v3312_v48 = vcombine.high %v10339_v52, %v10339_v52  ;;  %v3319_v63 = vrot.slane %v10339_v52, %v13047_v36  ;;  %v10346_v5 = vrot.slane %v10339_v52, 5  ;;  %v10349_v29 = vrot.slane %v10339_v52, 6 }
 0xbc2   : > { %v10352_v16 = vrot.slane %v10339_v52, 7  ;;  %v10355_v46 = vrot.slane %v10339_v52, 1  ;;  %v10358_v19 = vrot.slane %v10339_v52, 2  ;;  %v10363_v43 = vrot.slane %v10339_v52, 4 }
 0xbc3   : > { %v3326_v51 = vrot.slane %v3312_v48, %v13047_v36  ;;  %v3327_v47 = vcombine.high %v3319_v63, %v3319_v63  ;;  %v3335_v28 = vrot.slane %v3319_v63, %v13047_v36  ;;  %v3562_v40 = vmul.f32 %v10346_v5, %v10267_v27 }
 0xbc4   : > { %v3563_v59 = vmul.f32 %v10349_v29, %v10262_v4  ;;  %v3564_v2 = vmul.f32 %v10352_v16, %v10280_v39  ;;  %v3565_v57 = vmul.f32 %v10294_v49, %v10339_v52  ;;  %v3566_v53 = vmul.f32 %v10355_v46, %v10292_v25 }
 0xbc5   : > { %v3328_v62 = vcombine.high %v3326_v51, %v3326_v51  ;;  %v3342_v48 = vrot.slane %v3326_v51, %v13047_v36  ;;  %v3349_v63 = vrot.slane %v3327_v47, %v13047_v36  ;;  %v3357_v8 = vcombine.high %v3335_v28, %v3335_v28  ;;  %3369 = vst.msk [vmem:[%s9238_s15 + $0x2] sm:$0x1] %vm2058_vm15, %v3335_v28 }
 0xbc6   : > { %v3567_v18 = vmul.f32 %v10358_v19, %v10320_v11  ;;  %v3570_v42 = vadd.f32 %v3562_v40, %v9764_v21  ;;  %v3571_v28 = vadd.f32 %v3563_v59, %v9767_v1  ;;  %v10393_v35 = vrot.slane %v10339_v52, 3 }
 0xbc7   : > { %v3356_v51 = vrot.slane %v3328_v62, %v13047_v36  ;;  %v3358_v47 = vcombine.high %v3342_v48, %v3342_v48  ;;  %v3359_v23 = vcombine.high %v3349_v63, %v3349_v63  ;;  %3370 = vst.msk [vmem:[%s9238_s15 + $0x12] sm:$0x1] %vm2058_vm15, %v3349_v63  ;;  %3371 = vst.msk [vmem:[%s9238_s15 + $0x22] sm:$0x1] %vm2058_vm15, %v3357_v8 }
 0xbc8   : > { %3373 = vst.msk [vmem:[%s9238_s15 + $0x42] sm:$0x1] %vm2058_vm15, %v3342_v48  ;;  %v3572_v21 = vadd.f32 %v3564_v2, %v9771_v6  ;;  %v3574_v62 = vadd.f32 %v3566_v53, %v9777_v61  ;;  %v3575_v40 = vadd.f32 %v3567_v18, %v9783_v58  ;;  %v3569_v1 = vmul.f32 %v10363_v43, %v10390_v31 }
 0xbc9   : > { %v3360_v36 = vcombine.high %v3356_v51, %v3356_v51  ;;  %3372 = vst.msk [vmem:[%s9238_s15 + $0x32] sm:$0x1] %vm2058_vm15, %v3359_v23  ;;  %3374 = vst.msk [vmem:[%s9238_s15 + $0x52] sm:$0x1] %vm2058_vm15, %v3356_v51  ;;  %v3617_v8 = vrot.slane %v3570_v42, 3  ;;  %v3618_v59 = vrot.slane %v3571_v28, 2  ;;  %v3573_v48 = vadd.f32 %v3565_v57, %v9774_v50 }
 0xbca   : > { %3375 = vst.msk [vmem:[%s9238_s15 + $0x62] sm:$0x1] %vm2058_vm15, %v3358_v47  ;;  %v3620_v63 = vrot.slane %v3572_v21, 1  ;;  %v3623_v6 = vrot.slane %v3574_v62, 7  ;;  %v4213_v61 = vmul.f32 %v10363_v43, %v10267_v27  ;;  %v3625_v23 = vrot.slane %v3575_v40, 6 }
 0xbcb   : > { %3376 = vst.msk [vmem:[%s9238_s15 + $0x72] sm:$0x1] %vm2058_vm15, %v3360_v36  ;;  %v3619_v58 = vsel %vm1907_vm8, %v3618_v59, %v3617_v8  ;;  %v4214_v18 = vmul.f32 %v10346_v5, %v10262_v4  ;;  %v4215_v53 = vmul.f32 %v10349_v29, %v10280_v39  ;;  %v4216_v50 = vmul.f32 %v10352_v16, %v10294_v49 }
 0xbcc   : > { %v3621_v42 = vsel %vm1910_vm9, %v3620_v63, %v3619_v58  ;;  %v4217_v2 = vmul.f32 %v10292_v25, %v10339_v52  ;;  %v4218_v36 = vmul.f32 %v10355_v46, %v10320_v11  ;;  %v4220_v51 = vmul.f32 %v10393_v35, %v10390_v31 }
 0xbcd   : > { %v3622_v57 = vsel %vm1913_vm10, %v3573_v48, %v3621_v42  ;;  %v10427_v47 = vadd.f32 %v4213_v61, %v9826_v32  ;;  %v10430_v28 = vadd.f32 %v4214_v18, %v9829_v41  ;;  %v10434_v62 = vadd.f32 %v4215_v53, %v9832_v44  ;;  %v13071_v32 = vld [vmem:[#allocation67_spill] sm:$0xff]  ;;  %v13072_v41 = vld [vmem:[#allocation69_spill] sm:$0xff] }
 0xbce   : > { %v3624_v21 = vsel %vm1916_vm11, %v3623_v6, %v3622_v57  ;;  %v10437_v40 = vadd.f32 %v4216_v50, %v9835_v33  ;;  %v10440_v8 = vadd.f32 %v4217_v2, %v9838_v15  ;;  %v10446_v63 = vadd.f32 %v4218_v36, %v13071_v32  ;;  %v13074_v6 = vld [vmem:[#allocation65_spill] sm:$0xff]  ;;  %v13075_v50 = vld [vmem:[#allocation66_spill] sm:$0xff]  ;;  %v13076_v36 = vld [vmem:[#allocation68_spill] sm:$0xff] }
 0xbcf   : > { %v10442_v59 = vpop.permute.xlu1 %3540  ;;  %v3626_v48 = vsel %vm1919_vm12, %v3625_v23, %v3624_v21  ;;  %v10449_v61 = vadd.f32 %v4220_v51, %v13072_v41  ;;  %v4943_v44 = vmul.f32 %v10393_v35, %v10267_v27  ;;  %v3577_v58 = vadd.f32 %v3569_v1, %v13074_v6 }
 0xbd0   : > { %13069 = vst [vmem:[#allocation105_spill] sm:$0xff] %v10440_v8  ;;  %13070 = vst [vmem:[#allocation106_spill] sm:$0xff] %v10442_v59  ;;  %v3568_v33 = vmul.f32 %v10393_v35, %v10442_v59  ;;  %v4219_v15 = vmul.f32 %v10358_v19, %v10442_v59  ;;  %v4944_v23 = vmul.f32 %v10363_v43, %v10262_v4  ;;  %v13083_v8 = vld [vmem:[#allocation35_spill] sm:$0xff] }
 0xbd1   : > { %13073 = vst [vmem:[#allocation67_spill] sm:$0xff] %v10449_v61  ;;  %v4945_v18 = vmul.f32 %v10346_v5, %v10280_v39  ;;  %v4946_v53 = vmul.f32 %v10349_v29, %v10294_v49  ;;  %v4947_v42 = vmul.f32 %v10352_v16, %v10292_v25  ;;  %v4948_v1 = vmul.f32 %v10320_v11, %v10339_v52 }
 0xbd2   : > { %v3576_v2 = vadd.f32 %v3568_v33, %v13075_v50  ;;  %v10468_v57 = vadd.f32 %v4219_v15, %v13076_v36  ;;  %v4949_v51 = vmul.f32 %v10355_v46, %v10442_v59  ;;  %v4950_v21 = vmul.f32 %v10358_v19, %v10390_v31 }
 0xbd3   : > { %v10477_v32 = vadd.f32 %v4943_v44, %v9876_v55  ;;  %v3629_v6 = vrot.slane %v3577_v58, 4  ;;  %v10480_v61 = vadd.f32 %v4944_v23, %v9879_v45  ;;  %v10483_v33 = vadd.f32 %v4945_v18, %v9883_v10  ;;  %v13085_v58 = vld [vmem:[#allocation49_spill] sm:$0xff]  ;;  %v13089_v18 = vld [vmem:[#allocation51_spill] sm:$0xff] }
 0xbd4   : > { %v3627_v41 = vrot.slane %v3576_v2, 5  ;;  %v10486_v15 = vadd.f32 %v4946_v53, %v9886_v38  ;;  %v10489_v50 = vadd.f32 %v4947_v42, %v9889_v60  ;;  %v10492_v36 = vadd.f32 %v4948_v1, %v9892_v22  ;;  %v13093_v1 = vld [vmem:[#allocation52_spill] sm:$0xff] }
 0xbd5   : > { %13077 = vst [vmem:[#allocation69_spill] sm:$0xff] %v10477_v32  ;;  %13078 = vst [vmem:[#allocation65_spill] sm:$0xff] %v10480_v61  ;;  %v10495_v55 = vadd.f32 %v4949_v51, %v13083_v8  ;;  %v10499_v45 = vadd.f32 %v4950_v21, %v13085_v58  ;;  %v5705_v10 = vmul.f32 %v10358_v19, %v10267_v27  ;;  %v13092_v2 = vmov 0.0   ;;  %v13095_v21 = vld [vmem:[#allocation53_spill] sm:$0xff] }
 0xbd6   : > { %13079 = vst [vmem:[#allocation66_spill] sm:$0xff] %v10483_v33  ;;  %13080 = vst [vmem:[#allocation68_spill] sm:$0xff] %v10486_v15  ;;  %v3628_v44 = vsel %vm1922_vm13, %v3627_v41, %v3626_v48  ;;  %v6500_v38 = vmul.f32 %v10358_v19, %v10262_v4  ;;  %v5710_v22 = vmul.f32 %v10352_v16, %v10320_v11  ;;  %v13087_v48 = vld [vmem:[#allocation50_spill] sm:$0xff] }
 0xbd7   : > { %13081 = vst [vmem:[#allocation107_spill] sm:$0xff] %v10489_v50  ;;  %13082 = vst [vmem:[#allocation108_spill] sm:$0xff] %v10492_v36  ;;  %v3630_v60 = vsel %vm1925_vm14, %v3629_v6, %v3628_v44  ;;  %v5711_v8 = vmul.f32 %v10442_v59, %v10339_v52  ;;  %v10512_v23 = vadd.f32 %v5705_v10, %v13087_v48  ;;  %v13091_v19 = vld [vmem:[#allocation18_spill] sm:$0xff]  ;;  %v13097_v6 = vmov 0.0|0.0   ;;  %v13100_v48 = vld [vmem:[#allocation55_spill] sm:$0xff] }
 0xbd8   : > { %13084 = vst [vmem:[#allocation35_spill] sm:$0xff] %v10495_v55  ;;  %13086 = vst [vmem:[#allocation49_spill] sm:$0xff] %v10499_v45  ;;  %7729 = vmatmul.mubr.msk.f32.vlgmr.msra.gmra.mrb[8].mxu0 %vm1570_vm6, %v3630_v60  ;;  %v10515_v53 = vadd.f32 %v6500_v38, %v13089_v18  ;;  %v6505_v42 = vmul.f32 %v10352_v16, %v10442_v59  ;;  %v10523_v51 = vadd.f32 %v5710_v22, %v13093_v1  ;;  %v13098_v44 = vld [vmem:[#allocation54_spill] sm:$0xff]  ;;  %v13147_v55 = vld [vmem:[#allocation75_spill] sm:$0xff] }
 0xbd9   : > { %13088 = vst [vmem:[#allocation50_spill] sm:$0xff] %v10512_v23  ;;  %7809 = vmatpush3.bf16.msra.mxu0 %v13091_v19  ;;  %7750 = vmatprep.mubr.msk.f32.mxu0 %vm8581_vm0, %v13092_v2  ;;  %v10526_v41 = vadd.f32 %v5711_v8, %v13095_v21  ;;  %v5706_v10 = vmul.f32 %v10393_v35, %v10262_v4  ;;  %v13105_v2 = vld [vmem:[#allocation57_spill] sm:$0xff] }
 0xbda   : > { %13090 = vst [vmem:[#allocation51_spill] sm:$0xff] %v10515_v53  ;;  %13094 = vst [vmem:[#allocation52_spill] sm:$0xff] %v10523_v51  ;;  %7810 = vmatprep.subr.bf16.mxu0 %v13097_v6  ;;  %v10530_v58 = vadd.f32 %v6505_v42, %v13098_v44  ;;  %v5707_v16 = vmul.f32 %v10363_v43, %v10280_v39  ;;  %v5708_v38 = vmul.f32 %v10346_v5, %v10294_v49  ;;  %v13102_v42 = vld [vmem:[#allocation56_spill] sm:$0xff]  ;;  %v13104_v44 = vld [vmem:[#allocation19_spill] sm:$0xff] }
 0xbdb   : > { %13096 = vst [vmem:[#allocation53_spill] sm:$0xff] %v10526_v41  ;;  %v5709_v60 = vmul.f32 %v10349_v29, %v10292_v25  ;;  %v5712_v22 = vmul.f32 %v10355_v46, %v10390_v31  ;;  %v6499_v8 = vmul.f32 %v10355_v46, %v10267_v27  ;;  %v10545_v18 = vadd.f32 %v5706_v10, %v13100_v48  ;;  %v13109_v51 = vld [vmem:[#allocation59_spill] sm:$0xff]  ;;  %v13111_v46 = vld [vmem:[#allocation61_spill] sm:$0xff] }
 0xbdc   : > { %13099 = vst [vmem:[#allocation54_spill] sm:$0xff] %v10530_v58  ;;  %v10548_v1 = vadd.f32 %v5707_v16, %v13102_v42  ;;  %v6501_v21 = vmul.f32 %v10393_v35, %v10280_v39  ;;  %v10554_v19 = vadd.f32 %v5708_v38, %v13105_v2  ;;  %v13107_v58 = vld [vmem:[#allocation58_spill] sm:$0xff]  ;;  %v6502_v16 = vmul.f32 %v10363_v43, %v10294_v49  ;;  %v3443_v2 = vld [vmem:[#allocation6] sm:$0xff] }
 0xbdd   : > { %13101 = vst [vmem:[#allocation55_spill] sm:$0xff] %v10545_v18  ;;  %7812 = vmatpush3.bf16.msra.mxu0 %v13104_v44  ;;  %v10557_v41 = vadd.f32 %v5709_v60, %v13107_v58  ;;  %v10560_v53 = vadd.f32 %v5712_v22, %v13109_v51  ;;  %v10563_v10 = vadd.f32 %v6499_v8, %v13111_v46  ;;  %v13113_v58 = vld [vmem:[#allocation62_spill] sm:$0xff]  ;;  %v13141_v18 = vld [vmem:[#allocation77_spill] sm:$0xff] }
 0xbde   : > { %13103 = vst [vmem:[#allocation56_spill] sm:$0xff] %v10548_v1  ;;  %13106 = vst [vmem:[#allocation57_spill] sm:$0xff] %v10554_v19  ;;  %v6503_v35 = vmul.f32 %v10346_v5, %v10292_v25  ;;  %v6504_v48 = vmul.f32 %v10349_v29, %v10320_v11  ;;  %7819 = vmatprep.subr.bf16.mxu0 %v13097_v6  ;;  %v10573_v38 = vadd.f32 %v6501_v21, %v13113_v58  ;;  %v13115_v22 = vld [vmem:[#allocation34_spill] sm:$0xff]  ;;  %v13119_v5 = vld [vmem:[#allocation71_spill] sm:$0xff] }
 0xbdf   : > { %13108 = vst [vmem:[#allocation58_spill] sm:$0xff] %v10557_v41  ;;  %13110 = vst [vmem:[#allocation59_spill] sm:$0xff] %v10560_v53  ;;  %v6506_v51 = vmul.f32 %v10390_v31, %v10339_v52  ;;  %v3444_v60 = vadd.f32 %v3443_v2, %v10339_v52  ;;  %v10579_v8 = vadd.f32 %v6502_v16, %v13115_v22  ;;  %v13117_v43 = vld [vmem:[#allocation70_spill] sm:$0xff]  ;;  %v13121_v29 = vld [vmem:[#allocation72_spill] sm:$0xff] }
 0xbe0   : > { %13112 = vst [vmem:[#allocation61_spill] sm:$0xff] %v10563_v10  ;;  %13114 = vst [vmem:[#allocation62_spill] sm:$0xff] %v10573_v38  ;;  %v10582_v42 = vadd.f32 %v6503_v35, %v13117_v43  ;;  %v10585_v46 = vadd.f32 %v6504_v48, %v13119_v5  ;;  %v13123_v6 = vld [vmem:[#allocation20_spill] sm:$0xff]  ;;  %v13124_v2 = vld [vmem:[#allocation22_spill] sm:$0xff] }
 0xbe1   : > { %13116 = vst [vmem:[#allocation34_spill] sm:$0xff] %v10579_v8  ;;  %v10588_v44 = vadd.f32 %v6506_v51, %v13121_v29  ;;  %3445 = vst.msk [vmem:[#allocation6] sm:$0xff] %vm1570_vm6, %v3444_v60  ;;  %v13125_v43 = vld [vmem:[#allocation25_spill] sm:$0xff]  ;;  %v13136_v8 = vld [vmem:[#allocation39_spill] sm:$0xff] }
 0xbe2   : > { %13118 = vst [vmem:[#allocation70_spill] sm:$0xff] %v10582_v42  ;;  %13120 = vst [vmem:[#allocation71_spill] sm:$0xff] %v10585_v46  ;;  %v13126_v5 = vld [vmem:[#allocation21_spill] sm:$0xff]  ;;  %v3471_v53 = vmul.f32 %v13136_v8, %v9232_v0 }
 0xbe3   : > { %13122 = vst [vmem:[#allocation72_spill] sm:$0xff] %v10588_v44 }
 0xcab   : > { %v3699_v21 = vpop.f32.mrb[8].mxu0 }
 0xcac   : > { %v7730_v58 = vpop.f32.mrb[9].mxu0  ;;  %v3705_v38 = vrot.slane %v3699_v21, 6  ;;  %v3707_v10 = vrot.slane %v3699_v21, 1  ;;  %v3704_v16 = vrot.slane %v3699_v21, 5  ;;  %v10595_v22 = vadd.f32 %v3699_v21, %v13124_v2 }
 0xcad   : > { %v3708_v35 = vrot.slane %v3699_v21, 2  ;;  %v3706_v51 = vrot.slane %v3699_v21, 7  ;;  %v3710_v29 = vrot.slane %v3699_v21, 4  ;;  %v13127_v58 = vld [vmem:[#allocation24_spill] sm:$0xff]  ;;  %v3709_v2 = vrot.slane %v3699_v21, 3 }
 0xcae   : > { %v10592_v52 = vadd.f32 %v3705_v38, %v13123_v6  ;;  %v10598_v48 = vadd.f32 %v3707_v10, %v13125_v43  ;;  %v10602_v60 = vadd.f32 %v3704_v16, %v13126_v5  ;;  %v13128_v6 = vld [vmem:[#allocation23_spill] sm:$0xff]  ;;  %v13129_v10 = vld [vmem:[#allocation26_spill] sm:$0xff] }
 0xcaf   : > { %v10606_v38 = vadd.f32 %v3708_v35, %v13127_v58  ;;  %v10610_v44 = vadd.f32 %v3706_v51, %v13128_v6  ;;  %v10614_v43 = vadd.f32 %v3710_v29, %v13129_v10  ;;  %v13130_v5 = vld [vmem:[#allocation27_spill] sm:$0xff]  ;;  %v3500_v51 = vmul.f32 %v10024_v7, %v9515_v3  ;;  %v13132_v58 = vld [vmem:[#allocation30_spill] sm:$0xff] }
 0xcb0   : > { %8106 = vtanh.f32 %v10592_v52  ;;  %v10618_v46 = vadd.f32 %v3709_v2, %v13130_v5  ;;  %v13131_v2 = vld [vmem:[#allocation47_spill] sm:$0xff]  ;;  %v3467_v6 = vmul.f32 %v13038_v17, %v13132_v58  ;;  %v3593_v7 = vmul.f32 %v10258_v14, %v10267_v27  ;;  %v13138_v58 = vld [vmem:[#allocation45_spill] sm:$0xff] }
 0xcb1   : > { %8108 = vtanh.f32 %v10595_v22  ;;  %v3499_v10 = vmul.f32 %v10068_v12, %v13131_v2  ;;  %v10643_v12 = vrot.slane %v10174_v56, 1  ;;  %v13135_v2 = vld [vmem:[#allocation73_spill] sm:$0xff]  ;;  %v10651_v14 = vrot.slane %v10174_v56, 7 }
 0xcb2   : > { %8110 = vtanh.f32 %v10598_v48  ;;  %v3502_v41 = vmul.f32 %v9519_v13, %v13138_v58 }
 0xcb3   : > { %8112 = vtanh.f32 %v10602_v60  ;;  %13134 = vst [vmem:[#allocation109_spill] sm:$0xff] %v10643_v12  ;;  %v3507_v17 = vadd.f32 %v3499_v10, %v3467_v6  ;;  %v3595_v6 = vmul.f32 %v10651_v14, %v10280_v39 }
 0xcb4   : > { %8114 = vtanh.f32 %v10606_v38 }
 0xcb5   : > { %8116 = vtanh.f32 %v10610_v44  ;;  %v3601_v8 = vadd.f32 %v3593_v7, %v3507_v17  ;;  %v3596_v7 = vmul.f32 %v10294_v49, %v10174_v56  ;;  %v13145_v17 = vld [vmem:[#allocation64_spill] sm:$0xff] }
 0xcb6   : > { %8118 = vtanh.f32 %v10614_v43 }
 0xcb7   : > { %8120 = vtanh.f32 %v10618_v46 }
 0xcba   : > { %v8107_v16 = vpop.eup %8106 }
 0xcbb   : > { %3846 = vrot.lane.b32.xlu0 %v8107_v16, %s8575_s8  ;;  %v8109_v35 = vpop.eup %8108  ;;  %v3468_v16 = vmul.f32 %v13025_v9, %v9197_v24 }
 0xcbc   : > { %3850 = vrot.lane.b32.xlu1 %v8109_v35, %s8575_s8  ;;  %v8111_v21 = vpop.eup %8110  ;;  %v3594_v35 = vmul.f32 %v10276_v30, %v10262_v4  ;;  %v3501_v30 = vmul.f32 %v13135_v2, %v9587_v26 }
 0xcbd   : > { %v8113_v29 = vpop.eup %8112 }
 0xcbe   : > { %v8115_v5 = vpop.eup %8114 }
 0xcbf   : > { %3852 = vrot.lane.b32.xlu0 %v8111_v21, %s8575_s8  ;;  %v3508_v21 = vadd.f32 %v3500_v51, %v3468_v16  ;;  %v8117_v9 = vpop.eup %8116  ;;  %v3597_v51 = vmul.f32 %v10643_v12, %v10292_v25  ;;  %v13140_v12 = vld [vmem:[#allocation29_spill] sm:$0xff] }
 0xcc0   : > { %3844 = vrot.lane.b32.xlu1 %v8113_v29, %s8575_s8  ;;  %v13133_v29 = vld [vmem:[#allocation43_spill] sm:$0xff]  ;;  %v8119_v16 = vpop.eup %8118  ;;  %v3470_v1 = vmul.f32 %v9203_v37, %v13140_v12  ;;  %v3727_v12 = vadd.f32 %v13147_v55, %v3601_v8 }
 0xcc1   : > { %v3503_v42 = vmul.f32 %v13133_v29, %v9553_v54  ;;  %v13137_v29 = vld [vmem:[#allocation38_spill] sm:$0xff]  ;;  %v13153_v8 = vld [vmem:[#allocation79_spill] sm:$0xff] }
 0xcc2   : > { %v3469_v27 = vmul.f32 %v13137_v29, %v9199_v34 }
 0xcc3   : > { %3854 = vrot.lane.b32.xlu0 %v8115_v5, %s8575_s8  ;;  %v3602_v5 = vadd.f32 %v3594_v35, %v3508_v21  ;;  %v3511_v10 = vadd.f32 %v3503_v42, %v3471_v53  ;;  %v8121_v35 = vpop.eup %8120  ;;  %v13143_v53 = vld [vmem:[#allocation33_spill] sm:$0xff]  ;;  %v13144_v42 = vld [vmem:[#allocation40_spill] sm:$0xff] }
 0xcc4   : > { %3848 = vrot.lane.b32.xlu1 %v8117_v9, %s8575_s8  ;;  %v3509_v21 = vadd.f32 %v3501_v30, %v3469_v27  ;;  %v13139_v9 = vld [vmem:[#allocation74_spill] sm:$0xff]  ;;  %v3472_v27 = vmul.f32 %v13144_v42, %v13143_v53  ;;  %v3510_v30 = vadd.f32 %v3502_v41, %v3470_v1  ;;  %v13151_v41 = vld [vmem:[#allocation80_spill] sm:$0xff] }
 0xcc5   : > { %v3504_v19 = vmul.f32 %v13139_v9, %v9678_v20  ;;  %v3728_v23 = vadd.f32 %v13141_v18, %v3602_v5  ;;  %v3605_v58 = vadd.f32 %v3597_v51, %v3511_v10  ;;  %v13146_v9 = vld [vmem:[#allocation76_spill] sm:$0xff]  ;;  %v10682_v5 = vrot.slane %v10174_v56, 3  ;;  %v13150_v10 = vld [vmem:[#allocation42_spill] sm:$0xff] }
 0xcc6   : > { %v3505_v45 = vmul.f32 %v13146_v9, %v13145_v17  ;;  %v13149_v51 = vld [vmem:[#allocation36_spill] sm:$0xff]  ;;  %v3604_v9 = vadd.f32 %v3596_v7, %v3510_v30  ;;  %v13156_v7 = vld [vmem:[#allocation37_spill] sm:$0xff] }
 0xcc7   : > { %3858 = vrot.lane.b32.xlu0 %v8119_v16, %s8575_s8  ;;  %v10669_v16 = vrot.slane %v10174_v56, 2  ;;  %13148 = vst [vmem:[#allocation38_spill] sm:$0xff] %v10682_v5  ;;  %v3473_v36 = vmul.f32 %v13150_v10, %v13149_v51  ;;  %v3731_v1 = vadd.f32 %v13151_v41, %v3605_v58  ;;  %v3512_v42 = vadd.f32 %v3504_v19, %v3472_v27  ;;  %v13155_v58 = vld [vmem:[#allocation78_spill] sm:$0xff]  ;;  %v13157_v27 = vld [vmem:[#allocation44_spill] sm:$0xff] }
 0xcc8   : > { %3856 = vrot.lane.b32.xlu1 %v8121_v35, %s8575_s8  ;;  %v3603_v35 = vadd.f32 %v3595_v6, %v3509_v21  ;;  %v3599_v55 = vmul.f32 %v10682_v5, %v10442_v59  ;;  %v13154_v21 = vld [vmem:[#allocation41_spill] sm:$0xff]  ;;  %v10695_v10 = vrot.slane %v10174_v56, 4  ;;  %v3730_v19 = vadd.f32 %v13155_v58, %v3604_v9  ;;  %v13160_v9 = vld [vmem:[#allocation82_spill] sm:$0xff] }
 0xcc9   : > { %13142 = vst [vmem:[#allocation73_spill] sm:$0xff] %v10669_v16  ;;  %v3598_v18 = vmul.f32 %v10669_v16, %v10320_v11  ;;  %v3513_v15 = vadd.f32 %v3505_v45, %v3473_v36  ;;  %v3474_v30 = vmul.f32 %v13157_v27, %v13156_v7  ;;  %v13158_v5 = vld [vmem:[#allocation81_spill] sm:$0xff]  ;;  %v13159_v36 = vld [vmem:[#allocation83_spill] sm:$0xff] }
 0xcca   : > { %v3729_v16 = vadd.f32 %v13154_v21, %v3603_v35  ;;  %v3600_v41 = vmul.f32 %v10695_v10, %v10390_v31  ;;  %v7469_v21 = vmul.f32 -1.442695, %v10598_v48 }
 0xccb   : > { %3806 = vrot.lane.b32.xlu0 %v3728_v23, %s8575_s8  ;;  %v13152_v23 = vld [vmem:[#allocation63_spill] sm:$0xff]  ;;  %v3606_v50 = vadd.f32 %v3598_v18, %v3512_v42 }
 0xccc   : > { %3804 = vrot.lane.b32.xlu1 %v3727_v12, %s8575_s8  ;;  %v3506_v6 = vmul.f32 %v13153_v8, %v13152_v23  ;;  %v3607_v12 = vadd.f32 %v3599_v55, %v3513_v15  ;;  %v7467_v55 = vmul.f32 -1.442695, %v10610_v44 }
 0xccd   : > { %v3732_v35 = vadd.f32 %v13158_v5, %v3606_v50  ;;  %v7465_v50 = vmul.f32 -1.442695, %v10602_v60  ;;  %v7470_v5 = vmul.f32 -1.442695, %v10606_v38 }
 0xcce   : > { %v3514_v42 = vadd.f32 %v3506_v6, %v3474_v30  ;;  %v3733_v45 = vadd.f32 %v13159_v36, %v3607_v12  ;;  %v7472_v6 = vmul.f32 -1.442695, %v10614_v43 }
 0xccf   : > { %3812 = vrot.lane.b32.xlu0 %v3731_v1, %s8575_s8  ;;  %v7466_v1 = vmul.f32 -1.442695, %v10592_v52  ;;  %v7471_v52 = vmul.f32 -1.442695, %v10618_v46 }
 0xcd0   : > { %3808 = vrot.lane.b32.xlu1 %v3729_v16, %s8575_s8  ;;  %v3608_v18 = vadd.f32 %v3600_v41, %v3514_v42  ;;  %v7468_v16 = vmul.f32 -1.442695, %v10595_v22 }
 0xcd2   : > { %v3734_v15 = vadd.f32 %v13160_v9, %v3608_v18  ;;  %8122 = vpow2.f32 %v7468_v16 }
 0xcd3   : > { %3810 = vrot.lane.b32.xlu0 %v3730_v19, %s8575_s8  ;;  %8124 = vpow2.f32 %v7466_v1 }
 0xcd4   : > { %3814 = vrot.lane.b32.xlu1 %v3732_v35, %s8575_s8  ;;  %8126 = vpow2.f32 %v7465_v50  ;;  %v7463_v50 = vld [vmem:[%s8798_s3 + $0x18] sm:$0xff] }
 0xcd5   : > { %8128 = vpow2.f32 %v7470_v5  ;;  %v4144_v5 = vld [vmem:[#allocation7] sm:$0xff] }
 0xcd6   : > { %8130 = vpow2.f32 %v7467_v55 }
 0xcd7   : > { %3816 = vrot.lane.b32.xlu0 %v3733_v45, %s8575_s8  ;;  %8132 = vpow2.f32 %v7472_v6  ;;  %v4145_v6 = vadd.f32 %v7463_v50, %v4144_v5 }
 0xcd8   : > { %8134 = vpow2.f32 %v7469_v21 }
 0xcd9   : > { %8136 = vpow2.f32 %v7471_v52  ;;  %4146 = vst.msk [vmem:[#allocation7] sm:$0xff] %vm2139_vm7, %v4145_v6 }
 0xcdb   : > { %3818 = vrot.lane.b32.xlu0 %v3734_v15, %s8575_s8 }
 0xcdc   : > { %v8123_v58 = vpop.eup %8122 }
 0xcdd   : > { %v8125_v22 = vpop.eup %8124  ;;  %v3762_v60 = vadd.f32 1.0, %v8123_v58 }
 0xcde   : > { %v8127_v19 = vpop.eup %8126  ;;  %v3760_v38 = vadd.f32 1.0, %v8125_v22 }
 0xcdf   : > { %v8129_v12 = vpop.eup %8128  ;;  %8138 = vrcp.f32 %v3762_v60  ;;  %v3759_v30 = vadd.f32 1.0, %v8127_v19 }
 0xce0   : > { %v8131_v44 = vpop.eup %8130  ;;  %v3764_v41 = vadd.f32 1.0, %v8129_v12  ;;  %8140 = vrcp.f32 %v3760_v38 }
 0xce1   : > { %v8133_v35 = vpop.eup %8132  ;;  %8142 = vrcp.f32 %v3759_v30  ;;  %v3761_v43 = vadd.f32 1.0, %v8131_v44 }
 0xce2   : > { %v8135_v48 = vpop.eup %8134  ;;  %8144 = vrcp.f32 %v3764_v41  ;;  %v3766_v42 = vadd.f32 1.0, %v8133_v35 }
 0xce3   : > { %v3763_v46 = vadd.f32 1.0, %v8135_v48  ;;  %8146 = vrcp.f32 %v3761_v43  ;;  %v8137_v45 = vpop.eup %8136 }
 0xce4   : > { %8148 = vrcp.f32 %v3766_v42  ;;  %v3765_v1 = vadd.f32 1.0, %v8137_v45 }
 0xce5   : > { %8150 = vrcp.f32 %v3763_v46 }
 0xce6   : > { %8152 = vrcp.f32 %v3765_v1 }
 0xce9   : > { %v10718_v18 = vpop.eup %8138 }
 0xcea   : > { %v10722_v55 = vpop.eup %8140 }
 0xceb   : > { %v10725_v21 = vpop.eup %8142 }
 0xcec   : > { %v10730_v60 = vpop.eup %8144 }
 0xced   : > { %v10735_v38 = vpop.eup %8146 }
 0xcee   : > { %v10738_v41 = vpop.eup %8148 }
 0xcef   : > { %v10743_v48 = vpop.eup %8150 }
 0xcf0   : > { %v10748_v46 = vpop.eup %8152 }
 0xd2d   : > { %v3847_v36 = vpop.permute.xlu0 %3846 }
 0xd2e   : > { %v3851_v9 = vpop.permute.xlu1 %3850  ;;  %v3869_v52 = vmul.f32 %v10722_v55, %v3847_v36 }
 0xd2f   : > { %v3871_v15 = vmul.f32 %v10718_v18, %v3851_v9 }
 0xd31   : > { %v3853_v16 = vpop.permute.xlu0 %3852  ;;  %3890 = vrot.lane.b32.xlu1 %v3871_v15, %s8575_s8 }
 0xd32   : > { %v3845_v58 = vpop.permute.xlu1 %3844  ;;  %v3872_v42 = vmul.f32 %v10743_v48, %v3853_v16 }
 0xd33   : > { %v3868_v22 = vmul.f32 %v10725_v21, %v3845_v58 }
 0xd35   : > { %v3855_v19 = vpop.permute.xlu0 %3854  ;;  %3886 = vrot.lane.b32.xlu1 %v3869_v52, %s8575_s8  ;;  %3884 = vrot.lane.b32.xlu0 %v3868_v22, %s8575_s8 }
 0xd36   : > { %v3873_v12 = vmul.f32 %v10730_v60, %v3855_v19  ;;  %v3849_v30 = vpop.permute.xlu1 %3848 }
 0xd37   : > { %v3870_v44 = vmul.f32 %v10735_v38, %v3849_v30 }
 0xd39   : > { %v3859_v35 = vpop.permute.xlu0 %3858  ;;  %3888 = vrot.lane.b32.xlu1 %v3870_v44, %s8575_s8  ;;  %3894 = vrot.lane.b32.xlu0 %v3873_v12, %s8575_s8 }
 0xd3a   : > { %v3875_v43 = vmul.f32 %v10738_v41, %v3859_v35  ;;  %v3857_v36 = vpop.permute.xlu1 %3856 }
 0xd3b   : > { %v3874_v45 = vmul.f32 %v10748_v46, %v3857_v36 }
 0xd3d   : > { %3892 = vrot.lane.b32.xlu1 %v3872_v42, %s8575_s8  ;;  %3898 = vrot.lane.b32.xlu0 %v3875_v43, %s8575_s8  ;;  %v3807_v9 = vpop.permute.xlu0 %3806 }
 0xd3e   : > { %v3805_v1 = vpop.permute.xlu1 %3804  ;;  %v3829_v12 = vmul.f32 %v10722_v55, %v3807_v9 }
 0xd3f   : > { %v3828_v19 = vmul.f32 %v10725_v21, %v3805_v1 }
 0xd41   : > { %3896 = vrot.lane.b32.xlu1 %v3874_v45, %s8575_s8  ;;  %v3813_v15 = vpop.permute.xlu0 %3812 }
 0xd42   : > { %v3809_v6 = vpop.permute.xlu1 %3808  ;;  %v3832_v23 = vmul.f32 %v10743_v48, %v3813_v15 }
 0xd43   : > { %v3830_v42 = vmul.f32 %v10735_v38, %v3809_v6 }
 0xd45   : > { %3793 = vperm.xlu1 %7942, %v7463_v50   ;;  %v3811_v5 = vpop.permute.xlu0 %3810 }
 0xd46   : > { %v3815_v52 = vpop.permute.xlu1 %3814  ;;  %v3831_v1 = vmul.f32 %v10718_v18, %v3811_v5 }
 0xd47   : > { %v3833_v33 = vmul.f32 %v10730_v60, %v3815_v52 }
 0xd49   : > { %v3817_v58 = vpop.permute.xlu0 %3816 }
 0xd4d   : > { %v3819_v16 = vpop.permute.xlu0 %3818 }
 0xd4e   : > { %v3835_v6 = vmul.f32 %v10738_v41, %v3819_v16 }
 0xda3   : > { %v3891_v22 = vpop.permute.xlu1 %3890 }
 0xda7   : > { %v3887_v30 = vpop.permute.xlu1 %3886  ;;  %v3885_v44 = vpop.permute.xlu0 %3884 }
 0xda8   : > { %v3909_v35 = vadd.f32 %v3887_v30, %v3829_v12  ;;  %v3908_v43 = vadd.f32 %v3885_v44, %v3828_v19  ;;  %v3911_v44 = vadd.f32 %v3891_v22, %v3831_v1  ;;  %v13162_v22 = vld [vmem:[#allocation28_spill] sm:$0xff] }
 0xdaa   : > { %v3925_v50 = vrot.slane %v3909_v35, 2  ;;  %v3924_v36 = vrot.slane %v3908_v43, 3  ;;  %v3834_v43 = vmul.f32 %v10748_v46, %v3817_v58 }
 0xdab   : > { %v3889_v45 = vpop.permute.xlu1 %3888  ;;  %v3895_v31 = vpop.permute.xlu0 %3894 }
 0xdac   : > { %v3910_v7 = vadd.f32 %v3889_v45, %v3830_v42  ;;  %v3926_v9 = vsel %vm1907_vm8, %v3925_v50, %v3924_v36  ;;  %v3913_v35 = vadd.f32 %v3895_v31, %v3833_v33  ;;  %v8585_v31 = vmov 3  }
 0xdad   : > { %7943 = vset.pattern.permute.xlu1 %v8585_v31  ;;  %7944 = vset.pattern.permute.xlu0 %v8585_v31  ;;  %v13163_v31 = vld [vmem:[#allocation86_spill] sm:$0xff] }
 0xdae   : > { %v3927_v56 = vrot.slane %v3910_v7, 1  ;;  %v3932_v50 = vrot.slane %v3913_v35, 6 }
 0xdaf   : > { %v3893_v61 = vpop.permute.xlu1 %3892  ;;  %v3899_v30 = vpop.permute.xlu0 %3898 }
 0xdb0   : > { %v3928_v12 = vsel %vm1910_vm9, %v3927_v56, %v3926_v9  ;;  %v3912_v19 = vadd.f32 %v3893_v61, %v3832_v23  ;;  %v3915_v15 = vadd.f32 %v3899_v30, %v3835_v6 }
 0xdb1   : > { %v3929_v7 = vsel %vm1913_vm10, %v3911_v44, %v3928_v12 }
 0xdb2   : > { %v3930_v42 = vrot.slane %v3912_v19, 7  ;;  %v3936_v32 = vrot.slane %v3915_v15, 4 }
 0xdb3   : > { %v3897_v52 = vpop.permute.xlu1 %3896 }
 0xdb4   : > { %v3931_v5 = vsel %vm1916_vm11, %v3930_v42, %v3929_v7  ;;  %v3914_v45 = vadd.f32 %v3897_v52, %v3834_v43 }
 0xdb5   : > { %v3933_v56 = vsel %vm1919_vm12, %v3932_v50, %v3931_v5 }
 0xdb6   : > { %v3934_v36 = vrot.slane %v3914_v45, 5 }
 0xdb8   : > { %v3935_v61 = vsel %vm1922_vm13, %v3934_v36, %v3933_v56 }
 0xdb9   : > { %v3937_v23 = vsel %vm1925_vm14, %v3936_v32, %v3935_v61 }
 0xdba   : > { %3938 = vrot.lane.b32.xlu0 %v3937_v23, %s8577_s9 }
 0xdc4   : > { %v10768_v33 = vpop.permute.xlu1 %3793 }
 0xe2c   : > { %v3939_v58 = vpop.permute.xlu0 %3938 }
 0xe2d   : > { %v10771_v16 = vmul.f32 %v3939_v58, %v10768_v33  ;;  %v13164_v58 = vld [vmem:[#allocation85_spill] sm:$0xff] }
 0xe2f   : > { %13161 = vst [vmem:[#allocation77_spill] sm:$0xff] %v10771_v16  ;;  %8154 = vtanh.f32 %v10771_v16  ;;  %v4076_v32 = vcombine.high %v10771_v16, %v10771_v16  ;;  %v4083_v1 = vrot.slane %v10771_v16, %v13162_v22 }
 0xe31   : > { %v4090_v9 = vrot.slane %v4076_v32, %v13162_v22  ;;  %v4091_v12 = vcombine.high %v4083_v1, %v4083_v1  ;;  %v4099_v19 = vrot.slane %v4083_v1, %v13162_v22  ;;  %v13165_v32 = vld [vmem:[#allocation88_spill] sm:$0xff]  ;;  %v13166_v1 = vld [vmem:[#allocation87_spill] sm:$0xff] }
 0xe33   : > { %v4092_v30 = vcombine.high %v4090_v9, %v4090_v9  ;;  %v4106_v6 = vrot.slane %v4090_v9, %v13162_v22  ;;  %v4113_v44 = vrot.slane %v4091_v12, %v13162_v22  ;;  %v4121_v35 = vcombine.high %v4099_v19, %v4099_v19  ;;  %4133 = vst.msk [vmem:[%s9106_s11 + $0x3] sm:$0x1] %vm2058_vm15, %v4099_v19  ;;  %v13167_v9 = vld [vmem:[#allocation90_spill] sm:$0xff]  ;;  %v13168_v12 = vld [vmem:[#allocation89_spill] sm:$0xff]  ;;  %v13169_v19 = vld [vmem:[#allocation91_spill] sm:$0xff] }
 0xe35   : > { %v4120_v43 = vrot.slane %v4092_v30, %v13162_v22  ;;  %v4122_v42 = vcombine.high %v4106_v6, %v4106_v6  ;;  %v4123_v7 = vcombine.high %v4113_v44, %v4113_v44  ;;  %4134 = vst.msk [vmem:[%s9106_s11 + $0x13] sm:$0x1] %vm2058_vm15, %v4113_v44  ;;  %4135 = vst.msk [vmem:[%s9106_s11 + $0x23] sm:$0x1] %vm2058_vm15, %v4121_v35  ;;  %v13170_v30 = vmov 0  }
 0xe36   : > { %4137 = vst.msk [vmem:[%s9106_s11 + $0x43] sm:$0x1] %vm2058_vm15, %v4106_v6 }
 0xe37   : > { %v4124_v15 = vcombine.high %v4120_v43, %v4120_v43  ;;  %4136 = vst.msk [vmem:[%s9106_s11 + $0x33] sm:$0x1] %vm2058_vm15, %v4123_v7  ;;  %4138 = vst.msk [vmem:[%s9106_s11 + $0x53] sm:$0x1] %vm2058_vm15, %v4120_v43 }
 0xe38   : > { %4139 = vst.msk [vmem:[%s9106_s11 + $0x63] sm:$0x1] %vm2058_vm15, %v4122_v42 }
 0xe39   : > { %v8155_v52 = vpop.eup %8154  ;;  %4140 = vst.msk [vmem:[%s9106_s11 + $0x73] sm:$0x1] %vm2058_vm15, %v4124_v15 }
 0xe3a   : > { %3957 = vrot.lane.b32.xlu1 %v8155_v52, %s8579_s14  ;;  %v3945_v5 = vrot.slane %v8155_v52, 6  ;;  %v3944_v45 = vrot.slane %v8155_v52, 5  ;;  %v3947_v50 = vrot.slane %v8155_v52, 1  ;;  %v3946_v36 = vrot.slane %v8155_v52, 7 }
 0xe3b   : > { %v3948_v56 = vrot.slane %v8155_v52, 2  ;;  %v3949_v61 = vrot.slane %v8155_v52, 3  ;;  %v3950_v23 = vrot.slane %v8155_v52, 4 }
 0xe3c   : > { %3953 = vrot.lane.b32.xlu0 %v3945_v5, %s8579_s14 }
 0xe3e   : > { %3951 = vrot.lane.b32.xlu1 %v3944_v45, %s8579_s14 }
 0xe40   : > { %3959 = vrot.lane.b32.xlu0 %v3947_v50, %s8579_s14 }
 0xe42   : > { %3955 = vrot.lane.b32.xlu1 %v3946_v36, %s8579_s14 }
 0xe44   : > { %3961 = vrot.lane.b32.xlu0 %v3948_v56, %s8579_s14 }
 0xe46   : > { %3963 = vrot.lane.b32.xlu1 %v3949_v61, %s8579_s14 }
 0xe48   : > { %3965 = vrot.lane.b32.xlu0 %v3950_v23, %s8579_s14 }
 0xe4a   : > { %4246 = vperm.xlu1 %7943, %v13163_v31  }
 0xe4c   : > { %4250 = vperm.xlu0 %7944, %v13164_v58  }
 0xe4e   : > { %4254 = vperm.xlu1 %7943, %v13165_v32  }
 0xe50   : > { %4262 = vperm.xlu0 %7944, %v13166_v1  }
 0xe52   : > { %4258 = vperm.xlu1 %7943, %v13167_v9  }
 0xe56   : > { %4266 = vperm.xlu1 %7943, %v13168_v12  }
 0xe5a   : > { %4270 = vperm.xlu1 %7943, %v13169_v19  }
 0xe5e   : > { %7945 = vset.pattern.permute.xlu1 %v13170_v30 }
 0xeac   : > { %v3958_v6 = vpop.permute.xlu1 %3957 }
 0xead   : > { %v3978_v23 = vmul.f32 %v10718_v18, %v3958_v6 }
 0xeae   : > { %v3954_v44 = vpop.permute.xlu0 %3953 }
 0xeaf   : > { %v3976_v42 = vmul.f32 %v10722_v55, %v3954_v44 }
 0xeb0   : > { %v3952_v35 = vpop.permute.xlu1 %3951 }
 0xeb1   : > { %v3975_v43 = vmul.f32 %v10725_v21, %v3952_v35  ;;  %v3992_v50 = vrot.slane %v3976_v42, 2  ;;  %v10832_v35 = vld [vmem:[%s8781_s4 + $0x38] sm:$0xff] }
 0xeb2   : > { %v3960_v7 = vpop.permute.xlu0 %3959  ;;  %13171 = vst [vmem:[#allocation33_spill] sm:$0xff] %v10832_v35 }
 0xeb3   : > { %v3991_v15 = vrot.slane %v3975_v43, 3  ;;  %v3979_v5 = vmul.f32 %v10743_v48, %v3960_v7  ;;  %v4896_v43 = vmul.f32 %v13157_v27, %v9197_v24  ;;  %v5691_v7 = vmul.f32 %v13153_v8, %v9587_v26 }
 0xeb4   : > { %v3956_v52 = vpop.permute.xlu1 %3955 }
 0xeb5   : > { %v3977_v45 = vmul.f32 %v10735_v38, %v3956_v52  ;;  %v3993_v31 = vsel %vm1907_vm8, %v3992_v50, %v3991_v15  ;;  %v3997_v58 = vrot.slane %v3979_v5, 7  ;;  %v10846_v15 = vrot.slane %v10771_v16, 4 }
 0xeb6   : > { %v3962_v36 = vpop.permute.xlu0 %3961  ;;  %v4931_v5 = vmul.f32 %v13135_v2, %v9553_v54  ;;  %v5659_v50 = vmul.f32 %v13157_v27, %v9199_v34 }
 0xeb7   : > { %v3994_v56 = vrot.slane %v3977_v45, 1  ;;  %v3980_v61 = vmul.f32 %v10730_v60, %v3962_v36  ;;  %v5723_v36 = vmul.f32 %v10695_v10, %v10280_v39  ;;  %v13185_v39 = vld [vmem:[#allocation100_spill] sm:$0xff] }
 0xeb8   : > { %v3964_v21 = vpop.permute.xlu1 %3963 }
 0xeb9   : > { %v3995_v55 = vsel %vm1910_vm9, %v3994_v56, %v3993_v31  ;;  %v3999_v32 = vrot.slane %v3980_v61, 6  ;;  %v3981_v1 = vmul.f32 %v10748_v46, %v3964_v21  ;;  %v4928_v46 = vmul.f32 %v13153_v8, %v9515_v3 }
 0xeba   : > { %v3996_v48 = vsel %vm1913_vm10, %v3978_v23, %v3995_v55  ;;  %v3966_v38 = vpop.permute.xlu0 %3965  ;;  %v4899_v23 = vmul.f32 %v13137_v29, %v9232_v0  ;;  %v4963_v31 = vmul.f32 %v10651_v14, %v10292_v25  ;;  %v5699_v55 = vadd.f32 %v5691_v7, %v5659_v50  ;;  %v13176_v7 = vld [vmem:[#allocation97_spill] sm:$0xff] }
 0xebb   : > { %v3998_v9 = vsel %vm1916_vm11, %v3997_v58, %v3996_v48  ;;  %v4001_v12 = vrot.slane %v3981_v1, 5  ;;  %v3982_v60 = vmul.f32 %v10738_v41, %v3966_v38  ;;  %v4960_v41 = vmul.f32 %v10695_v10, %v10262_v4 }
 0xebc   : > { %v4000_v18 = vsel %vm1919_vm12, %v3999_v32, %v3998_v9  ;;  %v4936_v52 = vadd.f32 %v4928_v46, %v4896_v43  ;;  %v10865_v58 = vrot.slane %v10771_v16, 5  ;;  %v10868_v32 = vrot.slane %v10771_v16, 7 }
 0xebd   : > { %v4003_v19 = vrot.slane %v3982_v60, 4  ;;  %v4002_v6 = vsel %vm1922_vm13, %v4001_v12, %v4000_v18  ;;  %v4939_v48 = vadd.f32 %v4931_v5, %v4899_v23  ;;  %v6486_v38 = vmul.f32 %v13153_v8, %v9519_v13 }
 0xebe   : > { %v4968_v56 = vadd.f32 %v4960_v41, %v4936_v52  ;;  %v10877_v12 = vrot.slane %v10771_v16, 6  ;;  %v5731_v18 = vadd.f32 %v5723_v36, %v5699_v55  ;;  %v5694_v46 = vmul.f32 %v13135_v2, %v9678_v20 }
 0xebf   : > { %v4004_v44 = vsel %vm1925_vm14, %v4003_v19, %v4002_v6  ;;  %v4971_v6 = vadd.f32 %v4963_v31, %v4939_v48  ;;  %v6454_v43 = vmul.f32 %v13157_v27, %v9203_v37  ;;  %v6518_v36 = vmul.f32 %v10695_v10, %v10294_v49  ;;  %v13180_v48 = vld [vmem:[#allocation101_spill] sm:$0xff] }
 0xec0   : > { %4005 = vrot.lane.b32.xlu0 %v4004_v44, %s8579_s14  ;;  %v5726_v23 = vmul.f32 %v10651_v14, %v10320_v11 }
 0xec4   : > { %4274 = vperm.xlu0 %7944, %v10832_v35  }
 0xec9   : > { %v10841_v42 = vpop.permute.xlu1 %4246 }
 0xeca   : > { %13172 = vst [vmem:[#allocation75_spill] sm:$0xff] %v10841_v42 }
 0xecb   : > { %v10850_v45 = vpop.permute.xlu0 %4250 }
 0xecc   : > { %13173 = vst [vmem:[#allocation80_spill] sm:$0xff] %v10850_v45  ;;  %v4992_v61 = vmul.f32 %v10846_v15, %v10850_v45 }
 0xecd   : > { %v10862_v21 = vpop.permute.xlu1 %4254 }
 0xece   : > { %13174 = vst [vmem:[#allocation79_spill] sm:$0xff] %v10862_v21  ;;  %v10870_v1 = vadd.f32 %v4992_v61, %v4968_v56  ;;  %v4993_v60 = vmul.f32 %v10865_v58, %v10862_v21  ;;  %v5755_v19 = vmul.f32 %v10846_v15, %v10862_v21  ;;  %v5662_v61 = vmul.f32 %v13137_v29, %v13143_v53 }
 0xecf   : > { %v10874_v9 = vpop.permute.xlu0 %4262 }
 0xed0   : > { %13175 = vst [vmem:[#allocation41_spill] sm:$0xff] %v10870_v1  ;;  %v4995_v44 = vmul.f32 %v10868_v32, %v10874_v9  ;;  %v10892_v52 = vadd.f32 %v4993_v60, %v13176_v7  ;;  %v10894_v5 = vadd.f32 %v5755_v19, %v5731_v18  ;;  %v5757_v50 = vmul.f32 %v10877_v12, %v10874_v9  ;;  %v13182_v19 = vld [vmem:[#allocation98_spill] sm:$0xff] }
 0xed1   : > { %v10889_v41 = vpop.permute.xlu1 %4258  ;;  %v6494_v18 = vadd.f32 %v6486_v38, %v6454_v43  ;;  %v5702_v4 = vadd.f32 %v5694_v46, %v5662_v61  ;;  %v6457_v46 = vmul.f32 %v13137_v29, %v13149_v51  ;;  %v13188_v61 = vld [vmem:[#allocation102_spill] sm:$0xff] }
 0xed2   : > { %13177 = vst [vmem:[#allocation78_spill] sm:$0xff] %v10892_v52  ;;  %13178 = vst [vmem:[#allocation44_spill] sm:$0xff] %v10894_v5  ;;  %v4994_v56 = vmul.f32 %v10877_v12, %v10889_v41  ;;  %v10906_v31 = vadd.f32 %v4995_v44, %v4971_v6  ;;  %v5756_v55 = vmul.f32 %v10865_v58, %v10889_v41 }
 0xed3   : > { %v10911_v60 = vadd.f32 %v5757_v50, %v13180_v48  ;;  %v6550_v24 = vmul.f32 %v10846_v15, %v10889_v41  ;;  %v6526_v6 = vadd.f32 %v6518_v36, %v6494_v18  ;;  %v6551_v44 = vmul.f32 %v10865_v58, %v10874_v9  ;;  %v13192_v18 = vld [vmem:[#allocation103_spill] sm:$0xff] }
 0xed4   : > { %13179 = vst [vmem:[#allocation81_spill] sm:$0xff] %v10906_v31  ;;  %v10914_v7 = vadd.f32 %v4994_v56, %v13182_v19  ;;  %v10921_v34 = vadd.f32 %v5756_v55, %v13185_v39  ;;  %v6489_v50 = vmul.f32 %v13135_v2, %v13145_v17  ;;  %v5734_v38 = vadd.f32 %v5726_v23, %v5702_v4 }
 0xed5   : > { %13181 = vst [vmem:[#allocation83_spill] sm:$0xff] %v10911_v60  ;;  %v10918_v3 = vpop.permute.xlu1 %4266  ;;  %v10931_v56 = vadd.f32 %v6550_v24, %v6526_v6  ;;  %v10934_v48 = vadd.f32 %v6551_v44, %v13188_v61  ;;  %v6521_v39 = vmul.f32 %v10651_v14, %v10442_v59 }
 0xed6   : > { %13183 = vst [vmem:[#allocation82_spill] sm:$0xff] %v10914_v7  ;;  %13184 = vst [vmem:[#allocation28_spill] sm:$0xff] %v10918_v3  ;;  %v5758_v43 = vmul.f32 %v10868_v32, %v10918_v3  ;;  %v6552_v36 = vmul.f32 %v10877_v12, %v10918_v3  ;;  %v6497_v23 = vadd.f32 %v6489_v50, %v6457_v46 }
 0xed7   : > { %13186 = vst [vmem:[#allocation86_spill] sm:$0xff] %v10921_v34  ;;  %13187 = vst [vmem:[#allocation85_spill] sm:$0xff] %v10931_v56 }
 0xed8   : > { %13189 = vst [vmem:[#allocation88_spill] sm:$0xff] %v10934_v48  ;;  %v10940_v55 = vadd.f32 %v5758_v43, %v5734_v38  ;;  %v10945_v19 = vadd.f32 %v6552_v36, %v13192_v18  ;;  %v6529_v26 = vadd.f32 %v6521_v39, %v6497_v23 }
 0xed9   : > { %v10942_v4 = vpop.permute.xlu1 %4270 }
 0xeda   : > { %13190 = vst [vmem:[#allocation87_spill] sm:$0xff] %v10940_v55  ;;  %13191 = vst [vmem:[#allocation90_spill] sm:$0xff] %v10942_v4  ;;  %v6553_v24 = vmul.f32 %v10868_v32, %v10942_v4 }
 0xedb   : > { %13193 = vst [vmem:[#allocation89_spill] sm:$0xff] %v10945_v19 }
 0xedc   : > { %v10949_v6 = vadd.f32 %v6553_v24, %v6529_v26 }
 0xede   : > { %13194 = vst [vmem:[#allocation91_spill] sm:$0xff] %v10949_v6 }
 0xf32   : > { %v4006_v44 = vpop.permute.xlu0 %4005 }
 0xf33   : > { %v10952_v61 = vmul.f32 %v4006_v44, %v10768_v33 }
 0xf35   : > { %v4010_v38 = vcombine.high %v10952_v61, %v10952_v61  ;;  %v4017_v43 = vrot.slane %v10952_v61, %v13162_v22  ;;  %v10959_v50 = vrot.slane %v10952_v61, 4  ;;  %v10962_v46 = vrot.slane %v10952_v61, 5 }
 0xf36   : > { %v10965_v39 = vrot.slane %v10952_v61, 6  ;;  %v10968_v26 = vrot.slane %v10952_v61, 7  ;;  %v10971_v33 = vrot.slane %v10952_v61, 1  ;;  %v10974_v36 = vrot.slane %v10952_v61, 2 }
 0xf37   : > { %v4024_v23 = vrot.slane %v4010_v38, %v13162_v22  ;;  %v4025_v18 = vcombine.high %v4017_v43, %v4017_v43  ;;  %v4033_v24 = vrot.slane %v4017_v43, %v13162_v22  ;;  %v10979_v44 = vrot.slane %v10952_v61, 3 }
 0xf38   : > { %v4292_v31 = vmul.f32 %v10959_v50, %v10841_v42  ;;  %v4293_v7 = vmul.f32 %v10962_v46, %v10850_v45  ;;  %v4294_v52 = vmul.f32 %v10965_v39, %v10862_v21  ;;  %v4295_v38 = vmul.f32 %v10968_v26, %v10889_v41 }
 0xf39   : > { %v4026_v1 = vcombine.high %v4024_v23, %v4024_v23  ;;  %v4040_v43 = vrot.slane %v4024_v23, %v13162_v22  ;;  %v4047_v19 = vrot.slane %v4025_v18, %v13162_v22  ;;  %v4055_v55 = vcombine.high %v4033_v24, %v4033_v24  ;;  %4067 = vst.msk [vmem:[%s9238_s15 + $0x3] sm:$0x1] %vm2058_vm15, %v4033_v24 }
 0xf3a   : > { %v4296_v48 = vmul.f32 %v10874_v9, %v10952_v61  ;;  %v4297_v60 = vmul.f32 %v10971_v33, %v10918_v3  ;;  %v4298_v56 = vmul.f32 %v10974_v36, %v10942_v4  ;;  %v4300_v34 = vadd.f32 %v4292_v31, %v10427_v47 }
 0xf3b   : > { %v4054_v23 = vrot.slane %v4026_v1, %v13162_v22  ;;  %v4056_v18 = vcombine.high %v4040_v43, %v4040_v43  ;;  %v4057_v5 = vcombine.high %v4047_v19, %v4047_v19  ;;  %4068 = vst.msk [vmem:[%s9238_s15 + $0x13] sm:$0x1] %vm2058_vm15, %v4047_v19  ;;  %4069 = vst.msk [vmem:[%s9238_s15 + $0x23] sm:$0x1] %vm2058_vm15, %v4055_v55  ;;  %v13195_v19 = vld [vmem:[#allocation105_spill] sm:$0xff] }
 0xf3c   : > { %4071 = vst.msk [vmem:[%s9238_s15 + $0x43] sm:$0x1] %vm2058_vm15, %v4040_v43  ;;  %v4301_v24 = vadd.f32 %v4293_v7, %v10430_v28  ;;  %v4302_v6 = vadd.f32 %v4294_v52, %v10434_v62  ;;  %v4303_v35 = vadd.f32 %v4295_v38, %v10437_v40  ;;  %v4305_v30 = vadd.f32 %v4297_v60, %v10446_v63 }
 0xf3d   : > { %v4058_v47 = vcombine.high %v4054_v23, %v4054_v23  ;;  %4070 = vst.msk [vmem:[%s9238_s15 + $0x33] sm:$0x1] %vm2058_vm15, %v4057_v5  ;;  %4072 = vst.msk [vmem:[%s9238_s15 + $0x53] sm:$0x1] %vm2058_vm15, %v4054_v23  ;;  %v4306_v1 = vadd.f32 %v4298_v56, %v10468_v57  ;;  %v4347_v31 = vrot.slane %v4300_v34, 4  ;;  %v4304_v43 = vadd.f32 %v4296_v48, %v13195_v19 }
 0xf3e   : > { %4073 = vst.msk [vmem:[%s9238_s15 + $0x63] sm:$0x1] %vm2058_vm15, %v4056_v18  ;;  %v4348_v55 = vrot.slane %v4301_v24, 3  ;;  %v4350_v28 = vrot.slane %v4302_v6, 2  ;;  %v4352_v7 = vrot.slane %v4303_v35, 1  ;;  %v4355_v62 = vrot.slane %v4305_v30, 7 }
 0xf3f   : > { %4074 = vst.msk [vmem:[%s9238_s15 + $0x73] sm:$0x1] %vm2058_vm15, %v4058_v47  ;;  %v4357_v63 = vrot.slane %v4306_v1, 6  ;;  %v4975_v52 = vmul.f32 %v10979_v44, %v10841_v42  ;;  %v4976_v5 = vmul.f32 %v10959_v50, %v10850_v45  ;;  %v4977_v34 = vmul.f32 %v10962_v46, %v10862_v21  ;;  %v13196_v6 = vld [vmem:[#allocation69_spill] sm:$0xff]  ;;  %v13198_v47 = vld [vmem:[#allocation66_spill] sm:$0xff] }
 0xf40   : > { %v4349_v40 = vsel %vm1907_vm8, %v4348_v55, %v4347_v31  ;;  %v4978_v35 = vmul.f32 %v10965_v39, %v10889_v41  ;;  %v4979_v30 = vmul.f32 %v10968_v26, %v10874_v9  ;;  %v4980_v56 = vmul.f32 %v10918_v3, %v10952_v61  ;;  %v13197_v18 = vld [vmem:[#allocation65_spill] sm:$0xff]  ;;  %v13199_v31 = vld [vmem:[#allocation68_spill] sm:$0xff] }
 0xf41   : > { %v4351_v57 = vsel %vm1910_vm9, %v4350_v28, %v4349_v40  ;;  %v4981_v48 = vmul.f32 %v10971_v33, %v10942_v4  ;;  %v11039_v38 = vadd.f32 %v4975_v52, %v13196_v6  ;;  %v11043_v24 = vadd.f32 %v4976_v5, %v13197_v18  ;;  %v13202_v52 = vld [vmem:[#allocation108_spill] sm:$0xff]  ;;  %v13205_v6 = vld [vmem:[#allocation67_spill] sm:$0xff] }
 0xf42   : > { %v4353_v60 = vsel %vm1913_vm10, %v4352_v7, %v4351_v57  ;;  %v11046_v1 = vadd.f32 %v4977_v34, %v13198_v47  ;;  %v11049_v55 = vadd.f32 %v4978_v35, %v13199_v31  ;;  %v13201_v7 = vld [vmem:[#allocation107_spill] sm:$0xff]  ;;  %v11058_v57 = vadd.f32 %v4980_v56, %v13202_v52  ;;  %v13208_v47 = vld [vmem:[#allocation50_spill] sm:$0xff] }
 0xf43   : > { %v4354_v23 = vsel %vm1916_vm11, %v4304_v43, %v4353_v60  ;;  %v11051_v19 = vpop.permute.xlu0 %4274  ;;  %v11055_v40 = vadd.f32 %v4979_v30, %v13201_v7  ;;  %v13203_v43 = vld [vmem:[#allocation35_spill] sm:$0xff]  ;;  %v6532_v30 = vmul.f32 %v10974_v36, %v10850_v45 }
 0xf44   : > { %13200 = vst [vmem:[#allocation97_spill] sm:$0xff] %v11051_v19  ;;  %v4356_v28 = vsel %vm1919_vm12, %v4355_v62, %v4354_v23  ;;  %v11061_v60 = vadd.f32 %v4981_v48, %v13203_v43  ;;  %v4299_v5 = vmul.f32 %v10979_v44, %v11051_v19  ;;  %v4982_v35 = vmul.f32 %v10974_v36, %v11051_v19  ;;  %v13206_v23 = vld [vmem:[#allocation49_spill] sm:$0xff]  ;;  %v13212_v43 = vld [vmem:[#allocation52_spill] sm:$0xff] }
 0xf45   : > { %v4358_v34 = vsel %vm1922_vm13, %v4357_v63, %v4356_v28  ;;  %v5737_v62 = vmul.f32 %v10974_v36, %v10841_v42  ;;  %v5738_v48 = vmul.f32 %v10979_v44, %v10850_v45  ;;  %v5742_v63 = vmul.f32 %v10968_v26, %v10918_v3  ;;  %v13210_v28 = vld [vmem:[#allocation51_spill] sm:$0xff] }
 0xf46   : > { %13204 = vst [vmem:[#allocation101_spill] sm:$0xff] %v11061_v60  ;;  %v4307_v56 = vadd.f32 %v4299_v5, %v13205_v6  ;;  %v11076_v18 = vadd.f32 %v4982_v35, %v13206_v23  ;;  %v11084_v7 = vadd.f32 %v6532_v30, %v13210_v28  ;;  %v5743_v36 = vmul.f32 %v10942_v4, %v10952_v61  ;;  %v13214_v23 = vld [vmem:[#allocation53_spill] sm:$0xff]  ;;  %v13215_v28 = vld [vmem:[#allocation55_spill] sm:$0xff] }
 0xf47   : > { %v11081_v31 = vadd.f32 %v5737_v62, %v13208_v47  ;;  %v11089_v5 = vadd.f32 %v5742_v63, %v13212_v43  ;;  %v6537_v35 = vmul.f32 %v10968_v26, %v10942_v4  ;;  %v5739_v6 = vmul.f32 %v10959_v50, %v10862_v21  ;;  %v13216_v26 = vld [vmem:[#allocation54_spill] sm:$0xff] }
 0xf48   : > { %13207 = vst [vmem:[#allocation98_spill] sm:$0xff] %v11076_v18  ;;  %13211 = vst [vmem:[#allocation102_spill] sm:$0xff] %v11084_v7  ;;  %v4359_v52 = vrot.slane %v4307_v56, 5  ;;  %v5740_v62 = vmul.f32 %v10962_v46, %v10889_v41  ;;  %v5741_v30 = vmul.f32 %v10965_v39, %v10874_v9  ;;  %v11101_v47 = vadd.f32 %v5743_v36, %v13214_v23  ;;  %v13222_v36 = vld [vmem:[#allocation18_spill] sm:$0xff] }
 0xf49   : > { %13209 = vst [vmem:[#allocation100_spill] sm:$0xff] %v11081_v31  ;;  %13213 = vst [vmem:[#allocation103_spill] sm:$0xff] %v11089_v5  ;;  %v5744_v63 = vmul.f32 %v10971_v33, %v11051_v19  ;;  %v11106_v43 = vadd.f32 %v5738_v48, %v13215_v28  ;;  %v11110_v18 = vadd.f32 %v6537_v35, %v13216_v26  ;;  %v13217_v5 = vld [vmem:[#allocation56_spill] sm:$0xff]  ;;  %v13218_v31 = vld [vmem:[#allocation57_spill] sm:$0xff]  ;;  %v13223_v23 = vmov 0.0  }
 0xf4a   : > { %v4360_v56 = vsel %vm1925_vm14, %v4359_v52, %v4358_v34  ;;  %v11113_v7 = vadd.f32 %v5739_v6, %v13217_v5  ;;  %v11116_v60 = vadd.f32 %v5740_v62, %v13218_v31  ;;  %v13220_v34 = vld [vmem:[#allocation58_spill] sm:$0xff]  ;;  %v13224_v48 = vld [vmem:[#allocation59_spill] sm:$0xff]  ;;  %v6531_v35 = vmul.f32 %v10971_v33, %v10841_v42  ;;  %v13227_v26 = vld [vmem:[#allocation61_spill] sm:$0xff] }
 0xf4b   : > { %7740 = vmatmul.mubr.msk.f32.vlgmr.msra.gmra.mrb[4].mxu1 %vm1570_vm6, %v4360_v56  ;;  %v11119_v52 = vadd.f32 %v5741_v30, %v13220_v34  ;;  %v11125_v28 = vadd.f32 %v5744_v63, %v13224_v48  ;;  %v6533_v5 = vmul.f32 %v10979_v44, %v10862_v21  ;;  %v13226_v6 = vmov 0.0|0.0   ;;  %v4141_v63 = vld [vmem:[#allocation6] sm:$0xff]  ;;  %v13228_v34 = vld [vmem:[#allocation62_spill] sm:$0xff] }
 0xf4c   : > { %13219 = vst [vmem:[#allocation105_spill] sm:$0xff] %v11116_v60  ;;  %7815 = vmatpush3.bf16.msra.mxu1 %v13222_v36  ;;  %7761 = vmatprep.mubr.msk.f32.mxu1 %vm8581_vm0, %v13223_v23  ;;  %v6534_v31 = vmul.f32 %v10959_v50, %v10889_v41  ;;  %v6535_v62 = vmul.f32 %v10962_v46, %v10874_v9  ;;  %v13230_v23 = vld [vmem:[#allocation70_spill] sm:$0xff]  ;;  %v13232_v36 = vld [vmem:[#allocation71_spill] sm:$0xff] }
 0xf4d   : > { %13221 = vst [vmem:[#allocation69_spill] sm:$0xff] %v11119_v52  ;;  %13225 = vst [vmem:[#allocation65_spill] sm:$0xff] %v11125_v28  ;;  %7816 = vmatprep.subr.bf16.mxu1 %v13226_v6  ;;  %v6536_v30 = vmul.f32 %v10965_v39, %v10918_v3  ;;  %v6538_v56 = vmul.f32 %v11051_v19, %v10952_v61  ;;  %v11141_v33 = vadd.f32 %v6531_v35, %v13227_v26  ;;  %v13229_v6 = vld [vmem:[#allocation34_spill] sm:$0xff]  ;;  %v13234_v28 = vld [vmem:[#allocation72_spill] sm:$0xff] }
 0xf4e   : > { %v11144_v44 = vadd.f32 %v6533_v5, %v13228_v34  ;;  %v4142_v48 = vadd.f32 %v4141_v63, %v10952_v61  ;;  %v11148_v50 = vadd.f32 %v6534_v31, %v13229_v6  ;;  %v11151_v46 = vadd.f32 %v6535_v62, %v13230_v23  ;;  %v13236_v60 = vld [vmem:[#allocation19_spill] sm:$0xff]  ;;  %v13237_v61 = vld [vmem:[#allocation21_spill] sm:$0xff] }
 0xf4f   : > { %v11154_v39 = vadd.f32 %v6536_v30, %v13232_v36  ;;  %v11157_v52 = vadd.f32 %v6538_v56, %v13234_v28  ;;  %v13238_v31 = vld [vmem:[#allocation23_spill] sm:$0xff]  ;;  %v13239_v28 = vld [vmem:[#allocation25_spill] sm:$0xff] }
 0xf50   : > { %13231 = vst [vmem:[#allocation66_spill] sm:$0xff] %v11151_v46  ;;  %7818 = vmatpush3.bf16.msra.mxu1 %v13236_v60  ;;  %4143 = vst.msk [vmem:[#allocation6] sm:$0xff] %vm1570_vm6, %v4142_v48  ;;  %v13240_v48 = vld [vmem:[#allocation24_spill] sm:$0xff] }
 0xf51   : > { %13233 = vst [vmem:[#allocation68_spill] sm:$0xff] %v11154_v39  ;;  %13235 = vst [vmem:[#allocation107_spill] sm:$0xff] %v11157_v52  ;;  %v13243_v52 = vld [vmem:[#allocation22_spill] sm:$0xff] }
0x101e   : > { %v4429_v35 = vpop.f32.mrb[4].mxu1 }
0x101f   : > { %v4434_v5 = vrot.slane %v4429_v35, 4  ;;  %v7741_v26 = vpop.f32.mrb[5].mxu1  ;;  %v4436_v23 = vrot.slane %v4429_v35, 6  ;;  %v4438_v6 = vrot.slane %v4429_v35, 1  ;;  %v4435_v62 = vrot.slane %v4429_v35, 5 }
0x1020   : > { %v11169_v30 = vadd.f32 %v4429_v35, %v13239_v28  ;;  %v4439_v34 = vrot.slane %v4429_v35, 2  ;;  %v13241_v26 = vld [vmem:[#allocation20_spill] sm:$0xff]  ;;  %v4440_v28 = vrot.slane %v4429_v35, 3 }
0x1021   : > { %v11162_v63 = vadd.f32 %v4434_v5, %v13237_v61  ;;  %v11166_v36 = vadd.f32 %v4436_v23, %v13238_v31  ;;  %v11172_v60 = vadd.f32 %v4438_v6, %v13240_v48  ;;  %v4437_v5 = vrot.slane %v4429_v35, 7  ;;  %v13242_v23 = vld [vmem:[#allocation27_spill] sm:$0xff]  ;;  %v13245_v48 = vld [vmem:[#allocation26_spill] sm:$0xff] }
0x1022   : > { %v11177_v61 = vadd.f32 %v4435_v62, %v13241_v26  ;;  %v11181_v31 = vadd.f32 %v4439_v34, %v13242_v23  ;;  %v13244_v6 = vld [vmem:[#allocation47_spill] sm:$0xff]  ;;  %v11192_v26 = vadd.f32 %v4440_v28, %v13245_v48  ;;  %v13246_v34 = vld [vmem:[#allocation30_spill] sm:$0xff] }
0x1023   : > { %8156 = vtanh.f32 %v11162_v63  ;;  %v11185_v39 = vadd.f32 %v4437_v5, %v13243_v52  ;;  %v4165_v35 = vmul.f32 %v13157_v27, %v13246_v34  ;;  %v13247_v5 = vld [vmem:[#allocation93_spill] sm:$0xff]  ;;  %v13248_v48 = vld [vmem:[#allocation74_spill] sm:$0xff] }
0x1024   : > { %8158 = vtanh.f32 %v11166_v36  ;;  %v4229_v23 = vmul.f32 %v10695_v10, %v13247_v5  ;;  %v4203_v27 = vmul.f32 %v13248_v48, %v13145_v17 }
0x1025   : > { %8160 = vtanh.f32 %v11169_v30 }
0x1026   : > { %8162 = vtanh.f32 %v11172_v60 }
0x1027   : > { %8164 = vtanh.f32 %v11177_v61 }
0x1028   : > { %8166 = vtanh.f32 %v11181_v31 }
0x1029   : > { %8168 = vtanh.f32 %v11185_v39 }
0x102a   : > { %8170 = vtanh.f32 %v11192_v26 }
0x102d   : > { %v8157_v56 = vpop.eup %8156 }
0x102e   : > { %4574 = vrot.lane.b32.xlu1 %v8157_v56, %s8575_s8  ;;  %v4197_v56 = vmul.f32 %v13153_v8, %v13244_v6  ;;  %v8159_v62 = vpop.eup %8158  ;;  %v4323_v8 = vmul.f32 %v10846_v15, %v10841_v42  ;;  %v4200_v15 = vmul.f32 %v13135_v2, %v9519_v13  ;;  %v11225_v13 = vld [vmem:[#allocation5] sm:$0xff] }
0x102f   : > { %v8161_v52 = vpop.eup %8160  ;;  %13252 = vst [vmem:[#allocation35_spill] sm:$0xff] %v11225_v13 }
0x1030   : > { %4582 = vrot.lane.b32.xlu0 %v8161_v52, %s8575_s8  ;;  %v4205_v46 = vadd.f32 %v4197_v56, %v4165_v35  ;;  %v8163_v6 = vpop.eup %8162  ;;  %v4325_v52 = vmul.f32 %v10877_v12, %v10862_v21  ;;  %v13249_v35 = vld [vmem:[#allocation40_spill] sm:$0xff]  ;;  %v4168_v12 = vmul.f32 %v13137_v29, %v9203_v37  ;;  %v4326_v37 = vmul.f32 %v10868_v32, %v10889_v41  ;;  %v13255_v29 = vld [vmem:[#allocation43_spill] sm:$0xff] }
0x1031   : > { %v4171_v42 = vmul.f32 %v13249_v35, %v13149_v51  ;;  %v13254_v35 = vld [vmem:[#allocation94_spill] sm:$0xff]  ;;  %v11248_v32 = vrot.slane %v10771_v16, 1 }
0x1032   : > { %4578 = vrot.lane.b32.xlu1 %v8159_v62, %s8575_s8  ;;  %v4237_v28 = vadd.f32 %v4229_v23, %v4205_v46  ;;  %v8165_v62 = vpop.eup %8164  ;;  %v4324_v46 = vmul.f32 %v10865_v58, %v10850_v45  ;;  %v13250_v23 = vld [vmem:[#allocation73_spill] sm:$0xff]  ;;  %v4232_v58 = vmul.f32 %v10651_v14, %v10294_v49  ;;  %v13256_v49 = vld [vmem:[#allocation39_spill] sm:$0xff] }
0x1033   : > { %v8167_v56 = vpop.eup %8166  ;;  %v4170_v14 = vmul.f32 %v13256_v49, %v13143_v53  ;;  %13259 = vst [vmem:[#allocation49_spill] sm:$0xff] %v11248_v32 }
0x1034   : > { %4576 = vrot.lane.b32.xlu0 %v8165_v62, %s8575_s8  ;;  %v4331_v10 = vadd.f32 %v4323_v8, %v4237_v28  ;;  %v11220_v8 = vrot.slane %v10771_v16, 2  ;;  %v8169_v28 = vpop.eup %8168  ;;  %v4211_v62 = vadd.f32 %v4203_v27, %v4171_v42  ;;  %v4202_v42 = vmul.f32 %v13255_v29, %v9678_v20 }
0x1036   : > { %4584 = vrot.lane.b32.xlu1 %v8163_v6, %s8575_s8  ;;  %v4235_v6 = vmul.f32 %v13250_v23, %v10442_v59  ;;  %13251 = vst [vmem:[#allocation108_spill] sm:$0xff] %v11220_v8  ;;  %v4457_v2 = vadd.f32 %v11225_v13, %v4331_v10  ;;  %v4329_v21 = vmul.f32 %v11220_v8, %v10942_v4  ;;  %v8171_v10 = vpop.eup %8170 }
0x1037   : > { %v4208_v23 = vadd.f32 %v4200_v15, %v4168_v12  ;;  %v4332_v59 = vadd.f32 %v4324_v46, %v13254_v35  ;;  %v11244_v35 = vld [vmem:[#allocation5 + $0x10] sm:$0xff] }
0x1038   : > { %4580 = vrot.lane.b32.xlu0 %v8169_v28, %s8575_s8  ;;  %v4243_v27 = vadd.f32 %v4235_v6, %v4211_v62  ;;  %13258 = vst [vmem:[#allocation67_spill] sm:$0xff] %v11244_v35  ;;  %v13260_v12 = vld [vmem:[#allocation45_spill] sm:$0xff]  ;;  %v11252_v62 = vld [vmem:[#allocation5 + $0x8] sm:$0xff] }
0x1039   : > { %v4240_v15 = vadd.f32 %v4232_v58, %v4208_v23  ;;  %v4201_v6 = vmul.f32 %v9553_v54, %v13260_v12  ;;  %13261 = vst [vmem:[#allocation50_spill] sm:$0xff] %v11252_v62  ;;  %v4328_v23 = vmul.f32 %v11248_v32, %v10918_v3  ;;  %v13262_v58 = vld [vmem:[#allocation29_spill] sm:$0xff] }
0x103a   : > { %4586 = vrot.lane.b32.xlu1 %v8167_v56, %s8575_s8  ;;  %v13253_v56 = vld [vmem:[#allocation96_spill] sm:$0xff]  ;;  %v4337_v41 = vadd.f32 %v4329_v21, %v4243_v27  ;;  %v11261_v27 = vld [vmem:[#allocation5 + $0x30] sm:$0xff] }
0x103b   : > { %v4333_v45 = vadd.f32 %v4325_v52, %v13253_v56  ;;  %v13257_v52 = vld [vmem:[#allocation109_spill] sm:$0xff]  ;;  %v4334_v56 = vadd.f32 %v4326_v37, %v4240_v15  ;;  %13263 = vst [vmem:[#allocation51_spill] sm:$0xff] %v11261_v27  ;;  %v11266_v15 = vld [vmem:[#allocation5 + $0x18] sm:$0xff] }
0x103c   : > { %v4234_v28 = vmul.f32 %v13257_v52, %v10320_v11  ;;  %4588 = vrot.lane.b32.xlu0 %v8171_v10, %s8575_s8  ;;  %v4210_v10 = vadd.f32 %v4202_v42, %v4170_v14  ;;  %v4463_v54 = vadd.f32 %v11261_v27, %v4337_v41  ;;  %13265 = vst [vmem:[#allocation52_spill] sm:$0xff] %v11266_v15  ;;  %v13269_v27 = vld [vmem:[#allocation42_spill] sm:$0xff] }
0x103d   : > { %v4459_v46 = vadd.f32 %v11244_v35, %v4333_v45  ;;  %v4169_v45 = vmul.f32 %v9232_v0, %v13262_v58  ;;  %v13264_v35 = vld [vmem:[#allocation84_spill] sm:$0xff]  ;;  %v4460_v42 = vadd.f32 %v11266_v15, %v4334_v56  ;;  %v4327_v0 = vmul.f32 %v10874_v9, %v10771_v16 }
0x103e   : > { %4534 = vrot.lane.b32.xlu1 %v4457_v2, %s8575_s8  ;;  %v4458_v2 = vadd.f32 %v11252_v62, %v4332_v59  ;;  %v4242_v21 = vadd.f32 %v4234_v28, %v4210_v10  ;;  %v4233_v59 = vmul.f32 %v10292_v25, %v13264_v35  ;;  %v13267_v28 = vld [vmem:[#allocation76_spill] sm:$0xff]  ;;  %v13268_v10 = vld [vmem:[#allocation37_spill] sm:$0xff]  ;;  %v11280_v56 = vrot.slane %v10771_v16, 3  ;;  %v11292_v16 = vld [vmem:[#allocation5 + $0x38] sm:$0xff] }
0x103f   : > { %v4209_v37 = vadd.f32 %v4201_v6, %v4169_v45  ;;  %v4172_v25 = vmul.f32 %v13269_v27, %v13268_v10  ;;  %v13270_v6 = vld [vmem:[#allocation104_spill] sm:$0xff]  ;;  %v13271_v45 = vld [vmem:[#allocation38_spill] sm:$0xff]  ;;  %13274 = vst [vmem:[#allocation54_spill] sm:$0xff] %v11292_v16 }
0x1040   : > { %4536 = vrot.lane.b32.xlu0 %v4458_v2, %s8575_s8  ;;  %v4336_v14 = vadd.f32 %v4328_v23, %v4242_v21  ;;  %v4236_v3 = vmul.f32 %v13271_v45, %v13270_v6  ;;  %v11282_v23 = vld [vmem:[#allocation5 + $0x28] sm:$0xff]  ;;  %v4330_v15 = vmul.f32 %v11280_v56, %v11051_v19 }
0x1041   : > { %v4241_v41 = vadd.f32 %v4233_v59, %v4209_v37  ;;  %13272 = vst [vmem:[#allocation53_spill] sm:$0xff] %v11282_v23  ;;  %v11288_v37 = vld [vmem:[#allocation5 + $0x20] sm:$0xff] }
0x1042   : > { %4538 = vrot.lane.b32.xlu1 %v4459_v46, %s8575_s8  ;;  %v13266_v46 = vld [vmem:[#allocation63_spill] sm:$0xff]  ;;  %v4462_v21 = vadd.f32 %v11282_v23, %v4336_v14  ;;  %13273 = vst [vmem:[#allocation55_spill] sm:$0xff] %v11288_v37  ;;  %v7475_v14 = vmul.f32 -1.442695, %v11162_v63  ;;  %v7482_v63 = vmul.f32 -1.442695, %v11192_v26 }
0x1043   : > { %v4204_v2 = vmul.f32 %v13267_v28, %v13266_v46  ;;  %v4335_v9 = vadd.f32 %v4327_v0, %v4241_v41  ;;  %v7477_v0 = vmul.f32 -1.442695, %v11166_v36 }
0x1044   : > { %4540 = vrot.lane.b32.xlu0 %v4460_v42, %s8575_s8  ;;  %8172 = vpow2.f32 %v7475_v14 }
0x1045   : > { %v4461_v42 = vadd.f32 %v11288_v37, %v4335_v9  ;;  %8174 = vpow2.f32 %v7477_v0 }
0x1046   : > { %4546 = vrot.lane.b32.xlu1 %v4463_v54, %s8575_s8  ;;  %v4212_v54 = vadd.f32 %v4204_v2, %v4172_v25  ;;  %v7478_v25 = vmul.f32 -1.442695, %v11185_v39 }
0x1048   : > { %4544 = vrot.lane.b32.xlu0 %v4462_v21, %s8575_s8  ;;  %v4244_v59 = vadd.f32 %v4236_v3, %v4212_v54  ;;  %v7476_v3 = vmul.f32 -1.442695, %v11177_v61  ;;  %v7481_v21 = vmul.f32 -1.442695, %v11181_v31 }
0x104a   : > { %v4338_v62 = vadd.f32 %v4330_v15, %v4244_v59  ;;  %v7479_v15 = vmul.f32 -1.442695, %v11169_v30  ;;  %8176 = vpow2.f32 %v7476_v3 }
0x104c   : > { %4542 = vrot.lane.b32.xlu0 %v4461_v42, %s8575_s8  ;;  %v4464_v8 = vadd.f32 %v11292_v16, %v4338_v62  ;;  %v7480_v62 = vmul.f32 -1.442695, %v11172_v60 }
0x104e   : > { %v8173_v2 = vpop.eup %8172 }
0x104f   : > { %v4489_v41 = vadd.f32 1.0, %v8173_v2 }
0x1050   : > { %4548 = vrot.lane.b32.xlu0 %v4464_v8, %s8575_s8  ;;  %v8175_v8 = vpop.eup %8174 }
0x1051   : > { %8178 = vrcp.f32 %v4489_v41  ;;  %v4491_v36 = vadd.f32 1.0, %v8175_v8 }
0x1052   : > { %8180 = vpow2.f32 %v7479_v15 }
0x1053   : > { %8182 = vpow2.f32 %v7478_v25 }
0x1054   : > { %8184 = vpow2.f32 %v7480_v62  ;;  %v8177_v61 = vpop.eup %8176 }
0x1055   : > { %8186 = vpow2.f32 %v7482_v63  ;;  %v4490_v59 = vadd.f32 1.0, %v8177_v61  ;;  %v4874_v61 = vld [vmem:[#allocation7] sm:$0xff] }
0x1056   : > { %8188 = vrcp.f32 %v4491_v36 }
0x1057   : > { %8190 = vpow2.f32 %v7481_v21  ;;  %v7473_v21 = vld [vmem:[%s8798_s3 + $0x20] sm:$0xff] }
0x1058   : > { %8192 = vrcp.f32 %v4490_v59 }
0x105b   : > { %v11304_v9 = vpop.eup %8178 }
0x105c   : > { %v8181_v54 = vpop.eup %8180 }
0x105d   : > { %v8183_v60 = vpop.eup %8182  ;;  %v4493_v42 = vadd.f32 1.0, %v8181_v54 }
0x105e   : > { %v8185_v26 = vpop.eup %8184  ;;  %v4492_v14 = vadd.f32 1.0, %v8183_v60 }
0x105f   : > { %v8187_v0 = vpop.eup %8186  ;;  %8194 = vrcp.f32 %v4493_v42  ;;  %v4494_v31 = vadd.f32 1.0, %v8185_v26 }
0x1060   : > { %v11308_v2 = vpop.eup %8188  ;;  %8196 = vrcp.f32 %v4492_v14  ;;  %v4496_v41 = vadd.f32 1.0, %v8187_v0 }
0x1061   : > { %v8191_v15 = vpop.eup %8190  ;;  %8198 = vrcp.f32 %v4494_v31 }
0x1062   : > { %8200 = vrcp.f32 %v4496_v41  ;;  %v4495_v8 = vadd.f32 1.0, %v8191_v15  ;;  %v11312_v63 = vpop.eup %8192 }
0x1064   : > { %8202 = vrcp.f32 %v4495_v8 }
0x1069   : > { %v11316_v54 = vpop.eup %8194 }
0x106a   : > { %v11320_v59 = vpop.eup %8196 }
0x106b   : > { %v11324_v0 = vpop.eup %8198 }
0x106c   : > { %v11328_v31 = vpop.eup %8200 }
0x10a0   : > { %v4575_v30 = vpop.permute.xlu1 %4574 }
0x10a1   : > { %v4598_v39 = vmul.f32 %v11304_v9, %v4575_v30 }
0x10a2   : > { %v4583_v62 = vpop.permute.xlu0 %4582 }
0x10a3   : > { %4614 = vrot.lane.b32.xlu1 %v4598_v39, %s8575_s8  ;;  %v4875_v39 = vadd.f32 %v7473_v21, %v4874_v61  ;;  %v4602_v26 = vmul.f32 %v11316_v54, %v4583_v62  ;;  %v11334_v62 = vpop.eup %8202 }
0x10a4   : > { %v4579_v3 = vpop.permute.xlu1 %4578 }
0x10a5   : > { %v4600_v25 = vmul.f32 %v11308_v2, %v4579_v3  ;;  %4876 = vst.msk [vmem:[#allocation7] sm:$0xff] %vm2139_vm7, %v4875_v39 }
0x10a6   : > { %v4577_v36 = vpop.permute.xlu0 %4576 }
0x10a7   : > { %4618 = vrot.lane.b32.xlu1 %v4600_v25, %s8575_s8  ;;  %v4599_v30 = vmul.f32 %v11312_v63, %v4577_v36 }
0x10a8   : > { %v4585_v42 = vpop.permute.xlu1 %4584 }
0x10a9   : > { %4616 = vrot.lane.b32.xlu0 %v4599_v30, %s8575_s8  ;;  %v4603_v41 = vmul.f32 %v11324_v0, %v4585_v42 }
0x10aa   : > { %v4581_v60 = vpop.permute.xlu0 %4580 }
0x10ab   : > { %v4601_v14 = vmul.f32 %v11320_v59, %v4581_v60 }
0x10ac   : > { %v4587_v25 = vpop.permute.xlu1 %4586 }
0x10ad   : > { %4622 = vrot.lane.b32.xlu0 %v4602_v26, %s8575_s8  ;;  %4620 = vrot.lane.b32.xlu1 %v4601_v14, %s8575_s8  ;;  %v4604_v8 = vmul.f32 %v11334_v62, %v4587_v25 }
0x10ae   : > { %v4589_v3 = vpop.permute.xlu0 %4588 }
0x10af   : > { %v4605_v15 = vmul.f32 %v11328_v31, %v4589_v3 }
0x10b0   : > { %v4535_v61 = vpop.permute.xlu1 %4534 }
0x10b1   : > { %4628 = vrot.lane.b32.xlu0 %v4605_v15, %s8575_s8  ;;  %4624 = vrot.lane.b32.xlu1 %v4603_v41, %s8575_s8  ;;  %v4558_v41 = vmul.f32 %v11304_v9, %v4535_v61 }
0x10b2   : > { %v4537_v36 = vpop.permute.xlu0 %4536 }
0x10b3   : > { %v4559_v15 = vmul.f32 %v11312_v63, %v4537_v36 }
0x10b4   : > { %v4539_v39 = vpop.permute.xlu1 %4538 }
0x10b5   : > { %4626 = vrot.lane.b32.xlu1 %v4604_v8, %s8575_s8  ;;  %v4560_v25 = vmul.f32 %v11308_v2, %v4539_v39 }
0x10b6   : > { %v4541_v30 = vpop.permute.xlu0 %4540 }
0x10b8   : > { %v4547_v42 = vpop.permute.xlu1 %4546 }
0x10b9   : > { %4523 = vperm.xlu1 %7945, %v7473_v21   ;;  %v4561_v21 = vmul.f32 %v11320_v59, %v4541_v30  ;;  %v4564_v39 = vmul.f32 %v11334_v62, %v4547_v42 }
0x10ba   : > { %v4545_v60 = vpop.permute.xlu0 %4544 }
0x10bb   : > { %v4563_v4 = vmul.f32 %v11324_v0, %v4545_v60 }
0x10be   : > { %v4543_v26 = vpop.permute.xlu0 %4542 }
0x10c2   : > { %v4549_v3 = vpop.permute.xlu0 %4548 }
0x1115   : > { %v4615_v14 = vpop.permute.xlu1 %4614 }
0x1116   : > { %v4638_v8 = vadd.f32 %v4615_v14, %v4558_v41 }
0x1118   : > { %v4654_v32 = vrot.slane %v4638_v8, 4 }
0x1119   : > { %v4619_v23 = vpop.permute.xlu1 %4618 }
0x111a   : > { %v4640_v19 = vadd.f32 %v4619_v23, %v4560_v25  ;;  %v4562_v23 = vmul.f32 %v11316_v54, %v4543_v26 }
0x111b   : > { %v4617_v16 = vpop.permute.xlu0 %4616 }
0x111c   : > { %v4639_v37 = vadd.f32 %v4617_v16, %v4559_v15  ;;  %v4657_v6 = vrot.slane %v4640_v19, 2  ;;  %v4565_v16 = vmul.f32 %v11328_v31, %v4549_v3 }
0x111e   : > { %v4655_v11 = vrot.slane %v4639_v37, 3 }
0x111f   : > { %v4623_v35 = vpop.permute.xlu0 %4622  ;;  %v4621_v20 = vpop.permute.xlu1 %4620 }
0x1120   : > { %v4641_v12 = vadd.f32 %v4621_v20, %v4561_v21  ;;  %v4656_v36 = vsel %vm1907_vm8, %v4655_v11, %v4654_v32  ;;  %v4642_v19 = vadd.f32 %v4623_v35, %v4562_v23 }
0x1121   : > { %v4658_v37 = vsel %vm1910_vm9, %v4657_v6, %v4656_v36  ;;  %v8586_v6 = vmov 4  }
0x1122   : > { %v4659_v13 = vrot.slane %v4641_v12, 1  ;;  %7947 = vset.pattern.permute.xlu0 %v8586_v6  ;;  %7946 = vset.pattern.permute.xlu1 %v8586_v6  ;;  %v11406_v6 = vld [vmem:[%s8781_s4 + $0x10] sm:$0xff] }
0x1123   : > { %v4625_v61 = vpop.permute.xlu1 %4624  ;;  %v4629_v10 = vpop.permute.xlu0 %4628  ;;  %13279 = vst [vmem:[#allocation61_spill] sm:$0xff] %v11406_v6 }
0x1124   : > { %v4643_v52 = vadd.f32 %v4625_v61, %v4563_v4  ;;  %v4660_v20 = vsel %vm1913_vm10, %v4659_v13, %v4658_v37  ;;  %v4645_v30 = vadd.f32 %v4629_v10, %v4565_v16 }
0x1125   : > { %v4661_v11 = vsel %vm1916_vm11, %v4642_v19, %v4660_v20 }
0x1126   : > { %v4662_v14 = vrot.slane %v4643_v52, 7  ;;  %v4666_v12 = vrot.slane %v4645_v30, 5 }
0x1127   : > { %v4627_v60 = vpop.permute.xlu1 %4626 }
0x1128   : > { %v4644_v15 = vadd.f32 %v4627_v60, %v4564_v39  ;;  %v4663_v4 = vsel %vm1919_vm12, %v4662_v14, %v4661_v11 }
0x112a   : > { %v4664_v32 = vrot.slane %v4644_v15, 6 }
0x112c   : > { %v4665_v3 = vsel %vm1922_vm13, %v4664_v32, %v4663_v4  ;;  %v11394_v4 = vld [vmem:[%s8781_s4 + $0x8] sm:$0xff] }
0x112d   : > { %v4667_v42 = vsel %vm1925_vm14, %v4666_v12, %v4665_v3  ;;  %13276 = vst [vmem:[#allocation57_spill] sm:$0xff] %v11394_v4  ;;  %v11398_v3 = vld [vmem:[%s8781_s4] sm:$0xff] }
0x112e   : > { %4668 = vrot.lane.b32.xlu0 %v4667_v42, %s8577_s9  ;;  %13277 = vst [vmem:[#allocation58_spill] sm:$0xff] %v11398_v3  ;;  %v11402_v42 = vld [vmem:[%s8781_s4 + $0x30] sm:$0xff] }
0x112f   : > { %13278 = vst [vmem:[#allocation59_spill] sm:$0xff] %v11402_v42 }
0x1138   : > { %v11354_v13 = vpop.permute.xlu1 %4523 }
0x11a0   : > { %v4669_v52 = vpop.permute.xlu0 %4668 }
0x11a1   : > { %v11357_v35 = vmul.f32 %v4669_v52, %v11354_v13  ;;  %v11410_v52 = vld [vmem:[%s8781_s4 + $0x18] sm:$0xff] }
0x11a2   : > { %13280 = vst [vmem:[#allocation62_spill] sm:$0xff] %v11410_v52 }
0x11a3   : > { %13275 = vst [vmem:[#allocation56_spill] sm:$0xff] %v11357_v35  ;;  %8204 = vtanh.f32 %v11357_v35  ;;  %v4806_v10 = vcombine.high %v11357_v35, %v11357_v35  ;;  %v4813_v26 = vrot.slane %v11357_v35, %v13162_v22 }
0x11a5   : > { %v4820_v41 = vrot.slane %v4806_v10, %v13162_v22  ;;  %v4821_v25 = vcombine.high %v4813_v26, %v4813_v26  ;;  %v4829_v8 = vrot.slane %v4813_v26, %v13162_v22  ;;  %v11414_v10 = vld [vmem:[%s8781_s4 + $0x20] sm:$0xff]  ;;  %v11418_v26 = vld [vmem:[%s8781_s4 + $0x28] sm:$0xff] }
0x11a6   : > { %13281 = vst [vmem:[#allocation34_spill] sm:$0xff] %v11414_v10  ;;  %13282 = vst [vmem:[#allocation70_spill] sm:$0xff] %v11418_v26 }
0x11a7   : > { %v4822_v21 = vcombine.high %v4820_v41, %v4820_v41  ;;  %v4836_v36 = vrot.slane %v4820_v41, %v13162_v22  ;;  %v4843_v61 = vrot.slane %v4821_v25, %v13162_v22  ;;  %v4851_v16 = vcombine.high %v4829_v8, %v4829_v8  ;;  %4863 = vst.msk [vmem:[%s9106_s11 + $0x4] sm:$0x1] %vm2058_vm15, %v4829_v8 }
0x11a8   : > { %v13283_v41 = vmov 0  }
0x11a9   : > { %v4850_v39 = vrot.slane %v4822_v21, %v13162_v22  ;;  %v4852_v23 = vcombine.high %v4836_v36, %v4836_v36  ;;  %v4853_v37 = vcombine.high %v4843_v61, %v4843_v61  ;;  %4864 = vst.msk [vmem:[%s9106_s11 + $0x14] sm:$0x1] %vm2058_vm15, %v4843_v61  ;;  %4865 = vst.msk [vmem:[%s9106_s11 + $0x24] sm:$0x1] %vm2058_vm15, %v4851_v16 }
0x11aa   : > { %4867 = vst.msk [vmem:[%s9106_s11 + $0x44] sm:$0x1] %vm2058_vm15, %v4836_v36 }
0x11ab   : > { %v4854_v20 = vcombine.high %v4850_v39, %v4850_v39  ;;  %4866 = vst.msk [vmem:[%s9106_s11 + $0x34] sm:$0x1] %vm2058_vm15, %v4853_v37  ;;  %4868 = vst.msk [vmem:[%s9106_s11 + $0x54] sm:$0x1] %vm2058_vm15, %v4850_v39 }
0x11ac   : > { %4869 = vst.msk [vmem:[%s9106_s11 + $0x64] sm:$0x1] %vm2058_vm15, %v4852_v23 }
0x11ad   : > { %v8205_v30 = vpop.eup %8204  ;;  %4870 = vst.msk [vmem:[%s9106_s11 + $0x74] sm:$0x1] %vm2058_vm15, %v4854_v20 }
0x11ae   : > { %4689 = vrot.lane.b32.xlu0 %v8205_v30, %s8579_s14  ;;  %v4674_v14 = vrot.slane %v8205_v30, 4  ;;  %v4675_v60 = vrot.slane %v8205_v30, 5  ;;  %v4676_v19 = vrot.slane %v8205_v30, 6  ;;  %v4677_v15 = vrot.slane %v8205_v30, 7 }
0x11af   : > { %v4678_v11 = vrot.slane %v8205_v30, 1  ;;  %v4680_v32 = vrot.slane %v8205_v30, 3  ;;  %v4679_v12 = vrot.slane %v8205_v30, 2 }
0x11b0   : > { %4681 = vrot.lane.b32.xlu1 %v4674_v14, %s8579_s14 }
0x11b2   : > { %4683 = vrot.lane.b32.xlu0 %v4675_v60, %s8579_s14 }
0x11b4   : > { %4685 = vrot.lane.b32.xlu1 %v4676_v19, %s8579_s14 }
0x11b6   : > { %4687 = vrot.lane.b32.xlu0 %v4677_v15, %s8579_s14 }
0x11b8   : > { %4691 = vrot.lane.b32.xlu1 %v4678_v11, %s8579_s14 }
0x11ba   : > { %4695 = vrot.lane.b32.xlu0 %v4680_v32, %s8579_s14 }
0x11bc   : > { %4693 = vrot.lane.b32.xlu1 %v4679_v12, %s8579_s14 }
0x11be   : > { %5012 = vperm.xlu0 %7947, %v11394_v4  }
0x11c0   : > { %5008 = vperm.xlu1 %7946, %v11398_v3  }
0x11c2   : > { %5032 = vperm.xlu0 %7947, %v11402_v42  }
0x11c4   : > { %5016 = vperm.xlu1 %7946, %v11406_v6  }
0x11c8   : > { %5020 = vperm.xlu1 %7946, %v11410_v52  }
0x11cc   : > { %5024 = vperm.xlu1 %7946, %v11414_v10  }
0x11d0   : > { %5028 = vperm.xlu1 %7946, %v11418_v26  }
0x11d4   : > { %7948 = vset.pattern.permute.xlu1 %v13283_v41 }
0x1220   : > { %v4690_v25 = vpop.permute.xlu0 %4689 }
0x1222   : > { %v4682_v8 = vpop.permute.xlu1 %4681 }
0x1223   : > { %v4705_v21 = vmul.f32 %v11304_v9, %v4682_v8 }
0x1224   : > { %v4684_v36 = vpop.permute.xlu0 %4683 }
0x1225   : > { %v4706_v61 = vmul.f32 %v11312_v63, %v4684_v36  ;;  %v4721_v39 = vrot.slane %v4705_v21, 4  ;;  %v4709_v63 = vmul.f32 %v11316_v54, %v4690_v25  ;;  %v13284_v54 = vld [vmem:[#allocation33_spill] sm:$0xff] }
0x1226   : > { %v4686_v16 = vpop.permute.xlu1 %4685 }
0x1227   : > { %v4722_v23 = vrot.slane %v4706_v61, 3  ;;  %v4707_v37 = vmul.f32 %v11308_v2, %v4686_v16 }
0x1228   : > { %v4688_v20 = vpop.permute.xlu0 %4687 }
0x1229   : > { %v4723_v30 = vsel %vm1907_vm8, %v4722_v23, %v4721_v39  ;;  %v4724_v14 = vrot.slane %v4707_v37, 2  ;;  %v4708_v60 = vmul.f32 %v11320_v59, %v4688_v20  ;;  %v11449_v20 = vrot.slane %v11357_v35, 4 }
0x122a   : > { %v4692_v19 = vpop.permute.xlu1 %4691 }
0x122b   : > { %v4725_v15 = vsel %vm1910_vm9, %v4724_v14, %v4723_v30  ;;  %v4726_v11 = vrot.slane %v4708_v60, 1  ;;  %v4710_v9 = vmul.f32 %v11324_v0, %v4692_v19  ;;  %v13288_v19 = vld [vmem:[#allocation91_spill] sm:$0xff] }
0x122c   : > { %v4696_v32 = vpop.permute.xlu0 %4695 }
0x122d   : > { %v4727_v12 = vsel %vm1913_vm10, %v4726_v11, %v4725_v15  ;;  %v4729_v8 = vrot.slane %v4710_v9, 7  ;;  %v4712_v2 = vmul.f32 %v11328_v31, %v4696_v32  ;;  %v11461_v11 = vrot.slane %v11357_v35, 5  ;;  %v13290_v9 = vld [vmem:[#allocation44_spill] sm:$0xff] }
0x122e   : > { %v4694_v21 = vpop.permute.xlu1 %4693  ;;  %v4728_v36 = vsel %vm1916_vm11, %v4709_v63, %v4727_v12 }
0x122f   : > { %v4711_v61 = vmul.f32 %v11334_v62, %v4694_v21  ;;  %v4730_v16 = vsel %vm1919_vm12, %v4729_v8, %v4728_v36  ;;  %v4733_v39 = vrot.slane %v4712_v2, 5  ;;  %v11446_v62 = vrot.slane %v11357_v35, 7  ;;  %v13293_v21 = vld [vmem:[#allocation86_spill] sm:$0xff] }
0x1230   : > { %v11473_v2 = vrot.slane %v11357_v35, 6 }
0x1231   : > { %v4731_v59 = vrot.slane %v4711_v61, 6  ;;  %13287 = vst [vmem:[#allocation96_spill] sm:$0xff] %v11446_v62  ;;  %v13295_v61 = vld [vmem:[#allocation85_spill] sm:$0xff] }
0x1232   : > { %13292 = vst [vmem:[#allocation42_spill] sm:$0xff] %v11473_v2 }
0x1233   : > { %v4732_v23 = vsel %vm1922_vm13, %v4731_v59, %v4730_v16 }
0x1234   : > { %v4734_v0 = vsel %vm1925_vm14, %v4733_v39, %v4732_v23 }
0x1235   : > { %4735 = vrot.lane.b32.xlu0 %v4734_v0, %s8579_s14  ;;  %v13297_v0 = vld [vmem:[#allocation83_spill] sm:$0xff] }
0x1239   : > { %5036 = vperm.xlu0 %7947, %v13284_v54  }
0x123d   : > { %v11439_v25 = vpop.permute.xlu0 %5012 }
0x123e   : > { %13285 = vst [vmem:[#allocation71_spill] sm:$0xff] %v11439_v25 }
0x123f   : > { %v11441_v31 = vpop.permute.xlu1 %5008 }
0x1240   : > { %13286 = vst [vmem:[#allocation72_spill] sm:$0xff] %v11441_v31 }
0x1241   : > { %v11443_v37 = vpop.permute.xlu0 %5032 }
0x1242   : > { %v6585_v14 = vmul.f32 %v11446_v62, %v11443_v37 }
0x1243   : > { %v11451_v30 = vpop.permute.xlu1 %5016 }
0x1244   : > { %v5787_v60 = vmul.f32 %v11449_v20, %v11451_v30  ;;  %v11458_v15 = vadd.f32 %v6585_v14, %v13288_v19  ;;  %v13299_v14 = vld [vmem:[#allocation88_spill] sm:$0xff] }
0x1246   : > { %13289 = vst [vmem:[#allocation94_spill] sm:$0xff] %v11458_v15  ;;  %v11464_v32 = vadd.f32 %v5787_v60, %v13290_v9 }
0x1247   : > { %v11466_v63 = vpop.permute.xlu1 %5020 }
0x1248   : > { %13291 = vst [vmem:[#allocation76_spill] sm:$0xff] %v11464_v32  ;;  %v5788_v12 = vmul.f32 %v11461_v11, %v11466_v63  ;;  %v6582_v8 = vmul.f32 %v11449_v20, %v11466_v63 }
0x124a   : > { %v11476_v36 = vadd.f32 %v5788_v12, %v13293_v21  ;;  %v11479_v59 = vadd.f32 %v6582_v8, %v13295_v61  ;;  %v13301_v8 = vld [vmem:[#allocation87_spill] sm:$0xff]  ;;  %v13303_v61 = vld [vmem:[#allocation89_spill] sm:$0xff] }
0x124b   : > { %v11481_v16 = vpop.permute.xlu1 %5024 }
0x124c   : > { %13294 = vst [vmem:[#allocation38_spill] sm:$0xff] %v11476_v36  ;;  %13296 = vst [vmem:[#allocation33_spill] sm:$0xff] %v11479_v59  ;;  %v5789_v39 = vmul.f32 %v11473_v2, %v11481_v16  ;;  %v6583_v23 = vmul.f32 %v11461_v11, %v11481_v16 }
0x124e   : > { %v11488_v54 = vadd.f32 %v5789_v39, %v13297_v0  ;;  %v11491_v60 = vadd.f32 %v6583_v23, %v13299_v14 }
0x124f   : > { %v11493_v19 = vpop.permute.xlu1 %5028 }
0x1250   : > { %13298 = vst [vmem:[#allocation91_spill] sm:$0xff] %v11488_v54  ;;  %13300 = vst [vmem:[#allocation44_spill] sm:$0xff] %v11491_v60  ;;  %v5790_v9 = vmul.f32 %v11446_v62, %v11493_v19  ;;  %v6584_v12 = vmul.f32 %v11473_v2, %v11493_v19 }
0x1252   : > { %v11500_v21 = vadd.f32 %v5790_v9, %v13301_v8  ;;  %v11503_v15 = vadd.f32 %v6584_v12, %v13303_v61 }
0x1254   : > { %13302 = vst [vmem:[#allocation86_spill] sm:$0xff] %v11500_v21  ;;  %13304 = vst [vmem:[#allocation85_spill] sm:$0xff] %v11503_v15 }
0x12a7   : > { %v4736_v36 = vpop.permute.xlu0 %4735 }
0x12a8   : > { %v11506_v39 = vmul.f32 %v4736_v36, %v11354_v13 }
0x12aa   : > { %v4740_v23 = vcombine.high %v11506_v39, %v11506_v39  ;;  %v4747_v0 = vrot.slane %v11506_v39, %v13162_v22  ;;  %v11513_v14 = vrot.slane %v11506_v39, 3  ;;  %v11516_v54 = vrot.slane %v11506_v39, 4 }
0x12ab   : > { %v11519_v9 = vrot.slane %v11506_v39, 5  ;;  %v11522_v12 = vrot.slane %v11506_v39, 6  ;;  %v5043_v13 = vrot.slane %v11506_v39, 7  ;;  %v11526_v36 = vrot.slane %v11506_v39, 1 }
0x12ac   : > { %v4754_v8 = vrot.slane %v4740_v23, %v13162_v22  ;;  %v4755_v61 = vcombine.high %v4747_v0, %v4747_v0  ;;  %v4763_v21 = vrot.slane %v4747_v0, %v13162_v22  ;;  %v5045_v32 = vrot.slane %v11506_v39, 2 }
0x12ad   : > { %v5054_v60 = vmul.f32 %v11513_v14, %v11441_v31  ;;  %v5055_v59 = vmul.f32 %v11516_v54, %v11439_v25  ;;  %v5056_v15 = vmul.f32 %v11519_v9, %v11451_v30  ;;  %v5057_v23 = vmul.f32 %v11522_v12, %v11466_v63 }
0x12ae   : > { %v4756_v42 = vcombine.high %v4754_v8, %v4754_v8  ;;  %v4770_v0 = vrot.slane %v4754_v8, %v13162_v22  ;;  %v4777_v41 = vrot.slane %v4755_v61, %v13162_v22  ;;  %v4785_v10 = vcombine.high %v4763_v21, %v4763_v21  ;;  %4797 = vst.msk [vmem:[%s9238_s15 + $0x4] sm:$0x1] %vm2058_vm15, %v4763_v21 }
0x12af   : > { %v5058_v52 = vmul.f32 %v5043_v13, %v11481_v16  ;;  %v5059_v6 = vmul.f32 %v11493_v19, %v11506_v39  ;;  %v5060_v26 = vmul.f32 %v11526_v36, %v11443_v37  ;;  %v5062_v3 = vadd.f32 %v5054_v60, %v11039_v38 }
0x12b0   : > { %v4784_v8 = vrot.slane %v4756_v42, %v13162_v22  ;;  %v4786_v4 = vcombine.high %v4770_v0, %v4770_v0  ;;  %v4787_v61 = vcombine.high %v4777_v41, %v4777_v41  ;;  %4798 = vst.msk [vmem:[%s9238_s15 + $0x14] sm:$0x1] %vm2058_vm15, %v4777_v41  ;;  %4799 = vst.msk [vmem:[%s9238_s15 + $0x24] sm:$0x1] %vm2058_vm15, %v4785_v10  ;;  %v13305_v10 = vld [vmem:[#allocation101_spill] sm:$0xff] }
0x12b1   : > { %4801 = vst.msk [vmem:[%s9238_s15 + $0x44] sm:$0x1] %vm2058_vm15, %v4770_v0  ;;  %v5063_v21 = vadd.f32 %v5055_v59, %v11043_v24  ;;  %v5064_v62 = vadd.f32 %v5056_v15, %v11046_v1  ;;  %v5065_v2 = vadd.f32 %v5057_v23, %v11049_v55  ;;  %v5066_v48 = vadd.f32 %v5058_v52, %v11055_v40  ;;  %v13306_v15 = vld [vmem:[#allocation100_spill] sm:$0xff] }
0x12b2   : > { %v5067_v38 = vadd.f32 %v5059_v6, %v11058_v57  ;;  %v4788_v42 = vcombine.high %v4784_v8, %v4784_v8  ;;  %4800 = vst.msk [vmem:[%s9238_s15 + $0x34] sm:$0x1] %vm2058_vm15, %v4787_v61  ;;  %4802 = vst.msk [vmem:[%s9238_s15 + $0x54] sm:$0x1] %vm2058_vm15, %v4784_v8  ;;  %v5068_v41 = vadd.f32 %v5060_v26, %v13305_v10  ;;  %v5109_v60 = vrot.slane %v5062_v3, 5  ;;  %v13308_v8 = vld [vmem:[#allocation103_spill] sm:$0xff] }
0x12b3   : > { %4803 = vst.msk [vmem:[%s9238_s15 + $0x64] sm:$0x1] %vm2058_vm15, %v4786_v4  ;;  %v5110_v24 = vrot.slane %v5063_v21, 4  ;;  %v5112_v59 = vrot.slane %v5064_v62, 3  ;;  %v5114_v0 = vrot.slane %v5065_v2, 2  ;;  %v5116_v1 = vrot.slane %v5066_v48, 1 }
0x12b4   : > { %v5769_v55 = vmul.f32 %v5045_v32, %v11441_v31  ;;  %4804 = vst.msk [vmem:[%s9238_s15 + $0x74] sm:$0x1] %vm2058_vm15, %v4788_v42  ;;  %v5119_v57 = vrot.slane %v5068_v41, 7  ;;  %v6564_v6 = vmul.f32 %v5045_v32, %v11439_v25  ;;  %v5774_v52 = vmul.f32 %v5043_v13, %v11493_v19  ;;  %v13307_v2 = vld [vmem:[#allocation102_spill] sm:$0xff] }
0x12b5   : > { %v5111_v40 = vsel %vm1907_vm8, %v5110_v24, %v5109_v60  ;;  %v5775_v3 = vmul.f32 %v11443_v37, %v11506_v39  ;;  %v6569_v48 = vmul.f32 %v5043_v13, %v11443_v37  ;;  %v5770_v21 = vmul.f32 %v11513_v14, %v11439_v25 }
0x12b6   : > { %v5113_v4 = vsel %vm1910_vm9, %v5112_v59, %v5111_v40  ;;  %v11576_v26 = vadd.f32 %v5769_v55, %v13306_v15  ;;  %v11583_v23 = vadd.f32 %v6564_v6, %v13307_v2  ;;  %v11586_v61 = vadd.f32 %v5774_v52, %v13308_v8  ;;  %v13313_v52 = vld [vmem:[#allocation69_spill] sm:$0xff]  ;;  %v13314_v15 = vld [vmem:[#allocation98_spill] sm:$0xff] }
0x12b7   : > { %v5115_v62 = vsel %vm1913_vm10, %v5114_v0, %v5113_v4  ;;  %v11592_v10 = vadd.f32 %v5775_v3, %v11101_v47  ;;  %v11595_v41 = vadd.f32 %v6569_v48, %v11110_v18  ;;  %v5771_v13 = vmul.f32 %v11516_v54, %v11451_v30 }
0x12b8   : > { %v5117_v42 = vsel %vm1916_vm11, %v5116_v1, %v5115_v62  ;;  %v11599_v60 = vpop.permute.xlu0 %5036  ;;  %v5772_v59 = vmul.f32 %v11519_v9, %v11466_v63  ;;  %v5773_v0 = vmul.f32 %v11522_v12, %v11481_v16  ;;  %v11607_v1 = vadd.f32 %v5770_v21, %v11106_v43 }
0x12b9   : > { %13309 = vst [vmem:[#allocation83_spill] sm:$0xff] %v11592_v10  ;;  %13310 = vst [vmem:[#allocation88_spill] sm:$0xff] %v11595_v41  ;;  %v5118_v24 = vsel %vm1919_vm12, %v5067_v38, %v5117_v42  ;;  %v5061_v47 = vmul.f32 %v5045_v32, %v11599_v60  ;;  %v5776_v55 = vmul.f32 %v11526_v36, %v11599_v60  ;;  %v13312_v38 = vld [vmem:[#allocation105_spill] sm:$0xff] }
0x12ba   : > { %13311 = vst [vmem:[#allocation87_spill] sm:$0xff] %v11599_v60  ;;  %v5120_v18 = vsel %vm1922_vm13, %v5119_v57, %v5118_v24  ;;  %v11614_v40 = vadd.f32 %v5771_v13, %v11113_v7  ;;  %v11617_v6 = vadd.f32 %v5772_v59, %v13312_v38  ;;  %v11620_v4 = vadd.f32 %v5773_v0, %v13313_v52  ;;  %v13315_v32 = vld [vmem:[#allocation65_spill] sm:$0xff] }
0x12bb   : > { %v5069_v3 = vadd.f32 %v5061_v47, %v13314_v15  ;;  %v6563_v43 = vmul.f32 %v11526_v36, %v11441_v31  ;;  %v11626_v48 = vadd.f32 %v5776_v55, %v13315_v32  ;;  %v6565_v57 = vmul.f32 %v11513_v14, %v11451_v30  ;;  %v13316_v14 = vld [vmem:[#allocation66_spill] sm:$0xff]  ;;  %v13357_v41 = vld [vmem:[#allocation81_spill] sm:$0xff] }
0x12bc   : > { %v6566_v7 = vmul.f32 %v11516_v54, %v11466_v63  ;;  %v6567_v62 = vmul.f32 %v11519_v9, %v11481_v16  ;;  %v6568_v21 = vmul.f32 %v11522_v12, %v11493_v19  ;;  %v6570_v54 = vmul.f32 %v11599_v60, %v11506_v39  ;;  %v4871_v9 = vld [vmem:[#allocation6] sm:$0xff] }
0x12bd   : > { %v5121_v2 = vrot.slane %v5069_v3, 6  ;;  %v11635_v8 = vadd.f32 %v6563_v43, %v11141_v33  ;;  %v11640_v36 = vadd.f32 %v6565_v57, %v11144_v44  ;;  %v13317_v33 = vld [vmem:[#allocation68_spill] sm:$0xff]  ;;  %v4872_v12 = vadd.f32 %v4871_v9, %v11506_v39  ;;  %v13318_v44 = vld [vmem:[#allocation107_spill] sm:$0xff]  ;;  %v13323_v39 = vld [vmem:[#allocation21_spill] sm:$0xff] }
0x12be   : > { %v11643_v42 = vadd.f32 %v6566_v7, %v11148_v50  ;;  %v11646_v13 = vadd.f32 %v6567_v62, %v13316_v14  ;;  %v11652_v59 = vadd.f32 %v6568_v21, %v13317_v33  ;;  %v11657_v0 = vadd.f32 %v6570_v54, %v13318_v44  ;;  %v13319_v50 = vld [vmem:[#allocation18_spill] sm:$0xff]  ;;  %v13324_v7 = vld [vmem:[#allocation20_spill] sm:$0xff]  ;;  %v13325_v21 = vld [vmem:[#allocation23_spill] sm:$0xff] }
0x12bf   : > { %v5122_v24 = vsel %vm1925_vm14, %v5121_v2, %v5120_v18  ;;  %v13320_v47 = vmov 0.0   ;;  %4873 = vst.msk [vmem:[#allocation6] sm:$0xff] %vm1570_vm6, %v4872_v12  ;;  %v13321_v55 = vmov 0.0|0.0   ;;  %v13322_v18 = vld [vmem:[#allocation19_spill] sm:$0xff]  ;;  %v13326_v9 = vld [vmem:[#allocation22_spill] sm:$0xff]  ;;  %v13327_v12 = vld [vmem:[#allocation25_spill] sm:$0xff] }
0x12c0   : > { %7751 = vmatmul.mubr.msk.f32.vlgmr.msra.gmra.mrb[10].mxu0 %vm1570_vm6, %v5122_v24 }
0x12c1   : > { %7821 = vmatpush3.bf16.msra.mxu0 %v13319_v50  ;;  %7772 = vmatprep.mubr.msk.f32.mxu0 %vm8581_vm0, %v13320_v47  ;;  %v13328_v47 = vld [vmem:[#allocation27_spill] sm:$0xff] }
0x12c2   : > { %7822 = vmatprep.subr.bf16.mxu0 %v13321_v55 }
0x12c5   : > { %7824 = vmatpush3.bf16.msra.mxu0 %v13322_v18  ;;  %v13329_v18 = vld [vmem:[#allocation24_spill] sm:$0xff] }
0x1393   : > { %v5191_v38 = vpop.f32.mrb[10].mxu0 }
0x1394   : > { %v5196_v52 = vrot.slane %v5191_v38, 3  ;;  %v7752_v15 = vpop.f32.mrb[11].mxu0  ;;  %v5197_v43 = vrot.slane %v5191_v38, 4  ;;  %v5198_v32 = vrot.slane %v5191_v38, 5  ;;  %v5199_v57 = vrot.slane %v5191_v38, 6 }
0x1395   : > { %v5200_v2 = vrot.slane %v5191_v38, 7  ;;  %v5201_v54 = vrot.slane %v5191_v38, 1  ;;  %v5202_v50 = vrot.slane %v5191_v38, 2  ;;  %v13330_v15 = vld [vmem:[#allocation26_spill] sm:$0xff] }
0x1396   : > { %v11666_v3 = vadd.f32 %v5196_v52, %v13323_v39  ;;  %v11670_v62 = vadd.f32 %v5197_v43, %v13324_v7  ;;  %v11673_v14 = vadd.f32 %v5198_v32, %v13325_v21  ;;  %v11676_v24 = vadd.f32 %v5199_v57, %v13326_v9  ;;  %v13331_v32 = vld [vmem:[#allocation47_spill] sm:$0xff] }
0x1397   : > { %v11680_v44 = vadd.f32 %v5200_v2, %v13327_v12  ;;  %v11685_v55 = vadd.f32 %v5201_v54, %v13328_v47  ;;  %v11689_v52 = vadd.f32 %v5191_v38, %v13329_v18  ;;  %v11693_v43 = vadd.f32 %v5202_v50, %v13330_v15  ;;  %v13332_v47 = vld [vmem:[#allocation75_spill] sm:$0xff] }
0x1398   : > { %8206 = vtanh.f32 %v11666_v3  ;;  %v4927_v57 = vmul.f32 %v13267_v28, %v13331_v32  ;;  %v4895_v54 = vmul.f32 %v13269_v27, %v13246_v34  ;;  %v4959_v38 = vmul.f32 %v13271_v45, %v13247_v5  ;;  %v13340_v21 = vld [vmem:[#allocation35_spill] sm:$0xff] }
0x1399   : > { %8208 = vtanh.f32 %v11670_v62  ;;  %v4991_v32 = vmul.f32 %v11280_v56, %v13332_v47  ;;  %v11709_v15 = vrot.slane %v11357_v35, 3  ;;  %v5087_v47 = vmul.f32 %v11461_v11, %v11451_v30  ;;  %v13335_v11 = vld [vmem:[#allocation42_spill] sm:$0xff] }
0x139a   : > { %8210 = vtanh.f32 %v11673_v14  ;;  %v4935_v50 = vadd.f32 %v4927_v57, %v4895_v54  ;;  %v5086_v57 = vmul.f32 %v11449_v20, %v11439_v25  ;;  %v13333_v20 = vld [vmem:[#allocation74_spill] sm:$0xff] }
0x139b   : > { %8212 = vtanh.f32 %v11676_v24  ;;  %v5085_v34 = vmul.f32 %v11709_v15, %v11441_v31 }
0x139c   : > { %8214 = vtanh.f32 %v11680_v44  ;;  %v4967_v12 = vadd.f32 %v4959_v38, %v4935_v50  ;;  %v4933_v38 = vmul.f32 %v13255_v29, %v13145_v17  ;;  %v5088_v50 = vmul.f32 %v13335_v11, %v11466_v63  ;;  %v13338_v17 = vld [vmem:[#allocation37_spill] sm:$0xff]  ;;  %v13339_v29 = vld [vmem:[#allocation40_spill] sm:$0xff] }
0x139d   : > { %8216 = vtanh.f32 %v11685_v55  ;;  %v13346_v11 = vld [vmem:[#allocation49_spill] sm:$0xff] }
0x139e   : > { %8218 = vtanh.f32 %v11689_v52 }
0x139f   : > { %8220 = vtanh.f32 %v11693_v43 }
0x13a2   : > { %v8207_v33 = vpop.eup %8206 }
0x13a3   : > { %5336 = vrot.lane.b32.xlu1 %v8207_v33, %s8575_s8  ;;  %v8209_v2 = vpop.eup %8208 }
0x13a4   : > { %v8211_v33 = vpop.eup %8210  ;;  %5338 = vrot.lane.b32.xlu0 %v8209_v2, %s8575_s8  ;;  %v4999_v2 = vadd.f32 %v4991_v32, %v4967_v12  ;;  %v4900_v12 = vmul.f32 %v13143_v53, %v13262_v58  ;;  %v13342_v53 = vld [vmem:[#allocation96_spill] sm:$0xff] }
0x13a5   : > { %v8213_v18 = vpop.eup %8212  ;;  %v5089_v58 = vmul.f32 %v13342_v53, %v11481_v16  ;;  %v13351_v53 = vld [vmem:[#allocation97_spill] sm:$0xff] }
0x13a6   : > { %v8215_v5 = vpop.eup %8214 }
0x13a7   : > { %5340 = vrot.lane.b32.xlu1 %v8211_v33, %s8575_s8  ;;  %v8217_v54 = vpop.eup %8216  ;;  %v5093_v33 = vadd.f32 %v5085_v34, %v4999_v2  ;;  %v4934_v34 = vmul.f32 %v13333_v20, %v13266_v46  ;;  %v13336_v2 = vld [vmem:[#allocation106_spill] sm:$0xff]  ;;  %v13343_v46 = vld [vmem:[#allocation104_spill] sm:$0xff]  ;;  %v13344_v20 = vld [vmem:[#allocation73_spill] sm:$0xff]  ;;  %v5097_v10 = vadd.f32 %v5089_v58, %v13357_v41  ;;  %v5090_v58 = vmul.f32 %v11493_v19, %v11357_v35 }
0x13a8   : > { %5342 = vrot.lane.b32.xlu0 %v8213_v18, %s8575_s8  ;;  %v8219_v9 = vpop.eup %8218  ;;  %v13334_v18 = vld [vmem:[#allocation41_spill] sm:$0xff]  ;;  %v13361_v41 = vld [vmem:[#allocation55_spill] sm:$0xff]  ;;  %v7485_v19 = vmul.f32 -1.442695, %v11666_v3  ;;  %v7492_v3 = vmul.f32 -1.442695, %v11693_v43 }
0x13a9   : > { %v5094_v32 = vadd.f32 %v5086_v57, %v13334_v18  ;;  %v8221_v31 = vpop.eup %8220  ;;  %v4966_v57 = vmul.f32 %v13344_v20, %v13343_v46  ;;  %v13345_v18 = vld [vmem:[#allocation90_spill] sm:$0xff]  ;;  %v13352_v46 = vld [vmem:[#allocation108_spill] sm:$0xff] }
0x13aa   : > { %v4998_v20 = vmul.f32 %v13352_v46, %v13351_v53  ;;  %v13358_v53 = vld [vmem:[#allocation77_spill] sm:$0xff]  ;;  %8222 = vpow2.f32 %v7485_v19 }
0x13ab   : > { %5344 = vrot.lane.b32.xlu1 %v8215_v5, %s8575_s8  ;;  %v4901_v5 = vmul.f32 %v13256_v49, %v13149_v51  ;;  %v5219_v51 = vadd.f32 %v13340_v21, %v5093_v33  ;;  %v13341_v49 = vld [vmem:[#allocation78_spill] sm:$0xff] }
0x13ac   : > { %5348 = vrot.lane.b32.xlu0 %v8217_v54, %s8575_s8  ;;  %v13337_v54 = vld [vmem:[#allocation109_spill] sm:$0xff]  ;;  %v5095_v7 = vadd.f32 %v5087_v47, %v13341_v49  ;;  %v13349_v49 = vld [vmem:[#allocation84_spill] sm:$0xff]  ;;  %v13350_v47 = vld [vmem:[#allocation99_spill] sm:$0xff] }
0x13ad   : > { %v4965_v25 = vmul.f32 %v13337_v54, %v13336_v2  ;;  %v4941_v63 = vadd.f32 %v4933_v38, %v4901_v5  ;;  %v4997_v2 = vmul.f32 %v13346_v11, %v13345_v18  ;;  %v11746_v54 = vrot.slane %v11357_v35, 1  ;;  %v13354_v38 = vld [vmem:[#allocation50_spill] sm:$0xff] }
0x13ae   : > { %v4964_v16 = vmul.f32 %v13350_v47, %v13349_v49  ;;  %v5220_v5 = vadd.f32 %v13354_v38, %v5094_v32  ;;  %v13355_v18 = vld [vmem:[#allocation82_spill] sm:$0xff]  ;;  %v13359_v32 = vld [vmem:[#allocation28_spill] sm:$0xff] }
0x13af   : > { %5346 = vrot.lane.b32.xlu1 %v8219_v9, %s8575_s8  ;;  %v4902_v9 = vmul.f32 %v13339_v29, %v13338_v17  ;;  %v13347_v17 = vld [vmem:[#allocation45_spill] sm:$0xff]  ;;  %v13348_v29 = vld [vmem:[#allocation60_spill] sm:$0xff]  ;;  %v5096_v11 = vadd.f32 %v5088_v50, %v13355_v18  ;;  %v4973_v39 = vadd.f32 %v4965_v25, %v4941_v63  ;;  %v4996_v38 = vmul.f32 %v13359_v32, %v13358_v53 }
0x13b0   : > { %5350 = vrot.lane.b32.xlu0 %v8221_v31, %s8575_s8  ;;  %v4932_v21 = vmul.f32 %v13348_v29, %v13347_v17  ;;  %v11756_v31 = vrot.slane %v11357_v35, 2  ;;  %v5091_v29 = vmul.f32 %v11746_v54, %v11443_v37  ;;  %v13356_v17 = vld [vmem:[#allocation67_spill] sm:$0xff]  ;;  %v13360_v50 = vld [vmem:[#allocation52_spill] sm:$0xff] }
0x13b1   : > { %v4942_v33 = vadd.f32 %v4934_v34, %v4902_v9  ;;  %v5005_v9 = vadd.f32 %v4997_v2, %v4973_v39  ;;  %v5222_v63 = vadd.f32 %v13360_v50, %v5096_v11  ;;  %v13364_v11 = vld [vmem:[#allocation53_spill] sm:$0xff] }
0x13b2   : > { %13353 = vst [vmem:[#allocation89_spill] sm:$0xff] %v11756_v31  ;;  %v5092_v34 = vmul.f32 %v11756_v31, %v11599_v60  ;;  %v4940_v49 = vadd.f32 %v4932_v21, %v4900_v12  ;;  %v13362_v12 = vld [vmem:[#allocation51_spill] sm:$0xff] }
0x13b3   : > { %5296 = vrot.lane.b32.xlu1 %v5219_v51, %s8575_s8  ;;  %v5221_v51 = vadd.f32 %v13356_v17, %v5095_v7  ;;  %v4974_v47 = vadd.f32 %v4966_v57, %v4942_v33  ;;  %v5099_v18 = vadd.f32 %v5091_v29, %v5005_v9  ;;  %v5223_v7 = vadd.f32 %v13361_v41, %v5097_v10  ;;  %v13363_v33 = vld [vmem:[#allocation54_spill] sm:$0xff] }
0x13b4   : > { %5298 = vrot.lane.b32.xlu0 %v5220_v5, %s8575_s8  ;;  %v4972_v17 = vadd.f32 %v4964_v16, %v4940_v49  ;;  %v7486_v10 = vmul.f32 -1.442695, %v11670_v62  ;;  %v7487_v16 = vmul.f32 -1.442695, %v11673_v14  ;;  %v7488_v5 = vmul.f32 -1.442695, %v11676_v24  ;;  %v8223_v29 = vpop.eup %8222 }
0x13b5   : > { %v5006_v25 = vadd.f32 %v4998_v20, %v4974_v47  ;;  %v5225_v2 = vadd.f32 %v13362_v12, %v5099_v18  ;;  %v7491_v47 = vmul.f32 -1.442695, %v11685_v55  ;;  %v7490_v9 = vmul.f32 -1.442695, %v11689_v52 }
0x13b6   : > { %v5004_v39 = vadd.f32 %v4996_v38, %v4972_v17  ;;  %8224 = vpow2.f32 %v7486_v10 }
0x13b7   : > { %5300 = vrot.lane.b32.xlu1 %v5221_v51, %s8575_s8  ;;  %v5100_v57 = vadd.f32 %v5092_v34, %v5006_v25  ;;  %8226 = vpow2.f32 %v7487_v16  ;;  %v7489_v51 = vmul.f32 -1.442695, %v11680_v44  ;;  %v5251_v34 = vadd.f32 1.0, %v8223_v29 }
0x13b8   : > { %5302 = vrot.lane.b32.xlu0 %v5222_v63, %s8575_s8  ;;  %v5098_v21 = vadd.f32 %v5090_v58, %v5004_v39  ;;  %8228 = vpow2.f32 %v7488_v5  ;;  %v5636_v39 = vld [vmem:[#allocation7] sm:$0xff] }
0x13b9   : > { %v5226_v20 = vadd.f32 %v13363_v33, %v5100_v57  ;;  %8230 = vpow2.f32 %v7489_v51  ;;  %v7483_v57 = vld [vmem:[%s8798_s3 + $0x28] sm:$0xff] }
0x13ba   : > { %v5224_v49 = vadd.f32 %v13364_v11, %v5098_v21  ;;  %8232 = vpow2.f32 %v7491_v47  ;;  %v5637_v21 = vadd.f32 %v7483_v57, %v5636_v39 }
0x13bb   : > { %5304 = vrot.lane.b32.xlu1 %v5223_v7, %s8575_s8  ;;  %8234 = vrcp.f32 %v5251_v34 }
0x13bc   : > { %5308 = vrot.lane.b32.xlu0 %v5225_v2, %s8575_s8  ;;  %8236 = vpow2.f32 %v7490_v9  ;;  %5638 = vst.msk [vmem:[#allocation7] sm:$0xff] %vm2139_vm7, %v5637_v21 }
0x13bd   : > { %8238 = vpow2.f32 %v7492_v3 }
0x13bf   : > { %5310 = vrot.lane.b32.xlu1 %v5226_v20, %s8575_s8 }
0x13c0   : > { %5306 = vrot.lane.b32.xlu0 %v5224_v49, %s8575_s8  ;;  %v8225_v62 = vpop.eup %8224 }
0x13c1   : > { %v8227_v14 = vpop.eup %8226  ;;  %v5252_v24 = vadd.f32 1.0, %v8225_v62 }
0x13c2   : > { %v8229_v32 = vpop.eup %8228  ;;  %v5253_v38 = vadd.f32 1.0, %v8227_v14 }
0x13c3   : > { %v8231_v25 = vpop.eup %8230  ;;  %8240 = vrcp.f32 %v5252_v24  ;;  %v5254_v55 = vadd.f32 1.0, %v8229_v32 }
0x13c4   : > { %v8233_v44 = vpop.eup %8232  ;;  %8242 = vrcp.f32 %v5253_v38  ;;  %v5255_v43 = vadd.f32 1.0, %v8231_v25 }
0x13c5   : > { %v11790_v50 = vpop.eup %8234  ;;  %8244 = vrcp.f32 %v5254_v55  ;;  %v5257_v17 = vadd.f32 1.0, %v8233_v44 }
0x13c6   : > { %v8237_v18 = vpop.eup %8236  ;;  %8246 = vrcp.f32 %v5255_v43 }
0x13c7   : > { %v8239_v58 = vpop.eup %8238  ;;  %v5256_v41 = vadd.f32 1.0, %v8237_v18  ;;  %8248 = vrcp.f32 %v5257_v17 }
0x13c8   : > { %v5258_v7 = vadd.f32 1.0, %v8239_v58 }
0x13c9   : > { %8250 = vrcp.f32 %v5256_v41 }
0x13ca   : > { %8252 = vrcp.f32 %v5258_v7 }
0x13cd   : > { %v11795_v12 = vpop.eup %8240 }
0x13ce   : > { %v11798_v11 = vpop.eup %8242 }
0x13cf   : > { %v11803_v19 = vpop.eup %8244 }
0x13d0   : > { %v11806_v29 = vpop.eup %8246 }
0x13d1   : > { %v11811_v47 = vpop.eup %8248 }
0x13d3   : > { %v11814_v62 = vpop.eup %8250 }
0x13d4   : > { %v11819_v24 = vpop.eup %8252 }
0x1415   : > { %v5337_v63 = vpop.permute.xlu1 %5336 }
0x1416   : > { %v5360_v52 = vmul.f32 %v11790_v50, %v5337_v63  ;;  %v5339_v2 = vpop.permute.xlu0 %5338 }
0x1417   : > { %v5361_v33 = vmul.f32 %v11795_v12, %v5339_v2 }
0x1418   : > { %5376 = vrot.lane.b32.xlu1 %v5360_v52, %s8575_s8 }
0x1419   : > { %v5341_v20 = vpop.permute.xlu1 %5340  ;;  %5378 = vrot.lane.b32.xlu0 %v5361_v33, %s8575_s8 }
0x141a   : > { %v5362_v49 = vmul.f32 %v11798_v11, %v5341_v20  ;;  %v5343_v10 = vpop.permute.xlu0 %5342 }
0x141b   : > { %v5363_v16 = vmul.f32 %v11803_v19, %v5343_v10 }
0x141d   : > { %v5345_v5 = vpop.permute.xlu1 %5344  ;;  %5380 = vrot.lane.b32.xlu0 %v5362_v49, %s8575_s8  ;;  %5382 = vrot.lane.b32.xlu1 %v5363_v16, %s8575_s8 }
0x141e   : > { %v5364_v51 = vmul.f32 %v11806_v29, %v5345_v5  ;;  %v5349_v34 = vpop.permute.xlu0 %5348 }
0x141f   : > { %v5366_v9 = vmul.f32 %v11811_v47, %v5349_v34 }
0x1421   : > { %v5347_v3 = vpop.permute.xlu1 %5346  ;;  %5388 = vrot.lane.b32.xlu0 %v5366_v9, %s8575_s8  ;;  %5384 = vrot.lane.b32.xlu1 %v5364_v51, %s8575_s8 }
0x1422   : > { %v5365_v14 = vmul.f32 %v11814_v62, %v5347_v3  ;;  %v5351_v32 = vpop.permute.xlu0 %5350 }
0x1423   : > { %v5367_v38 = vmul.f32 %v11819_v24, %v5351_v32 }
0x1425   : > { %5390 = vrot.lane.b32.xlu0 %v5367_v38, %s8575_s8  ;;  %5386 = vrot.lane.b32.xlu1 %v5365_v14, %s8575_s8  ;;  %v5297_v25 = vpop.permute.xlu1 %5296 }
0x1426   : > { %v5299_v44 = vpop.permute.xlu0 %5298  ;;  %v5320_v41 = vmul.f32 %v11790_v50, %v5297_v25 }
0x1427   : > { %v5321_v7 = vmul.f32 %v11795_v12, %v5299_v44 }
0x1429   : > { %5285 = vperm.xlu1 %7948, %v7483_v57   ;;  %v5301_v55 = vpop.permute.xlu1 %5300 }
0x142a   : > { %v5303_v63 = vpop.permute.xlu0 %5302  ;;  %v5322_v57 = vmul.f32 %v11798_v11, %v5301_v55 }
0x142b   : > { %v5323_v33 = vmul.f32 %v11803_v19, %v5303_v63 }
0x142d   : > { %v5305_v52 = vpop.permute.xlu1 %5304 }
0x142e   : > { %v5309_v43 = vpop.permute.xlu0 %5308  ;;  %v5324_v34 = vmul.f32 %v11806_v29, %v5305_v52 }
0x142f   : > { %v5326_v3 = vmul.f32 %v11811_v47, %v5309_v43 }
0x1431   : > { %v5311_v18 = vpop.permute.xlu1 %5310 }
0x1432   : > { %v5307_v17 = vpop.permute.xlu0 %5306 }
0x148a   : > { %v5377_v58 = vpop.permute.xlu1 %5376 }
0x148b   : > { %v5379_v39 = vpop.permute.xlu0 %5378  ;;  %v5400_v2 = vadd.f32 %v5377_v58, %v5320_v41  ;;  %v5325_v58 = vmul.f32 %v11814_v62, %v5307_v17  ;;  %v5327_v41 = vmul.f32 %v11819_v24, %v5311_v18  ;;  %v8587_v18 = vmov 5  }
0x148c   : > { %v5401_v21 = vadd.f32 %v5379_v39, %v5321_v7  ;;  %7950 = vset.pattern.permute.xlu0 %v8587_v18  ;;  %7949 = vset.pattern.permute.xlu1 %v8587_v18  ;;  %v13368_v18 = vld [vmem:[#allocation61_spill] sm:$0xff] }
0x148d   : > { %v5416_v49 = vrot.slane %v5400_v2, 5 }
0x148e   : > { %v5417_v20 = vrot.slane %v5401_v21, 4 }
0x148f   : > { %v5381_v10 = vpop.permute.xlu0 %5380  ;;  %v5383_v16 = vpop.permute.xlu1 %5382 }
0x1490   : > { %v5402_v5 = vadd.f32 %v5381_v10, %v5322_v57  ;;  %v5403_v51 = vadd.f32 %v5383_v16, %v5323_v33  ;;  %v5418_v14 = vsel %vm1907_vm8, %v5417_v20, %v5416_v49 }
0x1492   : > { %v5419_v9 = vrot.slane %v5402_v5, 3  ;;  %v5421_v32 = vrot.slane %v5403_v51, 2 }
0x1493   : > { %v5389_v38 = vpop.permute.xlu0 %5388  ;;  %v5385_v25 = vpop.permute.xlu1 %5384 }
0x1494   : > { %v5420_v44 = vsel %vm1910_vm9, %v5419_v9, %v5418_v14  ;;  %v5404_v63 = vadd.f32 %v5385_v25, %v5324_v34  ;;  %v5406_v55 = vadd.f32 %v5389_v38, %v5326_v3 }
0x1495   : > { %v5422_v39 = vsel %vm1913_vm10, %v5421_v32, %v5420_v44 }
0x1496   : > { %v5423_v7 = vrot.slane %v5404_v63, 1  ;;  %v5426_v57 = vrot.slane %v5406_v55, 7 }
0x1497   : > { %v5391_v52 = vpop.permute.xlu0 %5390  ;;  %v5387_v2 = vpop.permute.xlu1 %5386 }
0x1498   : > { %v5424_v43 = vsel %vm1916_vm11, %v5423_v7, %v5422_v39  ;;  %v5407_v21 = vadd.f32 %v5391_v52, %v5327_v41  ;;  %v5405_v33 = vadd.f32 %v5387_v2, %v5325_v58 }
0x149a   : > { %v5428_v20 = vrot.slane %v5407_v21, 6  ;;  %v5425_v49 = vsel %vm1919_vm12, %v5405_v33, %v5424_v43 }
0x149b   : > { %v5427_v10 = vsel %vm1922_vm13, %v5426_v57, %v5425_v49  ;;  %v13365_v49 = vld [vmem:[#allocation57_spill] sm:$0xff] }
0x149c   : > { %v5429_v16 = vsel %vm1925_vm14, %v5428_v20, %v5427_v10  ;;  %v13366_v10 = vld [vmem:[#allocation58_spill] sm:$0xff] }
0x149d   : > { %5430 = vrot.lane.b32.xlu0 %v5429_v16, %s8577_s9  ;;  %v13367_v16 = vld [vmem:[#allocation70_spill] sm:$0xff] }
0x14a8   : > { %v11840_v17 = vpop.permute.xlu1 %5285 }
0x150f   : > { %v5431_v5 = vpop.permute.xlu0 %5430 }
0x1510   : > { %v11843_v51 = vmul.f32 %v5431_v5, %v11840_v17  ;;  %v13369_v5 = vld [vmem:[#allocation62_spill] sm:$0xff] }
0x1512   : > { %8254 = vtanh.f32 %v11843_v51  ;;  %v5568_v34 = vcombine.high %v11843_v51, %v11843_v51  ;;  %v5575_v9 = vrot.slane %v11843_v51, %v13162_v22 }
0x1514   : > { %v5582_v3 = vrot.slane %v5568_v34, %v13162_v22  ;;  %v5583_v14 = vcombine.high %v5575_v9, %v5575_v9  ;;  %v5591_v32 = vrot.slane %v5575_v9, %v13162_v22  ;;  %v13370_v34 = vld [vmem:[#allocation34_spill] sm:$0xff]  ;;  %v11886_v9 = vld [vmem:[%s8781_s4 + $0x38] sm:$0xff] }
0x1516   : > { %v5584_v38 = vcombine.high %v5582_v3, %v5582_v3  ;;  %v5598_v25 = vrot.slane %v5582_v3, %v13162_v22  ;;  %v5605_v44 = vrot.slane %v5583_v14, %v13162_v22  ;;  %v5613_v63 = vcombine.high %v5591_v32, %v5591_v32  ;;  %5625 = vst.msk [vmem:[%s9106_s11 + $0x5] sm:$0x1] %vm2058_vm15, %v5591_v32 }
0x1517   : > { %v13371_v3 = vmov 0  }
0x1518   : > { %v5612_v55 = vrot.slane %v5584_v38, %v13162_v22  ;;  %v5614_v58 = vcombine.high %v5598_v25, %v5598_v25  ;;  %v5615_v41 = vcombine.high %v5605_v44, %v5605_v44  ;;  %5626 = vst.msk [vmem:[%s9106_s11 + $0x15] sm:$0x1] %vm2058_vm15, %v5605_v44  ;;  %5627 = vst.msk [vmem:[%s9106_s11 + $0x25] sm:$0x1] %vm2058_vm15, %v5613_v63 }
0x1519   : > { %5629 = vst.msk [vmem:[%s9106_s11 + $0x45] sm:$0x1] %vm2058_vm15, %v5598_v25 }
0x151a   : > { %v5616_v7 = vcombine.high %v5612_v55, %v5612_v55  ;;  %5628 = vst.msk [vmem:[%s9106_s11 + $0x35] sm:$0x1] %vm2058_vm15, %v5615_v41  ;;  %5630 = vst.msk [vmem:[%s9106_s11 + $0x55] sm:$0x1] %vm2058_vm15, %v5612_v55 }
0x151b   : > { %5631 = vst.msk [vmem:[%s9106_s11 + $0x65] sm:$0x1] %vm2058_vm15, %v5614_v58 }
0x151c   : > { %v8255_v39 = vpop.eup %8254  ;;  %5632 = vst.msk [vmem:[%s9106_s11 + $0x75] sm:$0x1] %vm2058_vm15, %v5616_v7 }
0x151d   : > { %v5437_v52 = vrot.slane %v8255_v39, 4  ;;  %v5436_v2 = vrot.slane %v8255_v39, 3  ;;  %v5439_v43 = vrot.slane %v8255_v39, 6  ;;  %v5438_v21 = vrot.slane %v8255_v39, 5 }
0x151e   : > { %v5441_v33 = vrot.slane %v8255_v39, 1  ;;  %v5440_v57 = vrot.slane %v8255_v39, 7  ;;  %v5442_v20 = vrot.slane %v8255_v39, 2 }
0x151f   : > { %5445 = vrot.lane.b32.xlu0 %v5437_v52, %s8579_s14  ;;  %5443 = vrot.lane.b32.xlu1 %v5436_v2, %s8579_s14 }
0x1523   : > { %5449 = vrot.lane.b32.xlu0 %v5439_v43, %s8579_s14  ;;  %5447 = vrot.lane.b32.xlu1 %v5438_v21, %s8579_s14 }
0x1527   : > { %5455 = vrot.lane.b32.xlu0 %v5441_v33, %s8579_s14  ;;  %5451 = vrot.lane.b32.xlu1 %v5440_v57, %s8579_s14 }
0x152b   : > { %5457 = vrot.lane.b32.xlu0 %v5442_v20, %s8579_s14  ;;  %5453 = vrot.lane.b32.xlu1 %v8255_v39, %s8579_s14 }
0x152f   : > { %5806 = vperm.xlu0 %7950, %v13365_v49   ;;  %5802 = vperm.xlu1 %7949, %v13366_v10  }
0x1533   : > { %5822 = vperm.xlu0 %7950, %v13367_v16   ;;  %5810 = vperm.xlu1 %7949, %v13368_v18  }
0x1537   : > { %5814 = vperm.xlu1 %7949, %v13369_v5  }
0x153b   : > { %5818 = vperm.xlu1 %7949, %v13370_v34  }
0x153f   : > { %5830 = vperm.xlu1 %7949, %v11886_v9  }
0x1543   : > { %7951 = vset.pattern.permute.xlu1 %v13371_v3 }
0x1591   : > { %v5446_v14 = vpop.permute.xlu0 %5445  ;;  %v5444_v32 = vpop.permute.xlu1 %5443 }
0x1592   : > { %v5468_v38 = vmul.f32 %v11795_v12, %v5446_v14  ;;  %v5467_v25 = vmul.f32 %v11790_v50, %v5444_v32  ;;  %v13373_v32 = vld [vmem:[#allocation48_spill] sm:$0xff] }
0x1594   : > { %v5484_v44 = vrot.slane %v5468_v38, 4  ;;  %v5483_v63 = vrot.slane %v5467_v25, 5  ;;  %v6485_v38 = vmul.f32 %v13267_v28, %v13373_v32  ;;  %v13374_v25 = vld [vmem:[#allocation32_spill] sm:$0xff] }
0x1595   : > { %v5450_v55 = vpop.permute.xlu0 %5449  ;;  %v5448_v58 = vpop.permute.xlu1 %5447 }
0x1596   : > { %v5470_v41 = vmul.f32 %v11803_v19, %v5450_v55  ;;  %v5469_v7 = vmul.f32 %v11798_v11, %v5448_v58  ;;  %v5485_v52 = vsel %vm1907_vm8, %v5484_v44, %v5483_v63  ;;  %v13375_v44 = vld [vmem:[#allocation95_spill] sm:$0xff] }
0x1597   : > { %v13376_v55 = vld [vmem:[#allocation79_spill] sm:$0xff] }
0x1598   : > { %v5486_v39 = vrot.slane %v5469_v7, 3  ;;  %v5488_v2 = vrot.slane %v5470_v41, 2  ;;  %v6549_v58 = vmul.f32 %v11280_v56, %v13376_v55 }
0x1599   : > { %v5456_v43 = vpop.permute.xlu0 %5455  ;;  %v5452_v21 = vpop.permute.xlu1 %5451 }
0x159a   : > { %v5487_v33 = vsel %vm1910_vm9, %v5486_v39, %v5485_v52  ;;  %v5471_v12 = vmul.f32 %v11806_v29, %v5452_v21  ;;  %v5473_v50 = vmul.f32 %v11811_v47, %v5456_v43  ;;  %v13372_v47 = vld [vmem:[#allocation59_spill] sm:$0xff]  ;;  %v6581_v52 = vmul.f32 %v11709_v15, %v11451_v30 }
0x159b   : > { %v5489_v20 = vsel %vm1913_vm10, %v5488_v2, %v5487_v33  ;;  %v12886_v2 = vrot.slane %v11843_v51, 3  ;;  %v12883_v43 = vrot.slane %v11843_v51, 6  ;;  %v12885_v30 = vrot.slane %v11843_v51, 4 }
0x159c   : > { %v5490_v57 = vrot.slane %v5471_v12, 1  ;;  %v5493_v18 = vrot.slane %v5473_v50, 7 }
0x159d   : > { %v5458_v49 = vpop.permute.xlu0 %5457  ;;  %v5454_v10 = vpop.permute.xlu1 %5453 }
0x159e   : > { %v5491_v19 = vsel %vm1916_vm11, %v5490_v57, %v5489_v20  ;;  %v5474_v11 = vmul.f32 %v11819_v24, %v5458_v49  ;;  %v5472_v16 = vmul.f32 %v11814_v62, %v5454_v10  ;;  %v6453_v24 = vmul.f32 %v13269_v27, %v13374_v25  ;;  %v13380_v10 = vld [vmem:[#allocation85_spill] sm:$0xff] }
0x159f   : > { %v6517_v62 = vmul.f32 %v13271_v45, %v13375_v44 }
0x15a0   : > { %v5495_v5 = vrot.slane %v5474_v11, 6  ;;  %v5492_v34 = vsel %vm1919_vm12, %v5472_v16, %v5491_v19  ;;  %v6493_v63 = vadd.f32 %v6485_v38, %v6453_v24 }
0x15a1   : > { %v5494_v14 = vsel %vm1922_vm13, %v5493_v18, %v5492_v34  ;;  %v12884_v18 = vrot.slane %v11843_v51, 5 }
0x15a2   : > { %v5496_v29 = vsel %vm1925_vm14, %v5495_v5, %v5494_v14  ;;  %v6525_v39 = vadd.f32 %v6517_v62, %v6493_v63  ;;  %v13381_v5 = vld [vmem:[#allocation33_spill] sm:$0xff] }
0x15a3   : > { %5497 = vrot.lane.b32.xlu0 %v5496_v29, %s8579_s14 }
0x15a4   : > { %v6557_v21 = vadd.f32 %v6549_v58, %v6525_v39 }
0x15a6   : > { %v6589_v20 = vadd.f32 %v6581_v52, %v6557_v21 }
0x15a7   : > { %5826 = vperm.xlu0 %7950, %v13372_v47   ;;  %v13383_v47 = vld [vmem:[#allocation44_spill] sm:$0xff] }
0x15ae   : > { %v11915_v41 = vpop.permute.xlu0 %5806  ;;  %v11917_v7 = vpop.permute.xlu1 %5802 }
0x15af   : > { %13377 = vst [vmem:[#allocation101_spill] sm:$0xff] %v11915_v41  ;;  %13378 = vst [vmem:[#allocation100_spill] sm:$0xff] %v11917_v7 }
0x15b2   : > { %v11923_v33 = vpop.permute.xlu0 %5822  ;;  %v11925_v12 = vpop.permute.xlu1 %5810 }
0x15b3   : > { %v6616_v50 = vmul.f32 %v12883_v43, %v11923_v33  ;;  %v6613_v57 = vmul.f32 %v12886_v2, %v11925_v12 }
0x15b5   : > { %v11934_v49 = vadd.f32 %v6613_v57, %v6589_v20  ;;  %v11937_v19 = vadd.f32 %v6616_v50, %v13380_v10 }
0x15b6   : > { %v11939_v11 = vpop.permute.xlu1 %5814 }
0x15b7   : > { %13379 = vst [vmem:[#allocation102_spill] sm:$0xff] %v11934_v49  ;;  %v6614_v16 = vmul.f32 %v12885_v30, %v11939_v11  ;;  %v13404_v49 = vld [vmem:[#allocation75_spill] sm:$0xff] }
0x15b9   : > { %v11946_v34 = vadd.f32 %v6614_v16, %v13381_v5 }
0x15ba   : > { %v11948_v14 = vpop.permute.xlu1 %5818 }
0x15bb   : > { %13382 = vst [vmem:[#allocation103_spill] sm:$0xff] %v11946_v34  ;;  %v6615_v29 = vmul.f32 %v12884_v18, %v11948_v14 }
0x15bd   : > { %v11954_v32 = vadd.f32 %v6615_v29, %v13383_v47 }
0x15bf   : > { %13384 = vst [vmem:[#allocation105_spill] sm:$0xff] %v11954_v32 }
0x1615   : > { %v5498_v38 = vpop.permute.xlu0 %5497 }
0x1616   : > { %v11957_v25 = vmul.f32 %v5498_v38, %v11840_v17 }
0x1618   : > { %v5502_v24 = vcombine.high %v11957_v25, %v11957_v25  ;;  %v5509_v44 = vrot.slane %v11957_v25, %v13162_v22  ;;  %v12887_v62 = vrot.slane %v11957_v25, 7  ;;  %v5833_v63 = vrot.slane %v11957_v25, 2 }
0x1619   : > { %v5834_v55 = vrot.slane %v11957_v25, 3  ;;  %v5835_v58 = vrot.slane %v11957_v25, 4  ;;  %v5836_v39 = vrot.slane %v11957_v25, 5  ;;  %v5837_v17 = vrot.slane %v11957_v25, 6 }
0x161a   : > { %v5516_v52 = vrot.slane %v5502_v24, %v13162_v22  ;;  %v5517_v21 = vcombine.high %v5509_v44, %v5509_v44  ;;  %v5525_v50 = vrot.slane %v5509_v44, %v13162_v22  ;;  %v5853_v57 = vmul.f32 %v12887_v62, %v11923_v33 }
0x161b   : > { %v5839_v20 = vrot.slane %v11957_v25, 1  ;;  %v5848_v10 = vmul.f32 %v5833_v63, %v11917_v7  ;;  %v5849_v16 = vmul.f32 %v5834_v55, %v11915_v41  ;;  %v5850_v5 = vmul.f32 %v5835_v58, %v11925_v12 }
0x161c   : > { %v5518_v29 = vcombine.high %v5516_v52, %v5516_v52  ;;  %v5532_v47 = vrot.slane %v5516_v52, %v13162_v22  ;;  %v5539_v38 = vrot.slane %v5517_v21, %v13162_v22  ;;  %v5547_v24 = vcombine.high %v5525_v50, %v5525_v50  ;;  %5559 = vst.msk [vmem:[%s9238_s15 + $0x5] sm:$0x1] %vm2058_vm15, %v5525_v50 }
0x161d   : > { %v5861_v44 = vadd.f32 %v5853_v57, %v11586_v61  ;;  %v5851_v43 = vmul.f32 %v5836_v39, %v11939_v11  ;;  %v5852_v18 = vmul.f32 %v5837_v17, %v11948_v14  ;;  %v5856_v52 = vadd.f32 %v5848_v10, %v11576_v26  ;;  %v11993_v61 = vpop.permute.xlu1 %5830 }
0x161e   : > { %v5546_v30 = vrot.slane %v5518_v29, %v13162_v22  ;;  %v5548_v2 = vcombine.high %v5532_v47, %v5532_v47  ;;  %v5549_v62 = vcombine.high %v5539_v38, %v5539_v38  ;;  %5560 = vst.msk [vmem:[%s9238_s15 + $0x15] sm:$0x1] %vm2058_vm15, %v5539_v38  ;;  %5561 = vst.msk [vmem:[%s9238_s15 + $0x25] sm:$0x1] %vm2058_vm15, %v5547_v24 }
0x161f   : > { %5563 = vst.msk [vmem:[%s9238_s15 + $0x45] sm:$0x1] %vm2058_vm15, %v5532_v47  ;;  %13385 = vst [vmem:[#allocation69_spill] sm:$0xff] %v11993_v61  ;;  %v5857_v21 = vadd.f32 %v5849_v16, %v11607_v1  ;;  %v5858_v50 = vadd.f32 %v5850_v5, %v11614_v40  ;;  %v5859_v57 = vadd.f32 %v5851_v43, %v11617_v6  ;;  %v5903_v10 = vrot.slane %v5856_v52, 6 }
0x1620   : > { %v5550_v29 = vcombine.high %v5546_v30, %v5546_v30  ;;  %5562 = vst.msk [vmem:[%s9238_s15 + $0x35] sm:$0x1] %vm2058_vm15, %v5549_v62  ;;  %5564 = vst.msk [vmem:[%s9238_s15 + $0x55] sm:$0x1] %vm2058_vm15, %v5546_v30  ;;  %v5855_v47 = vmul.f32 %v5839_v20, %v11993_v61  ;;  %v5860_v26 = vadd.f32 %v5852_v18, %v11620_v4  ;;  %v5912_v38 = vrot.slane %v5861_v44, 1 }
0x1621   : > { %5565 = vst.msk [vmem:[%s9238_s15 + $0x65] sm:$0x1] %vm2058_vm15, %v5548_v2  ;;  %v5904_v24 = vrot.slane %v5857_v21, 5  ;;  %v5906_v32 = vrot.slane %v5858_v50, 4  ;;  %v6595_v1 = vmul.f32 %v5839_v20, %v11917_v7  ;;  %v5908_v40 = vrot.slane %v5859_v57, 3 }
0x1622   : > { %5566 = vst.msk [vmem:[%s9238_s15 + $0x75] sm:$0x1] %vm2058_vm15, %v5550_v29  ;;  %v5910_v6 = vrot.slane %v5860_v26, 2  ;;  %v6596_v43 = vmul.f32 %v5833_v63, %v11915_v41  ;;  %v6597_v30 = vmul.f32 %v5834_v55, %v11925_v12  ;;  %v6598_v4 = vmul.f32 %v5835_v58, %v11939_v11 }
0x1623   : > { %v5905_v2 = vsel %vm1907_vm8, %v5904_v24, %v5903_v10  ;;  %v12013_v62 = vadd.f32 %v6595_v1, %v11635_v8  ;;  %v6599_v18 = vmul.f32 %v5836_v39, %v11948_v14  ;;  %v6600_v20 = vmul.f32 %v5837_v17, %v11923_v33 }
0x1624   : > { %v5907_v16 = vsel %vm1910_vm9, %v5906_v32, %v5905_v2  ;;  %v12020_v5 = vadd.f32 %v6596_v43, %v11583_v23  ;;  %v12023_v63 = vadd.f32 %v6597_v30, %v11640_v36  ;;  %v12027_v44 = vadd.f32 %v6598_v4, %v11643_v42  ;;  %v5633_v32 = vld [vmem:[#allocation6] sm:$0xff]  ;;  %v13390_v2 = vld [vmem:[#allocation20_spill] sm:$0xff] }
0x1625   : > { %v5909_v55 = vsel %vm1913_vm10, %v5908_v40, %v5907_v16  ;;  %v12030_v8 = vadd.f32 %v6599_v18, %v11646_v13  ;;  %v6602_v58 = vmul.f32 %v11993_v61, %v11957_v25  ;;  %v5863_v23 = vadd.f32 %v5855_v47, %v11626_v48  ;;  %v13387_v48 = vld [vmem:[#allocation83_spill] sm:$0xff]  ;;  %v13389_v40 = vld [vmem:[#allocation21_spill] sm:$0xff] }
0x1626   : > { %v12034_v39 = vpop.permute.xlu0 %5826  ;;  %v5911_v17 = vsel %vm1916_vm11, %v5910_v6, %v5909_v55  ;;  %v12039_v36 = vadd.f32 %v6600_v20, %v11652_v59  ;;  %v5634_v52 = vadd.f32 %v5633_v32, %v11957_v25  ;;  %v13386_v13 = vrot.slane %v11957_v25, 7  ;;  %v13388_v59 = vld [vmem:[#allocation88_spill] sm:$0xff]  ;;  %v13391_v16 = vld [vmem:[#allocation23_spill] sm:$0xff] }
0x1627   : > { %v5854_v42 = vmul.f32 %v12034_v39, %v11957_v25  ;;  %v5913_v50 = vsel %vm1919_vm12, %v5912_v38, %v5911_v17  ;;  %v12049_v57 = vadd.f32 %v6602_v58, %v11657_v0  ;;  %v5915_v26 = vrot.slane %v5863_v23, 7  ;;  %v13392_v58 = vld [vmem:[#allocation22_spill] sm:$0xff] }
0x1628   : > { %v6601_v21 = vmul.f32 %v13386_v13, %v12034_v39  ;;  %5635 = vst.msk [vmem:[#allocation6] sm:$0xff] %vm1570_vm6, %v5634_v52  ;;  %v13393_v52 = vld [vmem:[#allocation25_spill] sm:$0xff]  ;;  %v13394_v13 = vld [vmem:[#allocation24_spill] sm:$0xff] }
0x1629   : > { %v5862_v29 = vadd.f32 %v5854_v42, %v13387_v48 }
0x162a   : > { %v12054_v47 = vadd.f32 %v6601_v21, %v13388_v59  ;;  %v13397_v59 = vld [vmem:[#allocation74_spill] sm:$0xff] }
0x162b   : > { %v5914_v10 = vsel %vm1922_vm13, %v5862_v29, %v5913_v50  ;;  %v13395_v50 = vld [vmem:[#allocation26_spill] sm:$0xff]  ;;  %v13396_v29 = vld [vmem:[#allocation47_spill] sm:$0xff] }
0x162c   : > { %v5916_v24 = vsel %vm1925_vm14, %v5915_v26, %v5914_v10  ;;  %v5689_v26 = vmul.f32 %v13397_v59, %v13396_v29  ;;  %v13398_v10 = vld [vmem:[#allocation30_spill] sm:$0xff] }
0x162d   : > { %7762 = vmatmul.mubr.msk.f32.vlgmr.msra.gmra.mrb[6].mxu1 %vm1570_vm6, %v5916_v24  ;;  %v13399_v24 = vld [vmem:[#allocation40_spill] sm:$0xff] }
0x1700   : > { %v5985_v25 = vpop.f32.mrb[6].mxu1 }
0x1701   : > { %v5990_v1 = vrot.slane %v5985_v25, 2  ;;  %v7763_v38 = vpop.f32.mrb[7].mxu1  ;;  %v5991_v6 = vrot.slane %v5985_v25, 3  ;;  %v5992_v43 = vrot.slane %v5985_v25, 4  ;;  %v5993_v30 = vrot.slane %v5985_v25, 5 }
0x1702   : > { %v5994_v18 = vrot.slane %v5985_v25, 6  ;;  %v5995_v55 = vrot.slane %v5985_v25, 7  ;;  %v5996_v17 = vrot.slane %v5985_v25, 1  ;;  %v13400_v38 = vld [vmem:[#allocation93_spill] sm:$0xff] }
0x1703   : > { %v12060_v0 = vadd.f32 %v5990_v1, %v13389_v40  ;;  %v12064_v4 = vadd.f32 %v5991_v6, %v13390_v2  ;;  %v12067_v20 = vadd.f32 %v5992_v43, %v13391_v16  ;;  %v12070_v32 = vadd.f32 %v5993_v30, %v13392_v58  ;;  %v13401_v6 = vld [vmem:[#allocation73_spill] sm:$0xff]  ;;  %v13402_v30 = vld [vmem:[#allocation27_spill] sm:$0xff] }
0x1704   : > { %v12074_v42 = vadd.f32 %v5994_v18, %v13393_v52  ;;  %v12079_v21 = vadd.f32 %v5995_v55, %v13394_v13  ;;  %v12083_v48 = vadd.f32 %v5996_v17, %v13395_v50  ;;  %v5657_v1 = vmul.f32 %v13399_v24, %v13398_v10  ;;  %v13403_v55 = vld [vmem:[#allocation46_spill] sm:$0xff]  ;;  %v13405_v24 = vld [vmem:[#allocation31_spill] sm:$0xff] }
0x1705   : > { %8256 = vtanh.f32 %v12060_v0  ;;  %v5721_v43 = vmul.f32 %v13401_v6, %v13400_v38  ;;  %v12093_v18 = vadd.f32 %v5985_v25, %v13402_v30  ;;  %v5753_v50 = vmul.f32 %v13352_v46, %v13404_v49  ;;  %v13406_v6 = vld [vmem:[#allocation92_spill] sm:$0xff] }
0x1706   : > { %8258 = vtanh.f32 %v12064_v4  ;;  %v5697_v34 = vadd.f32 %v5689_v26, %v5657_v1  ;;  %v5658_v10 = vmul.f32 %v13269_v27, %v13405_v24  ;;  %v5722_v25 = vmul.f32 %v13271_v45, %v13406_v6  ;;  %v13408_v1 = vld [vmem:[#allocation80_spill] sm:$0xff] }
0x1707   : > { %8260 = vtanh.f32 %v12067_v20  ;;  %v12890_v38 = vrot.slane %v11843_v51, 2  ;;  %v5754_v46 = vmul.f32 %v11280_v56, %v13408_v1  ;;  %v13410_v56 = vrot.slane %v11843_v51, 3 }
0x1708   : > { %8262 = vtanh.f32 %v12070_v32  ;;  %v5729_v30 = vadd.f32 %v5721_v43, %v5697_v34  ;;  %v13409_v34 = vld [vmem:[#allocation71_spill] sm:$0xff] }
0x1709   : > { %8264 = vtanh.f32 %v12074_v42  ;;  %v5879_v45 = vmul.f32 %v12890_v38, %v11917_v7  ;;  %v5786_v43 = vmul.f32 %v11709_v15, %v13409_v34 }
0x170a   : > { %8266 = vtanh.f32 %v12079_v21  ;;  %v5761_v24 = vadd.f32 %v5753_v50, %v5729_v30  ;;  %v13411_v50 = vld [vmem:[#allocation63_spill] sm:$0xff] }
0x170b   : > { %8268 = vtanh.f32 %v12083_v48  ;;  %v13412_v30 = vld [vmem:[#allocation43_spill] sm:$0xff] }
0x170c   : > { %8270 = vtanh.f32 %v12093_v18 }
0x170f   : > { %v8257_v23 = vpop.eup %8256 }
0x1710   : > { %6130 = vrot.lane.b32.xlu1 %v8257_v23, %s8575_s8  ;;  %v5690_v23 = vmul.f32 %v13267_v28, %v13403_v55  ;;  %v8259_v17 = vpop.eup %8258  ;;  %v13407_v28 = vld [vmem:[#allocation72_spill] sm:$0xff] }
0x1711   : > { %v8261_v59 = vpop.eup %8260  ;;  %6132 = vrot.lane.b32.xlu0 %v8259_v17, %s8575_s8  ;;  %v5785_v55 = vmul.f32 %v11756_v31, %v13407_v28  ;;  %v12143_v28 = vld [vmem:[#allocation5] sm:$0xff] }
0x1712   : > { %v5698_v26 = vadd.f32 %v5690_v23, %v5658_v10  ;;  %v8263_v27 = vpop.eup %8262  ;;  %v5880_v10 = vmul.f32 %v13410_v56, %v11915_v41  ;;  %v5696_v23 = vmul.f32 %v13412_v30, %v13411_v50  ;;  %v13419_v41 = vld [vmem:[#allocation97_spill] sm:$0xff] }
0x1713   : > { %v8265_v17 = vpop.eup %8264  ;;  %v5793_v31 = vadd.f32 %v5785_v55, %v5761_v24  ;;  %v13415_v24 = vld [vmem:[#allocation39_spill] sm:$0xff] }
0x1714   : > { %6134 = vrot.lane.b32.xlu1 %v8261_v59, %s8575_s8  ;;  %v5730_v6 = vadd.f32 %v5722_v25, %v5698_v26  ;;  %v8267_v1 = vpop.eup %8266  ;;  %v13413_v25 = vrot.slane %v11843_v51, 4 }
0x1715   : > { %6136 = vrot.lane.b32.xlu0 %v8263_v27, %s8575_s8  ;;  %v5887_v38 = vadd.f32 %v5879_v45, %v5793_v31  ;;  %v8269_v15 = vpop.eup %8268  ;;  %v13414_v27 = vld [vmem:[#allocation37_spill] sm:$0xff]  ;;  %v13418_v31 = vrot.slane %v11843_v51, 5 }
0x1716   : > { %v5762_v59 = vadd.f32 %v5754_v46, %v5730_v6  ;;  %v5881_v26 = vmul.f32 %v13413_v25, %v11925_v12  ;;  %v5664_v55 = vmul.f32 %v13415_v24, %v13414_v27  ;;  %v13417_v46 = vld [vmem:[#allocation109_spill] sm:$0xff]  ;;  %v13422_v27 = vrot.slane %v11843_v51, 6 }
0x1717   : > { %v5882_v45 = vmul.f32 %v13418_v31, %v11939_v11  ;;  %v13420_v12 = vld [vmem:[#allocation49_spill] sm:$0xff]  ;;  %v5792_v11 = vmul.f32 %v11746_v54, %v11599_v60 }
0x1718   : > { %6138 = vrot.lane.b32.xlu1 %v8265_v17, %s8575_s8  ;;  %v5794_v34 = vadd.f32 %v5786_v43, %v5762_v59  ;;  %v13416_v17 = vld [vmem:[#allocation104_spill] sm:$0xff]  ;;  %v5704_v50 = vadd.f32 %v5696_v23, %v5664_v55  ;;  %v5760_v25 = vmul.f32 %v13420_v12, %v13419_v41  ;;  %v8271_v43 = vpop.eup %8270  ;;  %v12894_v23 = vrot.slane %v11843_v51, 7 }
0x1719   : > { %v5728_v6 = vmul.f32 %v13417_v46, %v13416_v17  ;;  %6140 = vrot.lane.b32.xlu0 %v8267_v1, %s8575_s8  ;;  %v13421_v59 = vld [vmem:[#allocation76_spill] sm:$0xff]  ;;  %v5883_v17 = vmul.f32 %v13422_v27, %v11948_v14  ;;  %v6013_v1 = vadd.f32 %v12143_v28, %v5887_v38 }
0x171a   : > { %v5888_v56 = vadd.f32 %v5880_v10, %v5794_v34  ;;  %v5889_v7 = vadd.f32 %v5881_v26, %v13421_v59  ;;  %v12893_v34 = vrot.slane %v11843_v51, 1  ;;  %v13423_v26 = vld [vmem:[#allocation38_spill] sm:$0xff]  ;;  %v12156_v38 = vld [vmem:[#allocation5 + $0x8] sm:$0xff]  ;;  %v5884_v27 = vmul.f32 %v12894_v23, %v11923_v33 }
0x171b   : > { %v5736_v10 = vadd.f32 %v5728_v6, %v5704_v50  ;;  %v13424_v6 = vld [vmem:[#allocation91_spill] sm:$0xff]  ;;  %v5885_v23 = vmul.f32 %v12034_v39, %v11843_v51 }
0x171c   : > { %6144 = vrot.lane.b32.xlu1 %v8269_v15, %s8575_s8  ;;  %v5890_v15 = vadd.f32 %v5882_v45, %v13423_v26  ;;  %v5886_v14 = vmul.f32 %v12893_v34, %v11993_v61  ;;  %v6014_v50 = vadd.f32 %v12156_v38, %v5888_v56  ;;  %v5891_v31 = vadd.f32 %v5883_v17, %v13424_v6  ;;  %v12172_v34 = vld [vmem:[#allocation5 + $0x20] sm:$0xff] }
0x171d   : > { %6142 = vrot.lane.b32.xlu0 %v8271_v43, %s8575_s8  ;;  %v5768_v55 = vadd.f32 %v5760_v25, %v5736_v10  ;;  %v12163_v43 = vld [vmem:[#allocation5 + $0x10] sm:$0xff]  ;;  %v13426_v10 = vld [vmem:[#allocation86_spill] sm:$0xff]  ;;  %13427 = vst [vmem:[#allocation65_spill] sm:$0xff] %v12172_v34  ;;  %v7499_v6 = vmul.f32 -1.442695, %v12074_v42 }
0x171e   : > { %v6015_v59 = vadd.f32 %v12163_v43, %v5889_v7  ;;  %v5892_v26 = vadd.f32 %v5884_v27, %v13426_v10  ;;  %v6017_v33 = vadd.f32 %v12172_v34, %v5891_v31  ;;  %v12177_v7 = vld [vmem:[#allocation5 + $0x38] sm:$0xff]  ;;  %v7498_v31 = vmul.f32 -1.442695, %v12070_v32 }
0x171f   : > { %v5800_v45 = vadd.f32 %v5792_v11, %v5768_v55  ;;  %13428 = vst [vmem:[#allocation66_spill] sm:$0xff] %v12177_v7  ;;  %v12180_v11 = vld [vmem:[#allocation5 + $0x28] sm:$0xff] }
0x1720   : > { %6090 = vrot.lane.b32.xlu1 %v6013_v1, %s8575_s8  ;;  %v12168_v1 = vld [vmem:[#allocation5 + $0x18] sm:$0xff]  ;;  %13429 = vst [vmem:[#allocation68_spill] sm:$0xff] %v12180_v11  ;;  %v6018_v55 = vadd.f32 %v12180_v11, %v5892_v26 }
0x1721   : > { %6092 = vrot.lane.b32.xlu0 %v6014_v50, %s8575_s8  ;;  %v5894_v25 = vadd.f32 %v5886_v14, %v5800_v45  ;;  %13425 = vst [vmem:[#allocation98_spill] sm:$0xff] %v12168_v1  ;;  %v6016_v56 = vadd.f32 %v12168_v1, %v5890_v15  ;;  %v7495_v15 = vmul.f32 -1.442695, %v12060_v0  ;;  %v7496_v14 = vmul.f32 -1.442695, %v12064_v4 }
0x1722   : > { %v7497_v50 = vmul.f32 -1.442695, %v12067_v20  ;;  %v7500_v45 = vmul.f32 -1.442695, %v12079_v21  ;;  %v7502_v0 = vmul.f32 -1.442695, %v12083_v48 }
0x1723   : > { %v6020_v17 = vadd.f32 %v12177_v7, %v5894_v25  ;;  %8272 = vpow2.f32 %v7495_v15  ;;  %v7501_v20 = vmul.f32 -1.442695, %v12093_v18 }
0x1724   : > { %6094 = vrot.lane.b32.xlu1 %v6015_v59, %s8575_s8  ;;  %8274 = vpow2.f32 %v7496_v14  ;;  %v13430_v14 = vld [vmem:[#allocation45_spill] sm:$0xff] }
0x1725   : > { %6096 = vrot.lane.b32.xlu0 %v6016_v56, %s8575_s8  ;;  %8276 = vpow2.f32 %v7497_v50  ;;  %v13431_v50 = vld [vmem:[#allocation64_spill] sm:$0xff] }
0x1726   : > { %8278 = vpow2.f32 %v7499_v6 }
0x1727   : > { %8280 = vpow2.f32 %v7498_v31  ;;  %v13432_v31 = vld [vmem:[#allocation29_spill] sm:$0xff] }
0x1728   : > { %6098 = vrot.lane.b32.xlu1 %v6017_v33, %s8575_s8 }
0x1729   : > { %6104 = vrot.lane.b32.xlu0 %v6020_v17, %s8575_s8 }
0x172c   : > { %6100 = vrot.lane.b32.xlu1 %v6018_v55, %s8575_s8 }
0x172d   : > { %v8273_v27 = vpop.eup %8272 }
0x172e   : > { %v6045_v59 = vadd.f32 1.0, %v8273_v27  ;;  %v8275_v25 = vpop.eup %8274  ;;  %v5695_v27 = vmul.f32 %v13431_v50, %v13430_v14 }
0x172f   : > { %v8277_v4 = vpop.eup %8276  ;;  %v6046_v56 = vadd.f32 1.0, %v8275_v25  ;;  %v13435_v25 = vld [vmem:[#allocation106_spill] sm:$0xff] }
0x1730   : > { %8282 = vrcp.f32 %v6045_v59  ;;  %v8279_v10 = vpop.eup %8278  ;;  %v6047_v42 = vadd.f32 1.0, %v8277_v4  ;;  %v13433_v59 = vld [vmem:[#allocation36_spill] sm:$0xff] }
0x1731   : > { %8284 = vpow2.f32 %v7500_v45  ;;  %v8281_v26 = vpop.eup %8280  ;;  %v6049_v21 = vadd.f32 1.0, %v8279_v10  ;;  %v5663_v45 = vmul.f32 %v13433_v59, %v13432_v31  ;;  %v5791_v59 = vmul.f32 %v11443_v37, %v11357_v35 }
0x1732   : > { %8286 = vpow2.f32 %v7502_v0  ;;  %v6048_v48 = vadd.f32 1.0, %v8281_v26  ;;  %v13434_v0 = vld [vmem:[#allocation84_spill] sm:$0xff]  ;;  %v13436_v26 = vld [vmem:[#allocation90_spill] sm:$0xff] }
0x1733   : > { %8288 = vpow2.f32 %v7501_v20  ;;  %v5727_v4 = vmul.f32 %v13435_v25, %v13434_v0 }
0x1734   : > { %8290 = vrcp.f32 %v6046_v56 }
0x1735   : > { %8292 = vrcp.f32 %v6047_v42  ;;  %v5703_v42 = vadd.f32 %v5695_v27, %v5663_v45  ;;  %v6430_v27 = vld [vmem:[#allocation7] sm:$0xff] }
0x1736   : > { %8294 = vrcp.f32 %v6049_v21 }
0x1737   : > { %8296 = vrcp.f32 %v6048_v48  ;;  %v5735_v50 = vadd.f32 %v5727_v4, %v5703_v42 }
0x173a   : > { %v12193_v32 = vpop.eup %8282 }
0x173b   : > { %v8285_v17 = vpop.eup %8284 }
0x173c   : > { %v6050_v15 = vadd.f32 1.0, %v8285_v17  ;;  %v8287_v18 = vpop.eup %8286 }
0x173d   : > { %v8289_v6 = vpop.eup %8288  ;;  %v6052_v20 = vadd.f32 1.0, %v8287_v18  ;;  %v7493_v18 = vld [vmem:[%s8798_s3 + $0x30] sm:$0xff] }
0x173e   : > { %8298 = vrcp.f32 %v6050_v15  ;;  %v12203_v56 = vpop.eup %8290  ;;  %v6051_v48 = vadd.f32 1.0, %v8289_v6  ;;  %v6431_v25 = vadd.f32 %v7493_v18, %v6430_v27 }
0x173f   : > { %8300 = vrcp.f32 %v6052_v20 }
0x1740   : > { %8302 = vrcp.f32 %v6051_v48  ;;  %6432 = vst.msk [vmem:[#allocation7] sm:$0xff] %vm2139_vm7, %v6431_v25 }
0x1782   : > { %v6131_v33 = vpop.permute.xlu1 %6130 }
0x1783   : > { %v6154_v55 = vmul.f32 %v12193_v32, %v6131_v33  ;;  %v6133_v10 = vpop.permute.xlu0 %6132  ;;  %v5759_v33 = vmul.f32 %v13436_v26, %v13358_v53 }
0x1784   : > { %v6155_v21 = vmul.f32 %v12203_v56, %v6133_v10 }
0x1785   : > { %6170 = vrot.lane.b32.xlu1 %v6154_v55, %s8575_s8  ;;  %v12208_v55 = vpop.eup %8292  ;;  %v5767_v10 = vadd.f32 %v5759_v33, %v5735_v50 }
0x1786   : > { %v6135_v17 = vpop.permute.xlu1 %6134  ;;  %6172 = vrot.lane.b32.xlu0 %v6155_v21, %s8575_s8  ;;  %v12215_v26 = vpop.eup %8294 }
0x1787   : > { %v6156_v15 = vmul.f32 %v12208_v55, %v6135_v17  ;;  %v6137_v45 = vpop.permute.xlu0 %6136  ;;  %v5799_v37 = vadd.f32 %v5791_v59, %v5767_v10  ;;  %v12222_v20 = vpop.eup %8296 }
0x1788   : > { %v12225_v21 = vpop.eup %8298  ;;  %v6157_v17 = vmul.f32 %v12222_v20, %v6137_v45 }
0x1789   : > { %v5893_v33 = vadd.f32 %v5885_v23, %v5799_v37  ;;  %v12231_v59 = vpop.eup %8300 }
0x178a   : > { %v6139_v6 = vpop.permute.xlu1 %6138  ;;  %6174 = vrot.lane.b32.xlu0 %v6156_v15, %s8575_s8  ;;  %v12233_v15 = vld [vmem:[#allocation5 + $0x30] sm:$0xff]  ;;  %v12238_v23 = vpop.eup %8302 }
0x178b   : > { %v6158_v4 = vmul.f32 %v12215_v26, %v6139_v6  ;;  %v6141_v42 = vpop.permute.xlu0 %6140  ;;  %13437 = vst [vmem:[#allocation107_spill] sm:$0xff] %v12233_v15  ;;  %v6019_v27 = vadd.f32 %v12233_v15, %v5893_v33 }
0x178c   : > { %v6159_v50 = vmul.f32 %v12225_v21, %v6141_v42 }
0x178d   : > { %6178 = vrot.lane.b32.xlu1 %v6158_v4, %s8575_s8 }
0x178e   : > { %6176 = vrot.lane.b32.xlu0 %v6157_v17, %s8575_s8  ;;  %v6145_v48 = vpop.permute.xlu1 %6144 }
0x178f   : > { %v6143_v25 = vpop.permute.xlu0 %6142  ;;  %v6161_v10 = vmul.f32 %v12231_v59, %v6145_v48 }
0x1790   : > { %v6160_v45 = vmul.f32 %v12238_v23, %v6143_v25 }
0x1791   : > { %6180 = vrot.lane.b32.xlu1 %v6159_v50, %s8575_s8 }
0x1792   : > { %6102 = vrot.lane.b32.xlu0 %v6019_v27, %s8575_s8  ;;  %v6091_v6 = vpop.permute.xlu1 %6090 }
0x1793   : > { %v6093_v4 = vpop.permute.xlu0 %6092  ;;  %v6114_v61 = vmul.f32 %v12193_v32, %v6091_v6 }
0x1794   : > { %v6115_v27 = vmul.f32 %v12203_v56, %v6093_v4 }
0x1795   : > { %6184 = vrot.lane.b32.xlu1 %v6161_v10, %s8575_s8 }
0x1796   : > { %6182 = vrot.lane.b32.xlu0 %v6160_v45, %s8575_s8  ;;  %v6095_v37 = vpop.permute.xlu1 %6094 }
0x1797   : > { %v6097_v42 = vpop.permute.xlu0 %6096  ;;  %v6116_v10 = vmul.f32 %v12208_v55, %v6095_v37 }
0x1798   : > { %v6117_v53 = vmul.f32 %v12222_v20, %v6097_v42 }
0x1799   : > { %6079 = vperm.xlu1 %7951, %v7493_v18  }
0x179a   : > { %v6099_v17 = vpop.permute.xlu1 %6098 }
0x179b   : > { %v6105_v33 = vpop.permute.xlu0 %6104  ;;  %v6118_v18 = vmul.f32 %v12215_v26, %v6099_v17 }
0x179c   : > { %v6121_v17 = vmul.f32 %v12231_v59, %v6105_v33 }
0x179e   : > { %v6101_v50 = vpop.permute.xlu1 %6100 }
0x179f   : > { %v6119_v15 = vmul.f32 %v12225_v21, %v6101_v50 }
0x17f7   : > { %v6171_v48 = vpop.permute.xlu1 %6170 }
0x17f8   : > { %v6173_v7 = vpop.permute.xlu0 %6172  ;;  %v6194_v25 = vadd.f32 %v6171_v48, %v6114_v61 }
0x17f9   : > { %v6195_v60 = vadd.f32 %v6173_v7, %v6115_v27 }
0x17fa   : > { %v6210_v0 = vrot.slane %v6194_v25, 6 }
0x17fb   : > { %v6211_v31 = vrot.slane %v6195_v60, 5 }
0x17fc   : > { %v6175_v35 = vpop.permute.xlu0 %6174 }
0x17fd   : > { %v6196_v45 = vadd.f32 %v6175_v35, %v6116_v10  ;;  %v6212_v7 = vsel %vm1907_vm8, %v6211_v31, %v6210_v0 }
0x17ff   : > { %v6179_v41 = vpop.permute.xlu1 %6178  ;;  %v6213_v11 = vrot.slane %v6196_v45, 4 }
0x1800   : > { %v6198_v14 = vadd.f32 %v6179_v41, %v6118_v18  ;;  %v6177_v4 = vpop.permute.xlu0 %6176 }
0x1801   : > { %v6197_v34 = vadd.f32 %v6177_v4, %v6117_v53  ;;  %v6214_v35 = vsel %vm1910_vm9, %v6213_v11, %v6212_v7 }
0x1802   : > { %v6217_v37 = vrot.slane %v6198_v14, 2 }
0x1803   : > { %v6181_v6 = vpop.permute.xlu1 %6180  ;;  %v6215_v61 = vrot.slane %v6197_v34, 3 }
0x1804   : > { %v6199_v1 = vadd.f32 %v6181_v6, %v6119_v15  ;;  %v6103_v48 = vpop.permute.xlu0 %6102 }
0x1805   : > { %v6216_v60 = vsel %vm1913_vm10, %v6215_v61, %v6214_v35  ;;  %v6120_v53 = vmul.f32 %v12238_v23, %v6103_v48 }
0x1806   : > { %v6219_v42 = vrot.slane %v6199_v1, 1  ;;  %v6218_v50 = vsel %vm1916_vm11, %v6217_v37, %v6216_v60  ;;  %v8588_v1 = vmov 6  }
0x1807   : > { %v6185_v41 = vpop.permute.xlu1 %6184  ;;  %7953 = vset.pattern.permute.xlu0 %v8588_v1  ;;  %7952 = vset.pattern.permute.xlu1 %v8588_v1  ;;  %v8398_v1 = vld [vmem:[%s8781_s4] sm:$0xff] }
0x1808   : > { %v6201_v27 = vadd.f32 %v6185_v41, %v6121_v17  ;;  %v6220_v15 = vsel %vm1919_vm12, %v6219_v42, %v6218_v50  ;;  %v6183_v10 = vpop.permute.xlu0 %6182 }
0x1809   : > { %v6200_v34 = vadd.f32 %v6183_v10, %v6120_v53 }
0x180a   : > { %v6222_v31 = vrot.slane %v6201_v27, 7 }
0x180b   : > { %v6221_v14 = vsel %vm1922_vm13, %v6200_v34, %v6220_v15 }
0x180c   : > { %v6223_v0 = vsel %vm1925_vm14, %v6222_v31, %v6221_v14 }
0x180d   : > { %6224 = vrot.lane.b32.xlu0 %v6223_v0, %s8577_s9  ;;  %v8397_v0 = vld [vmem:[%s8781_s4 + $0x8] sm:$0xff] }
0x1818   : > { %v12259_v11 = vpop.permute.xlu1 %6079 }
0x187f   : > { %v6225_v33 = vpop.permute.xlu0 %6224 }
0x1880   : > { %v12262_v25 = vmul.f32 %v6225_v33, %v12259_v11  ;;  %v8399_v33 = vld [vmem:[%s8781_s4 + $0x10] sm:$0xff] }
0x1882   : > { %8304 = vtanh.f32 %v12262_v25  ;;  %v6362_v18 = vcombine.high %v12262_v25, %v12262_v25  ;;  %v6369_v45 = vrot.slane %v12262_v25, %v13162_v22 }
0x1884   : > { %v6376_v4 = vrot.slane %v6362_v18, %v13162_v22  ;;  %v6377_v6 = vcombine.high %v6369_v45, %v6369_v45  ;;  %v6385_v7 = vrot.slane %v6369_v45, %v13162_v22  ;;  %v8400_v18 = vld [vmem:[%s8781_s4 + $0x18] sm:$0xff]  ;;  %v8401_v45 = vld [vmem:[%s8781_s4 + $0x20] sm:$0xff] }
0x1886   : > { %v6378_v61 = vcombine.high %v6376_v4, %v6376_v4  ;;  %v6392_v37 = vrot.slane %v6376_v4, %v13162_v22  ;;  %v6399_v17 = vrot.slane %v6377_v6, %v13162_v22  ;;  %v6407_v35 = vcombine.high %v6385_v7, %v6385_v7  ;;  %6419 = vst.msk [vmem:[%s9106_s11 + $0x6] sm:$0x1] %vm2058_vm15, %v6385_v7  ;;  %v8402_v4 = vld [vmem:[%s8781_s4 + $0x30] sm:$0xff] }
0x1888   : > { %v6406_v48 = vrot.slane %v6378_v61, %v13162_v22  ;;  %v6408_v42 = vcombine.high %v6392_v37, %v6392_v37  ;;  %v6409_v60 = vcombine.high %v6399_v17, %v6399_v17  ;;  %6420 = vst.msk [vmem:[%s9106_s11 + $0x16] sm:$0x1] %vm2058_vm15, %v6399_v17  ;;  %6421 = vst.msk [vmem:[%s9106_s11 + $0x26] sm:$0x1] %vm2058_vm15, %v6407_v35 }
0x1889   : > { %6423 = vst.msk [vmem:[%s9106_s11 + $0x46] sm:$0x1] %vm2058_vm15, %v6392_v37 }
0x188a   : > { %v6410_v41 = vcombine.high %v6406_v48, %v6406_v48  ;;  %6422 = vst.msk [vmem:[%s9106_s11 + $0x36] sm:$0x1] %vm2058_vm15, %v6409_v60  ;;  %6424 = vst.msk [vmem:[%s9106_s11 + $0x56] sm:$0x1] %vm2058_vm15, %v6406_v48 }
0x188b   : > { %6425 = vst.msk [vmem:[%s9106_s11 + $0x66] sm:$0x1] %vm2058_vm15, %v6408_v42 }
0x188c   : > { %v8305_v27 = vpop.eup %8304  ;;  %6426 = vst.msk [vmem:[%s9106_s11 + $0x76] sm:$0x1] %vm2058_vm15, %v6410_v41 }
0x188d   : > { %v6231_v50 = vrot.slane %v8305_v27, 3  ;;  %v6230_v53 = vrot.slane %v8305_v27, 2  ;;  %v6233_v15 = vrot.slane %v8305_v27, 5  ;;  %v6232_v10 = vrot.slane %v8305_v27, 4 }
0x188e   : > { %v6235_v31 = vrot.slane %v8305_v27, 7  ;;  %v6234_v34 = vrot.slane %v8305_v27, 6  ;;  %v6236_v14 = vrot.slane %v8305_v27, 1 }
0x188f   : > { %6239 = vrot.lane.b32.xlu0 %v6231_v50, %s8579_s14  ;;  %6237 = vrot.lane.b32.xlu1 %v6230_v53, %s8579_s14 }
0x1893   : > { %6243 = vrot.lane.b32.xlu0 %v6233_v15, %s8579_s14  ;;  %6241 = vrot.lane.b32.xlu1 %v6232_v10, %s8579_s14 }
0x1897   : > { %6247 = vrot.lane.b32.xlu0 %v6235_v31, %s8579_s14  ;;  %6245 = vrot.lane.b32.xlu1 %v6234_v34, %s8579_s14 }
0x189b   : > { %6249 = vrot.lane.b32.xlu0 %v8305_v27, %s8579_s14  ;;  %6251 = vrot.lane.b32.xlu1 %v6236_v14, %s8579_s14 }
0x189f   : > { %6632 = vperm.xlu0 %7953, %v8397_v0   ;;  %6628 = vperm.xlu1 %7952, %v8398_v1  }
0x18a3   : > { %6636 = vperm.xlu1 %7952, %v8399_v33  }
0x18a7   : > { %6640 = vperm.xlu1 %7952, %v8400_v18  }
0x18ab   : > { %6644 = vperm.xlu1 %7952, %v8401_v45  }
0x18af   : > { %6652 = vperm.xlu1 %7952, %v8402_v4  }
0x18b3   : > { %7954 = vset.pattern.permute.xlu1 %v13371_v3 }
0x1901   : > { %v6240_v6 = vpop.permute.xlu0 %6239  ;;  %v6238_v7 = vpop.permute.xlu1 %6237 }
0x1902   : > { %v6262_v61 = vmul.f32 %v12203_v56, %v6240_v6  ;;  %v6261_v37 = vmul.f32 %v12193_v32, %v6238_v7 }
0x1904   : > { %v6278_v17 = vrot.slane %v6262_v61, 5  ;;  %v6277_v35 = vrot.slane %v6261_v37, 6 }
0x1905   : > { %v6244_v48 = vpop.permute.xlu0 %6243  ;;  %v6242_v42 = vpop.permute.xlu1 %6241 }
0x1906   : > { %v6264_v60 = vmul.f32 %v12222_v20, %v6244_v48  ;;  %v6263_v41 = vmul.f32 %v12208_v55, %v6242_v42  ;;  %v6279_v50 = vsel %vm1907_vm8, %v6278_v17, %v6277_v35 }
0x1908   : > { %v6280_v27 = vrot.slane %v6263_v41, 4  ;;  %v6282_v53 = vrot.slane %v6264_v60, 3 }
0x1909   : > { %v6248_v15 = vpop.permute.xlu0 %6247  ;;  %v6246_v10 = vpop.permute.xlu1 %6245 }
0x190a   : > { %v6281_v31 = vsel %vm1910_vm9, %v6280_v27, %v6279_v50  ;;  %v6266_v56 = vmul.f32 %v12225_v21, %v6248_v15  ;;  %v6265_v32 = vmul.f32 %v12215_v26, %v6246_v10  ;;  %v8403_v26 = vld [vmem:[%s8781_s4 + $0x28] sm:$0xff] }
0x190b   : > { %v6283_v0 = vsel %vm1913_vm10, %v6282_v53, %v6281_v31 }
0x190c   : > { %v6286_v34 = vrot.slane %v6266_v56, 1  ;;  %v6284_v14 = vrot.slane %v6265_v32, 2 }
0x190d   : > { %v6250_v20 = vpop.permute.xlu0 %6249  ;;  %v6252_v1 = vpop.permute.xlu1 %6251 }
0x190e   : > { %v6285_v55 = vsel %vm1916_vm11, %v6284_v14, %v6283_v0  ;;  %v6267_v33 = vmul.f32 %v12238_v23, %v6250_v20  ;;  %v6268_v18 = vmul.f32 %v12231_v59, %v6252_v1 }
0x190f   : > { %v6287_v45 = vsel %vm1919_vm12, %v6286_v34, %v6285_v55 }
0x1910   : > { %v6288_v4 = vsel %vm1922_vm13, %v6267_v33, %v6287_v45  ;;  %v6289_v6 = vrot.slane %v6268_v18, 7 }
0x1912   : > { %v6290_v21 = vsel %vm1925_vm14, %v6289_v6, %v6288_v4 }
0x1913   : > { %6291 = vrot.lane.b32.xlu0 %v6290_v21, %s8579_s14 }
0x1917   : > { %6648 = vperm.xlu0 %7953, %v8403_v26  }
0x191b   : > { %6656 = vperm.xlu0 %7953, %v11886_v9  }
0x191e   : > { %v12324_v7 = vpop.permute.xlu1 %6628  ;;  %v12328_v59 = vpop.permute.xlu0 %6632 }
0x191f   : > { %7955 = vset.pattern.permute.xlu0 %v13371_v3 }
0x1922   : > { %v12326_v23 = vpop.permute.xlu1 %6636 }
0x1926   : > { %v12330_v61 = vpop.permute.xlu1 %6640 }
0x192a   : > { %v12344_v27 = vpop.permute.xlu1 %6644 }
0x1985   : > { %v6292_v37 = vpop.permute.xlu0 %6291 }
0x1986   : > { %v12333_v17 = vmul.f32 %v6292_v37, %v12259_v11 }
0x1988   : > { %v6296_v35 = vcombine.high %v12333_v17, %v12333_v17  ;;  %v6303_v9 = vrot.slane %v12333_v17, %v13162_v22  ;;  %v6659_v3 = vrot.slane %v12333_v17, 1  ;;  %v6660_v48 = vrot.slane %v12333_v17, 2 }
0x1989   : > { %v6661_v42 = vrot.slane %v12333_v17, 3  ;;  %v6662_v60 = vrot.slane %v12333_v17, 4  ;;  %v6663_v41 = vrot.slane %v12333_v17, 5 }
0x198a   : > { %v6310_v11 = vrot.slane %v6296_v35, %v13162_v22  ;;  %v6311_v50 = vcombine.high %v6303_v9, %v6303_v9  ;;  %v6319_v53 = vrot.slane %v6303_v9, %v13162_v22  ;;  %v6675_v15 = vmul.f32 %v6660_v48, %v12328_v59 }
0x198b   : > { %v6674_v10 = vmul.f32 %v6659_v3, %v12324_v7  ;;  %v6676_v31 = vmul.f32 %v6661_v42, %v12326_v23  ;;  %v6677_v56 = vmul.f32 %v6662_v60, %v12330_v61  ;;  %v6678_v32 = vmul.f32 %v6663_v41, %v12344_v27  ;;  %v12382_v42 = vpop.permute.xlu1 %6652 }
0x198c   : > { %v6312_v34 = vcombine.high %v6310_v11, %v6310_v11  ;;  %v6326_v14 = vrot.slane %v6310_v11, %v13162_v22  ;;  %v6333_v0 = vrot.slane %v6311_v50, %v13162_v22  ;;  %v6341_v20 = vcombine.high %v6319_v53, %v6319_v53  ;;  %6353 = vst.msk [vmem:[%s9238_s15 + $0x6] sm:$0x1] %vm2058_vm15, %v6319_v53 }
0x198d   : > { %v6683_v1 = vadd.f32 %v6675_v15, %v12020_v5  ;;  %v6682_v55 = vadd.f32 %v6674_v10, %v12013_v62  ;;  %v6684_v33 = vadd.f32 %v6676_v31, %v12023_v63  ;;  %v6685_v18 = vadd.f32 %v6677_v56, %v12027_v44  ;;  %v6427_v63 = vld [vmem:[#allocation6] sm:$0xff] }
0x198e   : > { %v6340_v45 = vrot.slane %v6312_v34, %v13162_v22  ;;  %v6342_v4 = vcombine.high %v6326_v14, %v6326_v14  ;;  %v6343_v6 = vcombine.high %v6333_v0, %v6333_v0  ;;  %6354 = vst.msk [vmem:[%s9238_s15 + $0x16] sm:$0x1] %vm2058_vm15, %v6333_v0  ;;  %6355 = vst.msk [vmem:[%s9238_s15 + $0x26] sm:$0x1] %vm2058_vm15, %v6341_v20  ;;  %v6665_v44 = vrot.slane %v12333_v17, 7 }
0x198f   : > { %6357 = vst.msk [vmem:[%s9238_s15 + $0x46] sm:$0x1] %vm2058_vm15, %v6326_v14  ;;  %v6686_v5 = vadd.f32 %v6678_v32, %v12030_v8  ;;  %v6730_v62 = vrot.slane %v6683_v1, 6  ;;  %v6729_v21 = vrot.slane %v6682_v55, 7  ;;  %v6732_v26 = vrot.slane %v6684_v33, 5 }
0x1990   : > { %v6344_v37 = vcombine.high %v6340_v45, %v6340_v45  ;;  %6356 = vst.msk [vmem:[%s9238_s15 + $0x36] sm:$0x1] %vm2058_vm15, %v6343_v6  ;;  %6358 = vst.msk [vmem:[%s9238_s15 + $0x56] sm:$0x1] %vm2058_vm15, %v6340_v45  ;;  %v6428_v35 = vadd.f32 %v6427_v63, %v12333_v17  ;;  %v6734_v3 = vrot.slane %v6685_v18, 4  ;;  %v6680_v11 = vmul.f32 %v6665_v44, %v12382_v42 }
0x1991   : > { %6359 = vst.msk [vmem:[%s9238_s15 + $0x66] sm:$0x1] %vm2058_vm15, %v6342_v4  ;;  %v6731_v9 = vsel %vm1907_vm8, %v6730_v62, %v6729_v21  ;;  %v6736_v48 = vrot.slane %v6686_v5, 3  ;;  %v6664_v50 = vrot.slane %v12333_v17, 6  ;;  %v6695_v53 = vrot.slane %v12262_v25, 6 }
0x1992   : > { %6360 = vst.msk [vmem:[%s9238_s15 + $0x76] sm:$0x1] %vm2058_vm15, %v6344_v37  ;;  %v6733_v8 = vsel %vm1910_vm9, %v6732_v26, %v6731_v9  ;;  %v6688_v56 = vadd.f32 %v6680_v11, %v12054_v47  ;;  %v13439_v9 = vld [vmem:[#allocation30_spill] sm:$0xff] }
0x1993   : > { %6429 = vst.msk [vmem:[#allocation6] sm:$0xff] %vm1570_vm6, %v6428_v35  ;;  %v6735_v60 = vsel %vm1913_vm10, %v6734_v3, %v6733_v8  ;;  %v13440_v3 = vld [vmem:[#allocation93_spill] sm:$0xff] }
0x1994   : > { %v6737_v41 = vsel %vm1916_vm11, %v6736_v48, %v6735_v60  ;;  %v6740_v1 = vrot.slane %v6688_v56, 1  ;;  %v6515_v8 = vmul.f32 %v13417_v46, %v13440_v3  ;;  %v13441_v48 = vld [vmem:[#allocation46_spill] sm:$0xff] }
0x1995   : > { %v13442_v60 = vld [vmem:[#allocation74_spill] sm:$0xff] }
0x1996   : > { %v6649_v15 = vpop.permute.xlu0 %6648 }
0x1997   : > { %v6679_v10 = vmul.f32 %v6664_v50, %v6649_v15  ;;  %v6710_v31 = vmul.f32 %v6695_v53, %v6649_v15  ;;  %v13444_v50 = vld [vmem:[#allocation31_spill] sm:$0xff]  ;;  %v13445_v53 = vld [vmem:[#allocation40_spill] sm:$0xff] }
0x1998   : > { %v6452_v15 = vmul.f32 %v13445_v53, %v13444_v50  ;;  %v6693_v50 = vrot.slane %v12262_v25, 4  ;;  %v6694_v53 = vrot.slane %v12262_v25, 5 }
0x1999   : > { %v6687_v32 = vadd.f32 %v6679_v10, %v12039_v36  ;;  %v12392_v34 = vadd.f32 %v6710_v31, %v11937_v19  ;;  %v13446_v10 = vld [vmem:[#allocation92_spill] sm:$0xff] }
0x199a   : > { %v12394_v14 = vpop.permute.xlu0 %6656 }
0x199b   : > { %v6738_v0 = vrot.slane %v6687_v32, 2  ;;  %v6681_v20 = vmul.f32 %v12394_v14, %v12333_v17  ;;  %v13448_v32 = vld [vmem:[#allocation72_spill] sm:$0xff] }
0x199d   : > { %v6739_v55 = vsel %vm1919_vm12, %v6738_v0, %v6737_v41  ;;  %v6689_v33 = vadd.f32 %v6681_v20, %v12049_v57  ;;  %v6484_v41 = vmul.f32 %v13442_v60, %v13441_v48  ;;  %v6579_v0 = vmul.f32 %v11746_v54, %v13448_v32  ;;  %v13453_v54 = vld [vmem:[#allocation71_spill] sm:$0xff] }
0x199e   : > { %v6741_v18 = vsel %vm1922_vm13, %v6740_v1, %v6739_v55  ;;  %v13450_v1 = vld [vmem:[#allocation108_spill] sm:$0xff]  ;;  %v13458_v32 = vld [vmem:[#allocation103_spill] sm:$0xff] }
0x199f   : > { %v6742_v47 = vsel %vm1925_vm14, %v6689_v33, %v6741_v18  ;;  %v13451_v33 = vld [vmem:[#allocation100_spill] sm:$0xff]  ;;  %v13452_v18 = vrot.slane %v11843_v51, 1 }
0x19a0   : > { %7773 = vmatmul.mubr.msk.f32.vlgmr.msra.gmra.mrb[12].mxu0 %vm1570_vm6, %v6742_v47 }
0x19a1   : > { %v6611_v47 = vmul.f32 %v13452_v18, %v13451_v33  ;;  %v13462_v33 = vld [vmem:[#allocation65_spill] sm:$0xff] }
0x1a73   : > { %v6811_v36 = vpop.f32.mrb[12].mxu0 }
0x1a74   : > { %v6816_v19 = vrot.slane %v6811_v36, 1  ;;  %v7774_v45 = vpop.f32.mrb[13].mxu0  ;;  %v6817_v17 = vrot.slane %v6811_v36, 2  ;;  %v6818_v6 = vrot.slane %v6811_v36, 3  ;;  %v6819_v5 = vrot.slane %v6811_v36, 4 }
0x1a75   : > { %v6820_v57 = vrot.slane %v6811_v36, 5  ;;  %v6821_v26 = vrot.slane %v6811_v36, 6  ;;  %v6822_v37 = vrot.slane %v6811_v36, 7 }
0x1a76   : > { %v12404_v4 = vadd.f32 %v6816_v19, %v13389_v40  ;;  %v12408_v62 = vadd.f32 %v6817_v17, %v13390_v2  ;;  %v12411_v21 = vadd.f32 %v6818_v6, %v13391_v16  ;;  %v12414_v63 = vadd.f32 %v6819_v5, %v13392_v58  ;;  %v13438_v58 = vld [vmem:[#allocation27_spill] sm:$0xff]  ;;  %v13454_v17 = vld [vmem:[#allocation89_spill] sm:$0xff] }
0x1a77   : > { %v12418_v44 = vadd.f32 %v6820_v57, %v13393_v52  ;;  %v6483_v2 = vmul.f32 %v13412_v30, %v13396_v29  ;;  %v12425_v16 = vadd.f32 %v6821_v26, %v13394_v13  ;;  %v12429_v35 = vadd.f32 %v6822_v37, %v13438_v58  ;;  %v13443_v30 = vld [vmem:[#allocation26_spill] sm:$0xff]  ;;  %v13455_v37 = vld [vmem:[#allocation101_spill] sm:$0xff] }
0x1a78   : > { %8306 = vtanh.f32 %v12404_v4  ;;  %v6451_v52 = vmul.f32 %v13415_v24, %v13439_v9  ;;  %v6547_v13 = vmul.f32 %v13420_v12, %v13404_v49  ;;  %v12441_v11 = vadd.f32 %v6811_v36, %v13443_v30  ;;  %v13447_v24 = vld [vmem:[#allocation73_spill] sm:$0xff]  ;;  %v13449_v12 = vld [vmem:[#allocation80_spill] sm:$0xff] }
0x1a79   : > { %8308 = vtanh.f32 %v12408_v62  ;;  %v6516_v31 = vmul.f32 %v13447_v24, %v13446_v10  ;;  %v6492_v49 = vadd.f32 %v6484_v41, %v6452_v15  ;;  %v6548_v55 = vmul.f32 %v13450_v1, %v13449_v12  ;;  %v13461_v1 = vld [vmem:[#allocation98_spill] sm:$0xff] }
0x1a7a   : > { %8310 = vtanh.f32 %v12411_v21  ;;  %v6491_v29 = vadd.f32 %v6483_v2, %v6451_v52  ;;  %v6690_v19 = vrot.slane %v12262_v25, 1  ;;  %v6580_v6 = vmul.f32 %v13454_v17, %v13453_v54 }
0x1a7b   : > { %8312 = vtanh.f32 %v12414_v63  ;;  %v6524_v45 = vadd.f32 %v6516_v31, %v6492_v49  ;;  %v13456_v2 = vrot.slane %v11843_v51, 2  ;;  %v6691_v52 = vrot.slane %v12262_v25, 2  ;;  %v13457_v31 = vld [vmem:[#allocation102_spill] sm:$0xff]  ;;  %v13459_v49 = vld [vmem:[#allocation105_spill] sm:$0xff] }
0x1a7c   : > { %8314 = vtanh.f32 %v12418_v44  ;;  %v6523_v56 = vadd.f32 %v6515_v8, %v6491_v29  ;;  %v6705_v26 = vmul.f32 %v6690_v19, %v12324_v7  ;;  %v6692_v8 = vrot.slane %v12262_v25, 3  ;;  %v13464_v19 = vld [vmem:[#allocation68_spill] sm:$0xff] }
0x1a7d   : > { %8316 = vtanh.f32 %v12425_v16  ;;  %v6612_v58 = vmul.f32 %v13456_v2, %v13455_v37  ;;  %v6556_v9 = vadd.f32 %v6548_v55, %v6524_v45  ;;  %v6706_v60 = vmul.f32 %v6691_v52, %v12328_v59  ;;  %v13465_v45 = vld [vmem:[#allocation107_spill] sm:$0xff] }
0x1a7e   : > { %8318 = vtanh.f32 %v12429_v35  ;;  %v6555_v36 = vadd.f32 %v6547_v13, %v6523_v56  ;;  %v6707_v29 = vmul.f32 %v6692_v8, %v12326_v23  ;;  %v6708_v10 = vmul.f32 %v6693_v50, %v12330_v61 }
0x1a7f   : > { %8320 = vtanh.f32 %v12441_v11  ;;  %v6588_v48 = vadd.f32 %v6580_v6, %v6556_v9  ;;  %v6709_v23 = vmul.f32 %v6694_v53, %v12344_v27  ;;  %v6696_v27 = vrot.slane %v12262_v25, 7 }
0x1a80   : > { %v6587_v57 = vadd.f32 %v6579_v0, %v6555_v36  ;;  %v6716_v0 = vadd.f32 %v6708_v10, %v13458_v32  ;;  %v7505_v17 = vmul.f32 -1.442695, %v12404_v4  ;;  %v7507_v6 = vmul.f32 -1.442695, %v12411_v21  ;;  %v13472_v10 = vld [vmem:[#allocation77_spill] sm:$0xff]  ;;  %v13475_v32 = vld [vmem:[#allocation87_spill] sm:$0xff] }
0x1a81   : > { %v6620_v30 = vadd.f32 %v6612_v58, %v6588_v48  ;;  %v6717_v12 = vadd.f32 %v6709_v23, %v13459_v49  ;;  %v6711_v18 = vmul.f32 %v6696_v27, %v12382_v42  ;;  %v7506_v42 = vmul.f32 -1.442695, %v12408_v62  ;;  %v13466_v48 = vld [vmem:[#allocation45_spill] sm:$0xff]  ;;  %v7503_v27 = vld [vmem:[%s8798_s3 + $0x38] sm:$0xff] }
0x1a82   : > { %v8307_v40 = vpop.eup %8306  ;;  %v6619_v3 = vadd.f32 %v6611_v47, %v6587_v57  ;;  %v6842_v55 = vadd.f32 %v13461_v1, %v6716_v0  ;;  %8322 = vpow2.f32 %v7505_v17  ;;  %v7508_v57 = vmul.f32 -1.442695, %v12414_v63  ;;  %v7256_v1 = vld [vmem:[#allocation7] sm:$0xff] }
0x1a83   : > { %6956 = vrot.lane.b32.xlu1 %v8307_v40, %s8575_s8  ;;  %v8309_v46 = vpop.eup %8308  ;;  %v6714_v15 = vadd.f32 %v6706_v60, %v6620_v30  ;;  %8324 = vpow2.f32 %v7506_v42  ;;  %v7511_v62 = vmul.f32 -1.442695, %v12429_v35  ;;  %v7512_v9 = vmul.f32 -1.442695, %v12441_v11  ;;  %v13467_v60 = vld [vmem:[#allocation63_spill] sm:$0xff]  ;;  %v13471_v30 = vld [vmem:[#allocation37_spill] sm:$0xff] }
0x1a84   : > { %v8311_v20 = vpop.eup %8310  ;;  %6958 = vrot.lane.b32.xlu0 %v8309_v46, %s8575_s8  ;;  %v6713_v7 = vadd.f32 %v6705_v26, %v6619_v3  ;;  %v6715_v46 = vadd.f32 %v6707_v29, %v13457_v31  ;;  %8326 = vpow2.f32 %v7507_v6  ;;  %v13469_v29 = vld [vmem:[#allocation104_spill] sm:$0xff] }
0x1a85   : > { %v8313_v5 = vpop.eup %8312  ;;  %v6840_v56 = vadd.f32 %v12156_v38, %v6714_v15  ;;  %v6843_v38 = vadd.f32 %v13462_v33, %v6717_v12  ;;  %8328 = vpow2.f32 %v7508_v57  ;;  %v13476_v33 = vld [vmem:[#allocation69_spill] sm:$0xff] }
0x1a86   : > { %v8315_v40 = vpop.eup %8314  ;;  %v6839_v59 = vadd.f32 %v12143_v28, %v6713_v7  ;;  %v13460_v28 = vrot.slane %v11843_v51, 7  ;;  %v13468_v7 = vld [vmem:[#allocation84_spill] sm:$0xff] }
0x1a87   : > { %6960 = vrot.lane.b32.xlu1 %v8311_v20, %s8575_s8  ;;  %v8317_v41 = vpop.eup %8316  ;;  %v6841_v20 = vadd.f32 %v12163_v43, %v6715_v46  ;;  %v13463_v43 = vld [vmem:[#allocation94_spill] sm:$0xff]  ;;  %v6522_v11 = vmul.f32 %v13469_v29, %v13468_v7 }
0x1a88   : > { %6962 = vrot.lane.b32.xlu0 %v8313_v5, %s8575_s8  ;;  %v8319_v13 = vpop.eup %8318  ;;  %v6617_v61 = vmul.f32 %v13460_v28, %v12034_v39  ;;  %v6844_v39 = vadd.f32 %v13464_v19, %v12392_v34  ;;  %v7510_v34 = vmul.f32 -1.442695, %v12425_v16 }
0x1a89   : > { %v8321_v24 = vpop.eup %8320 }
0x1a8a   : > { %v6625_v47 = vadd.f32 %v6617_v61, %v13463_v43  ;;  %8330 = vpow2.f32 %v7510_v34 }
0x1a8b   : > { %6964 = vrot.lane.b32.xlu1 %v8315_v40, %s8575_s8  ;;  %v7509_v40 = vmul.f32 -1.442695, %v12418_v44 }
0x1a8c   : > { %6966 = vrot.lane.b32.xlu0 %v8317_v41, %s8575_s8  ;;  %v6719_v36 = vadd.f32 %v6711_v18, %v6625_v47  ;;  %v8323_v5 = vpop.eup %8322  ;;  %v6490_v41 = vmul.f32 %v13467_v60, %v13466_v48  ;;  %v7257_v47 = vadd.f32 %v7503_v27, %v7256_v1 }
0x1a8d   : > { %v6871_v26 = vadd.f32 1.0, %v8323_v5  ;;  %v8325_v37 = vpop.eup %8324 }
0x1a8e   : > { %v6845_v54 = vadd.f32 %v13465_v45, %v6719_v36  ;;  %v8327_v4 = vpop.eup %8326  ;;  %v6872_v2 = vadd.f32 1.0, %v8325_v37  ;;  %7258 = vst.msk [vmem:[#allocation7] sm:$0xff] %vm2139_vm7, %v7257_v47 }
0x1a8f   : > { %6968 = vrot.lane.b32.xlu1 %v8319_v13, %s8575_s8  ;;  %8332 = vrcp.f32 %v6871_v26  ;;  %v6873_v21 = vadd.f32 1.0, %v8327_v4  ;;  %v8329_v58 = vpop.eup %8328  ;;  %v13470_v13 = vld [vmem:[#allocation29_spill] sm:$0xff] }
0x1a90   : > { %6970 = vrot.lane.b32.xlu0 %v8321_v24, %s8575_s8  ;;  %8334 = vpow2.f32 %v7509_v40  ;;  %v6874_v44 = vadd.f32 1.0, %v8329_v58  ;;  %v6458_v50 = vmul.f32 %v13471_v30, %v13470_v13  ;;  %v13473_v24 = vld [vmem:[#allocation97_spill] sm:$0xff] }
0x1a91   : > { %8336 = vpow2.f32 %v7511_v62 }
0x1a92   : > { %8338 = vrcp.f32 %v6872_v2  ;;  %v6498_v31 = vadd.f32 %v6490_v41, %v6458_v50 }
0x1a93   : > { %6916 = vrot.lane.b32.xlu1 %v6839_v59, %s8575_s8  ;;  %8340 = vrcp.f32 %v6873_v21  ;;  %v6554_v59 = vmul.f32 %v13473_v24, %v13472_v10 }
0x1a94   : > { %6918 = vrot.lane.b32.xlu0 %v6840_v56, %s8575_s8  ;;  %v8331_v63 = vpop.eup %8330  ;;  %8342 = vpow2.f32 %v7512_v9  ;;  %v13474_v56 = vld [vmem:[#allocation56_spill] sm:$0xff] }
0x1a95   : > { %v6876_v8 = vadd.f32 1.0, %v8331_v63  ;;  %8344 = vrcp.f32 %v6874_v44  ;;  %v6586_v0 = vmul.f32 %v13475_v32, %v13474_v56 }
0x1a97   : > { %6920 = vrot.lane.b32.xlu1 %v6841_v20, %s8575_s8  ;;  %8346 = vrcp.f32 %v6876_v8  ;;  %v6530_v20 = vadd.f32 %v6522_v11, %v6498_v31 }
0x1a98   : > { %6922 = vrot.lane.b32.xlu0 %v6842_v55, %s8575_s8 }
0x1a99   : > { %v12511_v16 = vpop.eup %8332  ;;  %v6562_v18 = vadd.f32 %v6554_v59, %v6530_v20 }
0x1a9a   : > { %v8335_v35 = vpop.eup %8334 }
0x1a9b   : > { %6924 = vrot.lane.b32.xlu1 %v6843_v38, %s8575_s8  ;;  %v6875_v53 = vadd.f32 1.0, %v8335_v35  ;;  %v8337_v15 = vpop.eup %8336  ;;  %v6618_v38 = vmul.f32 %v13476_v33, %v11843_v51  ;;  %v6594_v19 = vadd.f32 %v6586_v0, %v6562_v18 }
0x1a9c   : > { %v12523_v46 = vpop.eup %8338  ;;  %v6877_v61 = vadd.f32 1.0, %v8337_v15 }
0x1a9d   : > { %v12528_v28 = vpop.eup %8340  ;;  %8348 = vrcp.f32 %v6875_v53  ;;  %v6626_v17 = vadd.f32 %v6618_v38, %v6594_v19 }
0x1a9e   : > { %v8343_v55 = vpop.eup %8342  ;;  %8350 = vrcp.f32 %v6877_v61 }
0x1a9f   : > { %6926 = vrot.lane.b32.xlu1 %v6844_v39, %s8575_s8  ;;  %v6712_v39 = vmul.f32 %v12394_v14, %v12262_v25  ;;  %v6878_v45 = vadd.f32 1.0, %v8343_v55  ;;  %v13477_v14 = vld [vmem:[#allocation66_spill] sm:$0xff] }
0x1aa1   : > { %v6720_v5 = vadd.f32 %v6712_v39, %v6626_v17  ;;  %8352 = vrcp.f32 %v6878_v45 }
0x1aa3   : > { %6928 = vrot.lane.b32.xlu1 %v6845_v54, %s8575_s8  ;;  %v12538_v54 = vpop.eup %8344  ;;  %v6846_v26 = vadd.f32 %v13477_v14, %v6720_v5 }
0x1aa4   : > { %v12541_v51 = vpop.eup %8346 }
0x1aa7   : > { %v12547_v25 = vpop.eup %8348 }
0x1aa8   : > { %v12553_v4 = vpop.eup %8350 }
0x1aab   : > { %v12557_v21 = vpop.eup %8352 }
0x1af5   : > { %v6957_v52 = vpop.permute.xlu1 %6956 }
0x1af6   : > { %v6980_v3 = vmul.f32 %v12511_v16, %v6957_v52  ;;  %v6959_v23 = vpop.permute.xlu0 %6958 }
0x1af7   : > { %v6981_v49 = vmul.f32 %v12523_v46, %v6959_v23 }
0x1af8   : > { %6996 = vrot.lane.b32.xlu1 %v6980_v3, %s8575_s8 }
0x1af9   : > { %v6961_v12 = vpop.permute.xlu1 %6960  ;;  %6998 = vrot.lane.b32.xlu0 %v6981_v49, %s8575_s8 }
0x1afa   : > { %v6982_v43 = vmul.f32 %v12528_v28, %v6961_v12  ;;  %v6963_v36 = vpop.permute.xlu0 %6962 }
0x1afb   : > { %v6983_v57 = vmul.f32 %v12538_v54, %v6963_v36 }
0x1afd   : > { %7000 = vrot.lane.b32.xlu0 %v6982_v43, %s8575_s8  ;;  %v6965_v6 = vpop.permute.xlu1 %6964 }
0x1afe   : > { %v6967_v42 = vpop.permute.xlu0 %6966  ;;  %v6984_v40 = vmul.f32 %v12547_v25, %v6965_v6 }
0x1aff   : > { %v6985_v34 = vmul.f32 %v12541_v51, %v6967_v42 }
0x1b01   : > { %7002 = vrot.lane.b32.xlu0 %v6983_v57, %s8575_s8  ;;  %7006 = vrot.lane.b32.xlu1 %v6985_v34, %s8575_s8  ;;  %v6969_v37 = vpop.permute.xlu1 %6968 }
0x1b02   : > { %v6986_v62 = vmul.f32 %v12553_v4, %v6969_v37  ;;  %v6971_v2 = vpop.permute.xlu0 %6970 }
0x1b03   : > { %v6987_v58 = vmul.f32 %v12557_v21, %v6971_v2 }
0x1b05   : > { %7004 = vrot.lane.b32.xlu0 %v6984_v40, %s8575_s8  ;;  %6930 = vrot.lane.b32.xlu1 %v6846_v26, %s8575_s8  ;;  %v6917_v9 = vpop.permute.xlu1 %6916 }
0x1b06   : > { %v6919_v3 = vpop.permute.xlu0 %6918  ;;  %v6940_v7 = vmul.f32 %v12511_v16, %v6917_v9 }
0x1b07   : > { %v6941_v41 = vmul.f32 %v12523_v46, %v6919_v3 }
0x1b09   : > { %7008 = vrot.lane.b32.xlu0 %v6986_v62, %s8575_s8  ;;  %6905 = vperm.xlu1 %7954, %v7503_v27   ;;  %v6921_v63 = vpop.permute.xlu1 %6920 }
0x1b0a   : > { %v6923_v8 = vpop.permute.xlu0 %6922  ;;  %v6942_v11 = vmul.f32 %v12528_v28, %v6921_v63 }
0x1b0b   : > { %v6943_v50 = vmul.f32 %v12538_v54, %v6923_v8 }
0x1b0d   : > { %7010 = vrot.lane.b32.xlu0 %v6987_v58, %s8575_s8  ;;  %v6925_v52 = vpop.permute.xlu1 %6924 }
0x1b0e   : > { %v6944_v23 = vmul.f32 %v12547_v25, %v6925_v52 }
0x1b11   : > { %v6927_v44 = vpop.permute.xlu1 %6926 }
0x1b12   : > { %v6945_v32 = vmul.f32 %v12541_v51, %v6927_v44 }
0x1b15   : > { %v6929_v35 = vpop.permute.xlu1 %6928 }
0x1b16   : > { %v6946_v27 = vmul.f32 %v12553_v4, %v6929_v35 }
0x1b6a   : > { %v6997_v60 = vpop.permute.xlu1 %6996 }
0x1b6b   : > { %v6999_v48 = vpop.permute.xlu0 %6998  ;;  %v7020_v30 = vadd.f32 %v6997_v60, %v6940_v7 }
0x1b6c   : > { %v7021_v13 = vadd.f32 %v6999_v48, %v6941_v41 }
0x1b6d   : > { %v7036_v59 = vrot.slane %v7020_v30, 7 }
0x1b6e   : > { %v7037_v24 = vrot.slane %v7021_v13, 6 }
0x1b6f   : > { %v7001_v29 = vpop.permute.xlu0 %7000 }
0x1b70   : > { %v7022_v53 = vadd.f32 %v7001_v29, %v6942_v11  ;;  %v7038_v12 = vsel %vm1907_vm8, %v7037_v24, %v7036_v59 }
0x1b72   : > { %v7039_v56 = vrot.slane %v7022_v53, 5 }
0x1b73   : > { %v7003_v15 = vpop.permute.xlu0 %7002  ;;  %v7007_v31 = vpop.permute.xlu1 %7006 }
0x1b74   : > { %v7023_v10 = vadd.f32 %v7003_v15, %v6943_v50  ;;  %v7025_v61 = vadd.f32 %v7007_v31, %v6945_v32  ;;  %v7040_v1 = vsel %vm1910_vm9, %v7039_v56, %v7038_v12 }
0x1b76   : > { %v7041_v0 = vrot.slane %v7023_v10, 4  ;;  %v7045_v36 = vrot.slane %v7025_v61, 2 }
0x1b77   : > { %v7005_v20 = vpop.permute.xlu0 %7004  ;;  %v6931_v38 = vpop.permute.xlu1 %6930 }
0x1b78   : > { %v7024_v49 = vadd.f32 %v7005_v20, %v6944_v23  ;;  %v7042_v33 = vsel %vm1913_vm10, %v7041_v0, %v7040_v1  ;;  %v6947_v19 = vmul.f32 %v12557_v21, %v6931_v38 }
0x1b7a   : > { %v7043_v55 = vrot.slane %v7024_v49, 3 }
0x1b7b   : > { %v7009_v18 = vpop.permute.xlu0 %7008 }
0x1b7c   : > { %v7044_v43 = vsel %vm1916_vm11, %v7043_v55, %v7042_v33  ;;  %v7026_v47 = vadd.f32 %v7009_v18, %v6946_v27 }
0x1b7d   : > { %v7046_v45 = vsel %vm1919_vm12, %v7045_v36, %v7044_v43 }
0x1b7e   : > { %v7047_v39 = vrot.slane %v7026_v47, 1 }
0x1b7f   : > { %v7011_v17 = vpop.permute.xlu0 %7010 }
0x1b80   : > { %v7048_v42 = vsel %vm1922_vm13, %v7047_v39, %v7046_v45  ;;  %v7027_v6 = vadd.f32 %v7011_v17, %v6947_v19  ;;  %v7253_v45 = vld [vmem:[#allocation6] sm:$0xff] }
0x1b82   : > { %v7049_v5 = vsel %vm1925_vm14, %v7027_v6, %v7048_v42 }
0x1b83   : > { %7050 = vrot.lane.b32.xlu0 %v7049_v5, %s8577_s9 }
0x1b88   : > { %v12577_v57 = vpop.permute.xlu1 %6905 }
0x1bf5   : > { %v7051_v34 = vpop.permute.xlu0 %7050 }
0x1bf6   : > { %v7053_v14 = vmul.f32 %v7051_v34, %v12577_v57 }
0x1bf8   : > { %8354 = vtanh.f32 %v7053_v14  ;;  %v7188_v26 = vcombine.high %v7053_v14, %v7053_v14  ;;  %v7195_v40 = vrot.slane %v7053_v14, %v13162_v22 }
0x1bfa   : > { %v7202_v37 = vrot.slane %v7188_v26, %v13162_v22  ;;  %v7203_v62 = vcombine.high %v7195_v40, %v7195_v40  ;;  %v7211_v2 = vrot.slane %v7195_v40, %v13162_v22 }
0x1bfc   : > { %v7204_v58 = vcombine.high %v7202_v37, %v7202_v37  ;;  %v7218_v9 = vrot.slane %v7202_v37, %v13162_v22  ;;  %v7225_v63 = vrot.slane %v7203_v62, %v13162_v22  ;;  %v7233_v52 = vcombine.high %v7211_v2, %v7211_v2  ;;  %7245 = vst.msk [vmem:[%s9106_s11 + $0x7] sm:$0x1] %vm2058_vm15, %v7211_v2 }
0x1bfe   : > { %v7232_v3 = vrot.slane %v7204_v58, %v13162_v22  ;;  %v7234_v44 = vcombine.high %v7218_v9, %v7218_v9  ;;  %v7235_v8 = vcombine.high %v7225_v63, %v7225_v63  ;;  %7246 = vst.msk [vmem:[%s9106_s11 + $0x17] sm:$0x1] %vm2058_vm15, %v7225_v63  ;;  %7247 = vst.msk [vmem:[%s9106_s11 + $0x27] sm:$0x1] %vm2058_vm15, %v7233_v52 }
0x1bff   : > { %7249 = vst.msk [vmem:[%s9106_s11 + $0x47] sm:$0x1] %vm2058_vm15, %v7218_v9 }
0x1c00   : > { %v7236_v35 = vcombine.high %v7232_v3, %v7232_v3  ;;  %7248 = vst.msk [vmem:[%s9106_s11 + $0x37] sm:$0x1] %vm2058_vm15, %v7235_v8  ;;  %7250 = vst.msk [vmem:[%s9106_s11 + $0x57] sm:$0x1] %vm2058_vm15, %v7232_v3 }
0x1c01   : > { %7251 = vst.msk [vmem:[%s9106_s11 + $0x67] sm:$0x1] %vm2058_vm15, %v7234_v44 }
0x1c02   : > { %v8355_v48 = vpop.eup %8354  ;;  %7252 = vst.msk [vmem:[%s9106_s11 + $0x77] sm:$0x1] %vm2058_vm15, %v7236_v35 }
0x1c03   : > { %v7057_v60 = vrot.slane %v8355_v48, 2  ;;  %v7056_v41 = vrot.slane %v8355_v48, 1  ;;  %v7059_v7 = vrot.slane %v8355_v48, 4  ;;  %v7058_v29 = vrot.slane %v8355_v48, 3 }
0x1c04   : > { %v7061_v11 = vrot.slane %v8355_v48, 6  ;;  %v7060_v13 = vrot.slane %v8355_v48, 5  ;;  %v7062_v30 = vrot.slane %v8355_v48, 7 }
0x1c05   : > { %7065 = vrot.lane.b32.xlu0 %v7057_v60, %s8579_s14  ;;  %7063 = vrot.lane.b32.xlu1 %v7056_v41, %s8579_s14 }
0x1c09   : > { %7069 = vrot.lane.b32.xlu0 %v7059_v7, %s8579_s14  ;;  %7067 = vrot.lane.b32.xlu1 %v7058_v29, %s8579_s14 }
0x1c0d   : > { %7073 = vrot.lane.b32.xlu0 %v7061_v11, %s8579_s14  ;;  %7071 = vrot.lane.b32.xlu1 %v7060_v13, %s8579_s14 }
0x1c11   : > { %7077 = vrot.lane.b32.xlu0 %v8355_v48, %s8579_s14  ;;  %7075 = vrot.lane.b32.xlu1 %v7062_v30, %s8579_s14 }
0x1c77   : > { %v7066_v50 = vpop.permute.xlu0 %7065  ;;  %v7064_v53 = vpop.permute.xlu1 %7063 }
0x1c78   : > { %v7088_v15 = vmul.f32 %v12523_v46, %v7066_v50  ;;  %v7087_v10 = vmul.f32 %v12511_v16, %v7064_v53 }
0x1c7a   : > { %v7104_v24 = vrot.slane %v7088_v15, 6  ;;  %v7103_v59 = vrot.slane %v7087_v10, 7 }
0x1c7b   : > { %v7070_v31 = vpop.permute.xlu0 %7069  ;;  %v7068_v23 = vpop.permute.xlu1 %7067 }
0x1c7c   : > { %v7090_v56 = vmul.f32 %v12538_v54, %v7070_v31  ;;  %v7089_v32 = vmul.f32 %v12528_v28, %v7068_v23  ;;  %v7105_v20 = vsel %vm1907_vm8, %v7104_v24, %v7103_v59 }
0x1c7e   : > { %v7106_v0 = vrot.slane %v7089_v32, 5  ;;  %v7108_v49 = vrot.slane %v7090_v56, 4 }
0x1c7f   : > { %v7074_v12 = vpop.permute.xlu0 %7073  ;;  %v7072_v61 = vpop.permute.xlu1 %7071 }
0x1c80   : > { %v7107_v27 = vsel %vm1910_vm9, %v7106_v0, %v7105_v20  ;;  %v7092_v46 = vmul.f32 %v12541_v51, %v7074_v12  ;;  %v7091_v16 = vmul.f32 %v12547_v25, %v7072_v61 }
0x1c81   : > { %v7109_v33 = vsel %vm1913_vm10, %v7108_v49, %v7107_v27 }
0x1c82   : > { %v7110_v1 = vrot.slane %v7091_v16, 3  ;;  %v7112_v55 = vrot.slane %v7092_v46, 2 }
0x1c83   : > { %v7076_v38 = vpop.permute.xlu1 %7075  ;;  %v7078_v28 = vpop.permute.xlu0 %7077 }
0x1c84   : > { %v7111_v54 = vsel %vm1916_vm11, %v7110_v1, %v7109_v33  ;;  %v7093_v18 = vmul.f32 %v12553_v4, %v7076_v38  ;;  %v7094_v47 = vmul.f32 %v12557_v21, %v7078_v28 }
0x1c85   : > { %v7113_v36 = vsel %vm1919_vm12, %v7112_v55, %v7111_v54 }
0x1c86   : > { %v7114_v43 = vrot.slane %v7093_v18, 1 }
0x1c88   : > { %v7115_v19 = vsel %vm1922_vm13, %v7114_v43, %v7113_v36 }
0x1c89   : > { %v7116_v51 = vsel %vm1925_vm14, %v7094_v47, %v7115_v19 }
0x1c8a   : > { %7117 = vrot.lane.b32.xlu1 %v7116_v51, %s8579_s14 }
0x1cfc   : > { %v7118_v25 = vpop.permute.xlu1 %7117 }
0x1cfd   : > { %v7120_v39 = vmul.f32 %v7118_v25, %v12577_v57 }
0x1cff   : > { %v7122_v17 = vcombine.high %v7120_v39, %v7120_v39  ;;  %v7129_v4 = vrot.slane %v7120_v39, %v13162_v22  ;;  %v7254_v21 = vadd.f32 %v7253_v45, %v7120_v39 }
0x1d01   : > { %v7136_v42 = vrot.slane %v7122_v17, %v13162_v22  ;;  %v7137_v6 = vcombine.high %v7129_v4, %v7129_v4  ;;  %v7145_v5 = vrot.slane %v7129_v4, %v13162_v22  ;;  %7255 = vst.msk [vmem:[#allocation6] sm:$0xff] %vm1570_vm6, %v7254_v21 }
0x1d03   : > { %v7138_v57 = vcombine.high %v7136_v42, %v7136_v42  ;;  %v7152_v34 = vrot.slane %v7136_v42, %v13162_v22  ;;  %v7159_v14 = vrot.slane %v7137_v6, %v13162_v22  ;;  %v7167_v26 = vcombine.high %v7145_v5, %v7145_v5  ;;  %7179 = vst.msk [vmem:[%s9238_s15 + $0x7] sm:$0x1] %vm2058_vm15, %v7145_v5 }
0x1d05   : > { %v7166_v40 = vrot.slane %v7138_v57, %v13162_v22  ;;  %v7168_v37 = vcombine.high %v7152_v34, %v7152_v34  ;;  %v7169_v62 = vcombine.high %v7159_v14, %v7159_v14  ;;  %7180 = vst.msk [vmem:[%s9238_s15 + $0x17] sm:$0x1] %vm2058_vm15, %v7159_v14  ;;  %7181 = vst.msk [vmem:[%s9238_s15 + $0x27] sm:$0x1] %vm2058_vm15, %v7167_v26 }
0x1d06   : > { %7183 = vst.msk [vmem:[%s9238_s15 + $0x47] sm:$0x1] %vm2058_vm15, %v7152_v34 }
0x1d07   : > { %v7170_v2 = vcombine.high %v7166_v40, %v7166_v40  ;;  %7182 = vst.msk [vmem:[%s9238_s15 + $0x37] sm:$0x1] %vm2058_vm15, %v7169_v62  ;;  %7184 = vst.msk [vmem:[%s9238_s15 + $0x57] sm:$0x1] %vm2058_vm15, %v7166_v40 }
0x1d08   : > { %7185 = vst.msk [vmem:[%s9238_s15 + $0x67] sm:$0x1] %vm2058_vm15, %v7168_v37 }
0x1d09   : > { %7186 = vst.msk [vmem:[%s9238_s15 + $0x77] sm:$0x1] %vm2058_vm15, %v7170_v2 }
0x1d0a PF: > { %p7259_p0 = scmp.eq.s32.totalorder %s8553_s19, 1  ;;  %p7260_p3 = scmp.eq.s32.totalorder %s8549_s18, 1 }
0x1d0c   : > { %p7261_p1 = pnand %p7260_p3, %p7259_p0 }
0x1d0d   : > { %v7266_v22 = vld [vmem:[#allocation7] sm:$0xff] (!%p7261_p1)  ;;  %v8589_v58 = vmov (!%p7261_p1), 0   ;;  %v7265_v52 = vld [vmem:[#allocation6] sm:$0xff] (!%p7261_p1)  ;;  %vm7275_vm1 = vcmask (!%p7261_p1), 261120  }
0x1d0e   : > { %7264 = sbr.rel (%p7261_p1) target bundleno = 7582 (0x1d9e), region = 64  ;;  %8404 = vset.pattern.permute.xlu0 (!%p7261_p1), %v8589_v58  ;;  %v7267_v9 = vmax.f32 (!%p7261_p1), %v7266_v22, 1.0 }
0x1d10   : > { %7270 = vperm.xlu0 (!%p7261_p1), %8404, %v7267_v9  }
0x1d8f   : > { %v7271_v63 = vpop.permute.xlu0 %7270 }
0x1d90   : > { %8405 = vrcp.f32 %v7271_v63 }
0x1d9a   : > { %v8406_v3 = vpop.eup %8405 }
0x1d9b   : > { %v7274_v44 = vmul.f32 %v8406_v3, %v7265_v52 }
0x1d9d   : > { %7276 = vst.msk [vmem:[#allocation13] sm:$0xff] %vm7275_vm1, %v7274_v44 }
0x1d9e PF: > { %s13478_s23 = sadd.s32 4294967295, %s8565_s22   ;;  %s8590_s18 = smov [#allocation13]  }
0x1d9f   : > { %p12654_p4 = scmp.eq.s32.totalorder %s13478_s23, 3  ;;  %s7284_s4 = sshll.u32 %s8590_s18, 4  ;;  %s7285_s4 = int_to_ptr.vmem [resolvable:$true] %s7284_s4 }
0x1da0   : > { %s8465_s2 = scalar_lea.vmem %s7285_s4, 128  ;;  %p8472_p13 = scmp.lt.s32.totalorder %s7285_s4, %s7285_s4 }
0x1da1   : > { %p8466_p2 = scmp.ne.s32.totalorder %s7285_s4, %s8465_s2  ;;  %p8473_p8 = scmp.lt.s32.totalorder %s8465_s2, %s8465_s2 }
0x1da3   : > { %p8467_p6 = pnand %p8466_p2, %p12654_p4  ;;  %p8474_p9 = por %p8473_p8, %p8472_p13 }
0x1da5   : > { %p8468_p5 = pneg %p8467_p6 }
0x1da7   : > { %p8475_p10 = pnand %p8474_p9, %p8468_p5 }
0x1da9   : > { %8478 = shalt.err (!%p8475_p10)
}
0x1daa   : > { %s13480_s29 = sld [smem:[#allocation113_spill]] }
0x1db0   : > { %s8479_s25 = scalar_lea.hbm %s13480_s29, 128 }
0x1db1   : > { %p8480_p7 = scmp.ne.s32.totalorder %s13480_s29, %s8479_s25  ;;  %p8485_p0 = scmp.lt.u32.totalorder %s8479_s25, %s13480_s29 }
0x1db3   : > { %p8481_p11 = pnand %p8480_p7, %p12654_p4 }
0x1db5   : > { %p8482_p12 = pneg %p8481_p11 }
0x1db7   : > { %p8487_p3 = pnand %p8485_p0, %p8482_p12 }
0x1db9   : > { %8490 = shalt.err (!%p8487_p3)
}
0x1dba   : > { %7832 = dma.vmem_to_hbm [thread:$0]  (%p12654_p4), %s7285_s4, 128, %s13480_s29, [#allocation10]  }
0x1dbb   : > { %8532 = dma.done.wait (%p12654_p4), [#allocation10], 128  }
0x1dbc   : > { %8534 = vsyncadd (%p12654_p4), [#allocation10], 4294967168 }
0x1dbd PF: > { %s19_s22 = sadd.s32 1, %s8565_s22   ;;  %s13481_s18 = sld [smem:[#allocation17_spill]] }
0x1dbe   : > { %p16_p1 = scmp.ge.s32.totalorder %s19_s22, 6   ;;  %s13482_s15 = smov %s8541_s16 }
0x1dbf   : > { %s13483_s16 = smov %s8545_s17  ;;  %s13484_s17 = smov %s8735_s1 }
0x1dc0   : > { %s13485_s19 = smov %s8561_s21  ;;  %s13486_s20 = smov %s13489_s27 }
0x1dc1   : > { %s13487_s21 = smov %s13493_s30  ;;  %18 = sbr.rel (!%p16_p1) target bundleno = 12 (0xc), region = 114 }
0x1dc8   :  { %7297 = vsyncpa [#allocation9], 1 }
0x1dc9   :  { %7299 = vsyncpa [#allocation9 + $0x1], 1 }
0x1dca   :  { %7300 = vsyncpa [#allocation12], 1 }
0x1dcb   :  { %7301 = vsyncpa [#allocation10], 1 }
0x1dcc   :  { %7303 = vsyncpa [#allocation10 + $0x1], 1 }

</bundles_post_ra>
